<compile_context>
chip_gen: v7x
topology: tpu7x:2x2x1
jax: 0.10.0
libtpu: 0.0.40
codegen_flags: <defaults>
</compile_context>

<pallas_src>
import functools

import jax
import jax.numpy as jnp
from jax.experimental import pallas as pl
from jax.experimental.pallas import tpu as pltpu

LRELU_SLOPE = 0.2
BN_EPS = 1e-5
CONV_STRIDES = (1, 2, 1, 2, 1, 2, 1, 2)  # conv1..conv8, all 3x3, pad=1
MAX_FUSED_M = 2048                       # whole-M-resident threshold (VMEM budget)


# ----------------------------------------------------------------------------
# Tile pickers (respect the (8, 128) block constraints; fall back to full dim)
# ----------------------------------------------------------------------------
def _pick_tile(dim, cands):
    for c in cands:
        if dim % c == 0:
            return c
    return dim  # full dim is always a legal block size


def _lrelu(y):
    return jnp.where(y >= 0.0, y, LRELU_SLOPE * y)


# ----------------------------------------------------------------------------
# Kernel A: whole-M-resident fused conv stage.
#   grid = (channel blocks, K blocks). fp32 accumulator in VMEM. Epilogue fuses
#   bias (+ BatchNorm over full M with batch statistics) + LeakyReLU, so the
#   activation slab is written to HBM exactly once.
# ----------------------------------------------------------------------------
def _make_stage_kernel(n_k, use_bn, activation):
    def epilogue(acc, b, g=None, bt=None):
        y = acc + b
        if use_bn:
            mean = jnp.mean(y, axis=0, keepdims=True)      # stats over N*H*W
            yc = y - mean
            var = jnp.mean(yc * yc, axis=0, keepdims=True)  # biased (PyTorch train)
            y = yc * (g * jax.lax.rsqrt(var + BN_EPS)) + bt
        if activation == "lrelu":
            y = _lrelu(y)
        elif activation == "sigmoid":
            y = jax.nn.sigmoid(y)
        return y

    if use_bn:
        def kernel(a_ref, w_ref, b_ref, g_ref, bt_ref, o_ref, acc_ref):
            kk = pl.program_id(1)

            @pl.when(kk == 0)
            def _():
                acc_ref[...] = jnp.zeros_like(acc_ref)

            acc_ref[...] += jnp.dot(a_ref[...], w_ref[...],
                                    preferred_element_type=jnp.float32)

            @pl.when(kk == n_k - 1)
            def _():
                o_ref[...] = epilogue(acc_ref[...], b_ref[...], g_ref[...],
                                      bt_ref[...]).astype(o_ref.dtype)
    else:
        def kernel(a_ref, w_ref, b_ref, o_ref, acc_ref):
            kk = pl.program_id(1)

            @pl.when(kk == 0)
            def _():
                acc_ref[...] = jnp.zeros_like(acc_ref)

            acc_ref[...] += jnp.dot(a_ref[...], w_ref[...],
                                    preferred_element_type=jnp.float32)

            @pl.when(kk == n_k - 1)
            def _():
                o_ref[...] = epilogue(acc_ref[...],
                                      b_ref[...]).astype(o_ref.dtype)

    return kernel


def conv_stage_matmul(a, w, b, gamma=None, beta=None, *, use_bn, activation):
    """(M,K) @ (K,N) + bias [+ BN(batch stats)] + activation, whole M resident."""
    M, K = a.shape
    K2, N = w.shape
    assert K == K2
    tn = _pick_tile(N, (256, 128))
    tk = _pick_tile(K, (512, 384, 256, 128))
    grid = (N // tn, K // tk)
    kernel = _make_stage_kernel(grid[1], use_bn, activation)

    vec_spec = pl.BlockSpec((1, tn), lambda j, k: (0, j))
    in_specs = [
        pl.BlockSpec((M, tk), lambda j, k: (0, k)),
        pl.BlockSpec((tk, tn), lambda j, k: (k, j)),
        vec_spec,
    ]
    operands = [a.astype(jnp.bfloat16), w.astype(jnp.bfloat16),
                b.reshape(1, N).astype(jnp.float32)]
    if use_bn:
        in_specs += [vec_spec, vec_spec]
        operands += [gamma.reshape(1, N).astype(jnp.float32),
                     beta.reshape(1, N).astype(jnp.float32)]

    return pl.pallas_call(
        kernel,
        out_shape=jax.ShapeDtypeStruct((M, N), jnp.bfloat16),
        grid=grid,
        in_specs=in_specs,
        out_specs=pl.BlockSpec((M, tn), lambda j, k: (0, j)),
        scratch_shapes=[pltpu.VMEM((M, tn), jnp.float32)],
        compiler_params=pltpu.CompilerParams(
            dimension_semantics=("parallel", "arbitrary")),
    )(*operands)


# ----------------------------------------------------------------------------
# Kernel B: fully tiled (M,N,K) matmul + bias + optional activation.
# Fallback for very large M (whole-M block would not fit VMEM).
# ----------------------------------------------------------------------------
def _matmul_kernel(a_ref, w_ref, b_ref, o_ref, acc_ref, *, activation, n_k):
    kk = pl.program_id(2)

    @pl.when(kk == 0)
    def _():
        acc_ref[...] = jnp.zeros_like(acc_ref)

    acc_ref[...] += jnp.dot(a_ref[...], w_ref[...],
                            preferred_element_type=jnp.float32)

    @pl.when(kk == n_k - 1)
    def _():
        y = acc_ref[...] + b_ref[...]
        if activation == "lrelu":
            y = _lrelu(y)
        elif activation == "sigmoid":
            y = jax.nn.sigmoid(y)
        o_ref[...] = y.astype(o_ref.dtype)


def matmul_bias_act(a, w, b, activation="none", out_dtype=jnp.bfloat16):
    M, K = a.shape
    K2, N = w.shape
    assert K == K2
    tm = _pick_tile(M, (512, 256, 128, 64, 32, 16, 8))
    tn = _pick_tile(N, (256, 128))
    tk = _pick_tile(K, (512, 384, 256, 128))
    grid = (M // tm, N // tn, K // tk)
    kernel = functools.partial(_matmul_kernel, activation=activation, n_k=grid[2])
    return pl.pallas_call(
        kernel,
        out_shape=jax.ShapeDtypeStruct((M, N), out_dtype),
        grid=grid,
        in_specs=[
            pl.BlockSpec((tm, tk), lambda i, j, k: (i, k)),
            pl.BlockSpec((tk, tn), lambda i, j, k: (k, j)),
            pl.BlockSpec((1, tn), lambda i, j, k: (0, j)),
        ],
        out_specs=pl.BlockSpec((tm, tn), lambda i, j, k: (i, j)),
        scratch_shapes=[pltpu.VMEM((tm, tn), jnp.float32)],
        compiler_params=pltpu.CompilerParams(
            dimension_semantics=("parallel", "parallel", "arbitrary")),
    )(a.astype(jnp.bfloat16), w.astype(jnp.bfloat16),
      b.reshape(1, N).astype(jnp.float32))


# Fallback BN-apply kernel (only used when M is too large for the fused path).
def _bn_lrelu_kernel(x_ref, s_ref, t_ref, o_ref):
    y = x_ref[...] * s_ref[...] + t_ref[...]
    o_ref[...] = _lrelu(y).astype(o_ref.dtype)


def bn_lrelu_apply(x, scale, shift):
    M, C = x.shape
    tm = _pick_tile(M, (1024, 512, 256, 128, 64, 32, 16, 8))
    tc = _pick_tile(C, (512, 256, 128))
    grid = (M // tm, C // tc)
    return pl.pallas_call(
        _bn_lrelu_kernel,
        out_shape=jax.ShapeDtypeStruct((M, C), jnp.bfloat16),
        grid=grid,
        in_specs=[
            pl.BlockSpec((tm, tc), lambda i, j: (i, j)),
            pl.BlockSpec((1, tc), lambda i, j: (0, j)),
            pl.BlockSpec((1, tc), lambda i, j: (0, j)),
        ],
        out_specs=pl.BlockSpec((tm, tc), lambda i, j: (i, j)),
        compiler_params=pltpu.CompilerParams(
            dimension_semantics=("parallel", "parallel")),
    )(x, scale.reshape(1, C).astype(jnp.float32),
      shift.reshape(1, C).astype(jnp.float32))


# ----------------------------------------------------------------------------
# Kernel C: fused tail (AdaptiveAvgPool(1) + conv9 1x1 + LReLU + conv10 1x1 + sigmoid)
# ----------------------------------------------------------------------------
def _tail_kernel(x_ref, w9_ref, b9_ref, w10_ref, b10_ref, o_ref):
    x = x_ref[...].astype(jnp.float32)                      # (B, HW, C8)
    pooled = jnp.mean(x, axis=1)                            # AdaptiveAvgPool2d(1)
    h = jnp.dot(pooled.astype(jnp.bfloat16), w9_ref[...],
                preferred_element_type=jnp.float32) + b9_ref[...]
    h = _lrelu(h)                                           # LeakyReLU(0.2)
    # conv10 has Cout=1: lane-reduce instead of a masked (M,1) matmul store
    logits = jnp.sum(h * w10_ref[...], axis=-1, keepdims=True) + b10_ref[...]
    o_ref[...] = jax.nn.sigmoid(logits)


def tail_head(x_nhwc, p9, p10):
    N, H, W, C8 = x_nhwc.shape
    x = x_nhwc.reshape(N, H * W, C8)
    C16 = p9["w"].shape[1]
    w9 = p9["w"].astype(jnp.bfloat16)                       # (C8, C16)
    b9 = p9["b"].reshape(1, C16).astype(jnp.float32)
    w10 = p10["w"].reshape(1, C16).astype(jnp.float32)      # (C16,1) -> row
    b10 = p10["b"].reshape(1, 1).astype(jnp.float32)
    out = pl.pallas_call(
        _tail_kernel,
        out_shape=jax.ShapeDtypeStruct((N, 1), jnp.float32),
        grid=(1,),
        in_specs=[
            pl.BlockSpec((N, H * W, C8), lambda i: (0, 0, 0)),
            pl.BlockSpec((C8, C16), lambda i: (0, 0)),
            pl.BlockSpec((1, C16), lambda i: (0, 0)),
            pl.BlockSpec((1, C16), lambda i: (0, 0)),
            pl.BlockSpec((1, 1), lambda i: (0, 0)),
        ],
        out_specs=pl.BlockSpec((N, 1), lambda i: (0, 0)),
    )(x.astype(jnp.bfloat16), w9, b9, w10, b10)
    return out.reshape(N)


# ----------------------------------------------------------------------------
# Glue: im2col, conv wrapper, params, forward
# ----------------------------------------------------------------------------
def im2col(x_nhwc, k, stride, pad):
    """x: (N,H,W,C) -> patches (N*Ho*Wo, k*k*C), feature order (kh, kw, cin)."""
    N, H, W, C = x_nhwc.shape
    xp = jnp.pad(x_nhwc, ((0, 0), (pad, pad), (pad, pad), (0, 0)))
    Ho = (H + 2 * pad - k) // stride + 1
    Wo = (W + 2 * pad - k) // stride + 1
    slabs = []
    for di in range(k):
        for dj in range(k):
            slabs.append(
                xp[:, di:di + stride * Ho:stride, dj:dj + stride * Wo:stride, :])
    patches = jnp.concatenate(slabs, axis=-1)
    return patches.reshape(N * Ho * Wo, k * k * C), (N, Ho, Wo)


def conv2d_stage(x_nhwc, p, *, stride, use_bn):
    patches, (N, Ho, Wo) = im2col(x_nhwc, 3, stride, pad=1)
    M = patches.shape[0]
    Cout = p["w"].shape[1]
    if M <= MAX_FUSED_M:
        out = conv_stage_matmul(patches, p["w"], p["b"], p["gamma"], p["beta"],
                                use_bn=use_bn, activation="lrelu")
    else:
        if use_bn:
            # TODO(synk): for large M, emit per-block channel sum/sumsq from the
            # matmul kernel instead of the jnp mean/var passes below.
            y = matmul_bias_act(patches, p["w"], p["b"], activation="none",
                                out_dtype=jnp.float32)
            mean = jnp.mean(y, axis=0)
            var = jnp.mean(jnp.square(y - mean), axis=0)
            scale = p["gamma"] * jax.lax.rsqrt(var + BN_EPS)
            shift = p["beta"] - mean * scale
            out = bn_lrelu_apply(y, scale, shift)
        else:
            out = matmul_bias_act(patches, p["w"], p["b"], activation="lrelu")
    return out.reshape(N, Ho, Wo, Cout)


def init_params(key, fsize=64):
    """Synthetic params.  Conv weights stored as (k*k*Cin, Cout), bf16 for MXU.
    NOTE: real PyTorch weights (Cout,Cin,KH,KW) would need a permute to
    (KH,KW,Cin,Cout).reshape(k*k*Cin, Cout) to match the im2col feature order."""
    chans = [
        (3, fsize, 3),               # conv1
        (fsize, fsize, 3),           # conv2 + BN
        (fsize, 2 * fsize, 3),       # conv3 + BN
        (2 * fsize, 2 * fsize, 3),   # conv4 + BN
        (2 * fsize, 4 * fsize, 3),   # conv5 + BN
        (4 * fsize, 4 * fsize, 3),   # conv6 + BN
        (4 * fsize, 8 * fsize, 3),   # conv7 + BN
        (8 * fsize, 8 * fsize, 3),   # conv8 + BN
        (8 * fsize, 16 * fsize, 1),  # conv9 (1x1)
        (16 * fsize, 1, 1),          # conv10 (1x1)
    ]
    params = []
    for (cin, cout, k) in chans:
        key, kw, kb = jax.random.split(key, 3)
        fan_in = k * k * cin
        std = 1.0 / jnp.sqrt(float(fan_in))
        w = jax.random.normal(kw, (k * k * cin, cout), jnp.float32) * std
        b = jax.random.normal(kb, (cout,), jnp.float32) * 0.01
        gamma = jnp.ones((cout,), jnp.float32)
        beta = jnp.zeros((cout,), jnp.float32)
        params.append(dict(w=w.astype(jnp.bfloat16), b=b, gamma=gamma, beta=beta))
    return params


def discriminator_forward(params, x_nchw):
    """Matches Discriminator.forward: sigmoid(net(x)).view(batch)."""
    x = jnp.transpose(x_nchw, (0, 2, 3, 1)).astype(jnp.bfloat16)  # NCHW -> NHWC

    # conv1 + LeakyReLU (no BN), fused in the matmul epilogue
    x = conv2d_stage(x, params[0], stride=CONV_STRIDES[0], use_bn=False)

    # conv2..conv8: conv + bias + BN(train batch stats) + LeakyReLU, one kernel each
    for idx in range(1, 8):
        x = conv2d_stage(x, params[idx], stride=CONV_STRIDES[idx], use_bn=True)

    # AdaptiveAvgPool2d(1) + conv9 + LReLU + conv10 + sigmoid, one fused kernel
    return tail_head(x, params[8], params[9])


if __name__ == "__main__":
    key = jax.random.PRNGKey(0)
    key_p, key_x = jax.random.split(key)

    fsize = 64  # pgd=2 (the only config consistent with the hardcoded BatchNorm sizes)
    params = init_params(key_p, fsize=fsize)

    # small input consistent with the module: batch=2, 3 channels, 16x16 spatial
    x = jax.random.normal(key_x, (2, 3, 16, 16), jnp.float32)

    fwd = jax.jit(discriminator_forward)
    out = fwd(params, x)
    out = jax.block_until_ready(out)

    assert out.shape == (2,), out.shape
    assert jnp.all(jnp.isfinite(out)) and jnp.all((out >= 0) & (out <= 1))
    print("KERNEL_OK")
</pallas_src>

<mosaic_0001>
module attributes {stable_mosaic.version = 11 : i64} {
  func.func @kernel(%arg0: i32, %arg1: i32, %arg2: memref<512x27xbf16, #tpu.memory_space<vmem>>, %arg3: memref<27x64xbf16, #tpu.memory_space<vmem>>, %arg4: memref<1x64xf32, #tpu.memory_space<vmem>>, %arg5: memref<512x64xbf16, #tpu.memory_space<vmem>>, %arg6: memref<512x64xf32, #tpu.memory_space<vmem>>) attributes {dimension_semantics = [#tpu.dimension_semantics<parallel>, #tpu.dimension_semantics<arbitrary>], iteration_bounds = array<i64: 1, 1>, scalar_prefetch = 0 : i64, scratch_operands = 1 : i64, tpu.core_type = #tpu.core_type<tc>, window_params = [{transform_indices = @transform_0, window_bounds = array<i64: 512, 27>}, {transform_indices = @transform_1, window_bounds = array<i64: 27, 64>}, {transform_indices = @transform_2, window_bounds = array<i64: 1, 64>}, {transform_indices = @transform_3, window_bounds = array<i64: 512, 64>}]} {
    %c0_i32 = arith.constant 0 : i32
    %0 = arith.cmpi eq, %arg1, %c0_i32 : i32
    %1 = arith.extui %0 : i1 to i32
    %c0_i32_0 = arith.constant 0 : i32
    %2 = arith.cmpi ne, %1, %c0_i32_0 : i32
    scf.if %2 {
      %cst_10 = arith.constant 0.000000e+00 : f32
      %12 = vector.broadcast %cst_10 : f32 to vector<512x64xf32>
      %c0_11 = arith.constant 0 : index
      %c0_12 = arith.constant 0 : index
      %13 = vector.load %arg6[%c0_11, %c0_12] : memref<512x64xf32, #tpu.memory_space<vmem>>, vector<512x64xf32>
      tpu.vector_store %arg6[%c0_11, %c0_12], %12 {strides = array<i32>} : memref<512x64xf32, #tpu.memory_space<vmem>>, vector<512x64xf32>,
    } else {
    }
    %c0 = arith.constant 0 : index
    %c0_1 = arith.constant 0 : index
    %3 = vector.load %arg6[%c0, %c0_1] : memref<512x64xf32, #tpu.memory_space<vmem>>, vector<512x64xf32>
    %c0_2 = arith.constant 0 : index
    %c0_3 = arith.constant 0 : index
    %4 = vector.load %arg2[%c0_2, %c0_3] : memref<512x27xbf16, #tpu.memory_space<vmem>>, vector<512x27xbf16>
    %c0_4 = arith.constant 0 : index
    %c0_5 = arith.constant 0 : index
    %5 = vector.load %arg3[%c0_4, %c0_5] : memref<27x64xbf16, #tpu.memory_space<vmem>>, vector<27x64xbf16>
    %cst = arith.constant dense<0.000000e+00> : vector<512x64xf32>
    %6 = tpu.matmul %4, %5, %cst {dimension_numbers = #tpu.dot_dimension_numbers<[1], [0], [0], [1], [0, 0, 1, 1], [], []>} : vector<512x27xbf16>, vector<27x64xbf16>, vector<512x64xf32> -> vector<512x64xf32>
    %7 = arith.addf %3, %6 : vector<512x64xf32>
    %c0_6 = arith.constant 0 : index
    %c0_7 = arith.constant 0 : index
    %8 = vector.load %arg6[%c0_6, %c0_7] : memref<512x64xf32, #tpu.memory_space<vmem>>, vector<512x64xf32>
    tpu.vector_store %arg6[%c0_6, %c0_7], %7 {strides = array<i32>} : memref<512x64xf32, #tpu.memory_space<vmem>>, vector<512x64xf32>,
    %c0_i32_8 = arith.constant 0 : i32
    %9 = arith.cmpi eq, %arg1, %c0_i32_8 : i32
    %10 = arith.extui %9 : i1 to i32
    %c0_i32_9 = arith.constant 0 : i32
    %11 = arith.cmpi ne, %10, %c0_i32_9 : i32
    scf.if %11 {
      %c0_10 = arith.constant 0 : index
      %c0_11 = arith.constant 0 : index
      %12 = vector.load %arg6[%c0_10, %c0_11] : memref<512x64xf32, #tpu.memory_space<vmem>>, vector<512x64xf32>
      %c0_12 = arith.constant 0 : index
      %c0_13 = arith.constant 0 : index
      %13 = vector.load %arg4[%c0_12, %c0_13] : memref<1x64xf32, #tpu.memory_space<vmem>>, vector<1x64xf32>
      %14 = vector.broadcast %13 : vector<1x64xf32> to vector<512x64xf32>
      %15 = arith.addf %12, %14 : vector<512x64xf32>
      %cst_14 = arith.constant 0.000000e+00 : f32
      %16 = vector.broadcast %cst_14 : f32 to vector<512x64xf32>
      %17 = arith.cmpf oge, %15, %16 : vector<512x64xf32>
      %cst_15 = arith.constant 2.000000e-01 : f32
      %18 = vector.broadcast %cst_15 : f32 to vector<512x64xf32>
      %19 = arith.mulf %18, %15 : vector<512x64xf32>
      %20 = arith.select %17, %15, %19 : vector<512x64xi1>, vector<512x64xf32>
      %21 = arith.truncf %20 : vector<512x64xf32> to vector<512x64xbf16>
      %c0_16 = arith.constant 0 : index
      %c0_17 = arith.constant 0 : index
      %22 = vector.load %arg5[%c0_16, %c0_17] : memref<512x64xbf16, #tpu.memory_space<vmem>>, vector<512x64xbf16>
      tpu.vector_store %arg5[%c0_16, %c0_17], %21 {strides = array<i32>} : memref<512x64xbf16, #tpu.memory_space<vmem>>, vector<512x64xbf16>,
    } else {
    }
    return
  }
  func.func @transform_0(%arg0: i32, %arg1: i32) -> (i32, i32) {
    %c0_i32 = arith.constant 0 : i32
    %c0_i32_0 = arith.constant 0 : i32
    return %c0_i32, %arg1 : i32, i32
  }
  func.func @transform_1(%arg0: i32, %arg1: i32) -> (i32, i32) {
    %c0_i32 = arith.constant 0 : i32
    return %arg1, %arg0 : i32, i32
  }
  func.func @transform_2(%arg0: i32, %arg1: i32) -> (i32, i32) {
    %c0_i32 = arith.constant 0 : i32
    %c0_i32_0 = arith.constant 0 : i32
    return %c0_i32, %arg0 : i32, i32
  }
  func.func @transform_3(%arg0: i32, %arg1: i32) -> (i32, i32) {
    %c0_i32 = arith.constant 0 : i32
    %c0_i32_0 = arith.constant 0 : i32
    return %c0_i32, %arg0 : i32, i32
  }
}

module attributes {stable_mosaic.version = 11 : i64} {
  func.func @kernel(%arg0: i32, %arg1: i32, %arg2: memref<128x576xbf16, #tpu.memory_space<vmem>>, %arg3: memref<576x64xbf16, #tpu.memory_space<vmem>>, %arg4: memref<1x64xf32, #tpu.memory_space<vmem>>, %arg5: memref<1x64xf32, #tpu.memory_space<vmem>>, %arg6: memref<1x64xf32, #tpu.memory_space<vmem>>, %arg7: memref<128x64xbf16, #tpu.memory_space<vmem>>, %arg8: memref<128x64xf32, #tpu.memory_space<vmem>>) attributes {dimension_semantics = [#tpu.dimension_semantics<parallel>, #tpu.dimension_semantics<arbitrary>], iteration_bounds = array<i64: 1, 1>, scalar_prefetch = 0 : i64, scratch_operands = 1 : i64, tpu.core_type = #tpu.core_type<tc>, window_params = [{transform_indices = @transform_0, window_bounds = array<i64: 128, 576>}, {transform_indices = @transform_1, window_bounds = array<i64: 576, 64>}, {transform_indices = @transform_2, window_bounds = array<i64: 1, 64>}, {transform_indices = @transform_3, window_bounds = array<i64: 1, 64>}, {transform_indices = @transform_4, window_bounds = array<i64: 1, 64>}, {transform_indices = @transform_5, window_bounds = array<i64: 128, 64>}]} {
    %c0_i32 = arith.constant 0 : i32
    %0 = arith.cmpi eq, %arg1, %c0_i32 : i32
    %1 = arith.extui %0 : i1 to i32
    %c0_i32_0 = arith.constant 0 : i32
    %2 = arith.cmpi ne, %1, %c0_i32_0 : i32
    scf.if %2 {
      %cst_10 = arith.constant 0.000000e+00 : f32
      %12 = vector.broadcast %cst_10 : f32 to vector<128x64xf32>
      %c0_11 = arith.constant 0 : index
      %c0_12 = arith.constant 0 : index
      %13 = vector.load %arg8[%c0_11, %c0_12] : memref<128x64xf32, #tpu.memory_space<vmem>>, vector<128x64xf32>
      tpu.vector_store %arg8[%c0_11, %c0_12], %12 {strides = array<i32>} : memref<128x64xf32, #tpu.memory_space<vmem>>, vector<128x64xf32>,
    } else {
    }
    %c0 = arith.constant 0 : index
    %c0_1 = arith.constant 0 : index
    %3 = vector.load %arg8[%c0, %c0_1] : memref<128x64xf32, #tpu.memory_space<vmem>>, vector<128x64xf32>
    %c0_2 = arith.constant 0 : index
    %c0_3 = arith.constant 0 : index
    %4 = vector.load %arg2[%c0_2, %c0_3] : memref<128x576xbf16, #tpu.memory_space<vmem>>, vector<128x576xbf16>
    %c0_4 = arith.constant 0 : index
    %c0_5 = arith.constant 0 : index
    %5 = vector.load %arg3[%c0_4, %c0_5] : memref<576x64xbf16, #tpu.memory_space<vmem>>, vector<576x64xbf16>
    %cst = arith.constant dense<0.000000e+00> : vector<128x64xf32>
    %6 = tpu.matmul %4, %5, %cst {dimension_numbers = #tpu.dot_dimension_numbers<[1], [0], [0], [1], [0, 0, 1, 1], [], []>} : vector<128x576xbf16>, vector<576x64xbf16>, vector<128x64xf32> -> vector<128x64xf32>
    %7 = arith.addf %3, %6 : vector<128x64xf32>
    %c0_6 = arith.constant 0 : index
    %c0_7 = arith.constant 0 : index
    %8 = vector.load %arg8[%c0_6, %c0_7] : memref<128x64xf32, #tpu.memory_space<vmem>>, vector<128x64xf32>
    tpu.vector_store %arg8[%c0_6, %c0_7], %7 {strides = array<i32>} : memref<128x64xf32, #tpu.memory_space<vmem>>, vector<128x64xf32>,
    %c0_i32_8 = arith.constant 0 : i32
    %9 = arith.cmpi eq, %arg1, %c0_i32_8 : i32
    %10 = arith.extui %9 : i1 to i32
    %c0_i32_9 = arith.constant 0 : i32
    %11 = arith.cmpi ne, %10, %c0_i32_9 : i32
    scf.if %11 {
      %c0_10 = arith.constant 0 : index
      %c0_11 = arith.constant 0 : index
      %12 = vector.load %arg8[%c0_10, %c0_11] : memref<128x64xf32, #tpu.memory_space<vmem>>, vector<128x64xf32>
      %c0_12 = arith.constant 0 : index
      %c0_13 = arith.constant 0 : index
      %13 = vector.load %arg4[%c0_12, %c0_13] : memref<1x64xf32, #tpu.memory_space<vmem>>, vector<1x64xf32>
      %c0_14 = arith.constant 0 : index
      %c0_15 = arith.constant 0 : index
      %14 = vector.load %arg5[%c0_14, %c0_15] : memref<1x64xf32, #tpu.memory_space<vmem>>, vector<1x64xf32>
      %c0_16 = arith.constant 0 : index
      %c0_17 = arith.constant 0 : index
      %15 = vector.load %arg6[%c0_16, %c0_17] : memref<1x64xf32, #tpu.memory_space<vmem>>, vector<1x64xf32>
      %16 = vector.broadcast %13 : vector<1x64xf32> to vector<128x64xf32>
      %17 = arith.addf %12, %16 : vector<128x64xf32>
      %cst_18 = arith.constant dense<0.000000e+00> : vector<64xf32>
      %18 = vector.multi_reduction <add>, %17, %cst_18 [0] : vector<128x64xf32> to vector<64xf32>
      %19 = vector.shape_cast %18 : vector<64xf32> to vector<1x64xf32>
      %cst_19 = arith.constant 1.280000e+02 : f32
      %20 = vector.broadcast %cst_19 : f32 to vector<1x64xf32>
      %21 = arith.divf %19, %20 : vector<1x64xf32>
      %22 = vector.broadcast %21 : vector<1x64xf32> to vector<128x64xf32>
      %23 = arith.subf %17, %22 : vector<128x64xf32>
      %24 = arith.mulf %23, %23 : vector<128x64xf32>
      %cst_20 = arith.constant dense<0.000000e+00> : vector<64xf32>
      %25 = vector.multi_reduction <add>, %24, %cst_20 [0] : vector<128x64xf32> to vector<64xf32>
      %26 = vector.shape_cast %25 : vector<64xf32> to vector<1x64xf32>
      %cst_21 = arith.constant 1.280000e+02 : f32
      %27 = vector.broadcast %cst_21 : f32 to vector<1x64xf32>
      %28 = arith.divf %26, %27 : vector<1x64xf32>
      %cst_22 = arith.constant 9.99999974E-6 : f32
      %29 = vector.broadcast %cst_22 : f32 to vector<1x64xf32>
      %30 = arith.addf %28, %29 : vector<1x64xf32>
      %31 = math.rsqrt %30 : vector<1x64xf32>
      %32 = arith.mulf %14, %31 : vector<1x64xf32>
      %33 = vector.broadcast %32 : vector<1x64xf32> to vector<128x64xf32>
      %34 = arith.mulf %23, %33 : vector<128x64xf32>
      %35 = vector.broadcast %15 : vector<1x64xf32> to vector<128x64xf32>
      %36 = arith.addf %34, %35 : vector<128x64xf32>
      %cst_23 = arith.constant 0.000000e+00 : f32
      %37 = vector.broadcast %cst_23 : f32 to vector<128x64xf32>
      %38 = arith.cmpf oge, %36, %37 : vector<128x64xf32>
      %cst_24 = arith.constant 2.000000e-01 : f32
      %39 = vector.broadcast %cst_24 : f32 to vector<128x64xf32>
      %40 = arith.mulf %39, %36 : vector<128x64xf32>
      %41 = arith.select %38, %36, %40 : vector<128x64xi1>, vector<128x64xf32>
      %42 = arith.truncf %41 : vector<128x64xf32> to vector<128x64xbf16>
      %c0_25 = arith.constant 0 : index
      %c0_26 = arith.constant 0 : index
      %43 = vector.load %arg7[%c0_25, %c0_26] : memref<128x64xbf16, #tpu.memory_space<vmem>>, vector<128x64xbf16>
      tpu.vector_store %arg7[%c0_25, %c0_26], %42 {strides = array<i32>} : memref<128x64xbf16, #tpu.memory_space<vmem>>, vector<128x64xbf16>,
    } else {
    }
    return
  }
  func.func @transform_0(%arg0: i32, %arg1: i32) -> (i32, i32) {
    %c0_i32 = arith.constant 0 : i32
    %c0_i32_0 = arith.constant 0 : i32
    return %c0_i32, %arg1 : i32, i32
  }
  func.func @transform_1(%arg0: i32, %arg1: i32) -> (i32, i32) {
    %c0_i32 = arith.constant 0 : i32
    return %arg1, %arg0 : i32, i32
  }
  func.func @transform_2(%arg0: i32, %arg1: i32) -> (i32, i32) {
    %c0_i32 = arith.constant 0 : i32
    %c0_i32_0 = arith.constant 0 : i32
    return %c0_i32, %arg0 : i32, i32
  }
  func.func @transform_3(%arg0: i32, %arg1: i32) -> (i32, i32) {
    %c0_i32 = arith.constant 0 : i32
    %c0_i32_0 = arith.constant 0 : i32
    return %c0_i32, %arg0 : i32, i32
  }
  func.func @transform_4(%arg0: i32, %arg1: i32) -> (i32, i32) {
    %c0_i32 = arith.constant 0 : i32
    %c0_i32_0 = arith.constant 0 : i32
    return %c0_i32, %arg0 : i32, i32
  }
  func.func @transform_5(%arg0: i32, %arg1: i32) -> (i32, i32) {
    %c0_i32 = arith.constant 0 : i32
    %c0_i32_0 = arith.constant 0 : i32
    return %c0_i32, %arg0 : i32, i32
  }
}

module attributes {stable_mosaic.version = 11 : i64} {
  func.func @kernel(%arg0: i32, %arg1: i32, %arg2: memref<128x576xbf16, #tpu.memory_space<vmem>>, %arg3: memref<576x128xbf16, #tpu.memory_space<vmem>>, %arg4: memref<1x128xf32, #tpu.memory_space<vmem>>, %arg5: memref<1x128xf32, #tpu.memory_space<vmem>>, %arg6: memref<1x128xf32, #tpu.memory_space<vmem>>, %arg7: memref<128x128xbf16, #tpu.memory_space<vmem>>, %arg8: memref<128x128xf32, #tpu.memory_space<vmem>>) attributes {dimension_semantics = [#tpu.dimension_semantics<parallel>, #tpu.dimension_semantics<arbitrary>], iteration_bounds = array<i64: 1, 1>, scalar_prefetch = 0 : i64, scratch_operands = 1 : i64, tpu.core_type = #tpu.core_type<tc>, window_params = [{transform_indices = @transform_0, window_bounds = array<i64: 128, 576>}, {transform_indices = @transform_1, window_bounds = array<i64: 576, 128>}, {transform_indices = @transform_2, window_bounds = array<i64: 1, 128>}, {transform_indices = @transform_3, window_bounds = array<i64: 1, 128>}, {transform_indices = @transform_4, window_bounds = array<i64: 1, 128>}, {transform_indices = @transform_5, window_bounds = array<i64: 128, 128>}]} {
    %c0_i32 = arith.constant 0 : i32
    %0 = arith.cmpi eq, %arg1, %c0_i32 : i32
    %1 = arith.extui %0 : i1 to i32
    %c0_i32_0 = arith.constant 0 : i32
    %2 = arith.cmpi ne, %1, %c0_i32_0 : i32
    scf.if %2 {
      %cst_10 = arith.constant 0.000000e+00 : f32
      %12 = vector.broadcast %cst_10 : f32 to vector<128x128xf32>
      %c0_11 = arith.constant 0 : index
      %c0_12 = arith.constant 0 : index
      %13 = vector.load %arg8[%c0_11, %c0_12] : memref<128x128xf32, #tpu.memory_space<vmem>>, vector<128x128xf32>
      tpu.vector_store %arg8[%c0_11, %c0_12], %12 {strides = array<i32>} : memref<128x128xf32, #tpu.memory_space<vmem>>, vector<128x128xf32>,
    } else {
    }
    %c0 = arith.constant 0 : index
    %c0_1 = arith.constant 0 : index
    %3 = vector.load %arg8[%c0, %c0_1] : memref<128x128xf32, #tpu.memory_space<vmem>>, vector<128x128xf32>
    %c0_2 = arith.constant 0 : index
    %c0_3 = arith.constant 0 : index
    %4 = vector.load %arg2[%c0_2, %c0_3] : memref<128x576xbf16, #tpu.memory_space<vmem>>, vector<128x576xbf16>
    %c0_4 = arith.constant 0 : index
    %c0_5 = arith.constant 0 : index
    %5 = vector.load %arg3[%c0_4, %c0_5] : memref<576x128xbf16, #tpu.memory_space<vmem>>, vector<576x128xbf16>
    %cst = arith.constant dense<0.000000e+00> : vector<128x128xf32>
    %6 = tpu.matmul %4, %5, %cst {dimension_numbers = #tpu.dot_dimension_numbers<[1], [0], [0], [1], [0, 0, 1, 1], [], []>} : vector<128x576xbf16>, vector<576x128xbf16>, vector<128x128xf32> -> vector<128x128xf32>
    %7 = arith.addf %3, %6 : vector<128x128xf32>
    %c0_6 = arith.constant 0 : index
    %c0_7 = arith.constant 0 : index
    %8 = vector.load %arg8[%c0_6, %c0_7] : memref<128x128xf32, #tpu.memory_space<vmem>>, vector<128x128xf32>
    tpu.vector_store %arg8[%c0_6, %c0_7], %7 {strides = array<i32>} : memref<128x128xf32, #tpu.memory_space<vmem>>, vector<128x128xf32>,
    %c0_i32_8 = arith.constant 0 : i32
    %9 = arith.cmpi eq, %arg1, %c0_i32_8 : i32
    %10 = arith.extui %9 : i1 to i32
    %c0_i32_9 = arith.constant 0 : i32
    %11 = arith.cmpi ne, %10, %c0_i32_9 : i32
    scf.if %11 {
      %c0_10 = arith.constant 0 : index
      %c0_11 = arith.constant 0 : index
      %12 = vector.load %arg8[%c0_10, %c0_11] : memref<128x128xf32, #tpu.memory_space<vmem>>, vector<128x128xf32>
      %c0_12 = arith.constant 0 : index
      %c0_13 = arith.constant 0 : index
      %13 = vector.load %arg4[%c0_12, %c0_13] : memref<1x128xf32, #tpu.memory_space<vmem>>, vector<1x128xf32>
      %c0_14 = arith.constant 0 : index
      %c0_15 = arith.constant 0 : index
      %14 = vector.load %arg5[%c0_14, %c0_15] : memref<1x128xf32, #tpu.memory_space<vmem>>, vector<1x128xf32>
      %c0_16 = arith.constant 0 : index
      %c0_17 = arith.constant 0 : index
      %15 = vector.load %arg6[%c0_16, %c0_17] : memref<1x128xf32, #tpu.memory_space<vmem>>, vector<1x128xf32>
      %16 = vector.broadcast %13 : vector<1x128xf32> to vector<128x128xf32>
      %17 = arith.addf %12, %16 : vector<128x128xf32>
      %cst_18 = arith.constant dense<0.000000e+00> : vector<128xf32>
      %18 = vector.multi_reduction <add>, %17, %cst_18 [0] : vector<128x128xf32> to vector<128xf32>
      %19 = vector.shape_cast %18 : vector<128xf32> to vector<1x128xf32>
      %cst_19 = arith.constant 1.280000e+02 : f32
      %20 = vector.broadcast %cst_19 : f32 to vector<1x128xf32>
      %21 = arith.divf %19, %20 : vector<1x128xf32>
      %22 = vector.broadcast %21 : vector<1x128xf32> to vector<128x128xf32>
      %23 = arith.subf %17, %22 : vector<128x128xf32>
      %24 = arith.mulf %23, %23 : vector<128x128xf32>
      %cst_20 = arith.constant dense<0.000000e+00> : vector<128xf32>
      %25 = vector.multi_reduction <add>, %24, %cst_20 [0] : vector<128x128xf32> to vector<128xf32>
      %26 = vector.shape_cast %25 : vector<128xf32> to vector<1x128xf32>
      %cst_21 = arith.constant 1.280000e+02 : f32
      %27 = vector.broadcast %cst_21 : f32 to vector<1x128xf32>
      %28 = arith.divf %26, %27 : vector<1x128xf32>
      %cst_22 = arith.constant 9.99999974E-6 : f32
      %29 = vector.broadcast %cst_22 : f32 to vector<1x128xf32>
      %30 = arith.addf %28, %29 : vector<1x128xf32>
      %31 = math.rsqrt %30 : vector<1x128xf32>
      %32 = arith.mulf %14, %31 : vector<1x128xf32>
      %33 = vector.broadcast %32 : vector<1x128xf32> to vector<128x128xf32>
      %34 = arith.mulf %23, %33 : vector<128x128xf32>
      %35 = vector.broadcast %15 : vector<1x128xf32> to vector<128x128xf32>
      %36 = arith.addf %34, %35 : vector<128x128xf32>
      %cst_23 = arith.constant 0.000000e+00 : f32
      %37 = vector.broadcast %cst_23 : f32 to vector<128x128xf32>
      %38 = arith.cmpf oge, %36, %37 : vector<128x128xf32>
      %cst_24 = arith.constant 2.000000e-01 : f32
      %39 = vector.broadcast %cst_24 : f32 to vector<128x128xf32>
      %40 = arith.mulf %39, %36 : vector<128x128xf32>
      %41 = arith.select %38, %36, %40 : vector<128x128xi1>, vector<128x128xf32>
      %42 = arith.truncf %41 : vector<128x128xf32> to vector<128x128xbf16>
      %c0_25 = arith.constant 0 : index
      %c0_26 = arith.constant 0 : index
      %43 = vector.load %arg7[%c0_25, %c0_26] : memref<128x128xbf16, #tpu.memory_space<vmem>>, vector<128x128xbf16>
      tpu.vector_store %arg7[%c0_25, %c0_26], %42 {strides = array<i32>} : memref<128x128xbf16, #tpu.memory_space<vmem>>, vector<128x128xbf16>,
    } else {
    }
    return
  }
  func.func @transform_0(%arg0: i32, %arg1: i32) -> (i32, i32) {
    %c0_i32 = arith.constant 0 : i32
    %c0_i32_0 = arith.constant 0 : i32
    return %c0_i32, %arg1 : i32, i32
  }
  func.func @transform_1(%arg0: i32, %arg1: i32) -> (i32, i32) {
    %c0_i32 = arith.constant 0 : i32
    return %arg1, %arg0 : i32, i32
  }
  func.func @transform_2(%arg0: i32, %arg1: i32) -> (i32, i32) {
    %c0_i32 = arith.constant 0 : i32
    %c0_i32_0 = arith.constant 0 : i32
    return %c0_i32, %arg0 : i32, i32
  }
  func.func @transform_3(%arg0: i32, %arg1: i32) -> (i32, i32) {
    %c0_i32 = arith.constant 0 : i32
    %c0_i32_0 = arith.constant 0 : i32
    return %c0_i32, %arg0 : i32, i32
  }
  func.func @transform_4(%arg0: i32, %arg1: i32) -> (i32, i32) {
    %c0_i32 = arith.constant 0 : i32
    %c0_i32_0 = arith.constant 0 : i32
    return %c0_i32, %arg0 : i32, i32
  }
  func.func @transform_5(%arg0: i32, %arg1: i32) -> (i32, i32) {
    %c0_i32 = arith.constant 0 : i32
    %c0_i32_0 = arith.constant 0 : i32
    return %c0_i32, %arg0 : i32, i32
  }
}

module attributes {stable_mosaic.version = 11 : i64} {
  func.func @kernel(%arg0: i32, %arg1: i32, %arg2: memref<32x384xbf16, #tpu.memory_space<vmem>>, %arg3: memref<384x128xbf16, #tpu.memory_space<vmem>>, %arg4: memref<1x128xf32, #tpu.memory_space<vmem>>, %arg5: memref<1x128xf32, #tpu.memory_space<vmem>>, %arg6: memref<1x128xf32, #tpu.memory_space<vmem>>, %arg7: memref<32x128xbf16, #tpu.memory_space<vmem>>, %arg8: memref<32x128xf32, #tpu.memory_space<vmem>>) attributes {dimension_semantics = [#tpu.dimension_semantics<parallel>, #tpu.dimension_semantics<arbitrary>], iteration_bounds = array<i64: 1, 3>, scalar_prefetch = 0 : i64, scratch_operands = 1 : i64, tpu.core_type = #tpu.core_type<tc>, window_params = [{transform_indices = @transform_0, window_bounds = array<i64: 32, 384>}, {transform_indices = @transform_1, window_bounds = array<i64: 384, 128>}, {transform_indices = @transform_2, window_bounds = array<i64: 1, 128>}, {transform_indices = @transform_3, window_bounds = array<i64: 1, 128>}, {transform_indices = @transform_4, window_bounds = array<i64: 1, 128>}, {transform_indices = @transform_5, window_bounds = array<i64: 32, 128>}]} {
    %c0_i32 = arith.constant 0 : i32
    %0 = arith.cmpi eq, %arg1, %c0_i32 : i32
    %1 = arith.extui %0 : i1 to i32
    %c0_i32_0 = arith.constant 0 : i32
    %2 = arith.cmpi ne, %1, %c0_i32_0 : i32
    scf.if %2 {
      %cst_9 = arith.constant 0.000000e+00 : f32
      %12 = vector.broadcast %cst_9 : f32 to vector<32x128xf32>
      %c0_10 = arith.constant 0 : index
      %c0_11 = arith.constant 0 : index
      %13 = vector.load %arg8[%c0_10, %c0_11] : memref<32x128xf32, #tpu.memory_space<vmem>>, vector<32x128xf32>
      tpu.vector_store %arg8[%c0_10, %c0_11], %12 {strides = array<i32>} : memref<32x128xf32, #tpu.memory_space<vmem>>, vector<32x128xf32>,
    } else {
    }
    %c0 = arith.constant 0 : index
    %c0_1 = arith.constant 0 : index
    %3 = vector.load %arg8[%c0, %c0_1] : memref<32x128xf32, #tpu.memory_space<vmem>>, vector<32x128xf32>
    %c0_2 = arith.constant 0 : index
    %c0_3 = arith.constant 0 : index
    %4 = vector.load %arg2[%c0_2, %c0_3] : memref<32x384xbf16, #tpu.memory_space<vmem>>, vector<32x384xbf16>
    %c0_4 = arith.constant 0 : index
    %c0_5 = arith.constant 0 : index
    %5 = vector.load %arg3[%c0_4, %c0_5] : memref<384x128xbf16, #tpu.memory_space<vmem>>, vector<384x128xbf16>
    %cst = arith.constant dense<0.000000e+00> : vector<32x128xf32>
    %6 = tpu.matmul %4, %5, %cst {dimension_numbers = #tpu.dot_dimension_numbers<[1], [0], [0], [1], [0, 0, 1, 1], [], []>} : vector<32x384xbf16>, vector<384x128xbf16>, vector<32x128xf32> -> vector<32x128xf32>
    %7 = arith.addf %3, %6 : vector<32x128xf32>
    %c0_6 = arith.constant 0 : index
    %c0_7 = arith.constant 0 : index
    %8 = vector.load %arg8[%c0_6, %c0_7] : memref<32x128xf32, #tpu.memory_space<vmem>>, vector<32x128xf32>
    tpu.vector_store %arg8[%c0_6, %c0_7], %7 {strides = array<i32>} : memref<32x128xf32, #tpu.memory_space<vmem>>, vector<32x128xf32>,
    %c2_i32 = arith.constant 2 : i32
    %9 = arith.cmpi eq, %arg1, %c2_i32 : i32
    %10 = arith.extui %9 : i1 to i32
    %c0_i32_8 = arith.constant 0 : i32
    %11 = arith.cmpi ne, %10, %c0_i32_8 : i32
    scf.if %11 {
      %c0_9 = arith.constant 0 : index
      %c0_10 = arith.constant 0 : index
      %12 = vector.load %arg8[%c0_9, %c0_10] : memref<32x128xf32, #tpu.memory_space<vmem>>, vector<32x128xf32>
      %c0_11 = arith.constant 0 : index
      %c0_12 = arith.constant 0 : index
      %13 = vector.load %arg4[%c0_11, %c0_12] : memref<1x128xf32, #tpu.memory_space<vmem>>, vector<1x128xf32>
      %c0_13 = arith.constant 0 : index
      %c0_14 = arith.constant 0 : index
      %14 = vector.load %arg5[%c0_13, %c0_14] : memref<1x128xf32, #tpu.memory_space<vmem>>, vector<1x128xf32>
      %c0_15 = arith.constant 0 : index
      %c0_16 = arith.constant 0 : index
      %15 = vector.load %arg6[%c0_15, %c0_16] : memref<1x128xf32, #tpu.memory_space<vmem>>, vector<1x128xf32>
      %16 = vector.broadcast %13 : vector<1x128xf32> to vector<32x128xf32>
      %17 = arith.addf %12, %16 : vector<32x128xf32>
      %cst_17 = arith.constant dense<0.000000e+00> : vector<128xf32>
      %18 = vector.multi_reduction <add>, %17, %cst_17 [0] : vector<32x128xf32> to vector<128xf32>
      %19 = vector.shape_cast %18 : vector<128xf32> to vector<1x128xf32>
      %cst_18 = arith.constant 3.200000e+01 : f32
      %20 = vector.broadcast %cst_18 : f32 to vector<1x128xf32>
      %21 = arith.divf %19, %20 : vector<1x128xf32>
      %22 = vector.broadcast %21 : vector<1x128xf32> to vector<32x128xf32>
      %23 = arith.subf %17, %22 : vector<32x128xf32>
      %24 = arith.mulf %23, %23 : vector<32x128xf32>
      %cst_19 = arith.constant dense<0.000000e+00> : vector<128xf32>
      %25 = vector.multi_reduction <add>, %24, %cst_19 [0] : vector<32x128xf32> to vector<128xf32>
      %26 = vector.shape_cast %25 : vector<128xf32> to vector<1x128xf32>
      %cst_20 = arith.constant 3.200000e+01 : f32
      %27 = vector.broadcast %cst_20 : f32 to vector<1x128xf32>
      %28 = arith.divf %26, %27 : vector<1x128xf32>
      %cst_21 = arith.constant 9.99999974E-6 : f32
      %29 = vector.broadcast %cst_21 : f32 to vector<1x128xf32>
      %30 = arith.addf %28, %29 : vector<1x128xf32>
      %31 = math.rsqrt %30 : vector<1x128xf32>
      %32 = arith.mulf %14, %31 : vector<1x128xf32>
      %33 = vector.broadcast %32 : vector<1x128xf32> to vector<32x128xf32>
      %34 = arith.mulf %23, %33 : vector<32x128xf32>
      %35 = vector.broadcast %15 : vector<1x128xf32> to vector<32x128xf32>
      %36 = arith.addf %34, %35 : vector<32x128xf32>
      %cst_22 = arith.constant 0.000000e+00 : f32
      %37 = vector.broadcast %cst_22 : f32 to vector<32x128xf32>
      %38 = arith.cmpf oge, %36, %37 : vector<32x128xf32>
      %cst_23 = arith.constant 2.000000e-01 : f32
      %39 = vector.broadcast %cst_23 : f32 to vector<32x128xf32>
      %40 = arith.mulf %39, %36 : vector<32x128xf32>
      %41 = arith.select %38, %36, %40 : vector<32x128xi1>, vector<32x128xf32>
      %42 = arith.truncf %41 : vector<32x128xf32> to vector<32x128xbf16>
      %c0_24 = arith.constant 0 : index
      %c0_25 = arith.constant 0 : index
      %43 = vector.load %arg7[%c0_24, %c0_25] : memref<32x128xbf16, #tpu.memory_space<vmem>>, vector<32x128xbf16>
      tpu.vector_store %arg7[%c0_24, %c0_25], %42 {strides = array<i32>} : memref<32x128xbf16, #tpu.memory_space<vmem>>, vector<32x128xbf16>,
    } else {
    }
    return
  }
  func.func @transform_0(%arg0: i32, %arg1: i32) -> (i32, i32) {
    %c0_i32 = arith.constant 0 : i32
    %c0_i32_0 = arith.constant 0 : i32
    return %c0_i32, %arg1 : i32, i32
  }
  func.func @transform_1(%arg0: i32, %arg1: i32) -> (i32, i32) {
    %c0_i32 = arith.constant 0 : i32
    return %arg1, %arg0 : i32, i32
  }
  func.func @transform_2(%arg0: i32, %arg1: i32) -> (i32, i32) {
    %c0_i32 = arith.constant 0 : i32
    %c0_i32_0 = arith.constant 0 : i32
    return %c0_i32, %arg0 : i32, i32
  }
  func.func @transform_3(%arg0: i32, %arg1: i32) -> (i32, i32) {
    %c0_i32 = arith.constant 0 : i32
    %c0_i32_0 = arith.constant 0 : i32
    return %c0_i32, %arg0 : i32, i32
  }
  func.func @transform_4(%arg0: i32, %arg1: i32) -> (i32, i32) {
    %c0_i32 = arith.constant 0 : i32
    %c0_i32_0 = arith.constant 0 : i32
    return %c0_i32, %arg0 : i32, i32
  }
  func.func @transform_5(%arg0: i32, %arg1: i32) -> (i32, i32) {
    %c0_i32 = arith.constant 0 : i32
    %c0_i32_0 = arith.constant 0 : i32
    return %c0_i32, %arg0 : i32, i32
  }
}

module attributes {stable_mosaic.version = 11 : i64} {
  func.func @kernel(%arg0: i32, %arg1: i32, %arg2: memref<32x384xbf16, #tpu.memory_space<vmem>>, %arg3: memref<384x256xbf16, #tpu.memory_space<vmem>>, %arg4: memref<1x256xf32, #tpu.memory_space<vmem>>, %arg5: memref<1x256xf32, #tpu.memory_space<vmem>>, %arg6: memref<1x256xf32, #tpu.memory_space<vmem>>, %arg7: memref<32x256xbf16, #tpu.memory_space<vmem>>, %arg8: memref<32x256xf32, #tpu.memory_space<vmem>>) attributes {dimension_semantics = [#tpu.dimension_semantics<parallel>, #tpu.dimension_semantics<arbitrary>], iteration_bounds = array<i64: 1, 3>, scalar_prefetch = 0 : i64, scratch_operands = 1 : i64, tpu.core_type = #tpu.core_type<tc>, window_params = [{transform_indices = @transform_0, window_bounds = array<i64: 32, 384>}, {transform_indices = @transform_1, window_bounds = array<i64: 384, 256>}, {transform_indices = @transform_2, window_bounds = array<i64: 1, 256>}, {transform_indices = @transform_3, window_bounds = array<i64: 1, 256>}, {transform_indices = @transform_4, window_bounds = array<i64: 1, 256>}, {transform_indices = @transform_5, window_bounds = array<i64: 32, 256>}]} {
    %c0_i32 = arith.constant 0 : i32
    %0 = arith.cmpi eq, %arg1, %c0_i32 : i32
    %1 = arith.extui %0 : i1 to i32
    %c0_i32_0 = arith.constant 0 : i32
    %2 = arith.cmpi ne, %1, %c0_i32_0 : i32
    scf.if %2 {
      %cst_9 = arith.constant 0.000000e+00 : f32
      %12 = vector.broadcast %cst_9 : f32 to vector<32x256xf32>
      %c0_10 = arith.constant 0 : index
      %c0_11 = arith.constant 0 : index
      %13 = vector.load %arg8[%c0_10, %c0_11] : memref<32x256xf32, #tpu.memory_space<vmem>>, vector<32x256xf32>
      tpu.vector_store %arg8[%c0_10, %c0_11], %12 {strides = array<i32>} : memref<32x256xf32, #tpu.memory_space<vmem>>, vector<32x256xf32>,
    } else {
    }
    %c0 = arith.constant 0 : index
    %c0_1 = arith.constant 0 : index
    %3 = vector.load %arg8[%c0, %c0_1] : memref<32x256xf32, #tpu.memory_space<vmem>>, vector<32x256xf32>
    %c0_2 = arith.constant 0 : index
    %c0_3 = arith.constant 0 : index
    %4 = vector.load %arg2[%c0_2, %c0_3] : memref<32x384xbf16, #tpu.memory_space<vmem>>, vector<32x384xbf16>
    %c0_4 = arith.constant 0 : index
    %c0_5 = arith.constant 0 : index
    %5 = vector.load %arg3[%c0_4, %c0_5] : memref<384x256xbf16, #tpu.memory_space<vmem>>, vector<384x256xbf16>
    %cst = arith.constant dense<0.000000e+00> : vector<32x256xf32>
    %6 = tpu.matmul %4, %5, %cst {dimension_numbers = #tpu.dot_dimension_numbers<[1], [0], [0], [1], [0, 0, 1, 1], [], []>} : vector<32x384xbf16>, vector<384x256xbf16>, vector<32x256xf32> -> vector<32x256xf32>
    %7 = arith.addf %3, %6 : vector<32x256xf32>
    %c0_6 = arith.constant 0 : index
    %c0_7 = arith.constant 0 : index
    %8 = vector.load %arg8[%c0_6, %c0_7] : memref<32x256xf32, #tpu.memory_space<vmem>>, vector<32x256xf32>
    tpu.vector_store %arg8[%c0_6, %c0_7], %7 {strides = array<i32>} : memref<32x256xf32, #tpu.memory_space<vmem>>, vector<32x256xf32>,
    %c2_i32 = arith.constant 2 : i32
    %9 = arith.cmpi eq, %arg1, %c2_i32 : i32
    %10 = arith.extui %9 : i1 to i32
    %c0_i32_8 = arith.constant 0 : i32
    %11 = arith.cmpi ne, %10, %c0_i32_8 : i32
    scf.if %11 {
      %c0_9 = arith.constant 0 : index
      %c0_10 = arith.constant 0 : index
      %12 = vector.load %arg8[%c0_9, %c0_10] : memref<32x256xf32, #tpu.memory_space<vmem>>, vector<32x256xf32>
      %c0_11 = arith.constant 0 : index
      %c0_12 = arith.constant 0 : index
      %13 = vector.load %arg4[%c0_11, %c0_12] : memref<1x256xf32, #tpu.memory_space<vmem>>, vector<1x256xf32>
      %c0_13 = arith.constant 0 : index
      %c0_14 = arith.constant 0 : index
      %14 = vector.load %arg5[%c0_13, %c0_14] : memref<1x256xf32, #tpu.memory_space<vmem>>, vector<1x256xf32>
      %c0_15 = arith.constant 0 : index
      %c0_16 = arith.constant 0 : index
      %15 = vector.load %arg6[%c0_15, %c0_16] : memref<1x256xf32, #tpu.memory_space<vmem>>, vector<1x256xf32>
      %16 = vector.broadcast %13 : vector<1x256xf32> to vector<32x256xf32>
      %17 = arith.addf %12, %16 : vector<32x256xf32>
      %cst_17 = arith.constant dense<0.000000e+00> : vector<256xf32>
      %18 = vector.multi_reduction <add>, %17, %cst_17 [0] : vector<32x256xf32> to vector<256xf32>
      %19 = vector.shape_cast %18 : vector<256xf32> to vector<1x256xf32>
      %cst_18 = arith.constant 3.200000e+01 : f32
      %20 = vector.broadcast %cst_18 : f32 to vector<1x256xf32>
      %21 = arith.divf %19, %20 : vector<1x256xf32>
      %22 = vector.broadcast %21 : vector<1x256xf32> to vector<32x256xf32>
      %23 = arith.subf %17, %22 : vector<32x256xf32>
      %24 = arith.mulf %23, %23 : vector<32x256xf32>
      %cst_19 = arith.constant dense<0.000000e+00> : vector<256xf32>
      %25 = vector.multi_reduction <add>, %24, %cst_19 [0] : vector<32x256xf32> to vector<256xf32>
      %26 = vector.shape_cast %25 : vector<256xf32> to vector<1x256xf32>
      %cst_20 = arith.constant 3.200000e+01 : f32
      %27 = vector.broadcast %cst_20 : f32 to vector<1x256xf32>
      %28 = arith.divf %26, %27 : vector<1x256xf32>
      %cst_21 = arith.constant 9.99999974E-6 : f32
      %29 = vector.broadcast %cst_21 : f32 to vector<1x256xf32>
      %30 = arith.addf %28, %29 : vector<1x256xf32>
      %31 = math.rsqrt %30 : vector<1x256xf32>
      %32 = arith.mulf %14, %31 : vector<1x256xf32>
      %33 = vector.broadcast %32 : vector<1x256xf32> to vector<32x256xf32>
      %34 = arith.mulf %23, %33 : vector<32x256xf32>
      %35 = vector.broadcast %15 : vector<1x256xf32> to vector<32x256xf32>
      %36 = arith.addf %34, %35 : vector<32x256xf32>
      %cst_22 = arith.constant 0.000000e+00 : f32
      %37 = vector.broadcast %cst_22 : f32 to vector<32x256xf32>
      %38 = arith.cmpf oge, %36, %37 : vector<32x256xf32>
      %cst_23 = arith.constant 2.000000e-01 : f32
      %39 = vector.broadcast %cst_23 : f32 to vector<32x256xf32>
      %40 = arith.mulf %39, %36 : vector<32x256xf32>
      %41 = arith.select %38, %36, %40 : vector<32x256xi1>, vector<32x256xf32>
      %42 = arith.truncf %41 : vector<32x256xf32> to vector<32x256xbf16>
      %c0_24 = arith.constant 0 : index
      %c0_25 = arith.constant 0 : index
      %43 = vector.load %arg7[%c0_24, %c0_25] : memref<32x256xbf16, #tpu.memory_space<vmem>>, vector<32x256xbf16>
      tpu.vector_store %arg7[%c0_24, %c0_25], %42 {strides = array<i32>} : memref<32x256xbf16, #tpu.memory_space<vmem>>, vector<32x256xbf16>,
    } else {
    }
    return
  }
  func.func @transform_0(%arg0: i32, %arg1: i32) -> (i32, i32) {
    %c0_i32 = arith.constant 0 : i32
    %c0_i32_0 = arith.constant 0 : i32
    return %c0_i32, %arg1 : i32, i32
  }
  func.func @transform_1(%arg0: i32, %arg1: i32) -> (i32, i32) {
    %c0_i32 = arith.constant 0 : i32
    return %arg1, %arg0 : i32, i32
  }
  func.func @transform_2(%arg0: i32, %arg1: i32) -> (i32, i32) {
    %c0_i32 = arith.constant 0 : i32
    %c0_i32_0 = arith.constant 0 : i32
    return %c0_i32, %arg0 : i32, i32
  }
  func.func @transform_3(%arg0: i32, %arg1: i32) -> (i32, i32) {
    %c0_i32 = arith.constant 0 : i32
    %c0_i32_0 = arith.constant 0 : i32
    return %c0_i32, %arg0 : i32, i32
  }
  func.func @transform_4(%arg0: i32, %arg1: i32) -> (i32, i32) {
    %c0_i32 = arith.constant 0 : i32
    %c0_i32_0 = arith.constant 0 : i32
    return %c0_i32, %arg0 : i32, i32
  }
  func.func @transform_5(%arg0: i32, %arg1: i32) -> (i32, i32) {
    %c0_i32 = arith.constant 0 : i32
    %c0_i32_0 = arith.constant 0 : i32
    return %c0_i32, %arg0 : i32, i32
  }
}

module attributes {stable_mosaic.version = 11 : i64} {
  func.func @kernel(%arg0: i32, %arg1: i32, %arg2: memref<8x384xbf16, #tpu.memory_space<vmem>>, %arg3: memref<384x256xbf16, #tpu.memory_space<vmem>>, %arg4: memref<1x256xf32, #tpu.memory_space<vmem>>, %arg5: memref<1x256xf32, #tpu.memory_space<vmem>>, %arg6: memref<1x256xf32, #tpu.memory_space<vmem>>, %arg7: memref<8x256xbf16, #tpu.memory_space<vmem>>, %arg8: memref<8x256xf32, #tpu.memory_space<vmem>>) attributes {dimension_semantics = [#tpu.dimension_semantics<parallel>, #tpu.dimension_semantics<arbitrary>], iteration_bounds = array<i64: 1, 6>, scalar_prefetch = 0 : i64, scratch_operands = 1 : i64, tpu.core_type = #tpu.core_type<tc>, window_params = [{transform_indices = @transform_0, window_bounds = array<i64: 8, 384>}, {transform_indices = @transform_1, window_bounds = array<i64: 384, 256>}, {transform_indices = @transform_2, window_bounds = array<i64: 1, 256>}, {transform_indices = @transform_3, window_bounds = array<i64: 1, 256>}, {transform_indices = @transform_4, window_bounds = array<i64: 1, 256>}, {transform_indices = @transform_5, window_bounds = array<i64: 8, 256>}]} {
    %c0_i32 = arith.constant 0 : i32
    %0 = arith.cmpi eq, %arg1, %c0_i32 : i32
    %1 = arith.extui %0 : i1 to i32
    %c0_i32_0 = arith.constant 0 : i32
    %2 = arith.cmpi ne, %1, %c0_i32_0 : i32
    scf.if %2 {
      %cst_9 = arith.constant 0.000000e+00 : f32
      %12 = vector.broadcast %cst_9 : f32 to vector<8x256xf32>
      %c0_10 = arith.constant 0 : index
      %c0_11 = arith.constant 0 : index
      %13 = vector.load %arg8[%c0_10, %c0_11] : memref<8x256xf32, #tpu.memory_space<vmem>>, vector<8x256xf32>
      tpu.vector_store %arg8[%c0_10, %c0_11], %12 {strides = array<i32>} : memref<8x256xf32, #tpu.memory_space<vmem>>, vector<8x256xf32>,
    } else {
    }
    %c0 = arith.constant 0 : index
    %c0_1 = arith.constant 0 : index
    %3 = vector.load %arg8[%c0, %c0_1] : memref<8x256xf32, #tpu.memory_space<vmem>>, vector<8x256xf32>
    %c0_2 = arith.constant 0 : index
    %c0_3 = arith.constant 0 : index
    %4 = vector.load %arg2[%c0_2, %c0_3] : memref<8x384xbf16, #tpu.memory_space<vmem>>, vector<8x384xbf16>
    %c0_4 = arith.constant 0 : index
    %c0_5 = arith.constant 0 : index
    %5 = vector.load %arg3[%c0_4, %c0_5] : memref<384x256xbf16, #tpu.memory_space<vmem>>, vector<384x256xbf16>
    %cst = arith.constant dense<0.000000e+00> : vector<8x256xf32>
    %6 = tpu.matmul %4, %5, %cst {dimension_numbers = #tpu.dot_dimension_numbers<[1], [0], [0], [1], [0, 0, 1, 1], [], []>} : vector<8x384xbf16>, vector<384x256xbf16>, vector<8x256xf32> -> vector<8x256xf32>
    %7 = arith.addf %3, %6 : vector<8x256xf32>
    %c0_6 = arith.constant 0 : index
    %c0_7 = arith.constant 0 : index
    %8 = vector.load %arg8[%c0_6, %c0_7] : memref<8x256xf32, #tpu.memory_space<vmem>>, vector<8x256xf32>
    tpu.vector_store %arg8[%c0_6, %c0_7], %7 {strides = array<i32>} : memref<8x256xf32, #tpu.memory_space<vmem>>, vector<8x256xf32>,
    %c5_i32 = arith.constant 5 : i32
    %9 = arith.cmpi eq, %arg1, %c5_i32 : i32
    %10 = arith.extui %9 : i1 to i32
    %c0_i32_8 = arith.constant 0 : i32
    %11 = arith.cmpi ne, %10, %c0_i32_8 : i32
    scf.if %11 {
      %c0_9 = arith.constant 0 : index
      %c0_10 = arith.constant 0 : index
      %12 = vector.load %arg8[%c0_9, %c0_10] : memref<8x256xf32, #tpu.memory_space<vmem>>, vector<8x256xf32>
      %c0_11 = arith.constant 0 : index
      %c0_12 = arith.constant 0 : index
      %13 = vector.load %arg4[%c0_11, %c0_12] : memref<1x256xf32, #tpu.memory_space<vmem>>, vector<1x256xf32>
      %c0_13 = arith.constant 0 : index
      %c0_14 = arith.constant 0 : index
      %14 = vector.load %arg5[%c0_13, %c0_14] : memref<1x256xf32, #tpu.memory_space<vmem>>, vector<1x256xf32>
      %c0_15 = arith.constant 0 : index
      %c0_16 = arith.constant 0 : index
      %15 = vector.load %arg6[%c0_15, %c0_16] : memref<1x256xf32, #tpu.memory_space<vmem>>, vector<1x256xf32>
      %16 = vector.broadcast %13 : vector<1x256xf32> to vector<8x256xf32>
      %17 = arith.addf %12, %16 : vector<8x256xf32>
      %cst_17 = arith.constant dense<0.000000e+00> : vector<256xf32>
      %18 = vector.multi_reduction <add>, %17, %cst_17 [0] : vector<8x256xf32> to vector<256xf32>
      %19 = vector.shape_cast %18 : vector<256xf32> to vector<1x256xf32>
      %cst_18 = arith.constant 8.000000e+00 : f32
      %20 = vector.broadcast %cst_18 : f32 to vector<1x256xf32>
      %21 = arith.divf %19, %20 : vector<1x256xf32>
      %22 = vector.broadcast %21 : vector<1x256xf32> to vector<8x256xf32>
      %23 = arith.subf %17, %22 : vector<8x256xf32>
      %24 = arith.mulf %23, %23 : vector<8x256xf32>
      %cst_19 = arith.constant dense<0.000000e+00> : vector<256xf32>
      %25 = vector.multi_reduction <add>, %24, %cst_19 [0] : vector<8x256xf32> to vector<256xf32>
      %26 = vector.shape_cast %25 : vector<256xf32> to vector<1x256xf32>
      %cst_20 = arith.constant 8.000000e+00 : f32
      %27 = vector.broadcast %cst_20 : f32 to vector<1x256xf32>
      %28 = arith.divf %26, %27 : vector<1x256xf32>
      %cst_21 = arith.constant 9.99999974E-6 : f32
      %29 = vector.broadcast %cst_21 : f32 to vector<1x256xf32>
      %30 = arith.addf %28, %29 : vector<1x256xf32>
      %31 = math.rsqrt %30 : vector<1x256xf32>
      %32 = arith.mulf %14, %31 : vector<1x256xf32>
      %33 = vector.broadcast %32 : vector<1x256xf32> to vector<8x256xf32>
      %34 = arith.mulf %23, %33 : vector<8x256xf32>
      %35 = vector.broadcast %15 : vector<1x256xf32> to vector<8x256xf32>
      %36 = arith.addf %34, %35 : vector<8x256xf32>
      %cst_22 = arith.constant 0.000000e+00 : f32
      %37 = vector.broadcast %cst_22 : f32 to vector<8x256xf32>
      %38 = arith.cmpf oge, %36, %37 : vector<8x256xf32>
      %cst_23 = arith.constant 2.000000e-01 : f32
      %39 = vector.broadcast %cst_23 : f32 to vector<8x256xf32>
      %40 = arith.mulf %39, %36 : vector<8x256xf32>
      %41 = arith.select %38, %36, %40 : vector<8x256xi1>, vector<8x256xf32>
      %42 = arith.truncf %41 : vector<8x256xf32> to vector<8x256xbf16>
      %c0_24 = arith.constant 0 : index
      %c0_25 = arith.constant 0 : index
      %43 = vector.load %arg7[%c0_24, %c0_25] : memref<8x256xbf16, #tpu.memory_space<vmem>>, vector<8x256xbf16>
      tpu.vector_store %arg7[%c0_24, %c0_25], %42 {strides = array<i32>} : memref<8x256xbf16, #tpu.memory_space<vmem>>, vector<8x256xbf16>,
    } else {
    }
    return
  }
  func.func @transform_0(%arg0: i32, %arg1: i32) -> (i32, i32) {
    %c0_i32 = arith.constant 0 : i32
    %c0_i32_0 = arith.constant 0 : i32
    return %c0_i32, %arg1 : i32, i32
  }
  func.func @transform_1(%arg0: i32, %arg1: i32) -> (i32, i32) {
    %c0_i32 = arith.constant 0 : i32
    return %arg1, %arg0 : i32, i32
  }
  func.func @transform_2(%arg0: i32, %arg1: i32) -> (i32, i32) {
    %c0_i32 = arith.constant 0 : i32
    %c0_i32_0 = arith.constant 0 : i32
    return %c0_i32, %arg0 : i32, i32
  }
  func.func @transform_3(%arg0: i32, %arg1: i32) -> (i32, i32) {
    %c0_i32 = arith.constant 0 : i32
    %c0_i32_0 = arith.constant 0 : i32
    return %c0_i32, %arg0 : i32, i32
  }
  func.func @transform_4(%arg0: i32, %arg1: i32) -> (i32, i32) {
    %c0_i32 = arith.constant 0 : i32
    %c0_i32_0 = arith.constant 0 : i32
    return %c0_i32, %arg0 : i32, i32
  }
  func.func @transform_5(%arg0: i32, %arg1: i32) -> (i32, i32) {
    %c0_i32 = arith.constant 0 : i32
    %c0_i32_0 = arith.constant 0 : i32
    return %c0_i32, %arg0 : i32, i32
  }
}

module attributes {stable_mosaic.version = 11 : i64} {
  func.func @kernel(%arg0: i32, %arg1: i32, %arg2: memref<8x384xbf16, #tpu.memory_space<vmem>>, %arg3: memref<384x256xbf16, #tpu.memory_space<vmem>>, %arg4: memref<1x256xf32, #tpu.memory_space<vmem>>, %arg5: memref<1x256xf32, #tpu.memory_space<vmem>>, %arg6: memref<1x256xf32, #tpu.memory_space<vmem>>, %arg7: memref<8x256xbf16, #tpu.memory_space<vmem>>, %arg8: memref<8x256xf32, #tpu.memory_space<vmem>>) attributes {dimension_semantics = [#tpu.dimension_semantics<parallel>, #tpu.dimension_semantics<arbitrary>], iteration_bounds = array<i64: 2, 6>, scalar_prefetch = 0 : i64, scratch_operands = 1 : i64, tpu.core_type = #tpu.core_type<tc>, window_params = [{transform_indices = @transform_0, window_bounds = array<i64: 8, 384>}, {transform_indices = @transform_1, window_bounds = array<i64: 384, 256>}, {transform_indices = @transform_2, window_bounds = array<i64: 1, 256>}, {transform_indices = @transform_3, window_bounds = array<i64: 1, 256>}, {transform_indices = @transform_4, window_bounds = array<i64: 1, 256>}, {transform_indices = @transform_5, window_bounds = array<i64: 8, 256>}]} {
    %c0_i32 = arith.constant 0 : i32
    %0 = arith.cmpi eq, %arg1, %c0_i32 : i32
    %1 = arith.extui %0 : i1 to i32
    %c0_i32_0 = arith.constant 0 : i32
    %2 = arith.cmpi ne, %1, %c0_i32_0 : i32
    scf.if %2 {
      %cst_9 = arith.constant 0.000000e+00 : f32
      %12 = vector.broadcast %cst_9 : f32 to vector<8x256xf32>
      %c0_10 = arith.constant 0 : index
      %c0_11 = arith.constant 0 : index
      %13 = vector.load %arg8[%c0_10, %c0_11] : memref<8x256xf32, #tpu.memory_space<vmem>>, vector<8x256xf32>
      tpu.vector_store %arg8[%c0_10, %c0_11], %12 {strides = array<i32>} : memref<8x256xf32, #tpu.memory_space<vmem>>, vector<8x256xf32>,
    } else {
    }
    %c0 = arith.constant 0 : index
    %c0_1 = arith.constant 0 : index
    %3 = vector.load %arg8[%c0, %c0_1] : memref<8x256xf32, #tpu.memory_space<vmem>>, vector<8x256xf32>
    %c0_2 = arith.constant 0 : index
    %c0_3 = arith.constant 0 : index
    %4 = vector.load %arg2[%c0_2, %c0_3] : memref<8x384xbf16, #tpu.memory_space<vmem>>, vector<8x384xbf16>
    %c0_4 = arith.constant 0 : index
    %c0_5 = arith.constant 0 : index
    %5 = vector.load %arg3[%c0_4, %c0_5] : memref<384x256xbf16, #tpu.memory_space<vmem>>, vector<384x256xbf16>
    %cst = arith.constant dense<0.000000e+00> : vector<8x256xf32>
    %6 = tpu.matmul %4, %5, %cst {dimension_numbers = #tpu.dot_dimension_numbers<[1], [0], [0], [1], [0, 0, 1, 1], [], []>} : vector<8x384xbf16>, vector<384x256xbf16>, vector<8x256xf32> -> vector<8x256xf32>
    %7 = arith.addf %3, %6 : vector<8x256xf32>
    %c0_6 = arith.constant 0 : index
    %c0_7 = arith.constant 0 : index
    %8 = vector.load %arg8[%c0_6, %c0_7] : memref<8x256xf32, #tpu.memory_space<vmem>>, vector<8x256xf32>
    tpu.vector_store %arg8[%c0_6, %c0_7], %7 {strides = array<i32>} : memref<8x256xf32, #tpu.memory_space<vmem>>, vector<8x256xf32>,
    %c5_i32 = arith.constant 5 : i32
    %9 = arith.cmpi eq, %arg1, %c5_i32 : i32
    %10 = arith.extui %9 : i1 to i32
    %c0_i32_8 = arith.constant 0 : i32
    %11 = arith.cmpi ne, %10, %c0_i32_8 : i32
    scf.if %11 {
      %c0_9 = arith.constant 0 : index
      %c0_10 = arith.constant 0 : index
      %12 = vector.load %arg8[%c0_9, %c0_10] : memref<8x256xf32, #tpu.memory_space<vmem>>, vector<8x256xf32>
      %c0_11 = arith.constant 0 : index
      %c0_12 = arith.constant 0 : index
      %13 = vector.load %arg4[%c0_11, %c0_12] : memref<1x256xf32, #tpu.memory_space<vmem>>, vector<1x256xf32>
      %c0_13 = arith.constant 0 : index
      %c0_14 = arith.constant 0 : index
      %14 = vector.load %arg5[%c0_13, %c0_14] : memref<1x256xf32, #tpu.memory_space<vmem>>, vector<1x256xf32>
      %c0_15 = arith.constant 0 : index
      %c0_16 = arith.constant 0 : index
      %15 = vector.load %arg6[%c0_15, %c0_16] : memref<1x256xf32, #tpu.memory_space<vmem>>, vector<1x256xf32>
      %16 = vector.broadcast %13 : vector<1x256xf32> to vector<8x256xf32>
      %17 = arith.addf %12, %16 : vector<8x256xf32>
      %cst_17 = arith.constant dense<0.000000e+00> : vector<256xf32>
      %18 = vector.multi_reduction <add>, %17, %cst_17 [0] : vector<8x256xf32> to vector<256xf32>
      %19 = vector.shape_cast %18 : vector<256xf32> to vector<1x256xf32>
      %cst_18 = arith.constant 8.000000e+00 : f32
      %20 = vector.broadcast %cst_18 : f32 to vector<1x256xf32>
      %21 = arith.divf %19, %20 : vector<1x256xf32>
      %22 = vector.broadcast %21 : vector<1x256xf32> to vector<8x256xf32>
      %23 = arith.subf %17, %22 : vector<8x256xf32>
      %24 = arith.mulf %23, %23 : vector<8x256xf32>
      %cst_19 = arith.constant dense<0.000000e+00> : vector<256xf32>
      %25 = vector.multi_reduction <add>, %24, %cst_19 [0] : vector<8x256xf32> to vector<256xf32>
      %26 = vector.shape_cast %25 : vector<256xf32> to vector<1x256xf32>
      %cst_20 = arith.constant 8.000000e+00 : f32
      %27 = vector.broadcast %cst_20 : f32 to vector<1x256xf32>
      %28 = arith.divf %26, %27 : vector<1x256xf32>
      %cst_21 = arith.constant 9.99999974E-6 : f32
      %29 = vector.broadcast %cst_21 : f32 to vector<1x256xf32>
      %30 = arith.addf %28, %29 : vector<1x256xf32>
      %31 = math.rsqrt %30 : vector<1x256xf32>
      %32 = arith.mulf %14, %31 : vector<1x256xf32>
      %33 = vector.broadcast %32 : vector<1x256xf32> to vector<8x256xf32>
      %34 = arith.mulf %23, %33 : vector<8x256xf32>
      %35 = vector.broadcast %15 : vector<1x256xf32> to vector<8x256xf32>
      %36 = arith.addf %34, %35 : vector<8x256xf32>
      %cst_22 = arith.constant 0.000000e+00 : f32
      %37 = vector.broadcast %cst_22 : f32 to vector<8x256xf32>
      %38 = arith.cmpf oge, %36, %37 : vector<8x256xf32>
      %cst_23 = arith.constant 2.000000e-01 : f32
      %39 = vector.broadcast %cst_23 : f32 to vector<8x256xf32>
      %40 = arith.mulf %39, %36 : vector<8x256xf32>
      %41 = arith.select %38, %36, %40 : vector<8x256xi1>, vector<8x256xf32>
      %42 = arith.truncf %41 : vector<8x256xf32> to vector<8x256xbf16>
      %c0_24 = arith.constant 0 : index
      %c0_25 = arith.constant 0 : index
      %43 = vector.load %arg7[%c0_24, %c0_25] : memref<8x256xbf16, #tpu.memory_space<vmem>>, vector<8x256xbf16>
      tpu.vector_store %arg7[%c0_24, %c0_25], %42 {strides = array<i32>} : memref<8x256xbf16, #tpu.memory_space<vmem>>, vector<8x256xbf16>,
    } else {
    }
    return
  }
  func.func @transform_0(%arg0: i32, %arg1: i32) -> (i32, i32) {
    %c0_i32 = arith.constant 0 : i32
    %c0_i32_0 = arith.constant 0 : i32
    return %c0_i32, %arg1 : i32, i32
  }
  func.func @transform_1(%arg0: i32, %arg1: i32) -> (i32, i32) {
    %c0_i32 = arith.constant 0 : i32
    return %arg1, %arg0 : i32, i32
  }
  func.func @transform_2(%arg0: i32, %arg1: i32) -> (i32, i32) {
    %c0_i32 = arith.constant 0 : i32
    %c0_i32_0 = arith.constant 0 : i32
    return %c0_i32, %arg0 : i32, i32
  }
  func.func @transform_3(%arg0: i32, %arg1: i32) -> (i32, i32) {
    %c0_i32 = arith.constant 0 : i32
    %c0_i32_0 = arith.constant 0 : i32
    return %c0_i32, %arg0 : i32, i32
  }
  func.func @transform_4(%arg0: i32, %arg1: i32) -> (i32, i32) {
    %c0_i32 = arith.constant 0 : i32
    %c0_i32_0 = arith.constant 0 : i32
    return %c0_i32, %arg0 : i32, i32
  }
  func.func @transform_5(%arg0: i32, %arg1: i32) -> (i32, i32) {
    %c0_i32 = arith.constant 0 : i32
    %c0_i32_0 = arith.constant 0 : i32
    return %c0_i32, %arg0 : i32, i32
  }
}

module attributes {stable_mosaic.version = 11 : i64} {
  func.func @_tail_kernel(%arg0: i32, %arg1: memref<2x1x512xbf16, #tpu.memory_space<vmem>>, %arg2: memref<512x1024xbf16, #tpu.memory_space<vmem>>, %arg3: memref<1x1024xf32, #tpu.memory_space<vmem>>, %arg4: memref<1x1024xf32, #tpu.memory_space<vmem>>, %arg5: memref<1x1xf32, #tpu.memory_space<vmem>>, %arg6: memref<2x1xf32, #tpu.memory_space<vmem>>) attributes {dimension_semantics = [#tpu.dimension_semantics<arbitrary>], iteration_bounds = array<i64: 1>, scalar_prefetch = 0 : i64, scratch_operands = 0 : i64, tpu.core_type = #tpu.core_type<tc>, window_params = [{pipeline_mode = #tpu.pipeline_mode<synchronous>, transform_indices = @transform_0, window_bounds = array<i64: 2, 1, 512>}, {pipeline_mode = #tpu.pipeline_mode<synchronous>, transform_indices = @transform_1, window_bounds = array<i64: 512, 1024>}, {pipeline_mode = #tpu.pipeline_mode<synchronous>, transform_indices = @transform_2, window_bounds = array<i64: 1, 1024>}, {pipeline_mode = #tpu.pipeline_mode<synchronous>, transform_indices = @transform_3, window_bounds = array<i64: 1, 1024>}, {pipeline_mode = #tpu.pipeline_mode<synchronous>, transform_indices = @transform_4, window_bounds = array<i64: 1, 1>}, {pipeline_mode = #tpu.pipeline_mode<synchronous>, transform_indices = @transform_5, window_bounds = array<i64: 2, 1>}]} {
    %c0 = arith.constant 0 : index
    %c0_0 = arith.constant 0 : index
    %c0_1 = arith.constant 0 : index
    %0 = vector.load %arg1[%c0, %c0_0, %c0_1] : memref<2x1x512xbf16, #tpu.memory_space<vmem>>, vector<2x1x512xbf16>
    %1 = arith.extf %0 : vector<2x1x512xbf16> to vector<2x1x512xf32>
    %cst = arith.constant dense<0.000000e+00> : vector<2x512xf32>
    %2 = vector.multi_reduction <add>, %1, %cst [1] : vector<2x1x512xf32> to vector<2x512xf32>
    %cst_2 = arith.constant 1.000000e+00 : f32
    %3 = vector.broadcast %cst_2 : f32 to vector<2x512xf32>
    %4 = arith.divf %2, %3 : vector<2x512xf32>
    %5 = arith.truncf %4 : vector<2x512xf32> to vector<2x512xbf16>
    %c0_3 = arith.constant 0 : index
    %c0_4 = arith.constant 0 : index
    %6 = vector.load %arg2[%c0_3, %c0_4] : memref<512x1024xbf16, #tpu.memory_space<vmem>>, vector<512x1024xbf16>
    %cst_5 = arith.constant dense<0.000000e+00> : vector<2x1024xf32>
    %7 = tpu.matmul %5, %6, %cst_5 {dimension_numbers = #tpu.dot_dimension_numbers<[1], [0], [0], [1], [0, 0, 1, 1], [], []>} : vector<2x512xbf16>, vector<512x1024xbf16>, vector<2x1024xf32> -> vector<2x1024xf32>
    %c0_6 = arith.constant 0 : index
    %c0_7 = arith.constant 0 : index
    %8 = vector.load %arg3[%c0_6, %c0_7] : memref<1x1024xf32, #tpu.memory_space<vmem>>, vector<1x1024xf32>
    %9 = vector.broadcast %8 : vector<1x1024xf32> to vector<2x1024xf32>
    %10 = arith.addf %7, %9 : vector<2x1024xf32>
    %cst_8 = arith.constant 0.000000e+00 : f32
    %11 = vector.broadcast %cst_8 : f32 to vector<2x1024xf32>
    %12 = arith.cmpf oge, %10, %11 : vector<2x1024xf32>
    %cst_9 = arith.constant 2.000000e-01 : f32
    %13 = vector.broadcast %cst_9 : f32 to vector<2x1024xf32>
    %14 = arith.mulf %13, %10 : vector<2x1024xf32>
    %15 = arith.select %12, %10, %14 : vector<2x1024xi1>, vector<2x1024xf32>
    %c0_10 = arith.constant 0 : index
    %c0_11 = arith.constant 0 : index
    %16 = vector.load %arg4[%c0_10, %c0_11] : memref<1x1024xf32, #tpu.memory_space<vmem>>, vector<1x1024xf32>
    %17 = vector.broadcast %16 : vector<1x1024xf32> to vector<2x1024xf32>
    %18 = arith.mulf %15, %17 : vector<2x1024xf32>
    %cst_12 = arith.constant dense<0.000000e+00> : vector<2xf32>
    %19 = vector.multi_reduction <add>, %18, %cst_12 [1] : vector<2x1024xf32> to vector<2xf32>
    %20 = vector.shape_cast %19 : vector<2xf32> to vector<2x1xf32>
    %c0_13 = arith.constant 0 : index
    %c0_14 = arith.constant 0 : index
    %21 = vector.load %arg5[%c0_13, %c0_14] : memref<1x1xf32, #tpu.memory_space<vmem>>, vector<1x1xf32>
    %22 = vector.broadcast %21 : vector<1x1xf32> to vector<2x1xf32>
    %23 = arith.addf %20, %22 : vector<2x1xf32>
    %24 = arith.negf %23 : vector<2x1xf32>
    %25 = math.exp %24 : vector<2x1xf32>
    %cst_15 = arith.constant 1.000000e+00 : f32
    %26 = vector.broadcast %cst_15 : f32 to vector<2x1xf32>
    %27 = arith.addf %26, %25 : vector<2x1xf32>
    %28 = arith.divf %26, %27 : vector<2x1xf32>
    %c0_16 = arith.constant 0 : index
    %c0_17 = arith.constant 0 : index
    %29 = vector.load %arg6[%c0_16, %c0_17] : memref<2x1xf32, #tpu.memory_space<vmem>>, vector<2x1xf32>
    tpu.vector_store %arg6[%c0_16, %c0_17], %28 {strides = array<i32>} : memref<2x1xf32, #tpu.memory_space<vmem>>, vector<2x1xf32>,
    return
  }
  func.func @transform_0(%arg0: i32) -> (i32, i32, i32) {
    %c0_i32 = arith.constant 0 : i32
    %c0_i32_0 = arith.constant 0 : i32
    %c0_i32_1 = arith.constant 0 : i32
    %c0_i32_2 = arith.constant 0 : i32
    return %c0_i32, %c0_i32_0, %c0_i32_1 : i32, i32, i32
  }
  func.func @transform_1(%arg0: i32) -> (i32, i32) {
    %c0_i32 = arith.constant 0 : i32
    %c0_i32_0 = arith.constant 0 : i32
    %c0_i32_1 = arith.constant 0 : i32
    return %c0_i32, %c0_i32_0 : i32, i32
  }
  func.func @transform_2(%arg0: i32) -> (i32, i32) {
    %c0_i32 = arith.constant 0 : i32
    %c0_i32_0 = arith.constant 0 : i32
    %c0_i32_1 = arith.constant 0 : i32
    return %c0_i32, %c0_i32_0 : i32, i32
  }
  func.func @transform_3(%arg0: i32) -> (i32, i32) {
    %c0_i32 = arith.constant 0 : i32
    %c0_i32_0 = arith.constant 0 : i32
    %c0_i32_1 = arith.constant 0 : i32
    return %c0_i32, %c0_i32_0 : i32, i32
  }
  func.func @transform_4(%arg0: i32) -> (i32, i32) {
    %c0_i32 = arith.constant 0 : i32
    %c0_i32_0 = arith.constant 0 : i32
    %c0_i32_1 = arith.constant 0 : i32
    return %c0_i32, %c0_i32_0 : i32, i32
  }
  func.func @transform_5(%arg0: i32) -> (i32, i32) {
    %c0_i32 = arith.constant 0 : i32
    %c0_i32_0 = arith.constant 0 : i32
    %c0_i32_1 = arith.constant 0 : i32
    return %c0_i32, %c0_i32_0 : i32, i32
  }
}

module attributes {stable_mosaic.version = 11 : i64} {
  func.func @kernel(%arg0: i32, %arg1: i32, %arg2: memref<2x512xbf16, #tpu.memory_space<vmem>>, %arg3: memref<512x256xbf16, #tpu.memory_space<vmem>>, %arg4: memref<1x256xf32, #tpu.memory_space<vmem>>, %arg5: memref<1x256xf32, #tpu.memory_space<vmem>>, %arg6: memref<1x256xf32, #tpu.memory_space<vmem>>, %arg7: memref<2x256xbf16, #tpu.memory_space<vmem>>, %arg8: memref<2x256xf32, #tpu.memory_space<vmem>>) attributes {dimension_semantics = [#tpu.dimension_semantics<parallel>, #tpu.dimension_semantics<arbitrary>], iteration_bounds = array<i64: 2, 9>, scalar_prefetch = 0 : i64, scratch_operands = 1 : i64, tpu.core_type = #tpu.core_type<tc>, window_params = [{transform_indices = @transform_0, window_bounds = array<i64: 2, 512>}, {transform_indices = @transform_1, window_bounds = array<i64: 512, 256>}, {transform_indices = @transform_2, window_bounds = array<i64: 1, 256>}, {transform_indices = @transform_3, window_bounds = array<i64: 1, 256>}, {transform_indices = @transform_4, window_bounds = array<i64: 1, 256>}, {transform_indices = @transform_5, window_bounds = array<i64: 2, 256>}]} {
    %c0_i32 = arith.constant 0 : i32
    %0 = arith.cmpi eq, %arg1, %c0_i32 : i32
    %1 = arith.extui %0 : i1 to i32
    %c0_i32_0 = arith.constant 0 : i32
    %2 = arith.cmpi ne, %1, %c0_i32_0 : i32
    scf.if %2 {
      %cst_9 = arith.constant 0.000000e+00 : f32
      %12 = vector.broadcast %cst_9 : f32 to vector<2x256xf32>
      %c0_10 = arith.constant 0 : index
      %c0_11 = arith.constant 0 : index
      %13 = vector.load %arg8[%c0_10, %c0_11] : memref<2x256xf32, #tpu.memory_space<vmem>>, vector<2x256xf32>
      tpu.vector_store %arg8[%c0_10, %c0_11], %12 {strides = array<i32>} : memref<2x256xf32, #tpu.memory_space<vmem>>, vector<2x256xf32>,
    } else {
    }
    %c0 = arith.constant 0 : index
    %c0_1 = arith.constant 0 : index
    %3 = vector.load %arg8[%c0, %c0_1] : memref<2x256xf32, #tpu.memory_space<vmem>>, vector<2x256xf32>
    %c0_2 = arith.constant 0 : index
    %c0_3 = arith.constant 0 : index
    %4 = vector.load %arg2[%c0_2, %c0_3] : memref<2x512xbf16, #tpu.memory_space<vmem>>, vector<2x512xbf16>
    %c0_4 = arith.constant 0 : index
    %c0_5 = arith.constant 0 : index
    %5 = vector.load %arg3[%c0_4, %c0_5] : memref<512x256xbf16, #tpu.memory_space<vmem>>, vector<512x256xbf16>
    %cst = arith.constant dense<0.000000e+00> : vector<2x256xf32>
    %6 = tpu.matmul %4, %5, %cst {dimension_numbers = #tpu.dot_dimension_numbers<[1], [0], [0], [1], [0, 0, 1, 1], [], []>} : vector<2x512xbf16>, vector<512x256xbf16>, vector<2x256xf32> -> vector<2x256xf32>
    %7 = arith.addf %3, %6 : vector<2x256xf32>
    %c0_6 = arith.constant 0 : index
    %c0_7 = arith.constant 0 : index
    %8 = vector.load %arg8[%c0_6, %c0_7] : memref<2x256xf32, #tpu.memory_space<vmem>>, vector<2x256xf32>
    tpu.vector_store %arg8[%c0_6, %c0_7], %7 {strides = array<i32>} : memref<2x256xf32, #tpu.memory_space<vmem>>, vector<2x256xf32>,
    %c8_i32 = arith.constant 8 : i32
    %9 = arith.cmpi eq, %arg1, %c8_i32 : i32
    %10 = arith.extui %9 : i1 to i32
    %c0_i32_8 = arith.constant 0 : i32
    %11 = arith.cmpi ne, %10, %c0_i32_8 : i32
    scf.if %11 {
      %c0_9 = arith.constant 0 : index
      %c0_10 = arith.constant 0 : index
      %12 = vector.load %arg8[%c0_9, %c0_10] : memref<2x256xf32, #tpu.memory_space<vmem>>, vector<2x256xf32>
      %c0_11 = arith.constant 0 : index
      %c0_12 = arith.constant 0 : index
      %13 = vector.load %arg4[%c0_11, %c0_12] : memref<1x256xf32, #tpu.memory_space<vmem>>, vector<1x256xf32>
      %c0_13 = arith.constant 0 : index
      %c0_14 = arith.constant 0 : index
      %14 = vector.load %arg5[%c0_13, %c0_14] : memref<1x256xf32, #tpu.memory_space<vmem>>, vector<1x256xf32>
      %c0_15 = arith.constant 0 : index
      %c0_16 = arith.constant 0 : index
      %15 = vector.load %arg6[%c0_15, %c0_16] : memref<1x256xf32, #tpu.memory_space<vmem>>, vector<1x256xf32>
      %16 = vector.broadcast %13 : vector<1x256xf32> to vector<2x256xf32>
      %17 = arith.addf %12, %16 : vector<2x256xf32>
      %cst_17 = arith.constant dense<0.000000e+00> : vector<256xf32>
      %18 = vector.multi_reduction <add>, %17, %cst_17 [0] : vector<2x256xf32> to vector<256xf32>
      %19 = vector.shape_cast %18 : vector<256xf32> to vector<1x256xf32>
      %cst_18 = arith.constant 2.000000e+00 : f32
      %20 = vector.broadcast %cst_18 : f32 to vector<1x256xf32>
      %21 = arith.divf %19, %20 : vector<1x256xf32>
      %22 = vector.broadcast %21 : vector<1x256xf32> to vector<2x256xf32>
      %23 = arith.subf %17, %22 : vector<2x256xf32>
      %24 = arith.mulf %23, %23 : vector<2x256xf32>
      %cst_19 = arith.constant dense<0.000000e+00> : vector<256xf32>
      %25 = vector.multi_reduction <add>, %24, %cst_19 [0] : vector<2x256xf32> to vector<256xf32>
      %26 = vector.shape_cast %25 : vector<256xf32> to vector<1x256xf32>
      %cst_20 = arith.constant 2.000000e+00 : f32
      %27 = vector.broadcast %cst_20 : f32 to vector<1x256xf32>
      %28 = arith.divf %26, %27 : vector<1x256xf32>
      %cst_21 = arith.constant 9.99999974E-6 : f32
      %29 = vector.broadcast %cst_21 : f32 to vector<1x256xf32>
      %30 = arith.addf %28, %29 : vector<1x256xf32>
      %31 = math.rsqrt %30 : vector<1x256xf32>
      %32 = arith.mulf %14, %31 : vector<1x256xf32>
      %33 = vector.broadcast %32 : vector<1x256xf32> to vector<2x256xf32>
      %34 = arith.mulf %23, %33 : vector<2x256xf32>
      %35 = vector.broadcast %15 : vector<1x256xf32> to vector<2x256xf32>
      %36 = arith.addf %34, %35 : vector<2x256xf32>
      %cst_22 = arith.constant 0.000000e+00 : f32
      %37 = vector.broadcast %cst_22 : f32 to vector<2x256xf32>
      %38 = arith.cmpf oge, %36, %37 : vector<2x256xf32>
      %cst_23 = arith.constant 2.000000e-01 : f32
      %39 = vector.broadcast %cst_23 : f32 to vector<2x256xf32>
      %40 = arith.mulf %39, %36 : vector<2x256xf32>
      %41 = arith.select %38, %36, %40 : vector<2x256xi1>, vector<2x256xf32>
      %42 = arith.truncf %41 : vector<2x256xf32> to vector<2x256xbf16>
      %c0_24 = arith.constant 0 : index
      %c0_25 = arith.constant 0 : index
      %43 = vector.load %arg7[%c0_24, %c0_25] : memref<2x256xbf16, #tpu.memory_space<vmem>>, vector<2x256xbf16>
      tpu.vector_store %arg7[%c0_24, %c0_25], %42 {strides = array<i32>} : memref<2x256xbf16, #tpu.memory_space<vmem>>, vector<2x256xbf16>,
    } else {
    }
    return
  }
  func.func @transform_0(%arg0: i32, %arg1: i32) -> (i32, i32) {
    %c0_i32 = arith.constant 0 : i32
    %c0_i32_0 = arith.constant 0 : i32
    return %c0_i32, %arg1 : i32, i32
  }
  func.func @transform_1(%arg0: i32, %arg1: i32) -> (i32, i32) {
    %c0_i32 = arith.constant 0 : i32
    return %arg1, %arg0 : i32, i32
  }
  func.func @transform_2(%arg0: i32, %arg1: i32) -> (i32, i32) {
    %c0_i32 = arith.constant 0 : i32
    %c0_i32_0 = arith.constant 0 : i32
    return %c0_i32, %arg0 : i32, i32
  }
  func.func @transform_3(%arg0: i32, %arg1: i32) -> (i32, i32) {
    %c0_i32 = arith.constant 0 : i32
    %c0_i32_0 = arith.constant 0 : i32
    return %c0_i32, %arg0 : i32, i32
  }
  func.func @transform_4(%arg0: i32, %arg1: i32) -> (i32, i32) {
    %c0_i32 = arith.constant 0 : i32
    %c0_i32_0 = arith.constant 0 : i32
    return %c0_i32, %arg0 : i32, i32
  }
  func.func @transform_5(%arg0: i32, %arg1: i32) -> (i32, i32) {
    %c0_i32 = arith.constant 0 : i32
    %c0_i32_0 = arith.constant 0 : i32
    return %c0_i32, %arg0 : i32, i32
  }
}

</mosaic_0001>

<bundles_post_ra>
// kernel: discriminator_forward.9
= control target key start
LH: loop header
LB: loop body
LE: loop exit
PB: predicated region body
PF: predicated region fallthrough
CT: control target
= control target key end

     0   :  { %8 = vsyncpa [#allocation4], 0  ;;  %s2796_s0 = inlined_call_operand.vmem [shape: bf16[512,27], index: 0, kind: input, shape index: {}]   ;;  %s2797_s1 = inlined_call_operand.hbm [shape: bf16[27,64], index: 1, kind: input, shape index: {}]   ;;  %s2798_s2 = inlined_call_operand.hbm [shape: f32[1,64], index: 2, kind: input, shape index: {}]   ;;  %s2799_s3 = inlined_call_operand.vmem [shape: bf16[512,64], index: 3, kind: output, shape index: {}]  }
   0x1   :  { %9 = vsyncpa [#allocation6], 0  ;;  %s1982_s12 = smov [#allocation3]   ;;  %s1934_s16 = scalar_lea.hbm %s2797_s1, 256 }
   0x2   :  { %s17_s13 = sshll.u32 %s1982_s12, 4  ;;  %p1935_p0 = scmp.ne.s32.totalorder %s2797_s1, %s1934_s16  ;;  %s18_s13 = int_to_ptr.vmem [resolvable:$true] %s17_s13 }
   0x3   :  { %p1938_p1 = scmp.lt.u32.totalorder %s1934_s16, %s2797_s1 }
   0x5   :  { %p1940_p2 = pnand %p1938_p1, %p1935_p0 }
   0x7   :  { %1943 = shalt.err (!%p1940_p2)
}
   0x8   :  { %s1944_s21 = scalar_lea.vmem %s18_s13, 256  ;;  %p1949_p4 = scmp.lt.s32.totalorder %s18_s13, %s18_s13 }
   0x9   :  { %p1945_p3 = scmp.ne.s32.totalorder %s18_s13, %s1944_s21  ;;  %p1950_p5 = scmp.lt.s32.totalorder %s1944_s21, %s1944_s21 }
   0xb   :  { %p1951_p6 = por %p1950_p5, %p1949_p4 }
   0xd   :  { %p1952_p7 = pnand %p1951_p6, %p1945_p3 }
   0xf   :  { %1955 = shalt.err (!%p1952_p7)
}
  0x10   :  { %s1983_s22 = smov 64   ;;  %s1984_s23 = smov 4  }
  0x11   :  { %23 = dma.hbm_to_vmem [thread:$0]  %s2797_s1, 256, %s18_s13, [#allocation4], %s1983_s22, %s1983_s22, %s1984_s23  }
  0x12   :  { %s1985_s26 = smov [#allocation5]   ;;  %s1956_s30 = scalar_lea.hbm %s2798_s2, 16 }
  0x13   :  { %s30_s27 = sshll.u32 %s1985_s26, 4  ;;  %p1957_p8 = scmp.ne.s32.totalorder %s2798_s2, %s1956_s30  ;;  %s31_s27 = int_to_ptr.vmem [resolvable:$true] %s30_s27 }
  0x14   :  { %p1960_p9 = scmp.lt.u32.totalorder %s1956_s30, %s2798_s2 }
  0x16   :  { %p1962_p10 = pnand %p1960_p9, %p1957_p8 }
  0x18   :  { %1965 = shalt.err (!%p1962_p10)
}
  0x19   :  { %s1966_s8 = scalar_lea.vmem %s31_s27, 16  ;;  %s1970_s1 = scalar_lea.vmem %s31_s27, 32 }
  0x1a   :  { %p1967_p11 = scmp.ne.s32.totalorder %s31_s27, %s1966_s8  ;;  %p1971_p12 = scmp.lt.s32.totalorder %s31_s27, %s31_s27 }
  0x1b   :  { %p1972_p13 = scmp.lt.s32.totalorder %s1970_s1, %s1966_s8 }
  0x1d   :  { %p1973_p0 = por %p1972_p13, %p1971_p12 }
  0x1f   :  { %p1974_p1 = pnand %p1973_p0, %p1967_p11 }
  0x21   :  { %1977 = shalt.err (!%p1974_p1)
}
  0x22   :  { %33 = dma.hbm_to_vmem [thread:$0]  %s2798_s2, 16, %s31_s27, [#allocation6]  }
  0x23   :  { %1978 = dma.done.wait [#allocation4], 256  }
  0x24   :  { %1979 = vsyncadd [#allocation4], 4294967040 }
  0x25   :  { %1980 = dma.done.wait [#allocation6], 16  }
  0x26   :  { %1981 = vsyncadd [#allocation6], 4294967280  ;;  %vm510_vm0 = vcmask 1044480   ;;  %vm45_vm1 = vcmask 523264   ;;  %v1986_v0 = vmov 0.0   ;;  %vm511_vm2 = vcmask 1045504  }
  0x27   :  { %48 = vst.msk [vmem:[#allocation2 + $0x10] sm:$0xff] %vm45_vm1, %v1986_v0  ;;  %46 = vst.msk [vmem:[#allocation2] sm:$0xff] %vm45_vm1, %v1986_v0  ;;  %v1987_v1 = vmov 65535   ;;  %vm413_vm3 = vcmask 220160   ;;  %v1899_v3 = vld [vmem:[#allocation3] sm:$0xff]   ;;  %v1903_v9 = vld [vmem:[%s2796_s0 + $0x8] sm:$0xff]  }
  0x28   :  { %47 = vst.msk [vmem:[#allocation2 + $0x8] sm:$0xff] %vm45_vm1, %v1986_v0  ;;  %49 = vst.msk [vmem:[#allocation2 + $0x18] sm:$0xff] %vm45_vm1, %v1986_v0  ;;  %v512_v2 = vsel %vm510_vm0, 4294967295, %v1987_v1  ;;  %v1900_v5 = vld [vmem:[#allocation3 + $0x8] sm:$0x3f]   ;;  %1821 = vmatprep.subr.bf16.mxu0 %v1899_v3  ;;  %1889 = vmatprep.subr.bf16.mxu1 %v1899_v3  ;;  %v1901_v6 = vld [vmem:[%s2796_s0] sm:$0xff]  }
  0x29   :  { %50 = vst.msk [vmem:[#allocation2 + $0x20] sm:$0xff] %vm45_vm1, %v1986_v0  ;;  %51 = vst.msk [vmem:[#allocation2 + $0x28] sm:$0xff] %vm45_vm1, %v1986_v0  ;;  %v513_v4 = vsel %vm511_vm2, %v512_v2, 0  ;;  %1822 = vmatpush3.bf16.msra.mxu0 %v1899_v3  ;;  %1891 = vmatpush3.bf16.msra.mxu1 %v1899_v3  ;;  %v1902_v8 = vld [vmem:[%s2796_s0 + $0x80] sm:$0xff]   ;;  %v1904_v10 = vld [vmem:[%s2796_s0 + $0x88] sm:$0xff]   ;;  %vm1521_vm4 = vcmask 519168  }
  0x2a   :  { %52 = vst.msk [vmem:[#allocation2 + $0x30] sm:$0xff] %vm45_vm1, %v1986_v0  ;;  %53 = vst.msk [vmem:[#allocation2 + $0x38] sm:$0xff] %vm45_vm1, %v1986_v0  ;;  %v515_v7 = vand.u32 %v1900_v5, %v513_v4  ;;  %1825 = vmatprep.mubr.msk.bf16.mxu0 %vm413_vm3, %v1901_v6  ;;  %1857 = vmatprep.mubr.msk.bf16.mxu1 %vm413_vm3, %v1902_v8  ;;  %v1905_v11 = vld [vmem:[%s2796_s0 + $0x10] sm:$0xff]   ;;  %v1907_v13 = vld [vmem:[%s2796_s0 + $0x18] sm:$0xff]  }
  0x2b   :  { %54 = vst.msk [vmem:[#allocation2 + $0x40] sm:$0xff] %vm45_vm1, %v1986_v0  ;;  %55 = vst.msk [vmem:[#allocation2 + $0x48] sm:$0xff] %vm45_vm1, %v1986_v0  ;;  %v1906_v12 = vld [vmem:[%s2796_s0 + $0x90] sm:$0xff]   ;;  %v1908_v14 = vld [vmem:[%s2796_s0 + $0x98] sm:$0xff]  }
  0x2c   :  { %56 = vst.msk [vmem:[#allocation2 + $0x50] sm:$0xff] %vm45_vm1, %v1986_v0  ;;  %57 = vst.msk [vmem:[#allocation2 + $0x58] sm:$0xff] %vm45_vm1, %v1986_v0  ;;  %1823 = vmatprep.subr.bf16.mxu0 %v515_v7  ;;  %1890 = vmatprep.subr.bf16.mxu1 %v515_v7  ;;  %v1909_v15 = vld [vmem:[%s2796_s0 + $0x20] sm:$0xff]   ;;  %v1911_v17 = vld [vmem:[%s2796_s0 + $0x28] sm:$0xff]  }
  0x2d   :  { %58 = vst.msk [vmem:[#allocation2 + $0x60] sm:$0xff] %vm45_vm1, %v1986_v0  ;;  %59 = vst.msk [vmem:[#allocation2 + $0x68] sm:$0xff] %vm45_vm1, %v1986_v0  ;;  %1824 = vmatpush3.bf16.msra.mxu0 %v515_v7  ;;  %1892 = vmatpush3.bf16.msra.mxu1 %v515_v7  ;;  %v1910_v16 = vld [vmem:[%s2796_s0 + $0xa0] sm:$0xff]   ;;  %v1912_v18 = vld [vmem:[%s2796_s0 + $0xa8] sm:$0xff]  }
  0x2e   :  { %60 = vst.msk [vmem:[#allocation2 + $0x70] sm:$0xff] %vm45_vm1, %v1986_v0  ;;  %61 = vst.msk [vmem:[#allocation2 + $0x78] sm:$0xff] %vm45_vm1, %v1986_v0  ;;  %v1913_v19 = vld [vmem:[%s2796_s0 + $0x30] sm:$0xff]   ;;  %v1915_v21 = vld [vmem:[%s2796_s0 + $0x38] sm:$0xff]  }
  0x2f   :  { %62 = vst.msk [vmem:[#allocation2 + $0x80] sm:$0xff] %vm45_vm1, %v1986_v0  ;;  %63 = vst.msk [vmem:[#allocation2 + $0x88] sm:$0xff] %vm45_vm1, %v1986_v0  ;;  %v1914_v20 = vld [vmem:[%s2796_s0 + $0xb0] sm:$0xff]   ;;  %v1916_v22 = vld [vmem:[%s2796_s0 + $0xb8] sm:$0xff]  }
  0x30   :  { %64 = vst.msk [vmem:[#allocation2 + $0x90] sm:$0xff] %vm45_vm1, %v1986_v0  ;;  %65 = vst.msk [vmem:[#allocation2 + $0x98] sm:$0xff] %vm45_vm1, %v1986_v0  ;;  %1826 = vmatmul.mubr.msk.bf16.vlgmr.msra.gmra.mrb[0].mxu0 %vm413_vm3, %v1903_v9  ;;  %1858 = vmatmul.mubr.msk.bf16.vlgmr.msra.gmra.mrb[0].mxu1 %vm413_vm3, %v1904_v10  ;;  %v1917_v23 = vld [vmem:[%s2796_s0 + $0x40] sm:$0xff]   ;;  %v1919_v25 = vld [vmem:[%s2796_s0 + $0x48] sm:$0xff]  }
  0x31   :  { %66 = vst.msk [vmem:[#allocation2 + $0xa0] sm:$0xff] %vm45_vm1, %v1986_v0  ;;  %67 = vst.msk [vmem:[#allocation2 + $0xa8] sm:$0xff] %vm45_vm1, %v1986_v0  ;;  %1829 = vmatprep.mubr.msk.bf16.mxu0 %vm413_vm3, %v1905_v11  ;;  %1861 = vmatprep.mubr.msk.bf16.mxu1 %vm413_vm3, %v1906_v12  ;;  %v1918_v24 = vld [vmem:[%s2796_s0 + $0xc0] sm:$0xff]   ;;  %v1920_v26 = vld [vmem:[%s2796_s0 + $0xc8] sm:$0xff]  }
  0x32   :  { %68 = vst.msk [vmem:[#allocation2 + $0xb0] sm:$0xff] %vm45_vm1, %v1986_v0  ;;  %69 = vst.msk [vmem:[#allocation2 + $0xb8] sm:$0xff] %vm45_vm1, %v1986_v0  ;;  %v1921_v27 = vld [vmem:[%s2796_s0 + $0x50] sm:$0xff]   ;;  %v1923_v29 = vld [vmem:[%s2796_s0 + $0x58] sm:$0xff]  }
  0x33   :  { %70 = vst.msk [vmem:[#allocation2 + $0xc0] sm:$0xff] %vm45_vm1, %v1986_v0  ;;  %71 = vst.msk [vmem:[#allocation2 + $0xc8] sm:$0xff] %vm45_vm1, %v1986_v0  ;;  %v1922_v28 = vld [vmem:[%s2796_s0 + $0xd0] sm:$0xff]   ;;  %v1924_v30 = vld [vmem:[%s2796_s0 + $0xd8] sm:$0xff]  }
  0x34   :  { %72 = vst.msk [vmem:[#allocation2 + $0xd0] sm:$0xff] %vm45_vm1, %v1986_v0  ;;  %73 = vst.msk [vmem:[#allocation2 + $0xd8] sm:$0xff] %vm45_vm1, %v1986_v0  ;;  %v1925_v31 = vld [vmem:[%s2796_s0 + $0x60] sm:$0xff]   ;;  %v1927_v33 = vld [vmem:[%s2796_s0 + $0x68] sm:$0xff]  }
  0x35   :  { %74 = vst.msk [vmem:[#allocation2 + $0xe0] sm:$0xff] %vm45_vm1, %v1986_v0  ;;  %75 = vst.msk [vmem:[#allocation2 + $0xe8] sm:$0xff] %vm45_vm1, %v1986_v0  ;;  %v1926_v32 = vld [vmem:[%s2796_s0 + $0xe0] sm:$0xff]   ;;  %v1928_v34 = vld [vmem:[%s2796_s0 + $0xe8] sm:$0xff]  }
  0x36   :  { %76 = vst.msk [vmem:[#allocation2 + $0xf0] sm:$0xff] %vm45_vm1, %v1986_v0  ;;  %77 = vst.msk [vmem:[#allocation2 + $0xf8] sm:$0xff] %vm45_vm1, %v1986_v0  ;;  %v1929_v35 = vld [vmem:[%s2796_s0 + $0x70] sm:$0xff]   ;;  %v1931_v37 = vld [vmem:[%s2796_s0 + $0x78] sm:$0xff]  }
  0x37   :  { %78 = vst.msk [vmem:[#allocation2 + $0x100] sm:$0xff] %vm45_vm1, %v1986_v0  ;;  %79 = vst.msk [vmem:[#allocation2 + $0x108] sm:$0xff] %vm45_vm1, %v1986_v0  ;;  %v1930_v36 = vld [vmem:[%s2796_s0 + $0xf0] sm:$0xff]   ;;  %v1932_v38 = vld [vmem:[%s2796_s0 + $0xf8] sm:$0xff]  }
  0x38   :  { %80 = vst.msk [vmem:[#allocation2 + $0x110] sm:$0xff] %vm45_vm1, %v1986_v0  ;;  %81 = vst.msk [vmem:[#allocation2 + $0x118] sm:$0xff] %vm45_vm1, %v1986_v0  ;;  %1830 = vmatmul.mubr.msk.bf16.gmra.mrb[4].mxu0 %vm413_vm3, %v1907_v13  ;;  %1862 = vmatmul.mubr.msk.bf16.gmra.mrb[4].mxu1 %vm413_vm3, %v1908_v14  ;;  %v112_v39 = vld [vmem:[#allocation2 + $0x10] sm:$0xff]  ;;  %v110_v41 = vld [vmem:[#allocation2] sm:$0xff] }
  0x39   :  { %82 = vst.msk [vmem:[#allocation2 + $0x120] sm:$0xff] %vm45_vm1, %v1986_v0  ;;  %83 = vst.msk [vmem:[#allocation2 + $0x128] sm:$0xff] %vm45_vm1, %v1986_v0  ;;  %1833 = vmatprep.mubr.msk.bf16.mxu0 %vm413_vm3, %v1909_v15  ;;  %1865 = vmatprep.mubr.msk.bf16.mxu1 %vm413_vm3, %v1910_v16  ;;  %v113_v45 = vld [vmem:[#allocation2 + $0x18] sm:$0xff]  ;;  %v111_v51 = vld [vmem:[#allocation2 + $0x8] sm:$0xff] }
  0x3a   :  { %84 = vst.msk [vmem:[#allocation2 + $0x130] sm:$0xff] %vm45_vm1, %v1986_v0  ;;  %85 = vst.msk [vmem:[#allocation2 + $0x138] sm:$0xff] %vm45_vm1, %v1986_v0  ;;  %v116_v63 = vld [vmem:[#allocation2 + $0x30] sm:$0xff]  ;;  %v114_v1 = vld [vmem:[#allocation2 + $0x20] sm:$0xff] }
  0x3b   :  { %86 = vst.msk [vmem:[#allocation2 + $0x140] sm:$0xff] %vm45_vm1, %v1986_v0  ;;  %87 = vst.msk [vmem:[#allocation2 + $0x148] sm:$0xff] %vm45_vm1, %v1986_v0  ;;  %v2297_v3 = vld [vmem:[#allocation5] ss:$0 sm:$0xff]  ;;  %v117_v6 = vld [vmem:[#allocation2 + $0x38] sm:$0xff] }
  0x3c   :  { %88 = vst.msk [vmem:[#allocation2 + $0x150] sm:$0xff] %vm45_vm1, %v1986_v0  ;;  %89 = vst.msk [vmem:[#allocation2 + $0x158] sm:$0xff] %vm45_vm1, %v1986_v0  ;;  %v115_v12 = vld [vmem:[#allocation2 + $0x28] sm:$0xff] }
  0x3d   :  { %90 = vst.msk [vmem:[#allocation2 + $0x160] sm:$0xff] %vm45_vm1, %v1986_v0  ;;  %91 = vst.msk [vmem:[#allocation2 + $0x168] sm:$0xff] %vm45_vm1, %v1986_v0 }
  0x3e   :  { %92 = vst.msk [vmem:[#allocation2 + $0x170] sm:$0xff] %vm45_vm1, %v1986_v0  ;;  %93 = vst.msk [vmem:[#allocation2 + $0x178] sm:$0xff] %vm45_vm1, %v1986_v0  ;;  %v142_v42 = vld [vmem:[#allocation2 + $0x100] sm:$0xff]  ;;  %v143_v52 = vld [vmem:[#allocation2 + $0x108] sm:$0xff] }
  0x3f   :  { %94 = vst.msk [vmem:[#allocation2 + $0x180] sm:$0xff] %vm45_vm1, %v1986_v0  ;;  %95 = vst.msk [vmem:[#allocation2 + $0x188] sm:$0xff] %vm45_vm1, %v1986_v0  ;;  %v144_v40 = vld [vmem:[#allocation2 + $0x110] sm:$0xff]  ;;  %v145_v46 = vld [vmem:[#allocation2 + $0x118] sm:$0xff] }
  0x40   :  { %96 = vst.msk [vmem:[#allocation2 + $0x190] sm:$0xff] %vm45_vm1, %v1986_v0  ;;  %97 = vst.msk [vmem:[#allocation2 + $0x198] sm:$0xff] %vm45_vm1, %v1986_v0  ;;  %1834 = vmatmul.mubr.msk.bf16.gmra.mrb[8].mxu0 %vm413_vm3, %v1911_v17  ;;  %1866 = vmatmul.mubr.msk.bf16.gmra.mrb[8].mxu1 %vm413_vm3, %v1912_v18  ;;  %v146_v2 = vld [vmem:[#allocation2 + $0x120] sm:$0xff]  ;;  %v147_v13 = vld [vmem:[#allocation2 + $0x128] sm:$0xff] }
  0x41   :  { %98 = vst.msk [vmem:[#allocation2 + $0x1a0] sm:$0xff] %vm45_vm1, %v1986_v0  ;;  %99 = vst.msk [vmem:[#allocation2 + $0x1a8] sm:$0xff] %vm45_vm1, %v1986_v0  ;;  %1837 = vmatprep.mubr.msk.bf16.mxu0 %vm413_vm3, %v1913_v19  ;;  %1869 = vmatprep.mubr.msk.bf16.mxu1 %vm413_vm3, %v1914_v20  ;;  %v149_v7 = vld [vmem:[#allocation2 + $0x138] sm:$0xff] }
  0x42   :  { %100 = vst.msk [vmem:[#allocation2 + $0x1b0] sm:$0xff] %vm45_vm1, %v1986_v0  ;;  %101 = vst.msk [vmem:[#allocation2 + $0x1b8] sm:$0xff] %vm45_vm1, %v1986_v0 }
  0x43   :  { %102 = vst.msk [vmem:[#allocation2 + $0x1c0] sm:$0xff] %vm45_vm1, %v1986_v0  ;;  %103 = vst.msk [vmem:[#allocation2 + $0x1c8] sm:$0xff] %vm45_vm1, %v1986_v0 }
  0x44   :  { %104 = vst.msk [vmem:[#allocation2 + $0x1d0] sm:$0xff] %vm45_vm1, %v1986_v0  ;;  %105 = vst.msk [vmem:[#allocation2 + $0x1d8] sm:$0xff] %vm45_vm1, %v1986_v0 }
  0x45   :  { %106 = vst.msk [vmem:[#allocation2 + $0x1e0] sm:$0xff] %vm45_vm1, %v1986_v0  ;;  %107 = vst.msk [vmem:[#allocation2 + $0x1e8] sm:$0xff] %vm45_vm1, %v1986_v0 }
  0x46   :  { %108 = vst.msk [vmem:[#allocation2 + $0x1f0] sm:$0xff] %vm45_vm1, %v1986_v0  ;;  %109 = vst.msk [vmem:[#allocation2 + $0x1f8] sm:$0xff] %vm45_vm1, %v1986_v0  ;;  %v148_v0 = vld [vmem:[#allocation2 + $0x130] sm:$0xff] }
  0x48   :  { %1838 = vmatmul.mubr.msk.bf16.gmra.mrb[12].mxu0 %vm413_vm3, %v1915_v21  ;;  %1870 = vmatmul.mubr.msk.bf16.gmra.mrb[12].mxu1 %vm413_vm3, %v1916_v22 }
  0x49   :  { %1841 = vmatprep.mubr.msk.bf16.mxu0 %vm413_vm3, %v1917_v23  ;;  %1873 = vmatprep.mubr.msk.bf16.mxu1 %vm413_vm3, %v1918_v24 }
  0x50   :  { %1842 = vmatmul.mubr.msk.bf16.gmra.mrb[16].mxu0 %vm413_vm3, %v1919_v25  ;;  %1874 = vmatmul.mubr.msk.bf16.gmra.mrb[16].mxu1 %vm413_vm3, %v1920_v26 }
  0x51   :  { %1845 = vmatprep.mubr.msk.bf16.mxu0 %vm413_vm3, %v1921_v27  ;;  %1877 = vmatprep.mubr.msk.bf16.mxu1 %vm413_vm3, %v1922_v28 }
  0x58   :  { %1846 = vmatmul.mubr.msk.bf16.gmra.mrb[20].mxu0 %vm413_vm3, %v1923_v29  ;;  %1878 = vmatmul.mubr.msk.bf16.gmra.mrb[20].mxu1 %vm413_vm3, %v1924_v30 }
  0x59   :  { %1849 = vmatprep.mubr.msk.bf16.mxu0 %vm413_vm3, %v1925_v31  ;;  %1881 = vmatprep.mubr.msk.bf16.mxu1 %vm413_vm3, %v1926_v32 }
  0x60   :  { %1850 = vmatmul.mubr.msk.bf16.gmra.mrb[24].mxu0 %vm413_vm3, %v1927_v33  ;;  %1882 = vmatmul.mubr.msk.bf16.gmra.mrb[24].mxu1 %vm413_vm3, %v1928_v34 }
  0x61   :  { %1853 = vmatprep.mubr.msk.bf16.mxu0 %vm413_vm3, %v1929_v35  ;;  %1885 = vmatprep.mubr.msk.bf16.mxu1 %vm413_vm3, %v1930_v36 }
  0x68   :  { %1854 = vmatmul.mubr.msk.bf16.gmra.mrb[28].mxu0 %vm413_vm3, %v1931_v37  ;;  %1886 = vmatmul.mubr.msk.bf16.gmra.mrb[28].mxu1 %vm413_vm3, %v1932_v38 }
 0x103   :  { %v1827_v43 = vpop.f32.mrb[0].mxu0  ;;  %v1859_v44 = vpop.f32.mrb[0].mxu1 }
 0x104   :  { %v808_v47 = vadd.f32 %v1827_v43, %v112_v39  ;;  %v840_v48 = vadd.f32 %v1859_v44, %v144_v40  ;;  %v551_v49 = vpop.f32.mrb[1].mxu0  ;;  %v679_v50 = vpop.f32.mrb[1].mxu1 }
 0x105   :  { %v806_v53 = vadd.f32 %v551_v49, %v110_v41  ;;  %v838_v54 = vadd.f32 %v679_v50, %v142_v42  ;;  %v1828_v55 = vpop.f32.mrb[2].mxu0  ;;  %v1860_v56 = vpop.f32.mrb[2].mxu1 }
 0x106   :  { %873 = vst.msk [vmem:[#allocation2 + $0x10] sm:$0xff] %vm45_vm1, %v808_v47  ;;  %905 = vst.msk [vmem:[#allocation2 + $0x110] sm:$0xff] %vm45_vm1, %v840_v48  ;;  %v809_v57 = vadd.f32 %v1828_v55, %v113_v45  ;;  %v841_v58 = vadd.f32 %v1860_v56, %v145_v46  ;;  %v554_v59 = vpop.f32.mrb[3].mxu0  ;;  %v682_v60 = vpop.f32.mrb[3].mxu1  ;;  %v120_v48 = vld [vmem:[#allocation2 + $0x50] sm:$0xff] }
 0x107   :  { %871 = vst.msk [vmem:[#allocation2] sm:$0xff] %vm45_vm1, %v806_v53  ;;  %903 = vst.msk [vmem:[#allocation2 + $0x100] sm:$0xff] %vm45_vm1, %v838_v54  ;;  %v807_v61 = vadd.f32 %v554_v59, %v111_v51  ;;  %v839_v62 = vadd.f32 %v682_v60, %v143_v52 }
 0x108   :  { %874 = vst.msk [vmem:[#allocation2 + $0x18] sm:$0xff] %vm45_vm1, %v809_v57  ;;  %906 = vst.msk [vmem:[#allocation2 + $0x118] sm:$0xff] %vm45_vm1, %v841_v58 }
 0x109   :  { %872 = vst.msk [vmem:[#allocation2 + $0x8] sm:$0xff] %vm45_vm1, %v807_v61  ;;  %904 = vst.msk [vmem:[#allocation2 + $0x108] sm:$0xff] %vm45_vm1, %v839_v62 }
 0x10b   :  { %v1831_v4 = vpop.f32.mrb[4].mxu0  ;;  %v1863_v5 = vpop.f32.mrb[4].mxu1 }
 0x10c   :  { %v812_v8 = vadd.f32 %v1831_v4, %v116_v63  ;;  %v844_v9 = vadd.f32 %v1863_v5, %v148_v0  ;;  %v567_v10 = vpop.f32.mrb[5].mxu0  ;;  %v695_v11 = vpop.f32.mrb[5].mxu1 }
 0x10d   :  { %v940_v14 = vld [vmem:[#allocation2 + $0x10] sm:$0xff]  ;;  %v810_v16 = vadd.f32 %v567_v10, %v114_v1  ;;  %v842_v17 = vadd.f32 %v695_v11, %v146_v2  ;;  %v1832_v18 = vpop.f32.mrb[6].mxu0  ;;  %v1864_v19 = vpop.f32.mrb[6].mxu1 }
 0x10e   :  { %v972_v15 = vld [vmem:[#allocation2 + $0x110] sm:$0xff]  ;;  %v1011_v20 = vadd.f32 %v2297_v3, %v940_v14  ;;  %v938_v22 = vld [vmem:[#allocation2] sm:$0xff]  ;;  %877 = vst.msk [vmem:[#allocation2 + $0x30] sm:$0xff] %vm45_vm1, %v812_v8  ;;  %909 = vst.msk [vmem:[#allocation2 + $0x130] sm:$0xff] %vm45_vm1, %v844_v9  ;;  %v813_v24 = vadd.f32 %v1832_v18, %v117_v6  ;;  %v845_v25 = vadd.f32 %v1864_v19, %v149_v7  ;;  %v570_v26 = vpop.f32.mrb[7].mxu0  ;;  %v698_v27 = vpop.f32.mrb[7].mxu1 }
 0x10f   :  { %v1043_v21 = vadd.f32 %v2297_v3, %v972_v15  ;;  %v970_v23 = vld [vmem:[#allocation2 + $0x100] sm:$0xff]  ;;  %v1009_v28 = vadd.f32 %v2297_v3, %v938_v22  ;;  %v941_v30 = vld [vmem:[#allocation2 + $0x18] sm:$0xff]  ;;  %875 = vst.msk [vmem:[#allocation2 + $0x20] sm:$0xff] %vm45_vm1, %v810_v16  ;;  %907 = vst.msk [vmem:[#allocation2 + $0x120] sm:$0xff] %vm45_vm1, %v842_v17  ;;  %v811_v32 = vadd.f32 %v570_v26, %v115_v12 }
 0x110   :  { %v1041_v29 = vadd.f32 %v2297_v3, %v970_v23  ;;  %v973_v31 = vld [vmem:[#allocation2 + $0x118] sm:$0xff]  ;;  %v843_v33 = vadd.f32 %v698_v27, %v147_v13  ;;  %vm1075_vm5 = vcmp.ge.f32.partialorder %v1011_v20, 0.0  ;;  %v1139_v34 = vmul.f32 0.2, %v1011_v20  ;;  %878 = vst.msk [vmem:[#allocation2 + $0x38] sm:$0xff] %vm45_vm1, %v813_v24  ;;  %910 = vst.msk [vmem:[#allocation2 + $0x138] sm:$0xff] %vm45_vm1, %v845_v25 }
 0x111   :  { %vm1107_vm6 = vcmp.ge.f32.partialorder %v1043_v21, 0.0  ;;  %v1171_v35 = vmul.f32 0.2, %v1043_v21  ;;  %vm1073_vm7 = vcmp.ge.f32.partialorder %v1009_v28, 0.0  ;;  %v1137_v36 = vmul.f32 0.2, %v1009_v28 }
 0x112   :  { %vm1105_vm8 = vcmp.ge.f32.partialorder %v1041_v29, 0.0  ;;  %v1169_v37 = vmul.f32 0.2, %v1041_v29  ;;  %876 = vst.msk [vmem:[#allocation2 + $0x28] sm:$0xff] %vm45_vm1, %v811_v32  ;;  %908 = vst.msk [vmem:[#allocation2 + $0x128] sm:$0xff] %vm45_vm1, %v843_v33  ;;  %v1203_v38 = vsel %vm1075_vm5, %v1011_v20, %v1139_v34  ;;  %v1012_v40 = vadd.f32 %v2297_v3, %v941_v30  ;;  %v939_v42 = vld [vmem:[#allocation2 + $0x8] sm:$0xff] }
 0x113   :  { %v1235_v39 = vsel %vm1107_vm6, %v1043_v21, %v1171_v35  ;;  %v1044_v41 = vadd.f32 %v2297_v3, %v973_v31  ;;  %v971_v43 = vld [vmem:[#allocation2 + $0x108] sm:$0xff]  ;;  %v1725_v44 = vpack.c.bf16 %v1203_v38, %v1203_v38  ;;  %v1201_v46 = vsel %vm1073_vm7, %v1009_v28, %v1137_v36  ;;  %v1835_v49 = vpop.f32.mrb[8].mxu0  ;;  %v2313_v50 = vpop.f32.mrb[8].mxu1  ;;  %v152_v33 = vld [vmem:[#allocation2 + $0x150] sm:$0xff] }
 0x114   :  { %v1757_v45 = vpack.c.bf16 %v1235_v39, %v1235_v39  ;;  %v1233_v47 = vsel %vm1105_vm8, %v1041_v29, %v1169_v37  ;;  %v1723_v51 = vpack.c.bf16 %v1201_v46, %v1201_v46  ;;  %vm1076_vm9 = vcmp.ge.f32.partialorder %v1012_v40, 0.0  ;;  %v2315_v54 = vpop.f32.mrb[9].mxu0  ;;  %v2317_v55 = vpop.f32.mrb[9].mxu1 }
 0x115   :  { %v1755_v52 = vpack.c.bf16 %v1233_v47, %v1233_v47  ;;  %v1140_v53 = vmul.f32 0.2, %v1012_v40  ;;  %1524 = vst.msk [vmem:[%s2799_s3 + $0x8] sm:$0xf] %vm1521_vm4, %v1725_v44  ;;  %vm1108_vm10 = vcmp.ge.f32.partialorder %v1044_v41, 0.0  ;;  %v1010_v57 = vadd.f32 %v2297_v3, %v939_v42  ;;  %v944_v59 = vld [vmem:[#allocation2 + $0x30] sm:$0xff] }
 0x116   :  { %1556 = vst.msk [vmem:[%s2799_s3 + $0x88] sm:$0xf] %vm1521_vm4, %v1757_v45  ;;  %v1172_v56 = vmul.f32 0.2, %v1044_v41  ;;  %v1042_v58 = vadd.f32 %v2297_v3, %v971_v43  ;;  %v976_v60 = vld [vmem:[#allocation2 + $0x130] sm:$0xff]  ;;  %v2329_v61 = vpop.f32.mrb[10].mxu0  ;;  %v1015_v63 = vadd.f32 %v2297_v3, %v944_v59  ;;  %v816_v1 = vadd.f32 %v1835_v49, %v120_v48 }
 0x117   :  { %1522 = vst.msk [vmem:[%s2799_s3] sm:$0xf] %vm1521_vm4, %v1723_v51  ;;  %1554 = vst.msk [vmem:[%s2799_s3 + $0x80] sm:$0xf] %vm1521_vm4, %v1755_v52  ;;  %v1204_v62 = vsel %vm1076_vm9, %v1012_v40, %v1140_v53  ;;  %v1047_v0 = vadd.f32 %v2297_v3, %v976_v60  ;;  %v2341_v2 = vpop.f32.mrb[10].mxu1  ;;  %v2343_v4 = vpop.f32.mrb[11].mxu0  ;;  %v848_v49 = vadd.f32 %v2313_v50, %v152_v33 }
 0x118   :  { %v1726_v5 = vpack.c.bf16 %v1204_v62, %v1204_v62  ;;  %v1236_v6 = vsel %vm1108_vm10, %v1044_v41, %v1172_v56  ;;  %vm1074_vm11 = vcmp.ge.f32.partialorder %v1010_v57, 0.0  ;;  %v1138_v7 = vmul.f32 0.2, %v1010_v57  ;;  %v942_v8 = vld [vmem:[#allocation2 + $0x20] sm:$0xff]  ;;  %v2346_v10 = vpop.f32.mrb[11].mxu1  ;;  %v945_v13 = vld [vmem:[#allocation2 + $0x38] sm:$0xff] }
 0x119   :  { %v974_v9 = vld [vmem:[#allocation2 + $0x120] sm:$0xff]  ;;  %v1758_v11 = vpack.c.bf16 %v1236_v6, %v1236_v6  ;;  %vm1106_vm12 = vcmp.ge.f32.partialorder %v1042_v58, 0.0  ;;  %v1170_v12 = vmul.f32 0.2, %v1042_v58  ;;  %vm1079_vm13 = vcmp.ge.f32.partialorder %v1015_v63, 0.0  ;;  %881 = vst.msk [vmem:[#allocation2 + $0x50] sm:$0xff] %vm45_vm1, %v816_v1 }
 0x11a   :  { %1525 = vst.msk [vmem:[%s2799_s3 + $0xc] sm:$0xf] %vm1521_vm4, %v1726_v5  ;;  %v1202_v14 = vsel %vm1074_vm11, %v1010_v57, %v1138_v7  ;;  %v1143_v15 = vmul.f32 0.2, %v1015_v63  ;;  %vm1111_vm14 = vcmp.ge.f32.partialorder %v1047_v0, 0.0  ;;  %v1013_v19 = vadd.f32 %v2297_v3, %v942_v8  ;;  %v977_v25 = vld [vmem:[#allocation2 + $0x138] sm:$0xff] }
 0x11b   :  { %v1175_v16 = vmul.f32 0.2, %v1047_v0  ;;  %1557 = vst.msk [vmem:[%s2799_s3 + $0x8c] sm:$0xf] %vm1521_vm4, %v1758_v11  ;;  %v1724_v17 = vpack.c.bf16 %v1202_v14, %v1202_v14  ;;  %v1234_v18 = vsel %vm1106_vm12, %v1042_v58, %v1170_v12  ;;  %v1045_v20 = vadd.f32 %v2297_v3, %v974_v9  ;;  %v943_v26 = vld [vmem:[#allocation2 + $0x28] sm:$0xff]  ;;  %v2360_v28 = vpop.f32.mrb[12].mxu0 }
 0x11c   :  { %v1756_v21 = vpack.c.bf16 %v1234_v18, %v1234_v18  ;;  %v1207_v22 = vsel %vm1079_vm13, %v1015_v63, %v1143_v15  ;;  %v1016_v24 = vadd.f32 %v2297_v3, %v945_v13  ;;  %v975_v27 = vld [vmem:[#allocation2 + $0x128] sm:$0xff]  ;;  %v2362_v29 = vpop.f32.mrb[12].mxu1  ;;  %vm1077_vm15 = vcmp.ge.f32.partialorder %v1013_v19, 0.0  ;;  %v2368_v34 = vpop.f32.mrb[13].mxu0  ;;  %v118_v42 = vld [vmem:[#allocation2 + $0x40] sm:$0xff]  ;;  %v121_v52 = vld [vmem:[#allocation2 + $0x58] sm:$0xff] }
 0x11d   :  { %v1239_v23 = vsel %vm1111_vm14, %v1047_v0, %v1175_v16  ;;  %1523 = vst.msk [vmem:[%s2799_s3 + $0x4] sm:$0xf] %vm1521_vm4, %v1724_v17  ;;  %v1729_v30 = vpack.c.bf16 %v1207_v22, %v1207_v22  ;;  %v1141_v32 = vmul.f32 0.2, %v1013_v19  ;;  %v2370_v35 = vpop.f32.mrb[13].mxu1  ;;  %vm1109_vm0 = vcmp.ge.f32.partialorder %v1045_v20, 0.0 }
 0x11e   :  { %v1761_v31 = vpack.c.bf16 %v1239_v23, %v1239_v23  ;;  %1555 = vst.msk [vmem:[%s2799_s3 + $0x84] sm:$0xf] %vm1521_vm4, %v1756_v21  ;;  %v1173_v36 = vmul.f32 0.2, %v1045_v20  ;;  %vm1080_vm2 = vcmp.ge.f32.partialorder %v1016_v24, 0.0  ;;  %v1048_v39 = vadd.f32 %v2297_v3, %v977_v25  ;;  %v2387_v43 = vpop.f32.mrb[14].mxu0 }
 0x11f   :  { %v1144_v37 = vmul.f32 0.2, %v1016_v24  ;;  %1528 = vst.msk [vmem:[%s2799_s3 + $0x18] sm:$0xf] %vm1521_vm4, %v1729_v30  ;;  %v1205_v38 = vsel %vm1077_vm15, %v1013_v19, %v1141_v32  ;;  %v1014_v40 = vadd.f32 %v2297_v3, %v943_v26  ;;  %v1046_v41 = vadd.f32 %v2297_v3, %v975_v27  ;;  %v2389_v44 = vpop.f32.mrb[14].mxu1  ;;  %v150_v51 = vld [vmem:[#allocation2 + $0x140] sm:$0xff] }
 0x120   :  { %1560 = vst.msk [vmem:[%s2799_s3 + $0x98] sm:$0xf] %vm1521_vm4, %v1761_v31  ;;  %v1727_v45 = vpack.c.bf16 %v1205_v38, %v1205_v38  ;;  %v1237_v46 = vsel %vm1109_vm0, %v1045_v20, %v1173_v36  ;;  %v948_v48 = vld [vmem:[#allocation2 + $0x50] sm:$0xff]  ;;  %v2392_v53 = vpop.f32.mrb[15].mxu0  ;;  %v2394_v56 = vpop.f32.mrb[15].mxu1  ;;  %vm1112_vm3 = vcmp.ge.f32.partialorder %v1048_v39, 0.0  ;;  %v814_v7 = vadd.f32 %v2315_v54, %v118_v42 }
 0x121   :  { %v1208_v47 = vsel %vm1080_vm2, %v1016_v24, %v1144_v37  ;;  %v1759_v57 = vpack.c.bf16 %v1237_v46, %v1237_v46  ;;  %v1176_v59 = vmul.f32 0.2, %v1048_v39  ;;  %v153_v60 = vld [vmem:[#allocation2 + $0x158] sm:$0xff]  ;;  %v119_v62 = vld [vmem:[#allocation2 + $0x48] sm:$0xff]  ;;  %v124_v0 = vld [vmem:[#allocation2 + $0x70] sm:$0xff]  ;;  %vm1078_vm5 = vcmp.ge.f32.partialorder %v1014_v40, 0.0 }
 0x122   :  { %v1730_v58 = vpack.c.bf16 %v1208_v47, %v1208_v47  ;;  %v151_v63 = vld [vmem:[#allocation2 + $0x148] sm:$0xff]  ;;  %1526 = vst.msk [vmem:[%s2799_s3 + $0x10] sm:$0xf] %vm1521_vm4, %v1727_v45  ;;  %v1142_v50 = vmul.f32 0.2, %v1014_v40  ;;  %vm1110_vm6 = vcmp.ge.f32.partialorder %v1046_v41, 0.0  ;;  %v1019_v6 = vadd.f32 %v2297_v3, %v948_v48 }
 0x123   :  { %v1174_v1 = vmul.f32 0.2, %v1046_v41  ;;  %913 = vst.msk [vmem:[#allocation2 + $0x150] sm:$0xff] %vm45_vm1, %v848_v49  ;;  %v1240_v5 = vsel %vm1112_vm3, %v1048_v39, %v1176_v59  ;;  %v846_v8 = vadd.f32 %v2317_v55, %v150_v51  ;;  %v156_v9 = vld [vmem:[#allocation2 + $0x170] sm:$0xff]  ;;  %v122_v11 = vld [vmem:[#allocation2 + $0x60] sm:$0xff]  ;;  %v817_v16 = vadd.f32 %v2329_v61, %v121_v52  ;;  %v125_v17 = vld [vmem:[#allocation2 + $0x78] sm:$0xff] }
 0x124   :  { %1558 = vst.msk [vmem:[%s2799_s3 + $0x90] sm:$0xf] %vm1521_vm4, %v1759_v57  ;;  %1529 = vst.msk [vmem:[%s2799_s3 + $0x1c] sm:$0xf] %vm1521_vm4, %v1730_v58  ;;  %v154_v12 = vld [vmem:[#allocation2 + $0x160] sm:$0xff]  ;;  %v1762_v13 = vpack.c.bf16 %v1240_v5, %v1240_v5  ;;  %v1206_v14 = vsel %vm1078_vm5, %v1014_v40, %v1142_v50  ;;  %v157_v18 = vld [vmem:[#allocation2 + $0x178] sm:$0xff]  ;;  %v849_v61 = vadd.f32 %v2341_v2, %v153_v60 }
 0x125   :  { %v1238_v15 = vsel %vm1110_vm6, %v1046_v41, %v1174_v1  ;;  %v123_v19 = vld [vmem:[#allocation2 + $0x68] sm:$0xff]  ;;  %v1843_v20 = vpop.f32.mrb[16].mxu0  ;;  %v1875_v21 = vpop.f32.mrb[16].mxu1  ;;  %v1728_v22 = vpack.c.bf16 %v1206_v14, %v1206_v14  ;;  %vm1083_vm7 = vcmp.ge.f32.partialorder %v1019_v6, 0.0  ;;  %v1147_v24 = vmul.f32 0.2, %v1019_v6 }
 0x126   :  { %v1760_v23 = vpack.c.bf16 %v1238_v15, %v1238_v15  ;;  %879 = vst.msk [vmem:[#allocation2 + $0x40] sm:$0xff] %vm45_vm1, %v814_v7  ;;  %911 = vst.msk [vmem:[#allocation2 + $0x140] sm:$0xff] %vm45_vm1, %v846_v8  ;;  %v155_v54 = vld [vmem:[#allocation2 + $0x168] sm:$0xff]  ;;  %v615_v55 = vpop.f32.mrb[17].mxu0  ;;  %v743_v25 = vpop.f32.mrb[17].mxu1  ;;  %v815_v26 = vadd.f32 %v2343_v4, %v119_v62  ;;  %v847_v27 = vadd.f32 %v2346_v10, %v151_v63  ;;  %v128_v31 = vld [vmem:[#allocation2 + $0x90] sm:$0xff] }
 0x127   :  { %1561 = vst.msk [vmem:[%s2799_s3 + $0x9c] sm:$0xf] %vm1521_vm4, %v1762_v13  ;;  %v820_v30 = vadd.f32 %v2360_v28, %v124_v0  ;;  %v160_v32 = vld [vmem:[#allocation2 + $0x190] sm:$0xff]  ;;  %v126_v33 = vld [vmem:[#allocation2 + $0x80] sm:$0xff]  ;;  %v1844_v36 = vpop.f32.mrb[18].mxu0  ;;  %v1876_v37 = vpop.f32.mrb[18].mxu1  ;;  %v1211_v2 = vsel %vm1083_vm7, %v1019_v6, %v1147_v24  ;;  %v852_v4 = vadd.f32 %v2362_v29, %v156_v9  ;;  %v818_v10 = vadd.f32 %v2368_v34, %v122_v11 }
 0x128   :  { %882 = vst.msk [vmem:[#allocation2 + $0x58] sm:$0xff] %vm45_vm1, %v817_v16  ;;  %v850_v28 = vadd.f32 %v2370_v35, %v154_v12  ;;  %v158_v38 = vld [vmem:[#allocation2 + $0x180] sm:$0xff]  ;;  %v129_v39 = vld [vmem:[#allocation2 + $0x98] sm:$0xff]  ;;  %v618_v41 = vpop.f32.mrb[19].mxu0  ;;  %v746_v42 = vpop.f32.mrb[19].mxu1  ;;  %v1733_v45 = vpack.c.bf16 %v1211_v2, %v1211_v2  ;;  %914 = vst.msk [vmem:[#allocation2 + $0x158] sm:$0xff] %vm45_vm1, %v849_v61  ;;  %v821_v29 = vadd.f32 %v2387_v43, %v125_v17 }
 0x129   :  { %1527 = vst.msk [vmem:[%s2799_s3 + $0x14] sm:$0xf] %vm1521_vm4, %v1728_v22  ;;  %1559 = vst.msk [vmem:[%s2799_s3 + $0x94] sm:$0xf] %vm1521_vm4, %v1760_v23  ;;  %v161_v40 = vld [vmem:[#allocation2 + $0x198] sm:$0xff]  ;;  %v853_v34 = vadd.f32 %v2389_v44, %v157_v18  ;;  %v819_v35 = vadd.f32 %v2392_v53, %v123_v19  ;;  %v127_v46 = vld [vmem:[#allocation2 + $0x88] sm:$0xff]  ;;  %v851_v49 = vadd.f32 %v2394_v56, %v155_v54 }
 0x12a   :  { %880 = vst.msk [vmem:[#allocation2 + $0x48] sm:$0xff] %vm45_vm1, %v815_v26  ;;  %912 = vst.msk [vmem:[#allocation2 + $0x148] sm:$0xff] %vm45_vm1, %v847_v27  ;;  %v159_v47 = vld [vmem:[#allocation2 + $0x188] sm:$0xff]  ;;  %v980_v48 = vld [vmem:[#allocation2 + $0x150] sm:$0xff]  ;;  %v824_v51 = vadd.f32 %v1843_v20, %v128_v31  ;;  %v856_v52 = vadd.f32 %v1875_v21, %v160_v32  ;;  %v822_v57 = vadd.f32 %v615_v55, %v126_v33 }
 0x12b   :  { %885 = vst.msk [vmem:[#allocation2 + $0x70] sm:$0xff] %vm45_vm1, %v820_v30  ;;  %917 = vst.msk [vmem:[#allocation2 + $0x170] sm:$0xff] %vm45_vm1, %v852_v4  ;;  %v1051_v43 = vadd.f32 %v2297_v3, %v980_v48  ;;  %v854_v44 = vadd.f32 %v743_v25, %v158_v38  ;;  %v825_v53 = vadd.f32 %v1844_v36, %v129_v39  ;;  %v132_v56 = vld [vmem:[#allocation2 + $0xb0] sm:$0xff]  ;;  %v130_v63 = vld [vmem:[#allocation2 + $0xa0] sm:$0xff]  ;;  %v1847_v5 = vpop.f32.mrb[20].mxu0  ;;  %v1879_v11 = vpop.f32.mrb[20].mxu1 }
 0x12c   :  { %883 = vst.msk [vmem:[#allocation2 + $0x60] sm:$0xff] %vm45_vm1, %v818_v10  ;;  %915 = vst.msk [vmem:[#allocation2 + $0x160] sm:$0xff] %vm45_vm1, %v850_v28  ;;  %v857_v58 = vadd.f32 %v1876_v37, %v161_v40  ;;  %v823_v59 = vadd.f32 %v618_v41, %v127_v46  ;;  %v855_v60 = vadd.f32 %v746_v42, %v159_v47  ;;  %v164_v62 = vld [vmem:[#allocation2 + $0x1b0] sm:$0xff]  ;;  %v631_v12 = vpop.f32.mrb[21].mxu0  ;;  %v162_v17 = vld [vmem:[#allocation2 + $0x1a0] sm:$0xff]  ;;  %v759_v18 = vpop.f32.mrb[21].mxu1 }
 0x12d   :  { %1532 = vst.msk [vmem:[%s2799_s3 + $0x28] sm:$0xf] %vm1521_vm4, %v1733_v45  ;;  %vm1115_vm8 = vcmp.ge.f32.partialorder %v1051_v43, 0.0  ;;  %v1179_v0 = vmul.f32 0.2, %v1051_v43  ;;  %v946_v50 = vld [vmem:[#allocation2 + $0x40] sm:$0xff]  ;;  %v828_v9 = vadd.f32 %v1847_v5, %v132_v56  ;;  %v860_v15 = vadd.f32 %v1879_v11, %v164_v62 }
 0x12e   :  { %886 = vst.msk [vmem:[#allocation2 + $0x78] sm:$0xff] %vm45_vm1, %v821_v29  ;;  %918 = vst.msk [vmem:[#allocation2 + $0x178] sm:$0xff] %vm45_vm1, %v853_v34  ;;  %v978_v1 = vld [vmem:[#allocation2 + $0x140] sm:$0xff]  ;;  %v1017_v6 = vadd.f32 %v2297_v3, %v946_v50  ;;  %v826_v16 = vadd.f32 %v631_v12, %v130_v63  ;;  %v2468_v19 = vpop.f32.mrb[22].mxu0  ;;  %v858_v31 = vadd.f32 %v759_v18, %v162_v17  ;;  %v2480_v32 = vpop.f32.mrb[22].mxu1 }
 0x12f   :  { %884 = vst.msk [vmem:[#allocation2 + $0x68] sm:$0xff] %vm45_vm1, %v819_v35  ;;  %916 = vst.msk [vmem:[#allocation2 + $0x168] sm:$0xff] %vm45_vm1, %v851_v49  ;;  %v1049_v7 = vadd.f32 %v2297_v3, %v978_v1  ;;  %v949_v8 = vld [vmem:[#allocation2 + $0x58] sm:$0xff]  ;;  %v1243_v13 = vsel %vm1115_vm8, %v1051_v43, %v1179_v0  ;;  %v2482_v33 = vpop.f32.mrb[23].mxu0  ;;  %v2486_v38 = vpop.f32.mrb[23].mxu1 }
 0x130   :  { %889 = vst.msk [vmem:[#allocation2 + $0x90] sm:$0xff] %vm45_vm1, %v824_v51  ;;  %921 = vst.msk [vmem:[#allocation2 + $0x190] sm:$0xff] %vm45_vm1, %v856_v52  ;;  %v1020_v14 = vadd.f32 %v2297_v3, %v949_v8  ;;  %v1765_v20 = vpack.c.bf16 %v1243_v13, %v1243_v13  ;;  %vm1081_vm9 = vcmp.ge.f32.partialorder %v1017_v6, 0.0  ;;  %v1145_v21 = vmul.f32 0.2, %v1017_v6  ;;  %v981_v22 = vld [vmem:[#allocation2 + $0x158] sm:$0xff] }
 0x131   :  { %887 = vst.msk [vmem:[#allocation2 + $0x80] sm:$0xff] %vm45_vm1, %v822_v57  ;;  %919 = vst.msk [vmem:[#allocation2 + $0x180] sm:$0xff] %vm45_vm1, %v854_v44  ;;  %vm1113_vm10 = vcmp.ge.f32.partialorder %v1049_v7, 0.0  ;;  %v947_v23 = vld [vmem:[#allocation2 + $0x48] sm:$0xff]  ;;  %v1177_v24 = vmul.f32 0.2, %v1049_v7  ;;  %v1052_v55 = vadd.f32 %v2297_v3, %v981_v22 }
 0x132   :  { %890 = vst.msk [vmem:[#allocation2 + $0x98] sm:$0xff] %vm45_vm1, %v825_v53  ;;  %922 = vst.msk [vmem:[#allocation2 + $0x198] sm:$0xff] %vm45_vm1, %v857_v58  ;;  %vm1084_vm11 = vcmp.ge.f32.partialorder %v1020_v14, 0.0  ;;  %v1148_v54 = vmul.f32 0.2, %v1020_v14  ;;  %v979_v25 = vld [vmem:[#allocation2 + $0x148] sm:$0xff]  ;;  %v1209_v61 = vsel %vm1081_vm9, %v1017_v6, %v1145_v21  ;;  %v1018_v26 = vadd.f32 %v2297_v3, %v947_v23 }
 0x133   :  { %888 = vst.msk [vmem:[#allocation2 + $0x88] sm:$0xff] %vm45_vm1, %v823_v59  ;;  %920 = vst.msk [vmem:[#allocation2 + $0x188] sm:$0xff] %vm45_vm1, %v855_v60  ;;  %v1050_v27 = vadd.f32 %v2297_v3, %v979_v25  ;;  %v952_v30 = vld [vmem:[#allocation2 + $0x70] sm:$0xff]  ;;  %v1731_v36 = vpack.c.bf16 %v1209_v61, %v1209_v61  ;;  %v1241_v37 = vsel %vm1113_vm10, %v1049_v7, %v1177_v24  ;;  %vm1116_vm12 = vcmp.ge.f32.partialorder %v1052_v55, 0.0  ;;  %v950_v10 = vld [vmem:[#allocation2 + $0x60] sm:$0xff]  ;;  %v2506_v48 = vpop.f32.mrb[24].mxu0 }
 0x134   :  { %893 = vst.msk [vmem:[#allocation2 + $0xb0] sm:$0xff] %vm45_vm1, %v828_v9  ;;  %925 = vst.msk [vmem:[#allocation2 + $0x1b0] sm:$0xff] %vm45_vm1, %v860_v15  ;;  %v1212_v2 = vsel %vm1084_vm11, %v1020_v14, %v1148_v54  ;;  %v984_v4 = vld [vmem:[#allocation2 + $0x170] sm:$0xff]  ;;  %v982_v28 = vld [vmem:[#allocation2 + $0x160] sm:$0xff]  ;;  %v1763_v39 = vpack.c.bf16 %v1241_v37, %v1241_v37  ;;  %v1180_v41 = vmul.f32 0.2, %v1052_v55  ;;  %v1023_v29 = vadd.f32 %v2297_v3, %v952_v30 }
 0x135   :  { %891 = vst.msk [vmem:[#allocation2 + $0xa0] sm:$0xff] %vm45_vm1, %v826_v16  ;;  %v1734_v40 = vpack.c.bf16 %v1212_v2, %v1212_v2  ;;  %vm1082_vm13 = vcmp.ge.f32.partialorder %v1018_v26, 0.0  ;;  %923 = vst.msk [vmem:[#allocation2 + $0x1a0] sm:$0xff] %vm45_vm1, %v858_v31  ;;  %v1146_v42 = vmul.f32 0.2, %v1018_v26  ;;  %vm1114_vm14 = vcmp.ge.f32.partialorder %v1050_v27, 0.0 }
 0x136   :  { %1564 = vst.msk [vmem:[%s2799_s3 + $0xa8] sm:$0xf] %vm1521_vm4, %v1765_v20  ;;  %1530 = vst.msk [vmem:[%s2799_s3 + $0x20] sm:$0xf] %vm1521_vm4, %v1731_v36  ;;  %v1178_v45 = vmul.f32 0.2, %v1050_v27  ;;  %v1244_v34 = vsel %vm1116_vm12, %v1052_v55, %v1180_v41  ;;  %v1055_v35 = vadd.f32 %v2297_v3, %v984_v4  ;;  %v1021_v46 = vadd.f32 %v2297_v3, %v950_v10 }
 0x137   :  { %1562 = vst.msk [vmem:[%s2799_s3 + $0xa0] sm:$0xf] %vm1521_vm4, %v1763_v39  ;;  %1533 = vst.msk [vmem:[%s2799_s3 + $0x2c] sm:$0xf] %vm1521_vm4, %v1734_v40  ;;  %v1053_v47 = vadd.f32 %v2297_v3, %v982_v28  ;;  %v2508_v49 = vpop.f32.mrb[24].mxu1  ;;  %v1766_v51 = vpack.c.bf16 %v1244_v34, %v1244_v34  ;;  %v1210_v52 = vsel %vm1082_vm13, %v1018_v26, %v1146_v42  ;;  %vm1087_vm15 = vcmp.ge.f32.partialorder %v1023_v29, 0.0 }
 0x138   :  { %v1242_v57 = vsel %vm1114_vm14, %v1050_v27, %v1178_v45  ;;  %v953_v43 = vld [vmem:[#allocation2 + $0x78] sm:$0xff]  ;;  %v2511_v53 = vpop.f32.mrb[25].mxu0  ;;  %v2513_v58 = vpop.f32.mrb[25].mxu1  ;;  %v1732_v56 = vpack.c.bf16 %v1210_v52, %v1210_v52  ;;  %v1151_v60 = vmul.f32 0.2, %v1023_v29  ;;  %vm1119_vm0 = vcmp.ge.f32.partialorder %v1055_v35, 0.0 }
 0x139   :  { %v985_v44 = vld [vmem:[#allocation2 + $0x178] sm:$0xff]  ;;  %v1764_v59 = vpack.c.bf16 %v1242_v57, %v1242_v57  ;;  %v951_v62 = vld [vmem:[#allocation2 + $0x68] sm:$0xff]  ;;  %1565 = vst.msk [vmem:[%s2799_s3 + $0xac] sm:$0xf] %vm1521_vm4, %v1766_v51  ;;  %v1183_v63 = vmul.f32 0.2, %v1055_v35  ;;  %v1024_v5 = vadd.f32 %v2297_v3, %v953_v43 }
 0x13a   :  { %vm1085_vm2 = vcmp.ge.f32.partialorder %v1021_v46, 0.0  ;;  %v1149_v0 = vmul.f32 0.2, %v1021_v46  ;;  %vm1117_vm3 = vcmp.ge.f32.partialorder %v1053_v47, 0.0  ;;  %1531 = vst.msk [vmem:[%s2799_s3 + $0x24] sm:$0xf] %vm1521_vm4, %v1732_v56  ;;  %v1215_v50 = vsel %vm1087_vm15, %v1023_v29, %v1151_v60 }
 0x13b   :  { %1563 = vst.msk [vmem:[%s2799_s3 + $0xa4] sm:$0xf] %vm1521_vm4, %v1764_v59  ;;  %v1181_v1 = vmul.f32 0.2, %v1053_v47  ;;  %v1056_v6 = vadd.f32 %v2297_v3, %v985_v44  ;;  %v2530_v7 = vpop.f32.mrb[26].mxu0  ;;  %v2532_v8 = vpop.f32.mrb[26].mxu1  ;;  %v1737_v9 = vpack.c.bf16 %v1215_v50, %v1215_v50  ;;  %v1247_v11 = vsel %vm1119_vm0, %v1055_v35, %v1183_v63 }
 0x13c   :  { %v1213_v12 = vsel %vm1085_vm2, %v1021_v46, %v1149_v0  ;;  %v1022_v13 = vadd.f32 %v2297_v3, %v951_v62  ;;  %v983_v14 = vld [vmem:[#allocation2 + $0x168] sm:$0xff]  ;;  %v956_v15 = vld [vmem:[#allocation2 + $0x90] sm:$0xff]  ;;  %v2536_v16 = vpop.f32.mrb[27].mxu0  ;;  %v2538_v17 = vpop.f32.mrb[27].mxu1  ;;  %v1769_v18 = vpack.c.bf16 %v1247_v11, %v1247_v11  ;;  %vm1088_vm5 = vcmp.ge.f32.partialorder %v1024_v5, 0.0  ;;  %v954_v23 = vld [vmem:[#allocation2 + $0x80] sm:$0xff] }
 0x13d   :  { %v1735_v20 = vpack.c.bf16 %v1213_v12, %v1213_v12  ;;  %v1245_v21 = vsel %vm1117_vm3, %v1053_v47, %v1181_v1  ;;  %v988_v22 = vld [vmem:[#allocation2 + $0x190] sm:$0xff]  ;;  %1536 = vst.msk [vmem:[%s2799_s3 + $0x38] sm:$0xf] %vm1521_vm4, %v1737_v9  ;;  %v1152_v54 = vmul.f32 0.2, %v1024_v5  ;;  %vm1120_vm6 = vcmp.ge.f32.partialorder %v1056_v6, 0.0 }
 0x13e   :  { %v1767_v24 = vpack.c.bf16 %v1245_v21, %v1245_v21  ;;  %v1184_v55 = vmul.f32 0.2, %v1056_v6  ;;  %v2545_v25 = vpop.f32.mrb[28].mxu0  ;;  %1568 = vst.msk [vmem:[%s2799_s3 + $0xb8] sm:$0xf] %vm1521_vm4, %v1769_v18  ;;  %vm1086_vm7 = vcmp.ge.f32.partialorder %v1022_v13, 0.0  ;;  %v1054_v26 = vadd.f32 %v2297_v3, %v983_v14 }
 0x13f   :  { %1534 = vst.msk [vmem:[%s2799_s3 + $0x30] sm:$0xf] %vm1521_vm4, %v1735_v20  ;;  %v1150_v61 = vmul.f32 0.2, %v1022_v13  ;;  %v1027_v27 = vadd.f32 %v2297_v3, %v956_v15  ;;  %v2557_v30 = vpop.f32.mrb[28].mxu1  ;;  %v2559_v31 = vpop.f32.mrb[29].mxu0  ;;  %v1216_v36 = vsel %vm1088_vm5, %v1024_v5, %v1152_v54  ;;  %v1059_v2 = vadd.f32 %v2297_v3, %v988_v22 }
 0x140   :  { %1566 = vst.msk [vmem:[%s2799_s3 + $0xb0] sm:$0xf] %vm1521_vm4, %v1767_v24  ;;  %v1248_v37 = vsel %vm1120_vm6, %v1056_v6, %v1184_v55  ;;  %v1025_v4 = vadd.f32 %v2297_v3, %v954_v23  ;;  %v2568_v10 = vpop.f32.mrb[29].mxu1  ;;  %v2570_v28 = vpop.f32.mrb[30].mxu0  ;;  %v1738_v39 = vpack.c.bf16 %v1216_v36, %v1216_v36  ;;  %vm1118_vm8 = vcmp.ge.f32.partialorder %v1054_v26, 0.0  ;;  %v986_v42 = vld [vmem:[#allocation2 + $0x180] sm:$0xff] }
 0x141   :  { %v1770_v40 = vpack.c.bf16 %v1248_v37, %v1248_v37  ;;  %v1214_v41 = vsel %vm1086_vm7, %v1022_v13, %v1150_v61  ;;  %v957_v45 = vld [vmem:[#allocation2 + $0x98] sm:$0xff]  ;;  %v2572_v29 = vpop.f32.mrb[30].mxu1  ;;  %v2574_v34 = vpop.f32.mrb[31].mxu0  ;;  %v1182_v46 = vmul.f32 0.2, %v1054_v26  ;;  %vm1091_vm9 = vcmp.ge.f32.partialorder %v1027_v27, 0.0 }
 0x142   :  { %v1736_v35 = vpack.c.bf16 %v1214_v41, %v1214_v41  ;;  %v1155_v47 = vmul.f32 0.2, %v1027_v27  ;;  %v2576_v51 = vpop.f32.mrb[31].mxu1  ;;  %1537 = vst.msk [vmem:[%s2799_s3 + $0x3c] sm:$0xf] %vm1521_vm4, %v1738_v39  ;;  %vm1123_vm10 = vcmp.ge.f32.partialorder %v1059_v2, 0.0  ;;  %v1057_v56 = vadd.f32 %v2297_v3, %v986_v42 }
 0x143   :  { %1569 = vst.msk [vmem:[%s2799_s3 + $0xbc] sm:$0xf] %vm1521_vm4, %v1770_v40  ;;  %v1187_v52 = vmul.f32 0.2, %v1059_v2  ;;  %vm1089_vm11 = vcmp.ge.f32.partialorder %v1025_v4, 0.0  ;;  %v1246_v43 = vsel %vm1118_vm8, %v1054_v26, %v1182_v46  ;;  %v1028_v59 = vadd.f32 %v2297_v3, %v957_v45  ;;  %v989_v60 = vld [vmem:[#allocation2 + $0x198] sm:$0xff] }
 0x144   :  { %v1153_v57 = vmul.f32 0.2, %v1025_v4  ;;  %1535 = vst.msk [vmem:[%s2799_s3 + $0x34] sm:$0xf] %vm1521_vm4, %v1736_v35  ;;  %v1219_v44 = vsel %vm1091_vm9, %v1027_v27, %v1155_v47  ;;  %v955_v62 = vld [vmem:[#allocation2 + $0x88] sm:$0xff]  ;;  %v1768_v63 = vpack.c.bf16 %v1246_v43, %v1246_v43  ;;  %v960_v6 = vld [vmem:[#allocation2 + $0xb0] sm:$0xff]  ;;  %v1060_v15 = vadd.f32 %v2297_v3, %v989_v60 }
 0x145   :  { %v1741_v0 = vpack.c.bf16 %v1219_v44, %v1219_v44  ;;  %v1251_v50 = vsel %vm1123_vm10, %v1059_v2, %v1187_v52  ;;  %v987_v5 = vld [vmem:[#allocation2 + $0x188] sm:$0xff]  ;;  %v992_v9 = vld [vmem:[#allocation2 + $0x1b0] sm:$0xff]  ;;  %vm1121_vm12 = vcmp.ge.f32.partialorder %v1057_v56, 0.0  ;;  %v1185_v13 = vmul.f32 0.2, %v1057_v56  ;;  %v958_v27 = vld [vmem:[#allocation2 + $0xa0] sm:$0xff] }
 0x146   :  { %v1217_v1 = vsel %vm1089_vm11, %v1025_v4, %v1153_v57  ;;  %v1773_v11 = vpack.c.bf16 %v1251_v50, %v1251_v50  ;;  %1567 = vst.msk [vmem:[%s2799_s3 + $0xb4] sm:$0xf] %vm1521_vm4, %v1768_v63  ;;  %vm1092_vm13 = vcmp.ge.f32.partialorder %v1028_v59, 0.0  ;;  %v1156_v14 = vmul.f32 0.2, %v1028_v59  ;;  %v990_v4 = vld [vmem:[#allocation2 + $0x1a0] sm:$0xff] }
 0x147   :  { %v1739_v12 = vpack.c.bf16 %v1217_v1, %v1217_v1  ;;  %1540 = vst.msk [vmem:[%s2799_s3 + $0x48] sm:$0xf] %vm1521_vm4, %v1741_v0  ;;  %v1026_v18 = vadd.f32 %v2297_v3, %v955_v62  ;;  %v1249_v20 = vsel %vm1121_vm12, %v1057_v56, %v1185_v13  ;;  %v1058_v21 = vadd.f32 %v2297_v3, %v987_v5  ;;  %v133_v42 = vld [vmem:[#allocation2 + $0xb8] sm:$0xff]  ;;  %v131_v57 = vld [vmem:[#allocation2 + $0xa8] sm:$0xff]  ;;  %v136_v62 = vld [vmem:[#allocation2 + $0xd0] sm:$0xff] }
 0x148   :  { %1572 = vst.msk [vmem:[%s2799_s3 + $0xc8] sm:$0xf] %vm1521_vm4, %v1773_v11  ;;  %v1031_v22 = vadd.f32 %v2297_v3, %v960_v6  ;;  %v1063_v23 = vadd.f32 %v2297_v3, %v992_v9  ;;  %v1771_v24 = vpack.c.bf16 %v1249_v20, %v1249_v20  ;;  %v1220_v54 = vsel %vm1092_vm13, %v1028_v59, %v1156_v14  ;;  %v165_v52 = vld [vmem:[#allocation2 + $0x1b8] sm:$0xff]  ;;  %v163_v43 = vld [vmem:[#allocation2 + $0x1a8] sm:$0xff]  ;;  %v168_v63 = vld [vmem:[#allocation2 + $0x1d0] sm:$0xff] }
 0x149   :  { %1538 = vst.msk [vmem:[%s2799_s3 + $0x40] sm:$0xf] %vm1521_vm4, %v1739_v12  ;;  %vm1124_vm14 = vcmp.ge.f32.partialorder %v1060_v15, 0.0  ;;  %v1188_v55 = vmul.f32 0.2, %v1060_v15  ;;  %v1742_v61 = vpack.c.bf16 %v1220_v54, %v1220_v54  ;;  %vm1090_vm15 = vcmp.ge.f32.partialorder %v1026_v18, 0.0 }
 0x14a   :  { %v1154_v26 = vmul.f32 0.2, %v1026_v18  ;;  %vm1122_vm0 = vcmp.ge.f32.partialorder %v1058_v21, 0.0  ;;  %1570 = vst.msk [vmem:[%s2799_s3 + $0xc0] sm:$0xf] %vm1521_vm4, %v1771_v24  ;;  %vm1095_vm2 = vcmp.ge.f32.partialorder %v1031_v22, 0.0  ;;  %v1029_v47 = vadd.f32 %v2297_v3, %v958_v27 }
 0x14b   :  { %v1252_v36 = vsel %vm1124_vm14, %v1060_v15, %v1188_v55  ;;  %v1186_v37 = vmul.f32 0.2, %v1058_v21  ;;  %v1159_v2 = vmul.f32 0.2, %v1031_v22  ;;  %1541 = vst.msk [vmem:[%s2799_s3 + $0x4c] sm:$0xf] %vm1521_vm4, %v1742_v61  ;;  %v1061_v60 = vadd.f32 %v2297_v3, %v990_v4 }
 0x14c   :  { %v1774_v39 = vpack.c.bf16 %v1252_v36, %v1252_v36  ;;  %v1218_v40 = vsel %vm1090_vm15, %v1026_v18, %v1154_v26  ;;  %vm1127_vm3 = vcmp.ge.f32.partialorder %v1063_v23, 0.0  ;;  %v1191_v41 = vmul.f32 0.2, %v1063_v23  ;;  %v134_v0 = vld [vmem:[#allocation2 + $0xc0] sm:$0xff]  ;;  %v137_v9 = vld [vmem:[#allocation2 + $0xd8] sm:$0xff]  ;;  %v167_v14 = vld [vmem:[#allocation2 + $0x1c8] sm:$0xff] }
 0x14d   :  { %v1740_v45 = vpack.c.bf16 %v1218_v40, %v1218_v40  ;;  %v1250_v35 = vsel %vm1122_vm0, %v1058_v21, %v1186_v37  ;;  %v1223_v46 = vsel %vm1095_vm2, %v1031_v22, %v1159_v2  ;;  %vm1093_vm5 = vcmp.ge.f32.partialorder %v1029_v47, 0.0  ;;  %v166_v6 = vld [vmem:[#allocation2 + $0x1c0] sm:$0xff]  ;;  %v169_v11 = vld [vmem:[#allocation2 + $0x1d8] sm:$0xff]  ;;  %v140_v15 = vld [vmem:[#allocation2 + $0xf0] sm:$0xff] }
 0x14e   :  { %1573 = vst.msk [vmem:[%s2799_s3 + $0xcc] sm:$0xf] %vm1521_vm4, %v1774_v39  ;;  %v1772_v44 = vpack.c.bf16 %v1250_v35, %v1250_v35  ;;  %v1745_v56 = vpack.c.bf16 %v1223_v46, %v1223_v46  ;;  %v1255_v59 = vsel %vm1127_vm3, %v1063_v23, %v1191_v41  ;;  %v1157_v1 = vmul.f32 0.2, %v1029_v47  ;;  %v172_v22 = vld [vmem:[#allocation2 + $0x1f0] sm:$0xff]  ;;  %v170_v23 = vld [vmem:[#allocation2 + $0x1e0] sm:$0xff] }
 0x14f   :  { %1539 = vst.msk [vmem:[%s2799_s3 + $0x44] sm:$0xf] %vm1521_vm4, %v1740_v45  ;;  %v1777_v50 = vpack.c.bf16 %v1255_v59, %v1255_v59  ;;  %v829_v5 = vadd.f32 %v2468_v19, %v133_v42  ;;  %vm1125_vm6 = vcmp.ge.f32.partialorder %v1061_v60, 0.0  ;;  %v1189_v3 = vmul.f32 0.2, %v1061_v60  ;;  %v135_v19 = vld [vmem:[#allocation2 + $0xc8] sm:$0xff] }
 0x150   :  { %1571 = vst.msk [vmem:[%s2799_s3 + $0xc4] sm:$0xf] %vm1521_vm4, %v1772_v44  ;;  %1544 = vst.msk [vmem:[%s2799_s3 + $0x58] sm:$0xf] %vm1521_vm4, %v1745_v56  ;;  %v861_v12 = vadd.f32 %v2480_v32, %v165_v52  ;;  %v827_v13 = vadd.f32 %v2482_v33, %v131_v57  ;;  %v1221_v18 = vsel %vm1093_vm5, %v1029_v47, %v1157_v1  ;;  %v138_v33 = vld [vmem:[#allocation2 + $0xe0] sm:$0xff]  ;;  %v141_v26 = vld [vmem:[#allocation2 + $0xf8] sm:$0xff] }
 0x151   :  { %1576 = vst.msk [vmem:[%s2799_s3 + $0xd8] sm:$0xf] %vm1521_vm4, %v1777_v50  ;;  %v859_v20 = vadd.f32 %v2486_v38, %v163_v43  ;;  %v832_v21 = vadd.f32 %v2506_v48, %v136_v62  ;;  %v864_v32 = vadd.f32 %v2508_v49, %v168_v63  ;;  %v1743_v24 = vpack.c.bf16 %v1221_v18, %v1221_v18  ;;  %v173_v38 = vld [vmem:[#allocation2 + $0x1f8] sm:$0xff]  ;;  %v139_v27 = vld [vmem:[#allocation2 + $0xe8] sm:$0xff] }
 0x152   :  { %894 = vst.msk [vmem:[#allocation2 + $0xb8] sm:$0xff] %vm45_vm1, %v829_v5  ;;  %v1253_v54 = vsel %vm1125_vm6, %v1061_v60, %v1189_v3  ;;  %926 = vst.msk [vmem:[#allocation2 + $0x1b8] sm:$0xff] %vm45_vm1, %v861_v12  ;;  %v830_v55 = vadd.f32 %v2511_v53, %v134_v0  ;;  %v862_v61 = vadd.f32 %v2513_v58, %v166_v6  ;;  %v171_v2 = vld [vmem:[#allocation2 + $0x1e8] sm:$0xff] }
 0x153   :  { %892 = vst.msk [vmem:[#allocation2 + $0xa8] sm:$0xff] %vm45_vm1, %v827_v13  ;;  %v1775_v48 = vpack.c.bf16 %v1253_v54, %v1253_v54  ;;  %924 = vst.msk [vmem:[#allocation2 + $0x1a8] sm:$0xff] %vm45_vm1, %v859_v20  ;;  %v833_v49 = vadd.f32 %v2530_v7, %v137_v9  ;;  %v865_v36 = vadd.f32 %v2532_v8, %v169_v11 }
 0x154   :  { %897 = vst.msk [vmem:[#allocation2 + $0xd0] sm:$0xff] %vm45_vm1, %v832_v21  ;;  %929 = vst.msk [vmem:[#allocation2 + $0x1d0] sm:$0xff] %vm45_vm1, %v864_v32  ;;  %v831_v37 = vadd.f32 %v2536_v16, %v135_v19  ;;  %v863_v53 = vadd.f32 %v2538_v17, %v167_v14  ;;  %v836_v58 = vadd.f32 %v2545_v25, %v140_v15 }
 0x155   :  { %1542 = vst.msk [vmem:[%s2799_s3 + $0x50] sm:$0xf] %vm1521_vm4, %v1743_v24  ;;  %v868_v7 = vadd.f32 %v2557_v30, %v172_v22  ;;  %v834_v8 = vadd.f32 %v2559_v31, %v138_v33  ;;  %1574 = vst.msk [vmem:[%s2799_s3 + $0xd0] sm:$0xf] %vm1521_vm4, %v1775_v48  ;;  %v866_v16 = vadd.f32 %v2568_v10, %v170_v23 }
 0x156   :  { %895 = vst.msk [vmem:[#allocation2 + $0xc0] sm:$0xff] %vm45_vm1, %v830_v55  ;;  %927 = vst.msk [vmem:[#allocation2 + $0x1c0] sm:$0xff] %vm45_vm1, %v862_v61  ;;  %v837_v17 = vadd.f32 %v2570_v28, %v141_v26  ;;  %v869_v25 = vadd.f32 %v2572_v29, %v173_v38  ;;  %v835_v30 = vadd.f32 %v2574_v34, %v139_v27  ;;  %v2694_v28 = vld [vmem:[#allocation5] ss:$0 sm:$0xff] }
 0x157   :  { %898 = vst.msk [vmem:[#allocation2 + $0xd8] sm:$0xff] %vm45_vm1, %v833_v49  ;;  %930 = vst.msk [vmem:[#allocation2 + $0x1d8] sm:$0xff] %vm45_vm1, %v865_v36  ;;  %v867_v31 = vadd.f32 %v2576_v51, %v171_v2 }
 0x158   :  { %896 = vst.msk [vmem:[#allocation2 + $0xc8] sm:$0xff] %vm45_vm1, %v831_v37  ;;  %928 = vst.msk [vmem:[#allocation2 + $0x1c8] sm:$0xff] %vm45_vm1, %v863_v53 }
 0x159   :  { %901 = vst.msk [vmem:[#allocation2 + $0xf0] sm:$0xff] %vm45_vm1, %v836_v58  ;;  %933 = vst.msk [vmem:[#allocation2 + $0x1f0] sm:$0xff] %vm45_vm1, %v868_v7  ;;  %v961_v10 = vld [vmem:[#allocation2 + $0xb8] sm:$0xff] }
 0x15a   :  { %899 = vst.msk [vmem:[#allocation2 + $0xe0] sm:$0xff] %vm45_vm1, %v834_v8  ;;  %931 = vst.msk [vmem:[#allocation2 + $0x1e0] sm:$0xff] %vm45_vm1, %v866_v16  ;;  %v1032_v29 = vadd.f32 %v2694_v28, %v961_v10  ;;  %v993_v34 = vld [vmem:[#allocation2 + $0x1b8] sm:$0xff]  ;;  %v959_v4 = vld [vmem:[#allocation2 + $0xa8] sm:$0xff] }
 0x15b   :  { %902 = vst.msk [vmem:[#allocation2 + $0xf8] sm:$0xff] %vm45_vm1, %v837_v17  ;;  %934 = vst.msk [vmem:[#allocation2 + $0x1f8] sm:$0xff] %vm45_vm1, %v869_v25  ;;  %v1064_v39 = vadd.f32 %v2694_v28, %v993_v34  ;;  %v1030_v51 = vadd.f32 %v2694_v28, %v959_v4  ;;  %v991_v40 = vld [vmem:[#allocation2 + $0x1a8] sm:$0xff]  ;;  %v964_v41 = vld [vmem:[#allocation2 + $0xd0] sm:$0xff] }
 0x15c   :  { %900 = vst.msk [vmem:[#allocation2 + $0xe8] sm:$0xff] %vm45_vm1, %v835_v30  ;;  %932 = vst.msk [vmem:[#allocation2 + $0x1e8] sm:$0xff] %vm45_vm1, %v867_v31  ;;  %vm1096_vm7 = vcmp.ge.f32.partialorder %v1032_v29, 0.0  ;;  %v1160_v42 = vmul.f32 0.2, %v1032_v29  ;;  %v1062_v45 = vadd.f32 %v2694_v28, %v991_v40  ;;  %v1035_v35 = vadd.f32 %v2694_v28, %v964_v41  ;;  %v996_v46 = vld [vmem:[#allocation2 + $0x1d0] sm:$0xff] }
 0x15d   :  { %vm1128_vm1 = vcmp.ge.f32.partialorder %v1064_v39, 0.0  ;;  %v1192_v47 = vmul.f32 0.2, %v1064_v39  ;;  %vm1094_vm8 = vcmp.ge.f32.partialorder %v1030_v51, 0.0  ;;  %v1158_v52 = vmul.f32 0.2, %v1030_v51 }
 0x15e   :  { %v1224_v57 = vsel %vm1096_vm7, %v1032_v29, %v1160_v42  ;;  %vm1126_vm9 = vcmp.ge.f32.partialorder %v1062_v45, 0.0  ;;  %v1190_v43 = vmul.f32 0.2, %v1062_v45  ;;  %vm1099_vm10 = vcmp.ge.f32.partialorder %v1035_v35, 0.0  ;;  %v962_v44 = vld [vmem:[#allocation2 + $0xc0] sm:$0xff]  ;;  %v965_v0 = vld [vmem:[#allocation2 + $0xd8] sm:$0xff] }
 0x15f   :  { %v994_v56 = vld [vmem:[#allocation2 + $0x1c0] sm:$0xff]  ;;  %v1746_v59 = vpack.c.bf16 %v1224_v57, %v1224_v57  ;;  %v1256_v60 = vsel %vm1128_vm1, %v1064_v39, %v1192_v47  ;;  %v1222_v62 = vsel %vm1094_vm8, %v1030_v51, %v1158_v52  ;;  %v1163_v63 = vmul.f32 0.2, %v1035_v35  ;;  %v997_v13 = vld [vmem:[#allocation2 + $0x1d8] sm:$0xff]  ;;  %v963_v18 = vld [vmem:[#allocation2 + $0xc8] sm:$0xff] }
 0x160   :  { %v1778_v50 = vpack.c.bf16 %v1256_v60, %v1256_v60  ;;  %v1744_v1 = vpack.c.bf16 %v1222_v62, %v1222_v62  ;;  %v1254_v5 = vsel %vm1126_vm9, %v1062_v45, %v1190_v43  ;;  %v1067_v6 = vadd.f32 %v2694_v28, %v996_v46  ;;  %v995_v23 = vld [vmem:[#allocation2 + $0x1c8] sm:$0xff]  ;;  %v968_v26 = vld [vmem:[#allocation2 + $0xf0] sm:$0xff] }
 0x161   :  { %1545 = vst.msk [vmem:[%s2799_s3 + $0x5c] sm:$0xf] %vm1521_vm4, %v1746_v59  ;;  %v1776_v9 = vpack.c.bf16 %v1254_v5, %v1254_v5  ;;  %v1227_v11 = vsel %vm1099_vm10, %v1035_v35, %v1163_v63  ;;  %v1033_v3 = vadd.f32 %v2694_v28, %v962_v44  ;;  %v1065_v12 = vadd.f32 %v2694_v28, %v994_v56  ;;  %v1000_v38 = vld [vmem:[#allocation2 + $0x1f0] sm:$0xff]  ;;  %v966_v27 = vld [vmem:[#allocation2 + $0xe0] sm:$0xff] }
 0x162   :  { %1577 = vst.msk [vmem:[%s2799_s3 + $0xdc] sm:$0xf] %vm1521_vm4, %v1778_v50  ;;  %1543 = vst.msk [vmem:[%s2799_s3 + $0x54] sm:$0xf] %vm1521_vm4, %v1744_v1  ;;  %v1749_v19 = vpack.c.bf16 %v1227_v11, %v1227_v11  ;;  %vm1131_vm11 = vcmp.ge.f32.partialorder %v1067_v6, 0.0  ;;  %v1036_v15 = vadd.f32 %v2694_v28, %v965_v0  ;;  %v1068_v33 = vadd.f32 %v2694_v28, %v997_v13  ;;  %v998_v37 = vld [vmem:[#allocation2 + $0x1e0] sm:$0xff] }
 0x163   :  { %v1195_v14 = vmul.f32 0.2, %v1067_v6  ;;  %1575 = vst.msk [vmem:[%s2799_s3 + $0xd4] sm:$0xf] %vm1521_vm4, %v1776_v9  ;;  %vm1097_vm12 = vcmp.ge.f32.partialorder %v1033_v3, 0.0  ;;  %vm1129_vm13 = vcmp.ge.f32.partialorder %v1065_v12, 0.0  ;;  %v1034_v61 = vadd.f32 %v2694_v28, %v963_v18 }
 0x164   :  { %v1161_v20 = vmul.f32 0.2, %v1033_v3  ;;  %v1193_v21 = vmul.f32 0.2, %v1065_v12  ;;  %1548 = vst.msk [vmem:[%s2799_s3 + $0x68] sm:$0xf] %vm1521_vm4, %v1749_v19  ;;  %v1066_v8 = vadd.f32 %v2694_v28, %v995_v23  ;;  %v1039_v16 = vadd.f32 %v2694_v28, %v968_v26 }
 0x165   :  { %v1259_v32 = vsel %vm1131_vm11, %v1067_v6, %v1195_v14  ;;  %vm1100_vm14 = vcmp.ge.f32.partialorder %v1036_v15, 0.0  ;;  %v1164_v22 = vmul.f32 0.2, %v1036_v15  ;;  %vm1132_vm15 = vcmp.ge.f32.partialorder %v1068_v33, 0.0  ;;  %v969_v2 = vld [vmem:[#allocation2 + $0xf8] sm:$0xff]  ;;  %v967_v57 = vld [vmem:[#allocation2 + $0xe8] sm:$0xff] }
 0x166   :  { %v1781_v24 = vpack.c.bf16 %v1259_v32, %v1259_v32  ;;  %v1225_v54 = vsel %vm1097_vm12, %v1033_v3, %v1161_v20  ;;  %v1257_v55 = vsel %vm1129_vm13, %v1065_v12, %v1193_v21  ;;  %v1196_v58 = vmul.f32 0.2, %v1068_v33  ;;  %v1001_v45 = vld [vmem:[#allocation2 + $0x1f8] sm:$0xff]  ;;  %v999_v43 = vld [vmem:[#allocation2 + $0x1e8] sm:$0xff] }
 0x167   :  { %v1747_v48 = vpack.c.bf16 %v1225_v54, %v1225_v54  ;;  %v1779_v49 = vpack.c.bf16 %v1257_v55, %v1257_v55  ;;  %v1228_v36 = vsel %vm1100_vm14, %v1036_v15, %v1164_v22  ;;  %vm1098_vm0 = vcmp.ge.f32.partialorder %v1034_v61, 0.0 }
 0x168   :  { %1580 = vst.msk [vmem:[%s2799_s3 + $0xe8] sm:$0xf] %vm1521_vm4, %v1781_v24  ;;  %v1750_v53 = vpack.c.bf16 %v1228_v36, %v1228_v36  ;;  %v1162_v7 = vmul.f32 0.2, %v1034_v61  ;;  %v1071_v17 = vadd.f32 %v2694_v28, %v1000_v38  ;;  %v1037_v25 = vadd.f32 %v2694_v28, %v966_v27 }
 0x169   :  { %1546 = vst.msk [vmem:[%s2799_s3 + $0x60] sm:$0xf] %vm1521_vm4, %v1747_v48  ;;  %1578 = vst.msk [vmem:[%s2799_s3 + $0xe0] sm:$0xf] %vm1521_vm4, %v1779_v49  ;;  %v1260_v30 = vsel %vm1132_vm15, %v1068_v33, %v1196_v58  ;;  %v1069_v10 = vadd.f32 %v2694_v28, %v998_v37  ;;  %v1040_v29 = vadd.f32 %v2694_v28, %v969_v2  ;;  %vm1130_vm2 = vcmp.ge.f32.partialorder %v1066_v8, 0.0 }
 0x16a   :  { %1549 = vst.msk [vmem:[%s2799_s3 + $0x6c] sm:$0xf] %vm1521_vm4, %v1750_v53  ;;  %v1226_v31 = vsel %vm1098_vm0, %v1034_v61, %v1162_v7  ;;  %v1782_v34 = vpack.c.bf16 %v1260_v30, %v1260_v30  ;;  %v1194_v39 = vmul.f32 0.2, %v1066_v8  ;;  %vm1103_vm3 = vcmp.ge.f32.partialorder %v1039_v16, 0.0 }
 0x16b   :  { %v1748_v4 = vpack.c.bf16 %v1226_v31, %v1226_v31  ;;  %v1167_v51 = vmul.f32 0.2, %v1039_v16  ;;  %vm1135_vm5 = vcmp.ge.f32.partialorder %v1071_v17, 0.0  ;;  %v1199_v40 = vmul.f32 0.2, %v1071_v17 }
 0x16c   :  { %1581 = vst.msk [vmem:[%s2799_s3 + $0xec] sm:$0xf] %vm1521_vm4, %v1782_v34  ;;  %v1258_v41 = vsel %vm1130_vm2, %v1066_v8, %v1194_v39  ;;  %vm1101_vm6 = vcmp.ge.f32.partialorder %v1037_v25, 0.0  ;;  %v1165_v42 = vmul.f32 0.2, %v1037_v25  ;;  %vm1133_vm7 = vcmp.ge.f32.partialorder %v1069_v10, 0.0 }
 0x16d   :  { %1547 = vst.msk [vmem:[%s2799_s3 + $0x64] sm:$0xf] %vm1521_vm4, %v1748_v4  ;;  %v1780_v35 = vpack.c.bf16 %v1258_v41, %v1258_v41  ;;  %v1231_v46 = vsel %vm1103_vm3, %v1039_v16, %v1167_v51  ;;  %v1263_v47 = vsel %vm1135_vm5, %v1071_v17, %v1199_v40  ;;  %v1197_v52 = vmul.f32 0.2, %v1069_v10 }
 0x16e   :  { %v1753_v44 = vpack.c.bf16 %v1231_v46, %v1231_v46  ;;  %v1785_v56 = vpack.c.bf16 %v1263_v47, %v1263_v47  ;;  %v1229_v59 = vsel %vm1101_vm6, %v1037_v25, %v1165_v42  ;;  %vm1104_vm1 = vcmp.ge.f32.partialorder %v1040_v29, 0.0 }
 0x16f   :  { %1579 = vst.msk [vmem:[%s2799_s3 + $0xe4] sm:$0xf] %vm1521_vm4, %v1780_v35  ;;  %v1751_v60 = vpack.c.bf16 %v1229_v59, %v1229_v59  ;;  %v1261_v62 = vsel %vm1133_vm7, %v1069_v10, %v1197_v52  ;;  %v1168_v63 = vmul.f32 0.2, %v1040_v29  ;;  %v1072_v0 = vadd.f32 %v2694_v28, %v1001_v45 }
 0x170   :  { %1552 = vst.msk [vmem:[%s2799_s3 + $0x78] sm:$0xf] %vm1521_vm4, %v1753_v44  ;;  %1584 = vst.msk [vmem:[%s2799_s3 + $0xf8] sm:$0xf] %vm1521_vm4, %v1785_v56  ;;  %v1783_v50 = vpack.c.bf16 %v1261_v62, %v1261_v62  ;;  %v1038_v1 = vadd.f32 %v2694_v28, %v967_v57  ;;  %v1070_v5 = vadd.f32 %v2694_v28, %v999_v43 }
 0x171   :  { %1550 = vst.msk [vmem:[%s2799_s3 + $0x70] sm:$0xf] %vm1521_vm4, %v1751_v60  ;;  %v1232_v6 = vsel %vm1104_vm1, %v1040_v29, %v1168_v63  ;;  %vm1136_vm8 = vcmp.ge.f32.partialorder %v1072_v0, 0.0  ;;  %v1200_v9 = vmul.f32 0.2, %v1072_v0 }
 0x172   :  { %1582 = vst.msk [vmem:[%s2799_s3 + $0xf0] sm:$0xf] %vm1521_vm4, %v1783_v50  ;;  %v1754_v11 = vpack.c.bf16 %v1232_v6, %v1232_v6  ;;  %vm1102_vm9 = vcmp.ge.f32.partialorder %v1038_v1, 0.0  ;;  %v1166_v3 = vmul.f32 0.2, %v1038_v1  ;;  %vm1134_vm10 = vcmp.ge.f32.partialorder %v1070_v5, 0.0 }
 0x173   :  { %v1264_v12 = vsel %vm1136_vm8, %v1072_v0, %v1200_v9  ;;  %v1198_v13 = vmul.f32 0.2, %v1070_v5 }
 0x174   :  { %1553 = vst.msk [vmem:[%s2799_s3 + $0x7c] sm:$0xf] %vm1521_vm4, %v1754_v11  ;;  %v1786_v28 = vpack.c.bf16 %v1264_v12, %v1264_v12  ;;  %v1230_v19 = vsel %vm1102_vm9, %v1038_v1, %v1166_v3 }
 0x175   :  { %v1752_v14 = vpack.c.bf16 %v1230_v19, %v1230_v19  ;;  %v1262_v15 = vsel %vm1134_vm10, %v1070_v5, %v1198_v13 }
 0x176   :  { %1585 = vst.msk [vmem:[%s2799_s3 + $0xfc] sm:$0xf] %vm1521_vm4, %v1786_v28  ;;  %v1784_v18 = vpack.c.bf16 %v1262_v15, %v1262_v15 }
 0x177   :  { %1551 = vst.msk [vmem:[%s2799_s3 + $0x74] sm:$0xf] %vm1521_vm4, %v1752_v14 }
 0x178   :  { %1583 = vst.msk [vmem:[%s2799_s3 + $0xf4] sm:$0xf] %vm1521_vm4, %v1784_v18 }
 0x179   :  { %1590 = vsyncpa [#allocation4], 1 }
 0x17a   :  { %1591 = vsyncpa [#allocation6], 1 }

// kernel: discriminator_forward.10
= control target key start
LH: loop header
LB: loop body
LE: loop exit
PB: predicated region body
PF: predicated region fallthrough
CT: control target
= control target key end

     0   :  { %vm25_vm0 = vcmask 523264   ;;  %s2213_s1 = inlined_call_operand.vmem [shape: bf16[576,64], index: 1, kind: input, shape index: {}]   ;;  %s2214_s0 = inlined_call_operand.vmem [shape: bf16[128,576], index: 0, kind: input, shape index: {}]   ;;  %s2215_s2 = inlined_call_operand.vmem [shape: f32[1,64], index: 2, kind: input, shape index: {}]   ;;  %s2216_s3 = inlined_call_operand.vmem [shape: f32[1,64], index: 3, kind: input, shape index: {}]   ;;  %s2217_s4 = inlined_call_operand.vmem [shape: f32[1,64], index: 4, kind: input, shape index: {}]   ;;  %s2218_s5 = inlined_call_operand.vmem [shape: bf16[128,64], index: 5, kind: output, shape index: {}]  }
   0x1   :  { %v1566_v0 = vld [vmem:[%s2213_s1 + $0x40] sm:$0xff]   ;;  %v1570_v4 = vld [vmem:[%s2213_s1 + $0x48] sm:$0xff]   ;;  %v1574_v8 = vld [vmem:[%s2213_s1 + $0x50] sm:$0xff]  }
   0x2   :  { %v1567_v1 = vld [vmem:[%s2213_s1 + $0xc0] sm:$0xff]   ;;  %1393 = vmatprep.subr.bf16.mxu0 %v1566_v0  ;;  %v1571_v5 = vld [vmem:[%s2213_s1 + $0xc8] sm:$0xff]   ;;  %v1575_v9 = vld [vmem:[%s2213_s1 + $0xd0] sm:$0xff]  }
   0x3   :  { %v1568_v2 = vld [vmem:[%s2213_s1] sm:$0xff]   ;;  %1457 = vmatprep.subr.bf16.mxu1 %v1567_v1  ;;  %v1572_v6 = vld [vmem:[%s2213_s1 + $0x8] sm:$0xff]   ;;  %v1576_v10 = vld [vmem:[%s2213_s1 + $0x10] sm:$0xff]  }
   0x4   :  { %v1569_v3 = vld [vmem:[%s2213_s1 + $0x80] sm:$0xff]   ;;  %1394 = vmatpush3.bf16.msra.mxu0 %v1568_v2  ;;  %v1573_v7 = vld [vmem:[%s2213_s1 + $0x88] sm:$0xff]   ;;  %v1577_v11 = vld [vmem:[%s2213_s1 + $0x90] sm:$0xff]  }
   0x5   :  { %1458 = vmatpush3.bf16.msra.mxu1 %v1569_v3  ;;  %1395 = vmatprep.subr.bf16.mxu0 %v1570_v4  ;;  %v1578_v12 = vld [vmem:[%s2213_s1 + $0x58] sm:$0xff]   ;;  %v1582_v16 = vld [vmem:[%s2213_s1 + $0x60] sm:$0xff]   ;;  %v1586_v20 = vld [vmem:[%s2213_s1 + $0x68] sm:$0xff]  }
   0x6   :  { %1459 = vmatprep.subr.bf16.mxu1 %v1571_v5  ;;  %v1579_v13 = vld [vmem:[%s2213_s1 + $0xd8] sm:$0xff]   ;;  %v1583_v17 = vld [vmem:[%s2213_s1 + $0xe0] sm:$0xff]   ;;  %v1587_v21 = vld [vmem:[%s2213_s1 + $0xe8] sm:$0xff]  }
   0x7   :  { %v1580_v14 = vld [vmem:[%s2213_s1 + $0x18] sm:$0xff]   ;;  %v1584_v18 = vld [vmem:[%s2213_s1 + $0x20] sm:$0xff]   ;;  %v1588_v22 = vld [vmem:[%s2213_s1 + $0x28] sm:$0xff]  }
   0x8   :  { %1396 = vmatpush3.bf16.msra.mxu0 %v1572_v6  ;;  %v1581_v15 = vld [vmem:[%s2213_s1 + $0x98] sm:$0xff]   ;;  %v1585_v19 = vld [vmem:[%s2213_s1 + $0xa0] sm:$0xff]   ;;  %v1589_v23 = vld [vmem:[%s2213_s1 + $0xa8] sm:$0xff]  }
   0x9   :  { %1460 = vmatpush3.bf16.msra.mxu1 %v1573_v7  ;;  %1397 = vmatprep.subr.bf16.mxu0 %v1574_v8  ;;  %v1590_v24 = vld [vmem:[%s2213_s1 + $0x70] sm:$0xff]   ;;  %v1594_v28 = vld [vmem:[%s2213_s1 + $0x78] sm:$0xff]   ;;  %v1603_v35 = vld [vmem:[%s2214_s0 + $0xc] ss:$20 sps:$4 sm:$0xff]  }
   0xa   :  { %1461 = vmatprep.subr.bf16.mxu1 %v1575_v9  ;;  %v1591_v25 = vld [vmem:[%s2213_s1 + $0xf0] sm:$0xff]   ;;  %v1595_v29 = vld [vmem:[%s2213_s1 + $0xf8] sm:$0xff]   ;;  %v1604_v36 = vld [vmem:[%s2213_s1 + $0x100] sm:$0xff]   ;;  %748 = vmatprep.mubr.bf16.mxu1 %v1603_v35 }
   0xb   :  { %v1592_v26 = vld [vmem:[%s2213_s1 + $0x30] sm:$0xff]   ;;  %v1596_v30 = vld [vmem:[%s2213_s1 + $0x38] sm:$0xff]   ;;  %v1605_v37 = vld [vmem:[%s2214_s0 + $0x2c] ss:$20 sps:$4 sm:$0xff]  }
   0xc   :  { %1398 = vmatpush3.bf16.msra.mxu0 %v1576_v10  ;;  %v1593_v27 = vld [vmem:[%s2213_s1 + $0xb0] sm:$0xff]   ;;  %v1597_v31 = vld [vmem:[%s2213_s1 + $0xb8] sm:$0xff]   ;;  %v1617_v42 = vld [vmem:[%s2213_s1 + $0x108] sm:$0xff]  }
   0xd   :  { %1462 = vmatpush3.bf16.msra.mxu1 %v1577_v11  ;;  %1399 = vmatprep.subr.bf16.mxu0 %v1578_v12  ;;  %v1598_v32 = vld [vmem:[%s2214_s0] ss:$20 sps:$4 sm:$0xff]   ;;  %v1600_v33 = vld [vmem:[%s2214_s0 + $0x4] ss:$20 sps:$4 sm:$0xff]   ;;  %v1601_v34 = vld [vmem:[%s2214_s0 + $0x8] ss:$20 sps:$4 sm:$0xff]  }
   0xe   :  { %1463 = vmatprep.subr.bf16.mxu1 %v1579_v13  ;;  %651 = vmatprep.mubr.bf16.mxu0 %v1600_v33  ;;  %v1607_v38 = vld [vmem:[%s2214_s0 + $0x34] ss:$20 sps:$4 sm:$0xff]   ;;  %v1610_v40 = vld [vmem:[%s2214_s0 + $0x30] ss:$20 sps:$4 sm:$0xff]   ;;  %v1616_v45 = vld [vmem:[%s2214_s0 + $0x58] ss:$20 sps:$4 sm:$0xff]  }
   0xf   :  { %v1609_v39 = vld [vmem:[%s2214_s0 + $0x28] ss:$20 sps:$4 sm:$0xff]   ;;  %v1615_v44 = vld [vmem:[%s2214_s0 + $0x50] ss:$20 sps:$4 sm:$0xff]   ;;  %v1622_v50 = vld [vmem:[%s2214_s0 + $0x78] ss:$20 sps:$4 sm:$0xff]  }
  0x10   :  { %1400 = vmatpush3.bf16.msra.mxu0 %v1580_v14  ;;  %v1611_v41 = vld [vmem:[%s2214_s0 + $0x54] ss:$20 sps:$4 sm:$0xff]   ;;  %v1613_v43 = vld [vmem:[%s2214_s0 + $0x5c] ss:$20 sps:$4 sm:$0xff]   ;;  %v1620_v48 = vld [vmem:[%s2214_s0 + $0x84] ss:$20 sps:$4 sm:$0xff]  }
  0x11   :  { %1464 = vmatpush3.bf16.msra.mxu1 %v1581_v15  ;;  %1401 = vmatprep.subr.bf16.mxu0 %v1582_v16  ;;  %v1630_v46 = vld [vmem:[%s2213_s1 + $0x110] sm:$0xff]   ;;  %v1643_v49 = vld [vmem:[%s2213_s1 + $0x118] sm:$0xff]   ;;  %v1626_v53 = vld [vmem:[%s2214_s0 + $0xac] ss:$20 sps:$4 sm:$0xff]   ;;  %v1660_v12 = vmov 0.0  }
  0x12   :  { %1465 = vmatprep.subr.bf16.mxu1 %v1583_v17  ;;  %v1618_v47 = vld [vmem:[%s2214_s0 + $0x7c] ss:$20 sps:$4 sm:$0xff]   ;;  %v1623_v51 = vld [vmem:[%s2214_s0 + $0x80] ss:$20 sps:$4 sm:$0xff]   ;;  %v1624_v52 = vld [vmem:[%s2214_s0 + $0xa4] ss:$20 sps:$4 sm:$0xff]  }
  0x13   :  { %v1628_v54 = vld [vmem:[%s2214_s0 + $0xa0] ss:$20 sps:$4 sm:$0xff]   ;;  %v1629_v55 = vld [vmem:[%s2214_s0 + $0xa8] ss:$20 sps:$4 sm:$0xff]   ;;  %v1636_v59 = vld [vmem:[%s2214_s0 + $0xd0] ss:$20 sps:$4 sm:$0xff]  }
  0x14   :  { %1402 = vmatpush3.bf16.msra.mxu0 %v1584_v18  ;;  %v1631_v56 = vld [vmem:[%s2214_s0 + $0xcc] ss:$20 sps:$4 sm:$0xff]   ;;  %v1633_v57 = vld [vmem:[%s2214_s0 + $0xd4] ss:$20 sps:$4 sm:$0xff]   ;;  %v1639_v61 = vld [vmem:[%s2214_s0 + $0xfc] ss:$20 sps:$4 sm:$0xff]  }
  0x15   :  { %1466 = vmatpush3.bf16.msra.mxu1 %v1585_v19  ;;  %1403 = vmatprep.subr.bf16.mxu0 %v1586_v20  ;;  %v1635_v58 = vld [vmem:[%s2214_s0 + $0xc8] ss:$20 sps:$4 sm:$0xff]   ;;  %v1641_v62 = vld [vmem:[%s2214_s0 + $0xf0] ss:$20 sps:$4 sm:$0xff]   ;;  %v1642_v63 = vld [vmem:[%s2214_s0 + $0xf8] ss:$20 sps:$4 sm:$0xff]  }
  0x16   :  { %1467 = vmatprep.subr.bf16.mxu1 %v1587_v21  ;;  %v1637_v60 = vld [vmem:[%s2214_s0 + $0xf4] ss:$20 sps:$4 sm:$0xff]   ;;  %v1644_v0 = vld [vmem:[%s2214_s0 + $0x11c] ss:$20 sps:$4 sm:$0xff]   ;;  %v1646_v1 = vld [vmem:[%s2214_s0 + $0x124] ss:$20 sps:$4 sm:$0xff]  }
  0x17   :  { %v1648_v2 = vld [vmem:[%s2214_s0 + $0x118] ss:$20 sps:$4 sm:$0xff]   ;;  %v1649_v3 = vld [vmem:[%s2214_s0 + $0x120] ss:$20 sps:$4 sm:$0xff]   ;;  %v1650_v4 = vld [vmem:[%s2214_s0 + $0x10] ss:$20 sps:$4 sm:$0xff]  }
  0x18   :  { %1404 = vmatpush3.bf16.msra.mxu0 %v1588_v22  ;;  %v1651_v5 = vld [vmem:[%s2214_s0 + $0xb0] ss:$20 sps:$4 sm:$0xff]   ;;  %v1652_v6 = vld [vmem:[%s2214_s0 + $0x38] ss:$20 sps:$4 sm:$0xff]   ;;  %v1654_v8 = vld [vmem:[%s2214_s0 + $0x60] ss:$20 sps:$4 sm:$0xff]  }
  0x19   :  { %1468 = vmatpush3.bf16.msra.mxu1 %v1589_v23  ;;  %1405 = vmatprep.subr.bf16.mxu0 %v1590_v24  ;;  %v1653_v7 = vld [vmem:[%s2214_s0 + $0xd8] ss:$20 sps:$4 sm:$0xff]   ;;  %v1655_v9 = vld [vmem:[%s2214_s0 + $0x100] ss:$20 sps:$4 sm:$0xff]   ;;  %v1656_v10 = vld [vmem:[%s2214_s0 + $0x88] ss:$20 sps:$4 sm:$0xff]  }
  0x1a   :  { %1469 = vmatprep.subr.bf16.mxu1 %v1591_v25  ;;  %v1657_v11 = vld [vmem:[%s2214_s0 + $0x128] ss:$20 sps:$4 sm:$0xff]   ;;  %28 = vst.msk [vmem:[#allocation2 + $0x10] sm:$0xff] %vm25_vm0, %v1660_v12  ;;  %26 = vst.msk [vmem:[#allocation2] sm:$0xff] %vm25_vm0, %v1660_v12 }
  0x1b   :  { %27 = vst.msk [vmem:[#allocation2 + $0x8] sm:$0xff] %vm25_vm0, %v1660_v12  ;;  %29 = vst.msk [vmem:[#allocation2 + $0x18] sm:$0xff] %vm25_vm0, %v1660_v12 }
  0x1c   :  { %1406 = vmatpush3.bf16.msra.mxu0 %v1592_v26  ;;  %30 = vst.msk [vmem:[#allocation2 + $0x20] sm:$0xff] %vm25_vm0, %v1660_v12  ;;  %31 = vst.msk [vmem:[#allocation2 + $0x28] sm:$0xff] %vm25_vm0, %v1660_v12 }
  0x1d   :  { %1470 = vmatpush3.bf16.msra.mxu1 %v1593_v27  ;;  %1407 = vmatprep.subr.bf16.mxu0 %v1594_v28  ;;  %32 = vst.msk [vmem:[#allocation2 + $0x30] sm:$0xff] %vm25_vm0, %v1660_v12  ;;  %33 = vst.msk [vmem:[#allocation2 + $0x38] sm:$0xff] %vm25_vm0, %v1660_v12 }
  0x1e   :  { %1471 = vmatprep.subr.bf16.mxu1 %v1595_v29  ;;  %34 = vst.msk [vmem:[#allocation2 + $0x40] sm:$0xff] %vm25_vm0, %v1660_v12  ;;  %35 = vst.msk [vmem:[#allocation2 + $0x48] sm:$0xff] %vm25_vm0, %v1660_v12 }
  0x1f   :  { %36 = vst.msk [vmem:[#allocation2 + $0x50] sm:$0xff] %vm25_vm0, %v1660_v12  ;;  %37 = vst.msk [vmem:[#allocation2 + $0x58] sm:$0xff] %vm25_vm0, %v1660_v12 }
  0x20   :  { %1408 = vmatpush3.bf16.msra.mxu0 %v1596_v30  ;;  %38 = vst.msk [vmem:[#allocation2 + $0x60] sm:$0xff] %vm25_vm0, %v1660_v12  ;;  %39 = vst.msk [vmem:[#allocation2 + $0x68] sm:$0xff] %vm25_vm0, %v1660_v12 }
  0x21   :  { %1472 = vmatpush3.bf16.msra.mxu1 %v1597_v31  ;;  %1533 = vmatprep.subr.bf16.mxu0 %v1604_v36  ;;  %40 = vst.msk [vmem:[#allocation2 + $0x70] sm:$0xff] %vm25_vm0, %v1660_v12  ;;  %41 = vst.msk [vmem:[#allocation2 + $0x78] sm:$0xff] %vm25_vm0, %v1660_v12 }
  0x22   :  { %1557 = vmatprep.subr.bf16.mxu1 %v1604_v36 }
  0x23   :  { %652 = vmatmul.mubr.bf16.vlgmr.msra.gmra.mrb[0].mxu0 %v1598_v32 }
  0x24   :  { %749 = vmatmul.mubr.bf16.vlgmr.msra.gmra.mrb[0].mxu1 %v1601_v34  ;;  %1534 = vmatpush3.bf16.msra.mxu0 %v1604_v36 }
  0x25   :  { %659 = vmatprep.mubr.bf16.mxu0 %v1605_v37  ;;  %756 = vmatprep.mubr.bf16.mxu1 %v1607_v38 }
  0x26   :  { %1561 = vmatpush3.bf16.msra.mxu1 %v1604_v36  ;;  %1535 = vmatprep.subr.bf16.mxu0 %v1617_v42 }
  0x27   :  { %1558 = vmatprep.subr.bf16.mxu1 %v1617_v42 }
  0x28   :  { %1536 = vmatpush3.bf16.msra.mxu0 %v1617_v42 }
  0x29   :  { %1537 = vmatprep.subr.bf16.mxu0 %v1630_v46 }
  0x2a   :  { %1562 = vmatpush3.bf16.msra.mxu1 %v1617_v42 }
  0x2b   :  { %660 = vmatmul.mubr.bf16.gmra.mrb[4].mxu0 %v1609_v39  ;;  %1559 = vmatprep.subr.bf16.mxu1 %v1630_v46 }
  0x2c   :  { %757 = vmatmul.mubr.bf16.gmra.mrb[4].mxu1 %v1610_v40  ;;  %667 = vmatprep.mubr.bf16.mxu0 %v1611_v41 }
  0x2d   :  { %764 = vmatprep.mubr.bf16.mxu1 %v1613_v43  ;;  %1538 = vmatpush3.bf16.msra.mxu0 %v1630_v46 }
  0x2e   :  { %1563 = vmatpush3.bf16.msra.mxu1 %v1630_v46  ;;  %1539 = vmatprep.subr.bf16.mxu0 %v1643_v49 }
  0x2f   :  { %1560 = vmatprep.subr.bf16.mxu1 %v1643_v49 }
  0x31   :  { %1540 = vmatpush3.bf16.msra.mxu0 %v1643_v49 }
  0x32   :  { %1564 = vmatpush3.bf16.msra.mxu1 %v1643_v49 }
  0x33   :  { %668 = vmatmul.mubr.bf16.gmra.mrb[8].mxu0 %v1615_v44 }
  0x34   :  { %765 = vmatmul.mubr.bf16.gmra.mrb[8].mxu1 %v1616_v45  ;;  %675 = vmatprep.mubr.bf16.mxu0 %v1618_v47 }
  0x35   :  { %772 = vmatprep.mubr.bf16.mxu1 %v1620_v48 }
  0x3b   :  { %676 = vmatmul.mubr.bf16.gmra.mrb[12].mxu0 %v1622_v50 }
  0x3c   :  { %773 = vmatmul.mubr.bf16.gmra.mrb[12].mxu1 %v1623_v51  ;;  %683 = vmatprep.mubr.bf16.mxu0 %v1624_v52 }
  0x3d   :  { %780 = vmatprep.mubr.bf16.mxu1 %v1626_v53 }
  0x43   :  { %684 = vmatmul.mubr.bf16.gmra.mrb[16].mxu0 %v1628_v54 }
  0x44   :  { %781 = vmatmul.mubr.bf16.gmra.mrb[16].mxu1 %v1629_v55  ;;  %691 = vmatprep.mubr.bf16.mxu0 %v1631_v56 }
  0x45   :  { %788 = vmatprep.mubr.bf16.mxu1 %v1633_v57 }
  0x4b   :  { %692 = vmatmul.mubr.bf16.gmra.mrb[20].mxu0 %v1635_v58 }
  0x4c   :  { %789 = vmatmul.mubr.bf16.gmra.mrb[20].mxu1 %v1636_v59  ;;  %699 = vmatprep.mubr.bf16.mxu0 %v1637_v60 }
  0x4d   :  { %796 = vmatprep.mubr.bf16.mxu1 %v1639_v61 }
  0x53   :  { %700 = vmatmul.mubr.bf16.gmra.mrb[24].mxu0 %v1641_v62 }
  0x54   :  { %797 = vmatmul.mubr.bf16.gmra.mrb[24].mxu1 %v1642_v63  ;;  %707 = vmatprep.mubr.bf16.mxu0 %v1644_v0 }
  0x55   :  { %804 = vmatprep.mubr.bf16.mxu1 %v1646_v1 }
  0x5b   :  { %708 = vmatmul.mubr.bf16.gmra.mrb[28].mxu0 %v1648_v2 }
  0x5c   :  { %805 = vmatmul.mubr.bf16.gmra.mrb[28].mxu1 %v1649_v3  ;;  %1541 = vmatprep.mubr.msk.bf16.mxu0 %vm25_vm0, %v1650_v4 }
  0x5d   :  { %1549 = vmatprep.mubr.msk.bf16.mxu1 %vm25_vm0, %v1651_v5 }
  0x63   :  { %1542 = vmatmul.mubr.msk.bf16.vlgmr.msra.gmra.mrb[32].mxu0 %vm25_vm0, %v1652_v6 }
  0x64   :  { %1550 = vmatmul.mubr.msk.bf16.vlgmr.msra.gmra.mrb[32].mxu1 %vm25_vm0, %v1653_v7  ;;  %1545 = vmatprep.mubr.msk.bf16.mxu0 %vm25_vm0, %v1654_v8 }
  0x65   :  { %1553 = vmatprep.mubr.msk.bf16.mxu1 %vm25_vm0, %v1655_v9 }
  0x6b   :  { %1546 = vmatmul.mubr.msk.bf16.gmra.mrb[36].mxu0 %vm25_vm0, %v1656_v10 }
  0x6c   :  { %1554 = vmatmul.mubr.msk.bf16.gmra.mrb[36].mxu1 %vm25_vm0, %v1657_v11 }
  0xf6   :  { %v1409_v13 = vpop.f32.mrb[0].mxu0 }
  0xf7   :  { %v1473_v14 = vpop.f32.mrb[0].mxu1  ;;  %v1410_v15 = vpop.f32.mrb[1].mxu0 }
  0xf8   :  { %v1411_v16 = vadd.f32 %v1410_v15, %v1409_v13  ;;  %v1474_v17 = vpop.f32.mrb[1].mxu1  ;;  %v1412_v18 = vpop.f32.mrb[2].mxu0 }
  0xf9   :  { %v1475_v19 = vadd.f32 %v1474_v17, %v1473_v14  ;;  %v1476_v20 = vpop.f32.mrb[2].mxu1  ;;  %v1413_v21 = vpop.f32.mrb[3].mxu0 }
  0xfa   :  { %v1414_v22 = vadd.f32 %v1413_v21, %v1412_v18  ;;  %v1477_v23 = vpop.f32.mrb[3].mxu1 }
  0xfb   :  { %v1478_v24 = vadd.f32 %v1477_v23, %v1476_v20  ;;  %v1943_v25 = vadd.f32 %v1475_v19, %v1411_v16 }
  0xfd   :  { %v1945_v26 = vadd.f32 %v1478_v24, %v1414_v22 }
  0xfe   :  { %v1415_v27 = vpop.f32.mrb[4].mxu0 }
  0xff   :  { %v1479_v28 = vpop.f32.mrb[4].mxu1  ;;  %v1416_v29 = vpop.f32.mrb[5].mxu0 }
 0x100   :  { %v1417_v30 = vadd.f32 %v1416_v29, %v1415_v27  ;;  %v1480_v31 = vpop.f32.mrb[5].mxu1  ;;  %v1418_v32 = vpop.f32.mrb[6].mxu0 }
 0x101   :  { %v1481_v33 = vadd.f32 %v1480_v31, %v1479_v28  ;;  %v1482_v34 = vpop.f32.mrb[6].mxu1  ;;  %v1419_v35 = vpop.f32.mrb[7].mxu0 }
 0x102   :  { %v1420_v36 = vadd.f32 %v1419_v35, %v1418_v32  ;;  %v1483_v37 = vpop.f32.mrb[7].mxu1 }
 0x103   :  { %v1484_v38 = vadd.f32 %v1483_v37, %v1482_v34  ;;  %v1947_v39 = vadd.f32 %v1481_v33, %v1417_v30 }
 0x105   :  { %v1949_v40 = vadd.f32 %v1484_v38, %v1420_v36 }
 0x106   :  { %v1421_v41 = vpop.f32.mrb[8].mxu0 }
 0x107   :  { %v1485_v42 = vpop.f32.mrb[8].mxu1  ;;  %v1422_v43 = vpop.f32.mrb[9].mxu0 }
 0x108   :  { %v1423_v44 = vadd.f32 %v1422_v43, %v1421_v41  ;;  %v1486_v45 = vpop.f32.mrb[9].mxu1  ;;  %v1424_v46 = vpop.f32.mrb[10].mxu0 }
 0x109   :  { %v1487_v47 = vadd.f32 %v1486_v45, %v1485_v42  ;;  %v1488_v48 = vpop.f32.mrb[10].mxu1  ;;  %v1425_v49 = vpop.f32.mrb[11].mxu0 }
 0x10a   :  { %v1426_v50 = vadd.f32 %v1425_v49, %v1424_v46  ;;  %v1489_v51 = vpop.f32.mrb[11].mxu1 }
 0x10b   :  { %v1490_v52 = vadd.f32 %v1489_v51, %v1488_v48  ;;  %v1951_v53 = vadd.f32 %v1487_v47, %v1423_v44 }
 0x10d   :  { %v1953_v54 = vadd.f32 %v1490_v52, %v1426_v50 }
 0x10e   :  { %v1427_v55 = vpop.f32.mrb[12].mxu0 }
 0x10f   :  { %v1491_v56 = vpop.f32.mrb[12].mxu1  ;;  %v1428_v57 = vpop.f32.mrb[13].mxu0 }
 0x110   :  { %v1429_v58 = vadd.f32 %v1428_v57, %v1427_v55  ;;  %v1492_v59 = vpop.f32.mrb[13].mxu1  ;;  %v1430_v60 = vpop.f32.mrb[14].mxu0 }
 0x111   :  { %v1493_v61 = vadd.f32 %v1492_v59, %v1491_v56  ;;  %v1494_v62 = vpop.f32.mrb[14].mxu1  ;;  %v1431_v63 = vpop.f32.mrb[15].mxu0 }
 0x112   :  { %v1432_v0 = vadd.f32 %v1431_v63, %v1430_v60  ;;  %v1495_v1 = vpop.f32.mrb[15].mxu1 }
 0x113   :  { %v1496_v2 = vadd.f32 %v1495_v1, %v1494_v62  ;;  %v1955_v3 = vadd.f32 %v1493_v61, %v1429_v58 }
 0x115   :  { %v1957_v4 = vadd.f32 %v1496_v2, %v1432_v0 }
 0x116   :  { %v1433_v5 = vpop.f32.mrb[16].mxu0 }
 0x117   :  { %v1497_v6 = vpop.f32.mrb[16].mxu1  ;;  %v1434_v7 = vpop.f32.mrb[17].mxu0 }
 0x118   :  { %v1435_v8 = vadd.f32 %v1434_v7, %v1433_v5  ;;  %v1498_v9 = vpop.f32.mrb[17].mxu1  ;;  %v1436_v10 = vpop.f32.mrb[18].mxu0  ;;  %v44_v5 = vld [vmem:[#allocation2 + $0x10] sm:$0xff] }
 0x119   :  { %v1499_v11 = vadd.f32 %v1498_v9, %v1497_v6  ;;  %v1500_v12 = vpop.f32.mrb[18].mxu1  ;;  %v1437_v13 = vpop.f32.mrb[19].mxu0 }
 0x11a   :  { %v1438_v14 = vadd.f32 %v1437_v13, %v1436_v10  ;;  %v1501_v15 = vpop.f32.mrb[19].mxu1  ;;  %v42_v10 = vld [vmem:[#allocation2] sm:$0xff] }
 0x11b   :  { %v1502_v16 = vadd.f32 %v1501_v15, %v1500_v12  ;;  %v783_v17 = vadd.f32 %v1499_v11, %v1435_v8  ;;  %v52_v8 = vld [vmem:[#allocation2 + $0x50] sm:$0xff] }
 0x11d   :  { %v1959_v18 = vadd.f32 %v1502_v16, %v1438_v14  ;;  %v50_v14 = vld [vmem:[#allocation2 + $0x40] sm:$0xff]  ;;  %v45_v16 = vld [vmem:[#allocation2 + $0x18] sm:$0xff] }
 0x11e   :  { %v1439_v19 = vpop.f32.mrb[20].mxu0 }
 0x11f   :  { %v1503_v20 = vpop.f32.mrb[20].mxu1  ;;  %v1440_v21 = vpop.f32.mrb[21].mxu0 }
 0x120   :  { %v1441_v22 = vadd.f32 %v1440_v21, %v1439_v19  ;;  %v1504_v23 = vpop.f32.mrb[21].mxu1  ;;  %v1442_v24 = vpop.f32.mrb[22].mxu0 }
 0x121   :  { %v1505_v27 = vadd.f32 %v1504_v23, %v1503_v20  ;;  %v1506_v28 = vpop.f32.mrb[22].mxu1  ;;  %v1443_v29 = vpop.f32.mrb[23].mxu0  ;;  %v53_v23 = vld [vmem:[#allocation2 + $0x58] sm:$0xff] }
 0x122   :  { %v1444_v30 = vadd.f32 %v1443_v29, %v1442_v24  ;;  %v1507_v31 = vpop.f32.mrb[23].mxu1 }
 0x123   :  { %v1508_v32 = vadd.f32 %v1507_v31, %v1506_v28  ;;  %v791_v33 = vadd.f32 %v1505_v27, %v1441_v22  ;;  %v43_v27 = vld [vmem:[#allocation2 + $0x8] sm:$0xff] }
 0x125   :  { %v794_v34 = vadd.f32 %v1508_v32, %v1444_v30  ;;  %v51_v32 = vld [vmem:[#allocation2 + $0x48] sm:$0xff] }
 0x126   :  { %v1445_v35 = vpop.f32.mrb[24].mxu0 }
 0x127   :  { %v1509_v36 = vpop.f32.mrb[24].mxu1  ;;  %v1446_v37 = vpop.f32.mrb[25].mxu0 }
 0x128   :  { %v1447_v38 = vadd.f32 %v1446_v37, %v1445_v35  ;;  %v1510_v41 = vpop.f32.mrb[25].mxu1  ;;  %v1448_v42 = vpop.f32.mrb[26].mxu0 }
 0x129   :  { %v1511_v43 = vadd.f32 %v1510_v41, %v1509_v36  ;;  %v1512_v44 = vpop.f32.mrb[26].mxu1  ;;  %v1449_v45 = vpop.f32.mrb[27].mxu0 }
 0x12a   :  { %v1450_v46 = vadd.f32 %v1449_v45, %v1448_v42  ;;  %v1513_v47 = vpop.f32.mrb[27].mxu1  ;;  %v46_v42 = vld [vmem:[#allocation2 + $0x20] sm:$0xff] }
 0x12b   :  { %v1514_v48 = vadd.f32 %v1513_v47, %v1512_v44  ;;  %v1961_v49 = vadd.f32 %v1511_v43, %v1447_v38  ;;  %v56_v38 = vld [vmem:[#allocation2 + $0x70] sm:$0xff] }
 0x12d   :  { %v1963_v50 = vadd.f32 %v1514_v48, %v1450_v46  ;;  %v54_v46 = vld [vmem:[#allocation2 + $0x60] sm:$0xff]  ;;  %v49_v48 = vld [vmem:[#allocation2 + $0x38] sm:$0xff] }
 0x12e   :  { %v1451_v51 = vpop.f32.mrb[28].mxu0 }
 0x12f   :  { %v1515_v52 = vpop.f32.mrb[28].mxu1  ;;  %v1452_v55 = vpop.f32.mrb[29].mxu0 }
 0x130   :  { %v1453_v56 = vadd.f32 %v1452_v55, %v1451_v51  ;;  %v1516_v57 = vpop.f32.mrb[29].mxu1  ;;  %v1454_v58 = vpop.f32.mrb[30].mxu0 }
 0x131   :  { %v1517_v59 = vadd.f32 %v1516_v57, %v1515_v52  ;;  %v1518_v60 = vpop.f32.mrb[30].mxu1  ;;  %v1455_v61 = vpop.f32.mrb[31].mxu0  ;;  %v1985_v52 = vld [vmem:[%s2215_s2] ss:$0 sm:$0xff]  ;;  %v57_v57 = vld [vmem:[#allocation2 + $0x78] sm:$0xff] }
 0x132   :  { %v1456_v62 = vadd.f32 %v1455_v61, %v1454_v58  ;;  %v1519_v63 = vpop.f32.mrb[31].mxu1 }
 0x133   :  { %v1520_v0 = vadd.f32 %v1519_v63, %v1518_v60  ;;  %v807_v1 = vadd.f32 %v1517_v59, %v1453_v56  ;;  %v47_v59 = vld [vmem:[#allocation2 + $0x28] sm:$0xff] }
 0x135   :  { %v1965_v2 = vadd.f32 %v1520_v0, %v1456_v62  ;;  %v55_v0 = vld [vmem:[#allocation2 + $0x68] sm:$0xff] }
 0x136   :  { %v1543_v6 = vpop.f32.mrb[32].mxu0 }
 0x137   :  { %v856_v7 = vadd.f32 %v1543_v6, %v1947_v39  ;;  %v1551_v9 = vpop.f32.mrb[32].mxu1  ;;  %v847_v11 = vpop.f32.mrb[33].mxu0 }
 0x138   :  { %v888_v12 = vadd.f32 %v1551_v9, %v791_v33  ;;  %v848_v13 = vadd.f32 %v847_v11, %v1943_v25  ;;  %v879_v15 = vpop.f32.mrb[33].mxu1  ;;  %v1544_v19 = vpop.f32.mrb[34].mxu0 }
 0x139   :  { %v912_v20 = vadd.f32 %v856_v7, %v44_v5  ;;  %v880_v21 = vadd.f32 %v879_v15, %v783_v17  ;;  %v859_v22 = vadd.f32 %v1544_v19, %v1949_v40  ;;  %v1552_v24 = vpop.f32.mrb[34].mxu1  ;;  %v850_v28 = vpop.f32.mrb[35].mxu0 }
 0x13a   :  { %v920_v39 = vadd.f32 %v888_v12, %v52_v8  ;;  %v910_v29 = vadd.f32 %v848_v13, %v42_v10  ;;  %v891_v30 = vadd.f32 %v1552_v24, %v794_v34  ;;  %v851_v31 = vadd.f32 %v850_v28, %v1945_v26  ;;  %v882_v33 = vpop.f32.mrb[35].mxu1  ;;  %v48_v26 = vld [vmem:[#allocation2 + $0x30] sm:$0xff] }
 0x13b   :  { %928 = vst.msk [vmem:[#allocation2 + $0x10] sm:$0xff] %vm25_vm0, %v912_v20  ;;  %v918_v25 = vadd.f32 %v880_v21, %v50_v14  ;;  %v913_v35 = vadd.f32 %v859_v22, %v45_v16  ;;  %v883_v36 = vadd.f32 %v882_v33, %v1959_v18 }
 0x13c   :  { %936 = vst.msk [vmem:[#allocation2 + $0x50] sm:$0xff] %vm25_vm0, %v920_v39  ;;  %926 = vst.msk [vmem:[#allocation2] sm:$0xff] %vm25_vm0, %v910_v29  ;;  %v921_v40 = vadd.f32 %v891_v30, %v53_v23  ;;  %v911_v17 = vadd.f32 %v851_v31, %v43_v27 }
 0x13d   :  { %934 = vst.msk [vmem:[#allocation2 + $0x40] sm:$0xff] %vm25_vm0, %v918_v25  ;;  %929 = vst.msk [vmem:[#allocation2 + $0x18] sm:$0xff] %vm25_vm0, %v913_v35  ;;  %v919_v34 = vadd.f32 %v883_v36, %v51_v32 }
 0x13e   :  { %937 = vst.msk [vmem:[#allocation2 + $0x58] sm:$0xff] %vm25_vm0, %v921_v40  ;;  %927 = vst.msk [vmem:[#allocation2 + $0x8] sm:$0xff] %vm25_vm0, %v911_v17  ;;  %v1547_v37 = vpop.f32.mrb[36].mxu0 }
 0x13f   :  { %935 = vst.msk [vmem:[#allocation2 + $0x48] sm:$0xff] %vm25_vm0, %v919_v34  ;;  %v872_v18 = vadd.f32 %v1547_v37, %v1955_v3  ;;  %v1555_v41 = vpop.f32.mrb[36].mxu1  ;;  %v863_v43 = vpop.f32.mrb[37].mxu0 }
 0x140   :  { %v904_v44 = vadd.f32 %v1555_v41, %v807_v1  ;;  %v864_v45 = vadd.f32 %v863_v43, %v1951_v53  ;;  %v895_v47 = vpop.f32.mrb[37].mxu1  ;;  %v1548_v51 = vpop.f32.mrb[38].mxu0 }
 0x141   :  { %v916_v55 = vadd.f32 %v872_v18, %v48_v26  ;;  %v896_v56 = vadd.f32 %v895_v47, %v1961_v49  ;;  %v875_v3 = vadd.f32 %v1548_v51, %v1957_v4  ;;  %v1556_v58 = vpop.f32.mrb[38].mxu1  ;;  %v866_v60 = vpop.f32.mrb[39].mxu0 }
 0x142   :  { %v924_v61 = vadd.f32 %v904_v44, %v56_v38  ;;  %v914_v53 = vadd.f32 %v864_v45, %v46_v42  ;;  %v907_v62 = vadd.f32 %v1556_v58, %v1965_v2  ;;  %v867_v63 = vadd.f32 %v866_v60, %v1953_v54  ;;  %v898_v1 = vpop.f32.mrb[39].mxu1  ;;  %v947_v5 = vld [vmem:[#allocation2 + $0x10] sm:$0xff] }
 0x143   :  { %v945_v6 = vld [vmem:[#allocation2] sm:$0xff]  ;;  %932 = vst.msk [vmem:[#allocation2 + $0x30] sm:$0xff] %vm25_vm0, %v916_v55  ;;  %v922_v7 = vadd.f32 %v896_v56, %v54_v46  ;;  %v917_v49 = vadd.f32 %v875_v3, %v49_v48  ;;  %v899_v4 = vadd.f32 %v898_v1, %v1963_v50  ;;  %v2001_v12 = vadd.f32 %v1985_v52, %v947_v5  ;;  %v955_v26 = vld [vmem:[#allocation2 + $0x50] sm:$0xff] }
 0x144   :  { %v1994_v8 = vadd.f32 %v1985_v52, %v945_v6  ;;  %940 = vst.msk [vmem:[#allocation2 + $0x70] sm:$0xff] %vm25_vm0, %v924_v61  ;;  %930 = vst.msk [vmem:[#allocation2 + $0x20] sm:$0xff] %vm25_vm0, %v914_v53  ;;  %v925_v2 = vadd.f32 %v907_v62, %v57_v57  ;;  %v915_v9 = vadd.f32 %v867_v63, %v47_v59  ;;  %v948_v54 = vld [vmem:[#allocation2 + $0x18] sm:$0xff]  ;;  %v953_v32 = vld [vmem:[#allocation2 + $0x40] sm:$0xff] }
 0x145   :  { %v946_v10 = vld [vmem:[#allocation2 + $0x8] sm:$0xff]  ;;  %938 = vst.msk [vmem:[#allocation2 + $0x60] sm:$0xff] %vm25_vm0, %v922_v7  ;;  %933 = vst.msk [vmem:[#allocation2 + $0x38] sm:$0xff] %vm25_vm0, %v917_v49  ;;  %v923_v11 = vadd.f32 %v899_v4, %v55_v0  ;;  %v2012_v14 = vadd.f32 %v1985_v52, %v948_v54  ;;  %v989_v19 = vsel %vm25_vm0, %v2001_v12, 0.0  ;;  %v978_v17 = vadd.f32 %v1985_v52, %v953_v32  ;;  %v956_v41 = vld [vmem:[#allocation2 + $0x58] sm:$0xff] }
 0x146   :  { %v2004_v50 = vadd.f32 %v1985_v52, %v946_v10  ;;  %941 = vst.msk [vmem:[#allocation2 + $0x78] sm:$0xff] %vm25_vm0, %v925_v2  ;;  %931 = vst.msk [vmem:[#allocation2 + $0x28] sm:$0xff] %vm25_vm0, %v915_v9  ;;  %v986_v13 = vsel %vm25_vm0, %v1994_v8, 0.0  ;;  %v954_v36 = vld [vmem:[#allocation2 + $0x48] sm:$0xff]  ;;  %v980_v43 = vadd.f32 %v1985_v52, %v955_v26  ;;  %v981_v47 = vadd.f32 %v1985_v52, %v956_v41 }
 0x147   :  { %939 = vst.msk [vmem:[#allocation2 + $0x68] sm:$0xff] %vm25_vm0, %v923_v11  ;;  %v991_v23 = vsel %vm25_vm0, %v2012_v14, 0.0  ;;  %v979_v18 = vadd.f32 %v1985_v52, %v954_v36  ;;  %v1001_v44 = vsel %vm25_vm0, %v978_v17, 0.0 }
 0x148   :  { %v987_v15 = vsel %vm25_vm0, %v2004_v50, 0.0  ;;  %v1005_v56 = vsel %vm25_vm0, %v980_v43, 0.0  ;;  %v1007_v59 = vsel %vm25_vm0, %v981_v47, 0.0 }
 0x149   :  { %v988_v16 = vadd.f32 %v987_v15, %v986_v13  ;;  %v1003_v48 = vsel %vm25_vm0, %v979_v18, 0.0 }
 0x14a   :  { %v951_v21 = vld [vmem:[#allocation2 + $0x30] sm:$0xff] }
 0x14b   :  { %v990_v20 = vadd.f32 %v989_v19, %v988_v16  ;;  %v949_v22 = vld [vmem:[#allocation2 + $0x20] sm:$0xff]  ;;  %v2022_v29 = vadd.f32 %v1985_v52, %v951_v21  ;;  %v959_v57 = vld [vmem:[#allocation2 + $0x70] sm:$0xff] }
 0x14c   :  { %v974_v24 = vadd.f32 %v1985_v52, %v949_v22  ;;  %v952_v28 = vld [vmem:[#allocation2 + $0x38] sm:$0xff]  ;;  %v957_v45 = vld [vmem:[#allocation2 + $0x60] sm:$0xff]  ;;  %v984_v62 = vadd.f32 %v1985_v52, %v959_v57 }
 0x14d   :  { %v992_v27 = vadd.f32 %v991_v23, %v990_v20  ;;  %v950_v39 = vld [vmem:[#allocation2 + $0x28] sm:$0xff]  ;;  %v977_v25 = vadd.f32 %v1985_v52, %v952_v28  ;;  %v997_v34 = vsel %vm25_vm0, %v2022_v29, 0.0  ;;  %v982_v3 = vadd.f32 %v1985_v52, %v957_v45  ;;  %v960_v61 = vld [vmem:[#allocation2 + $0x78] sm:$0xff] }
 0x14e   :  { %v993_v30 = vsel %vm25_vm0, %v974_v24, 0.0  ;;  %v975_v31 = vadd.f32 %v1985_v52, %v950_v39  ;;  %v958_v51 = vld [vmem:[#allocation2 + $0x68] sm:$0xff]  ;;  %v2044_v1 = vadd.f32 %v1985_v52, %v960_v61  ;;  %v1013_v7 = vsel %vm25_vm0, %v984_v62, 0.0 }
 0x14f   :  { %v994_v33 = vadd.f32 %v993_v30, %v992_v27  ;;  %v999_v38 = vsel %vm25_vm0, %v977_v25, 0.0  ;;  %v983_v60 = vadd.f32 %v1985_v52, %v958_v51  ;;  %v1009_v63 = vsel %vm25_vm0, %v982_v3, 0.0 }
 0x150   :  { %v995_v35 = vsel %vm25_vm0, %v975_v31, 0.0  ;;  %v1015_v4 = vsel %vm25_vm0, %v2044_v1, 0.0 }
 0x151   :  { %v996_v40 = vadd.f32 %v995_v35, %v994_v33  ;;  %v1011_v5 = vsel %vm25_vm0, %v983_v60, 0.0 }
 0x153   :  { %v998_v37 = vadd.f32 %v997_v34, %v996_v40 }
 0x155   :  { %v1000_v42 = vadd.f32 %v999_v38, %v998_v37 }
 0x157   :  { %v1002_v46 = vadd.f32 %v1001_v44, %v1000_v42 }
 0x159   :  { %v1004_v55 = vadd.f32 %v1003_v48, %v1002_v46 }
 0x15b   :  { %v1006_v58 = vadd.f32 %v1005_v56, %v1004_v55 }
 0x15d   :  { %v1008_v53 = vadd.f32 %v1007_v59, %v1006_v58 }
 0x15f   :  { %v1010_v0 = vadd.f32 %v1009_v63, %v1008_v53 }
 0x161   :  { %v1012_v6 = vadd.f32 %v1011_v5, %v1010_v0 }
 0x163   :  { %v1014_v49 = vadd.f32 %v1013_v7, %v1012_v6 }
 0x165   :  { %v1016_v2 = vadd.f32 %v1015_v4, %v1014_v49 }
 0x167   :  { %v1017_v9 = vrot.slane %v1016_v2, 4 }
 0x169   :  { %v1018_v54 = vadd.f32 %v1017_v9, %v1016_v2 }
 0x16b   :  { %v1019_v10 = vrot.slane %v1018_v54, 2 }
 0x16d   :  { %v1020_v11 = vadd.f32 %v1019_v10, %v1018_v54 }
 0x16f   :  { %v1021_v13 = vrot.slane %v1020_v11, 1 }
 0x171   :  { %v1022_v15 = vadd.f32 %v1021_v13, %v1020_v11 }
 0x173   :  { %v1024_v16 = vmul.f32 0.0078125, %v1022_v15 }
 0x175   :  { %v2051_v52 = vsub.f32 %v1994_v8, %v1024_v16  ;;  %v2054_v19 = vsub.f32 %v2004_v50, %v1024_v16  ;;  %v2057_v20 = vsub.f32 %v2001_v12, %v1024_v16  ;;  %v2060_v21 = vsub.f32 %v2012_v14, %v1024_v16 }
 0x176   :  { %v2066_v27 = vsub.f32 %v974_v24, %v1024_v16  ;;  %v2070_v28 = vsub.f32 %v975_v31, %v1024_v16  ;;  %v2077_v30 = vsub.f32 %v2022_v29, %v1024_v16  ;;  %v2082_v35 = vsub.f32 %v977_v25, %v1024_v16 }
 0x177   :  { %v1041_v22 = vmul.f32 %v2051_v52, %v2051_v52  ;;  %v1042_v23 = vmul.f32 %v2054_v19, %v2054_v19  ;;  %v1043_v8 = vmul.f32 %v2057_v20, %v2057_v20  ;;  %v1044_v12 = vmul.f32 %v2060_v21, %v2060_v21 }
 0x178   :  { %v1045_v24 = vmul.f32 %v2066_v27, %v2066_v27  ;;  %v1046_v31 = vmul.f32 %v2070_v28, %v2070_v28  ;;  %v2087_v34 = vsub.f32 %v978_v17, %v1024_v16  ;;  %v1047_v29 = vmul.f32 %v2077_v30, %v2077_v30 }
 0x179   :  { %v1057_v50 = vsel %vm25_vm0, %v1041_v22, 0.0  ;;  %v1058_v14 = vsel %vm25_vm0, %v1042_v23, 0.0  ;;  %v1060_v32 = vsel %vm25_vm0, %v1043_v8, 0.0  ;;  %v1062_v36 = vsel %vm25_vm0, %v1044_v12, 0.0 }
 0x17a   :  { %v1059_v39 = vadd.f32 %v1058_v14, %v1057_v50  ;;  %v1064_v26 = vsel %vm25_vm0, %v1045_v24, 0.0  ;;  %v2092_v38 = vsub.f32 %v979_v18, %v1024_v16  ;;  %v1048_v25 = vmul.f32 %v2082_v35, %v2082_v35 }
 0x17b   :  { %v1066_v41 = vsel %vm25_vm0, %v1046_v31, 0.0  ;;  %v2097_v44 = vsub.f32 %v980_v43, %v1024_v16  ;;  %v1049_v17 = vmul.f32 %v2087_v34, %v2087_v34  ;;  %v1068_v45 = vsel %vm25_vm0, %v1047_v29, 0.0 }
 0x17c   :  { %v1061_v33 = vadd.f32 %v1060_v32, %v1059_v39  ;;  %v1036_v48 = vsub.f32 %v981_v47, %v1024_v16  ;;  %v1050_v51 = vmul.f32 %v2092_v38, %v2092_v38  ;;  %v1070_v18 = vsel %vm25_vm0, %v1048_v25, 0.0 }
 0x17d   :  { %v1037_v56 = vsub.f32 %v982_v3, %v1024_v16  ;;  %v1051_v57 = vmul.f32 %v2097_v44, %v2097_v44  ;;  %v1072_v43 = vsel %vm25_vm0, %v1049_v17, 0.0  ;;  %v1038_v59 = vsub.f32 %v983_v60, %v1024_v16 }
 0x17e   :  { %v1063_v40 = vadd.f32 %v1062_v36, %v1061_v33  ;;  %v1052_v61 = vmul.f32 %v1036_v48, %v1036_v48  ;;  %v1074_v53 = vsel %vm25_vm0, %v1050_v51, 0.0  ;;  %v1039_v0 = vsub.f32 %v984_v62, %v1024_v16  ;;  %v962_v33 = vld [vmem:[%s2216_s3] sm:$0x1] }
 0x17f   :  { %v1053_v47 = vmul.f32 %v1037_v56, %v1037_v56  ;;  %v1076_v5 = vsel %vm25_vm0, %v1051_v57, 0.0  ;;  %v1040_v7 = vsub.f32 %v2044_v1, %v1024_v16  ;;  %v1054_v49 = vmul.f32 %v1038_v59, %v1038_v59 }
 0x180   :  { %v1065_v37 = vadd.f32 %v1064_v26, %v1063_v40  ;;  %v1078_v3 = vsel %vm25_vm0, %v1052_v61, 0.0  ;;  %v1055_v2 = vmul.f32 %v1039_v0, %v1039_v0  ;;  %v1099_v24 = vlaneseq }
 0x181   :  { %v1080_v9 = vsel %vm25_vm0, %v1053_v47, 0.0  ;;  %v1056_v60 = vmul.f32 %v1040_v7, %v1040_v7  ;;  %v1082_v10 = vsel %vm25_vm0, %v1054_v49, 0.0 }
 0x182   :  { %v1067_v42 = vadd.f32 %v1066_v41, %v1065_v37  ;;  %v1084_v62 = vsel %vm25_vm0, %v1055_v2, 0.0  ;;  %v1100_v32 = vshrl.u32 %v1099_v24, 7 }
 0x183   :  { %v1086_v15 = vsel %vm25_vm0, %v1056_v60, 0.0 }
 0x184   :  { %v1069_v46 = vadd.f32 %v1068_v45, %v1067_v42  ;;  %v1101_v31 = vsub.s32 0, %v1100_v32  ;;  %v1360_v42 = vld [vmem:[%s2217_s4] ss:$0 sm:$0xff] }
 0x186   :  { %v1071_v55 = vadd.f32 %v1070_v18, %v1069_v46 }
 0x188   :  { %v1073_v58 = vadd.f32 %v1072_v43, %v1071_v55 }
 0x18a   :  { %v1075_v63 = vadd.f32 %v1074_v53, %v1073_v58 }
 0x18c   :  { %v1077_v6 = vadd.f32 %v1076_v5, %v1075_v63 }
 0x18e   :  { %v1079_v4 = vadd.f32 %v1078_v3, %v1077_v6 }
 0x190   :  { %v1081_v54 = vadd.f32 %v1080_v9, %v1079_v4 }
 0x192   :  { %v1083_v11 = vadd.f32 %v1082_v10, %v1081_v54 }
 0x194   :  { %v1085_v13 = vadd.f32 %v1084_v62, %v1083_v11 }
 0x196   :  { %v1087_v22 = vadd.f32 %v1086_v15, %v1085_v13 }
 0x198   :  { %v1088_v23 = vrot.slane %v1087_v22, 4 }
 0x19a   :  { %v1089_v1 = vadd.f32 %v1088_v23, %v1087_v22 }
 0x19c   :  { %v1090_v16 = vrot.slane %v1089_v1, 2 }
 0x19e   :  { %v1091_v8 = vadd.f32 %v1090_v16, %v1089_v1 }
 0x1a0   :  { %v1092_v12 = vrot.slane %v1091_v8, 1 }
 0x1a2   :  { %v1093_v50 = vadd.f32 %v1092_v12, %v1091_v8 }
 0x1a4   :  { %v1094_v14 = vmul.f32 0.0078125, %v1093_v50 }
 0x1a6   :  { %v1095_v39 = vadd.f32 1e-05, %v1094_v14 }
 0x1a8   :  { %1658 = vrsqrt.f32 %v1095_v39 }
 0x1b2   :  { %v1659_v36 = vpop.eup %1658 }
 0x1b3   :  { %v1097_v40 = vmul.f32 %v1659_v36, %v962_v33 }
 0x1b5   :  { %v1102_v29 = vrot.slane %v1097_v40, %v1101_v31 }
 0x1b7   :  { %v1104_v26 = vmul.f32 %v1102_v29, %v2051_v52  ;;  %v1105_v37 = vmul.f32 %v1102_v29, %v2054_v19  ;;  %v1106_v25 = vmul.f32 %v1102_v29, %v2057_v20  ;;  %v1107_v41 = vmul.f32 %v1102_v29, %v2060_v21 }
 0x1b8   :  { %v1108_v17 = vmul.f32 %v1102_v29, %v2066_v27  ;;  %v1109_v45 = vmul.f32 %v1102_v29, %v2070_v28  ;;  %v1110_v46 = vmul.f32 %v1102_v29, %v2077_v30  ;;  %v1111_v51 = vmul.f32 %v1102_v29, %v2082_v35 }
 0x1b9   :  { %v1112_v52 = vmul.f32 %v1102_v29, %v2087_v34  ;;  %v1113_v19 = vmul.f32 %v1102_v29, %v2092_v38  ;;  %v1114_v20 = vmul.f32 %v1102_v29, %v2097_v44  ;;  %v1115_v18 = vmul.f32 %v1102_v29, %v1036_v48 }
 0x1ba   :  { %v1116_v21 = vmul.f32 %v1102_v29, %v1037_v56  ;;  %v1117_v55 = vmul.f32 %v1102_v29, %v1038_v59  ;;  %v1118_v57 = vmul.f32 %v1102_v29, %v1039_v0  ;;  %v1119_v43 = vmul.f32 %v1102_v29, %v1040_v7 }
 0x1bb   :  { %v1126_v58 = vadd.f32 %v1360_v42, %v1104_v26  ;;  %v1127_v61 = vadd.f32 %v1360_v42, %v1105_v37  ;;  %v1128_v27 = vadd.f32 %v1360_v42, %v1106_v25  ;;  %v1129_v53 = vadd.f32 %v1360_v42, %v1107_v41 }
 0x1bc   :  { %v1130_v28 = vadd.f32 %v1360_v42, %v1108_v17  ;;  %v1131_v63 = vadd.f32 %v1360_v42, %v1109_v45  ;;  %v1132_v30 = vadd.f32 %v1360_v42, %v1110_v46  ;;  %v1133_v47 = vadd.f32 %v1360_v42, %v1111_v51 }
 0x1bd   :  { %v1134_v35 = vadd.f32 %v1360_v42, %v1112_v52  ;;  %v1135_v5 = vadd.f32 %v1360_v42, %v1113_v19  ;;  %v1136_v34 = vadd.f32 %v1360_v42, %v1114_v20  ;;  %v1137_v6 = vadd.f32 %v1360_v42, %v1115_v18 }
 0x1be   :  { %v1138_v38 = vadd.f32 %v1360_v42, %v1116_v21  ;;  %v1139_v49 = vadd.f32 %v1360_v42, %v1117_v55  ;;  %v1140_v44 = vadd.f32 %v1360_v42, %v1118_v57  ;;  %v1141_v48 = vadd.f32 %v1360_v42, %v1119_v43 }
 0x1bf   :  { %vm1143_vm2 = vcmp.ge.f32.partialorder %v1127_v61, 0.0  ;;  %vm1144_vm3 = vcmp.ge.f32.partialorder %v1128_v27, 0.0  ;;  %vm1145_vm4 = vcmp.ge.f32.partialorder %v1129_v53, 0.0  ;;  %vm1146_vm5 = vcmp.ge.f32.partialorder %v1130_v28, 0.0 }
 0x1c0   :  { %vm1147_vm6 = vcmp.ge.f32.partialorder %v1131_v63, 0.0  ;;  %vm1149_vm8 = vcmp.ge.f32.partialorder %v1133_v47, 0.0  ;;  %vm1150_vm9 = vcmp.ge.f32.partialorder %v1134_v35, 0.0  ;;  %vm1151_vm10 = vcmp.ge.f32.partialorder %v1135_v5, 0.0 }
 0x1c1   :  { %vm1152_vm11 = vcmp.ge.f32.partialorder %v1136_v34, 0.0  ;;  %vm1153_vm12 = vcmp.ge.f32.partialorder %v1137_v6, 0.0  ;;  %vm1154_vm13 = vcmp.ge.f32.partialorder %v1138_v38, 0.0  ;;  %vm1155_vm14 = vcmp.ge.f32.partialorder %v1139_v49, 0.0 }
 0x1c2   :  { %vm1156_vm15 = vcmp.ge.f32.partialorder %v1140_v44, 0.0  ;;  %vm1157_vm0 = vcmp.ge.f32.partialorder %v1141_v48, 0.0  ;;  %v1158_v56 = vmul.f32 0.2, %v1126_v58  ;;  %v1159_v59 = vmul.f32 0.2, %v1127_v61 }
 0x1c3   :  { %v1160_v0 = vmul.f32 0.2, %v1128_v27  ;;  %v1161_v7 = vmul.f32 0.2, %v1129_v53  ;;  %v1162_v3 = vmul.f32 0.2, %v1130_v28 }
 0x1c4   :  { %v1163_v4 = vmul.f32 0.2, %v1131_v63  ;;  %v1164_v2 = vmul.f32 0.2, %v1132_v30  ;;  %v1165_v9 = vmul.f32 0.2, %v1133_v47  ;;  %v1175_v13 = vsel %vm1143_vm2, %v1127_v61, %v1159_v59 }
 0x1c5   :  { %v1166_v54 = vmul.f32 0.2, %v1134_v35  ;;  %vm2219_vm7 = vcmp.ge.f32.partialorder %v1126_v58, 0.0  ;;  %v1167_v10 = vmul.f32 0.2, %v1135_v5  ;;  %v1176_v1 = vsel %vm1144_vm3, %v1128_v27, %v1160_v0 }
 0x1c6   :  { %v1174_v60 = vsel %vm2219_vm7, %v1126_v58, %v1158_v56  ;;  %v1168_v11 = vmul.f32 0.2, %v1136_v34  ;;  %v1169_v62 = vmul.f32 0.2, %v1137_v6  ;;  %v1170_v15 = vmul.f32 0.2, %v1138_v38 }
 0x1c7   :  { %v1171_v22 = vmul.f32 0.2, %v1139_v49  ;;  %v1172_v23 = vmul.f32 0.2, %v1140_v44  ;;  %v1173_v16 = vmul.f32 0.2, %v1141_v48  ;;  %v1177_v8 = vsel %vm1145_vm4, %v1129_v53, %v1161_v7 }
 0x1c8   :  { %v1178_v12 = vsel %vm1146_vm5, %v1130_v28, %v1162_v3  ;;  %v1179_v50 = vsel %vm1147_vm6, %v1131_v63, %v1163_v4  ;;  %vm2220_vm1 = vcmp.ge.f32.partialorder %v1132_v30, 0.0  ;;  %v1181_v39 = vsel %vm1149_vm8, %v1133_v47, %v1165_v9 }
 0x1c9   :  { %v1180_v14 = vsel %vm2220_vm1, %v1132_v30, %v1164_v2  ;;  %v1182_v24 = vsel %vm1150_vm9, %v1134_v35, %v1166_v54  ;;  %v1183_v32 = vsel %vm1151_vm10, %v1135_v5, %v1167_v10  ;;  %v1184_v33 = vsel %vm1152_vm11, %v1136_v34, %v1168_v11 }
 0x1ca   :  { %v1185_v31 = vsel %vm1153_vm12, %v1137_v6, %v1169_v62  ;;  %v1186_v36 = vsel %vm1154_vm13, %v1138_v38, %v1170_v15  ;;  %v1187_v40 = vsel %vm1155_vm14, %v1139_v49, %v1171_v22  ;;  %v1188_v29 = vsel %vm1156_vm15, %v1140_v44, %v1172_v23 }
 0x1cb   :  { %v1189_v26 = vsel %vm1157_vm0, %v1141_v48, %v1173_v16  ;;  %v1377_v37 = vpack.c.bf16 %v1174_v60, %v1174_v60  ;;  %v1378_v25 = vpack.c.bf16 %v1175_v13, %v1175_v13  ;;  %v1379_v41 = vpack.c.bf16 %v1176_v1, %v1176_v1 }
 0x1cc   :  { %v1380_v42 = vpack.c.bf16 %v1177_v8, %v1177_v8  ;;  %v1381_v17 = vpack.c.bf16 %v1178_v12, %v1178_v12  ;;  %v1382_v45 = vpack.c.bf16 %v1179_v50, %v1179_v50  ;;  %v1383_v46 = vpack.c.bf16 %v1180_v14, %v1180_v14 }
 0x1cd   :  { %v1384_v51 = vpack.c.bf16 %v1181_v39, %v1181_v39  ;;  %v1385_v52 = vpack.c.bf16 %v1182_v24, %v1182_v24  ;;  %v1386_v19 = vpack.c.bf16 %v1183_v32, %v1183_v32  ;;  %vm2221_vm1 = vcmask 519168  }
 0x1ce   :  { %1255 = vst.msk [vmem:[%s2218_s5] sm:$0xf] %vm2221_vm1, %v1377_v37  ;;  %vm2222_vm2 = vmmov %vm2221_vm1  ;;  %v1387_v20 = vpack.c.bf16 %v1184_v33, %v1184_v33  ;;  %v1388_v18 = vpack.c.bf16 %v1185_v31, %v1185_v31  ;;  %v1389_v21 = vpack.c.bf16 %v1186_v36, %v1186_v36  ;;  %v1390_v55 = vpack.c.bf16 %v1187_v40, %v1187_v40 }
 0x1cf   :  { %1256 = vst.msk [vmem:[%s2218_s5 + $0x4] sm:$0xf] %vm2222_vm2, %v1378_v25  ;;  %vm2223_vm3 = vmmov %vm2221_vm1  ;;  %v1391_v57 = vpack.c.bf16 %v1188_v29, %v1188_v29  ;;  %v1392_v43 = vpack.c.bf16 %v1189_v26, %v1189_v26 }
 0x1d0   :  { %1257 = vst.msk [vmem:[%s2218_s5 + $0x8] sm:$0xf] %vm2223_vm3, %v1379_v41  ;;  %vm2224_vm4 = vmmov %vm2221_vm1 }
 0x1d1   :  { %1258 = vst.msk [vmem:[%s2218_s5 + $0xc] sm:$0xf] %vm2224_vm4, %v1380_v42  ;;  %vm2225_vm5 = vmmov %vm2221_vm1 }
 0x1d2   :  { %1259 = vst.msk [vmem:[%s2218_s5 + $0x10] sm:$0xf] %vm2225_vm5, %v1381_v17  ;;  %vm2226_vm6 = vmmov %vm2221_vm1 }
 0x1d3   :  { %1260 = vst.msk [vmem:[%s2218_s5 + $0x14] sm:$0xf] %vm2226_vm6, %v1382_v45  ;;  %vm2227_vm7 = vmmov %vm2221_vm1 }
 0x1d4   :  { %1261 = vst.msk [vmem:[%s2218_s5 + $0x18] sm:$0xf] %vm2227_vm7, %v1383_v46  ;;  %vm2228_vm8 = vmmov %vm2221_vm1 }
 0x1d5   :  { %1262 = vst.msk [vmem:[%s2218_s5 + $0x1c] sm:$0xf] %vm2228_vm8, %v1384_v51  ;;  %vm2229_vm9 = vmmov %vm2221_vm1 }
 0x1d6   :  { %1263 = vst.msk [vmem:[%s2218_s5 + $0x20] sm:$0xf] %vm2229_vm9, %v1385_v52  ;;  %vm2230_vm10 = vmmov %vm2221_vm1 }
 0x1d7   :  { %1264 = vst.msk [vmem:[%s2218_s5 + $0x24] sm:$0xf] %vm2230_vm10, %v1386_v19  ;;  %vm2231_vm11 = vmmov %vm2221_vm1 }
 0x1d8   :  { %1265 = vst.msk [vmem:[%s2218_s5 + $0x28] sm:$0xf] %vm2231_vm11, %v1387_v20  ;;  %vm2232_vm12 = vmmov %vm2221_vm1 }
 0x1d9   :  { %1266 = vst.msk [vmem:[%s2218_s5 + $0x2c] sm:$0xf] %vm2232_vm12, %v1388_v18  ;;  %vm2233_vm13 = vmmov %vm2221_vm1 }
 0x1da   :  { %1267 = vst.msk [vmem:[%s2218_s5 + $0x30] sm:$0xf] %vm2233_vm13, %v1389_v21  ;;  %vm2234_vm14 = vmmov %vm2221_vm1 }
 0x1db   :  { %1268 = vst.msk [vmem:[%s2218_s5 + $0x34] sm:$0xf] %vm2234_vm14, %v1390_v55  ;;  %vm2235_vm15 = vmmov %vm2221_vm1 }
 0x1dc   :  { %1269 = vst.msk [vmem:[%s2218_s5 + $0x38] sm:$0xf] %vm2235_vm15, %v1391_v57  ;;  %vm2236_vm0 = vmmov %vm2221_vm1 }
 0x1dd   :  { %1270 = vst.msk [vmem:[%s2218_s5 + $0x3c] sm:$0xf] %vm2236_vm0, %v1392_v43 }

// kernel: discriminator_forward.11
= control target key start
LH: loop header
LB: loop body
LE: loop exit
PB: predicated region body
PF: predicated region fallthrough
CT: control target
= control target key end

     0   :  { %vm593_vm0 = vcmask 523264   ;;  %s2091_s1 = inlined_call_operand.vmem [shape: bf16[576,128], index: 1, kind: input, shape index: {}]   ;;  %s2092_s0 = inlined_call_operand.vmem [shape: bf16[128,576], index: 0, kind: input, shape index: {}]   ;;  %s2093_s2 = inlined_call_operand.vmem [shape: f32[1,128], index: 2, kind: input, shape index: {}]   ;;  %s2094_s3 = inlined_call_operand.vmem [shape: f32[1,128], index: 3, kind: input, shape index: {}]   ;;  %s2095_s4 = inlined_call_operand.vmem [shape: f32[1,128], index: 4, kind: input, shape index: {}]   ;;  %s2096_s5 = inlined_call_operand.vmem [shape: bf16[128,128], index: 5, kind: output, shape index: {}]  }
   0x1   :  { %v1578_v0 = vld [vmem:[%s2091_s1 + $0x40] sm:$0xff]   ;;  %v1582_v4 = vld [vmem:[%s2091_s1 + $0x48] sm:$0xff]   ;;  %v1586_v8 = vld [vmem:[%s2091_s1 + $0x50] sm:$0xff]  }
   0x2   :  { %v1579_v1 = vld [vmem:[%s2091_s1 + $0xc0] sm:$0xff]   ;;  %1406 = vmatprep.subr.bf16.mxu0 %v1578_v0  ;;  %v1583_v5 = vld [vmem:[%s2091_s1 + $0xc8] sm:$0xff]   ;;  %v1587_v9 = vld [vmem:[%s2091_s1 + $0xd0] sm:$0xff]  }
   0x3   :  { %v1580_v2 = vld [vmem:[%s2091_s1] sm:$0xff]   ;;  %1470 = vmatprep.subr.bf16.mxu1 %v1579_v1  ;;  %v1584_v6 = vld [vmem:[%s2091_s1 + $0x8] sm:$0xff]   ;;  %v1588_v10 = vld [vmem:[%s2091_s1 + $0x10] sm:$0xff]  }
   0x4   :  { %v1581_v3 = vld [vmem:[%s2091_s1 + $0x80] sm:$0xff]   ;;  %1407 = vmatpush3.bf16.msra.mxu0 %v1580_v2  ;;  %v1585_v7 = vld [vmem:[%s2091_s1 + $0x88] sm:$0xff]   ;;  %v1589_v11 = vld [vmem:[%s2091_s1 + $0x90] sm:$0xff]  }
   0x5   :  { %1471 = vmatpush3.bf16.msra.mxu1 %v1581_v3  ;;  %1408 = vmatprep.subr.bf16.mxu0 %v1582_v4  ;;  %v1590_v12 = vld [vmem:[%s2091_s1 + $0x58] sm:$0xff]   ;;  %v1594_v16 = vld [vmem:[%s2091_s1 + $0x60] sm:$0xff]   ;;  %v1598_v20 = vld [vmem:[%s2091_s1 + $0x68] sm:$0xff]  }
   0x6   :  { %1472 = vmatprep.subr.bf16.mxu1 %v1583_v5  ;;  %v1591_v13 = vld [vmem:[%s2091_s1 + $0xd8] sm:$0xff]   ;;  %v1595_v17 = vld [vmem:[%s2091_s1 + $0xe0] sm:$0xff]   ;;  %v1599_v21 = vld [vmem:[%s2091_s1 + $0xe8] sm:$0xff]  }
   0x7   :  { %v1592_v14 = vld [vmem:[%s2091_s1 + $0x18] sm:$0xff]   ;;  %v1596_v18 = vld [vmem:[%s2091_s1 + $0x20] sm:$0xff]   ;;  %v1600_v22 = vld [vmem:[%s2091_s1 + $0x28] sm:$0xff]  }
   0x8   :  { %1409 = vmatpush3.bf16.msra.mxu0 %v1584_v6  ;;  %v1593_v15 = vld [vmem:[%s2091_s1 + $0x98] sm:$0xff]   ;;  %v1597_v19 = vld [vmem:[%s2091_s1 + $0xa0] sm:$0xff]   ;;  %v1601_v23 = vld [vmem:[%s2091_s1 + $0xa8] sm:$0xff]  }
   0x9   :  { %1473 = vmatpush3.bf16.msra.mxu1 %v1585_v7  ;;  %1410 = vmatprep.subr.bf16.mxu0 %v1586_v8  ;;  %v1602_v24 = vld [vmem:[%s2091_s1 + $0x70] sm:$0xff]   ;;  %v1606_v28 = vld [vmem:[%s2091_s1 + $0x78] sm:$0xff]   ;;  %v1615_v35 = vld [vmem:[%s2092_s0 + $0xc] ss:$20 sps:$4 sm:$0xff]  }
   0xa   :  { %1474 = vmatprep.subr.bf16.mxu1 %v1587_v9  ;;  %v1603_v25 = vld [vmem:[%s2091_s1 + $0xf0] sm:$0xff]   ;;  %v1607_v29 = vld [vmem:[%s2091_s1 + $0xf8] sm:$0xff]   ;;  %v1616_v36 = vld [vmem:[%s2091_s1 + $0x100] sm:$0xff]   ;;  %747 = vmatprep.mubr.bf16.mxu1 %v1615_v35 }
   0xb   :  { %v1604_v26 = vld [vmem:[%s2091_s1 + $0x30] sm:$0xff]   ;;  %v1608_v30 = vld [vmem:[%s2091_s1 + $0x38] sm:$0xff]   ;;  %v1617_v37 = vld [vmem:[%s2092_s0 + $0x2c] ss:$20 sps:$4 sm:$0xff]  }
   0xc   :  { %1411 = vmatpush3.bf16.msra.mxu0 %v1588_v10  ;;  %v1605_v27 = vld [vmem:[%s2091_s1 + $0xb0] sm:$0xff]   ;;  %v1609_v31 = vld [vmem:[%s2091_s1 + $0xb8] sm:$0xff]   ;;  %v1629_v42 = vld [vmem:[%s2091_s1 + $0x108] sm:$0xff]  }
   0xd   :  { %1475 = vmatpush3.bf16.msra.mxu1 %v1589_v11  ;;  %1412 = vmatprep.subr.bf16.mxu0 %v1590_v12  ;;  %v1610_v32 = vld [vmem:[%s2092_s0] ss:$20 sps:$4 sm:$0xff]   ;;  %v1612_v33 = vld [vmem:[%s2092_s0 + $0x4] ss:$20 sps:$4 sm:$0xff]   ;;  %v1613_v34 = vld [vmem:[%s2092_s0 + $0x8] ss:$20 sps:$4 sm:$0xff]  }
   0xe   :  { %1476 = vmatprep.subr.bf16.mxu1 %v1591_v13  ;;  %650 = vmatprep.mubr.bf16.mxu0 %v1612_v33  ;;  %v1619_v38 = vld [vmem:[%s2092_s0 + $0x34] ss:$20 sps:$4 sm:$0xff]   ;;  %v1622_v40 = vld [vmem:[%s2092_s0 + $0x30] ss:$20 sps:$4 sm:$0xff]   ;;  %v1628_v45 = vld [vmem:[%s2092_s0 + $0x58] ss:$20 sps:$4 sm:$0xff]  }
   0xf   :  { %v1621_v39 = vld [vmem:[%s2092_s0 + $0x28] ss:$20 sps:$4 sm:$0xff]   ;;  %v1627_v44 = vld [vmem:[%s2092_s0 + $0x50] ss:$20 sps:$4 sm:$0xff]   ;;  %v1634_v50 = vld [vmem:[%s2092_s0 + $0x78] ss:$20 sps:$4 sm:$0xff]  }
  0x10   :  { %1413 = vmatpush3.bf16.msra.mxu0 %v1592_v14  ;;  %v1623_v41 = vld [vmem:[%s2092_s0 + $0x54] ss:$20 sps:$4 sm:$0xff]   ;;  %v1625_v43 = vld [vmem:[%s2092_s0 + $0x5c] ss:$20 sps:$4 sm:$0xff]   ;;  %v1632_v48 = vld [vmem:[%s2092_s0 + $0x84] ss:$20 sps:$4 sm:$0xff]  }
  0x11   :  { %1477 = vmatpush3.bf16.msra.mxu1 %v1593_v15  ;;  %1414 = vmatprep.subr.bf16.mxu0 %v1594_v16  ;;  %v1642_v46 = vld [vmem:[%s2091_s1 + $0x110] sm:$0xff]   ;;  %v1655_v49 = vld [vmem:[%s2091_s1 + $0x118] sm:$0xff]   ;;  %v1638_v53 = vld [vmem:[%s2092_s0 + $0xac] ss:$20 sps:$4 sm:$0xff]  }
  0x12   :  { %1478 = vmatprep.subr.bf16.mxu1 %v1595_v17  ;;  %v1630_v47 = vld [vmem:[%s2092_s0 + $0x7c] ss:$20 sps:$4 sm:$0xff]   ;;  %v1635_v51 = vld [vmem:[%s2092_s0 + $0x80] ss:$20 sps:$4 sm:$0xff]   ;;  %v1636_v52 = vld [vmem:[%s2092_s0 + $0xa4] ss:$20 sps:$4 sm:$0xff]  }
  0x13   :  { %v1640_v54 = vld [vmem:[%s2092_s0 + $0xa0] ss:$20 sps:$4 sm:$0xff]   ;;  %v1641_v55 = vld [vmem:[%s2092_s0 + $0xa8] ss:$20 sps:$4 sm:$0xff]   ;;  %v1648_v59 = vld [vmem:[%s2092_s0 + $0xd0] ss:$20 sps:$4 sm:$0xff]  }
  0x14   :  { %1415 = vmatpush3.bf16.msra.mxu0 %v1596_v18  ;;  %v1643_v56 = vld [vmem:[%s2092_s0 + $0xcc] ss:$20 sps:$4 sm:$0xff]   ;;  %v1645_v57 = vld [vmem:[%s2092_s0 + $0xd4] ss:$20 sps:$4 sm:$0xff]   ;;  %v1651_v61 = vld [vmem:[%s2092_s0 + $0xfc] ss:$20 sps:$4 sm:$0xff]  }
  0x15   :  { %1479 = vmatpush3.bf16.msra.mxu1 %v1597_v19  ;;  %1416 = vmatprep.subr.bf16.mxu0 %v1598_v20  ;;  %v1647_v58 = vld [vmem:[%s2092_s0 + $0xc8] ss:$20 sps:$4 sm:$0xff]   ;;  %v1653_v62 = vld [vmem:[%s2092_s0 + $0xf0] ss:$20 sps:$4 sm:$0xff]   ;;  %v1654_v63 = vld [vmem:[%s2092_s0 + $0xf8] ss:$20 sps:$4 sm:$0xff]  }
  0x16   :  { %1480 = vmatprep.subr.bf16.mxu1 %v1599_v21  ;;  %v1649_v60 = vld [vmem:[%s2092_s0 + $0xf4] ss:$20 sps:$4 sm:$0xff]   ;;  %v1656_v0 = vld [vmem:[%s2092_s0 + $0x11c] ss:$20 sps:$4 sm:$0xff]   ;;  %v1658_v1 = vld [vmem:[%s2092_s0 + $0x124] ss:$20 sps:$4 sm:$0xff]  }
  0x17   :  { %v1660_v2 = vld [vmem:[%s2092_s0 + $0x118] ss:$20 sps:$4 sm:$0xff]   ;;  %v1661_v3 = vld [vmem:[%s2092_s0 + $0x120] ss:$20 sps:$4 sm:$0xff]   ;;  %v1662_v4 = vld [vmem:[%s2092_s0 + $0x10] ss:$20 sps:$4 sm:$0xff]  }
  0x18   :  { %1417 = vmatpush3.bf16.msra.mxu0 %v1600_v22  ;;  %v1663_v5 = vld [vmem:[%s2092_s0 + $0xb0] ss:$20 sps:$4 sm:$0xff]   ;;  %v1664_v6 = vld [vmem:[%s2092_s0 + $0x38] ss:$20 sps:$4 sm:$0xff]   ;;  %v1666_v8 = vld [vmem:[%s2092_s0 + $0x60] ss:$20 sps:$4 sm:$0xff]  }
  0x19   :  { %1481 = vmatpush3.bf16.msra.mxu1 %v1601_v23  ;;  %1418 = vmatprep.subr.bf16.mxu0 %v1602_v24  ;;  %v1665_v7 = vld [vmem:[%s2092_s0 + $0xd8] ss:$20 sps:$4 sm:$0xff]   ;;  %v1667_v9 = vld [vmem:[%s2092_s0 + $0x100] ss:$20 sps:$4 sm:$0xff]   ;;  %v1668_v10 = vld [vmem:[%s2092_s0 + $0x88] ss:$20 sps:$4 sm:$0xff]  }
  0x1a   :  { %1482 = vmatprep.subr.bf16.mxu1 %v1603_v25  ;;  %v1669_v11 = vld [vmem:[%s2092_s0 + $0x128] ss:$20 sps:$4 sm:$0xff]  }
  0x1c   :  { %1419 = vmatpush3.bf16.msra.mxu0 %v1604_v26 }
  0x1d   :  { %1483 = vmatpush3.bf16.msra.mxu1 %v1605_v27  ;;  %1420 = vmatprep.subr.bf16.mxu0 %v1606_v28 }
  0x1e   :  { %1484 = vmatprep.subr.bf16.mxu1 %v1607_v29 }
  0x20   :  { %1421 = vmatpush3.bf16.msra.mxu0 %v1608_v30 }
  0x21   :  { %1485 = vmatpush3.bf16.msra.mxu1 %v1609_v31  ;;  %1546 = vmatprep.subr.bf16.mxu0 %v1616_v36 }
  0x22   :  { %1570 = vmatprep.subr.bf16.mxu1 %v1616_v36 }
  0x23   :  { %651 = vmatmul.mubr.bf16.vlgmr.msra.gmra.mrb[0].mxu0 %v1610_v32 }
  0x24   :  { %748 = vmatmul.mubr.bf16.vlgmr.msra.gmra.mrb[0].mxu1 %v1613_v34  ;;  %1547 = vmatpush3.bf16.msra.mxu0 %v1616_v36 }
  0x25   :  { %658 = vmatprep.mubr.bf16.mxu0 %v1617_v37  ;;  %755 = vmatprep.mubr.bf16.mxu1 %v1619_v38 }
  0x26   :  { %1574 = vmatpush3.bf16.msra.mxu1 %v1616_v36  ;;  %1548 = vmatprep.subr.bf16.mxu0 %v1629_v42 }
  0x27   :  { %1571 = vmatprep.subr.bf16.mxu1 %v1629_v42 }
  0x28   :  { %1549 = vmatpush3.bf16.msra.mxu0 %v1629_v42 }
  0x29   :  { %1550 = vmatprep.subr.bf16.mxu0 %v1642_v46 }
  0x2a   :  { %1575 = vmatpush3.bf16.msra.mxu1 %v1629_v42 }
  0x2b   :  { %659 = vmatmul.mubr.bf16.gmra.mrb[4].mxu0 %v1621_v39  ;;  %1572 = vmatprep.subr.bf16.mxu1 %v1642_v46 }
  0x2c   :  { %756 = vmatmul.mubr.bf16.gmra.mrb[4].mxu1 %v1622_v40  ;;  %666 = vmatprep.mubr.bf16.mxu0 %v1623_v41 }
  0x2d   :  { %763 = vmatprep.mubr.bf16.mxu1 %v1625_v43  ;;  %1551 = vmatpush3.bf16.msra.mxu0 %v1642_v46 }
  0x2e   :  { %1576 = vmatpush3.bf16.msra.mxu1 %v1642_v46  ;;  %1552 = vmatprep.subr.bf16.mxu0 %v1655_v49 }
  0x2f   :  { %1573 = vmatprep.subr.bf16.mxu1 %v1655_v49 }
  0x31   :  { %1553 = vmatpush3.bf16.msra.mxu0 %v1655_v49 }
  0x32   :  { %1577 = vmatpush3.bf16.msra.mxu1 %v1655_v49 }
  0x33   :  { %667 = vmatmul.mubr.bf16.gmra.mrb[8].mxu0 %v1627_v44 }
  0x34   :  { %764 = vmatmul.mubr.bf16.gmra.mrb[8].mxu1 %v1628_v45  ;;  %674 = vmatprep.mubr.bf16.mxu0 %v1630_v47 }
  0x35   :  { %771 = vmatprep.mubr.bf16.mxu1 %v1632_v48 }
  0x3b   :  { %675 = vmatmul.mubr.bf16.gmra.mrb[12].mxu0 %v1634_v50 }
  0x3c   :  { %772 = vmatmul.mubr.bf16.gmra.mrb[12].mxu1 %v1635_v51  ;;  %682 = vmatprep.mubr.bf16.mxu0 %v1636_v52 }
  0x3d   :  { %779 = vmatprep.mubr.bf16.mxu1 %v1638_v53 }
  0x43   :  { %683 = vmatmul.mubr.bf16.gmra.mrb[16].mxu0 %v1640_v54 }
  0x44   :  { %780 = vmatmul.mubr.bf16.gmra.mrb[16].mxu1 %v1641_v55  ;;  %690 = vmatprep.mubr.bf16.mxu0 %v1643_v56 }
  0x45   :  { %787 = vmatprep.mubr.bf16.mxu1 %v1645_v57 }
  0x4b   :  { %691 = vmatmul.mubr.bf16.gmra.mrb[20].mxu0 %v1647_v58 }
  0x4c   :  { %788 = vmatmul.mubr.bf16.gmra.mrb[20].mxu1 %v1648_v59  ;;  %698 = vmatprep.mubr.bf16.mxu0 %v1649_v60 }
  0x4d   :  { %795 = vmatprep.mubr.bf16.mxu1 %v1651_v61 }
  0x53   :  { %699 = vmatmul.mubr.bf16.gmra.mrb[24].mxu0 %v1653_v62 }
  0x54   :  { %796 = vmatmul.mubr.bf16.gmra.mrb[24].mxu1 %v1654_v63  ;;  %706 = vmatprep.mubr.bf16.mxu0 %v1656_v0 }
  0x55   :  { %803 = vmatprep.mubr.bf16.mxu1 %v1658_v1 }
  0x5b   :  { %707 = vmatmul.mubr.bf16.gmra.mrb[28].mxu0 %v1660_v2 }
  0x5c   :  { %804 = vmatmul.mubr.bf16.gmra.mrb[28].mxu1 %v1661_v3  ;;  %1554 = vmatprep.mubr.msk.bf16.mxu0 %vm593_vm0, %v1662_v4 }
  0x5d   :  { %1562 = vmatprep.mubr.msk.bf16.mxu1 %vm593_vm0, %v1663_v5 }
  0x63   :  { %1555 = vmatmul.mubr.msk.bf16.vlgmr.msra.gmra.mrb[32].mxu0 %vm593_vm0, %v1664_v6 }
  0x64   :  { %1563 = vmatmul.mubr.msk.bf16.vlgmr.msra.gmra.mrb[32].mxu1 %vm593_vm0, %v1665_v7  ;;  %1558 = vmatprep.mubr.msk.bf16.mxu0 %vm593_vm0, %v1666_v8 }
  0x65   :  { %1566 = vmatprep.mubr.msk.bf16.mxu1 %vm593_vm0, %v1667_v9 }
  0x6b   :  { %1559 = vmatmul.mubr.msk.bf16.gmra.mrb[36].mxu0 %vm593_vm0, %v1668_v10 }
  0x6c   :  { %1567 = vmatmul.mubr.msk.bf16.gmra.mrb[36].mxu1 %vm593_vm0, %v1669_v11 }
  0xf6   :  { %v1422_v12 = vpop.f32.mrb[0].mxu0 }
  0xf7   :  { %v1486_v13 = vpop.f32.mrb[0].mxu1  ;;  %v1423_v14 = vpop.f32.mrb[1].mxu0 }
  0xf8   :  { %v1424_v15 = vadd.f32 %v1423_v14, %v1422_v12  ;;  %v1487_v16 = vpop.f32.mrb[1].mxu1  ;;  %v1425_v17 = vpop.f32.mrb[2].mxu0 }
  0xf9   :  { %v1488_v18 = vadd.f32 %v1487_v16, %v1486_v13  ;;  %v1489_v19 = vpop.f32.mrb[2].mxu1  ;;  %v1426_v20 = vpop.f32.mrb[3].mxu0 }
  0xfa   :  { %v1427_v21 = vadd.f32 %v1426_v20, %v1425_v17  ;;  %v1490_v22 = vpop.f32.mrb[3].mxu1 }
  0xfb   :  { %v1491_v23 = vadd.f32 %v1490_v22, %v1489_v19  ;;  %v1938_v24 = vadd.f32 %v1488_v18, %v1424_v15 }
  0xfd   :  { %v1940_v25 = vadd.f32 %v1491_v23, %v1427_v21 }
  0xfe   :  { %v1428_v26 = vpop.f32.mrb[4].mxu0 }
  0xff   :  { %v1492_v27 = vpop.f32.mrb[4].mxu1  ;;  %v1429_v28 = vpop.f32.mrb[5].mxu0 }
 0x100   :  { %v1430_v29 = vadd.f32 %v1429_v28, %v1428_v26  ;;  %v1493_v30 = vpop.f32.mrb[5].mxu1  ;;  %v1431_v31 = vpop.f32.mrb[6].mxu0 }
 0x101   :  { %v1494_v32 = vadd.f32 %v1493_v30, %v1492_v27  ;;  %v1495_v33 = vpop.f32.mrb[6].mxu1  ;;  %v1432_v34 = vpop.f32.mrb[7].mxu0 }
 0x102   :  { %v1433_v35 = vadd.f32 %v1432_v34, %v1431_v31  ;;  %v1496_v36 = vpop.f32.mrb[7].mxu1 }
 0x103   :  { %v1497_v37 = vadd.f32 %v1496_v36, %v1495_v33  ;;  %v1942_v38 = vadd.f32 %v1494_v32, %v1430_v29 }
 0x105   :  { %v1944_v39 = vadd.f32 %v1497_v37, %v1433_v35 }
 0x106   :  { %v1434_v40 = vpop.f32.mrb[8].mxu0 }
 0x107   :  { %v1498_v41 = vpop.f32.mrb[8].mxu1  ;;  %v1435_v42 = vpop.f32.mrb[9].mxu0 }
 0x108   :  { %v1436_v43 = vadd.f32 %v1435_v42, %v1434_v40  ;;  %v1499_v44 = vpop.f32.mrb[9].mxu1  ;;  %v1437_v45 = vpop.f32.mrb[10].mxu0 }
 0x109   :  { %v1500_v46 = vadd.f32 %v1499_v44, %v1498_v41  ;;  %v1501_v47 = vpop.f32.mrb[10].mxu1  ;;  %v1438_v48 = vpop.f32.mrb[11].mxu0 }
 0x10a   :  { %v1439_v49 = vadd.f32 %v1438_v48, %v1437_v45  ;;  %v1502_v50 = vpop.f32.mrb[11].mxu1 }
 0x10b   :  { %v1503_v51 = vadd.f32 %v1502_v50, %v1501_v47  ;;  %v1946_v52 = vadd.f32 %v1500_v46, %v1436_v43 }
 0x10d   :  { %v1948_v53 = vadd.f32 %v1503_v51, %v1439_v49 }
 0x10e   :  { %v1440_v54 = vpop.f32.mrb[12].mxu0 }
 0x10f   :  { %v1504_v55 = vpop.f32.mrb[12].mxu1  ;;  %v1441_v56 = vpop.f32.mrb[13].mxu0 }
 0x110   :  { %v1442_v57 = vadd.f32 %v1441_v56, %v1440_v54  ;;  %v1505_v58 = vpop.f32.mrb[13].mxu1  ;;  %v1443_v59 = vpop.f32.mrb[14].mxu0 }
 0x111   :  { %v1506_v60 = vadd.f32 %v1505_v58, %v1504_v55  ;;  %v1507_v61 = vpop.f32.mrb[14].mxu1  ;;  %v1444_v62 = vpop.f32.mrb[15].mxu0 }
 0x112   :  { %v1445_v63 = vadd.f32 %v1444_v62, %v1443_v59  ;;  %v1508_v0 = vpop.f32.mrb[15].mxu1 }
 0x113   :  { %v1509_v1 = vadd.f32 %v1508_v0, %v1507_v61  ;;  %v1950_v2 = vadd.f32 %v1506_v60, %v1442_v57 }
 0x115   :  { %v1952_v3 = vadd.f32 %v1509_v1, %v1445_v63 }
 0x116   :  { %v1446_v4 = vpop.f32.mrb[16].mxu0 }
 0x117   :  { %v1510_v5 = vpop.f32.mrb[16].mxu1  ;;  %v1447_v6 = vpop.f32.mrb[17].mxu0 }
 0x118   :  { %v1448_v7 = vadd.f32 %v1447_v6, %v1446_v4  ;;  %v1511_v8 = vpop.f32.mrb[17].mxu1  ;;  %v1449_v9 = vpop.f32.mrb[18].mxu0 }
 0x119   :  { %v1512_v10 = vadd.f32 %v1511_v8, %v1510_v5  ;;  %v1513_v11 = vpop.f32.mrb[18].mxu1  ;;  %v1450_v12 = vpop.f32.mrb[19].mxu0 }
 0x11a   :  { %v1451_v13 = vadd.f32 %v1450_v12, %v1449_v9  ;;  %v1514_v14 = vpop.f32.mrb[19].mxu1  ;;  %v1325_v12 = vld [vmem:[%s2093_s2] ss:$0 sm:$0xff] }
 0x11b   :  { %v1515_v15 = vadd.f32 %v1514_v14, %v1513_v11  ;;  %v782_v16 = vadd.f32 %v1512_v10, %v1448_v7 }
 0x11d   :  { %v785_v17 = vadd.f32 %v1515_v15, %v1451_v13 }
 0x11e   :  { %v1452_v18 = vpop.f32.mrb[20].mxu0 }
 0x11f   :  { %v1516_v19 = vpop.f32.mrb[20].mxu1  ;;  %v1453_v20 = vpop.f32.mrb[21].mxu0 }
 0x120   :  { %v1454_v21 = vadd.f32 %v1453_v20, %v1452_v18  ;;  %v1517_v22 = vpop.f32.mrb[21].mxu1  ;;  %v1455_v23 = vpop.f32.mrb[22].mxu0 }
 0x121   :  { %v1518_v26 = vadd.f32 %v1517_v22, %v1516_v19  ;;  %v1519_v27 = vpop.f32.mrb[22].mxu1  ;;  %v1456_v28 = vpop.f32.mrb[23].mxu0 }
 0x122   :  { %v1457_v29 = vadd.f32 %v1456_v28, %v1455_v23  ;;  %v1520_v30 = vpop.f32.mrb[23].mxu1 }
 0x123   :  { %v1521_v31 = vadd.f32 %v1520_v30, %v1519_v27  ;;  %v790_v32 = vadd.f32 %v1518_v26, %v1454_v21 }
 0x125   :  { %v793_v33 = vadd.f32 %v1521_v31, %v1457_v29 }
 0x126   :  { %v1458_v34 = vpop.f32.mrb[24].mxu0 }
 0x127   :  { %v1522_v35 = vpop.f32.mrb[24].mxu1  ;;  %v1459_v36 = vpop.f32.mrb[25].mxu0 }
 0x128   :  { %v1460_v37 = vadd.f32 %v1459_v36, %v1458_v34  ;;  %v1523_v40 = vpop.f32.mrb[25].mxu1  ;;  %v1461_v41 = vpop.f32.mrb[26].mxu0 }
 0x129   :  { %v1524_v42 = vadd.f32 %v1523_v40, %v1522_v35  ;;  %v1525_v43 = vpop.f32.mrb[26].mxu1  ;;  %v1462_v44 = vpop.f32.mrb[27].mxu0 }
 0x12a   :  { %v1463_v45 = vadd.f32 %v1462_v44, %v1461_v41  ;;  %v1526_v46 = vpop.f32.mrb[27].mxu1 }
 0x12b   :  { %v1527_v47 = vadd.f32 %v1526_v46, %v1525_v43  ;;  %v798_v48 = vadd.f32 %v1524_v42, %v1460_v37 }
 0x12d   :  { %v801_v49 = vadd.f32 %v1527_v47, %v1463_v45 }
 0x12e   :  { %v1464_v50 = vpop.f32.mrb[28].mxu0 }
 0x12f   :  { %v1528_v51 = vpop.f32.mrb[28].mxu1  ;;  %v1465_v54 = vpop.f32.mrb[29].mxu0 }
 0x130   :  { %v1466_v55 = vadd.f32 %v1465_v54, %v1464_v50  ;;  %v1529_v56 = vpop.f32.mrb[29].mxu1  ;;  %v1467_v57 = vpop.f32.mrb[30].mxu0 }
 0x131   :  { %v1530_v58 = vadd.f32 %v1529_v56, %v1528_v51  ;;  %v1531_v59 = vpop.f32.mrb[30].mxu1  ;;  %v1468_v60 = vpop.f32.mrb[31].mxu0 }
 0x132   :  { %v1469_v61 = vadd.f32 %v1468_v60, %v1467_v57  ;;  %v1532_v62 = vpop.f32.mrb[31].mxu1 }
 0x133   :  { %v1533_v63 = vadd.f32 %v1532_v62, %v1531_v59  ;;  %v806_v0 = vadd.f32 %v1530_v58, %v1466_v55 }
 0x135   :  { %v809_v1 = vadd.f32 %v1533_v63, %v1469_v61 }
 0x136   :  { %v1556_v4 = vpop.f32.mrb[32].mxu0 }
 0x137   :  { %v855_v5 = vadd.f32 %v1556_v4, %v1942_v38  ;;  %v1564_v6 = vpop.f32.mrb[32].mxu1  ;;  %v846_v7 = vpop.f32.mrb[33].mxu0 }
 0x138   :  { %v887_v8 = vadd.f32 %v1564_v6, %v790_v32  ;;  %v847_v9 = vadd.f32 %v846_v7, %v1938_v24  ;;  %v878_v10 = vpop.f32.mrb[33].mxu1  ;;  %v1557_v11 = vpop.f32.mrb[34].mxu0 }
 0x139   :  { %v879_v13 = vadd.f32 %v878_v10, %v782_v16  ;;  %v858_v14 = vadd.f32 %v1557_v11, %v1944_v39  ;;  %v1565_v15 = vpop.f32.mrb[34].mxu1  ;;  %v849_v18 = vpop.f32.mrb[35].mxu0  ;;  %v971_v26 = vadd.f32 %v1325_v12, %v855_v5 }
 0x13a   :  { %v890_v19 = vadd.f32 %v1565_v15, %v793_v33  ;;  %v850_v20 = vadd.f32 %v849_v18, %v1940_v25  ;;  %v881_v38 = vpop.f32.mrb[35].mxu1  ;;  %v969_v22 = vadd.f32 %v1325_v12, %v847_v9 }
 0x13b   :  { %v882_v21 = vadd.f32 %v881_v38, %v785_v17  ;;  %v972_v31 = vadd.f32 %v1325_v12, %v858_v14  ;;  %v977_v51 = vadd.f32 %v1325_v12, %v879_v13 }
 0x13c   :  { %v970_v23 = vadd.f32 %v1325_v12, %v850_v20  ;;  %v980_v57 = vadd.f32 %v1325_v12, %v890_v19 }
 0x13e   :  { %v985_v24 = vadd.f32 %v970_v23, %v969_v22  ;;  %v1560_v27 = vpop.f32.mrb[36].mxu0 }
 0x13f   :  { %v871_v28 = vadd.f32 %v1560_v27, %v1950_v2  ;;  %v1568_v29 = vpop.f32.mrb[36].mxu1  ;;  %v862_v30 = vpop.f32.mrb[37].mxu0 }
 0x140   :  { %v986_v16 = vadd.f32 %v985_v24, %v971_v26  ;;  %v903_v32 = vadd.f32 %v1568_v29, %v806_v0  ;;  %v863_v39 = vadd.f32 %v862_v30, %v1946_v52  ;;  %v894_v34 = vpop.f32.mrb[37].mxu1  ;;  %v1561_v33 = vpop.f32.mrb[38].mxu0 }
 0x141   :  { %v895_v35 = vadd.f32 %v894_v34, %v798_v48  ;;  %v874_v25 = vadd.f32 %v1561_v33, %v1952_v3  ;;  %v1569_v17 = vpop.f32.mrb[38].mxu1  ;;  %v865_v36 = vpop.f32.mrb[39].mxu0  ;;  %v975_v46 = vadd.f32 %v1325_v12, %v871_v28  ;;  %v978_v48 = vadd.f32 %v1325_v12, %v882_v21 }
 0x142   :  { %v973_v37 = vadd.f32 %v1325_v12, %v863_v39  ;;  %v987_v40 = vadd.f32 %v986_v16, %v972_v31  ;;  %v906_v41 = vadd.f32 %v1569_v17, %v809_v1  ;;  %v897_v42 = vpop.f32.mrb[39].mxu1  ;;  %v866_v2 = vadd.f32 %v865_v36, %v1948_v53 }
 0x143   :  { %v898_v43 = vadd.f32 %v897_v42, %v801_v49  ;;  %v976_v50 = vadd.f32 %v1325_v12, %v874_v25  ;;  %v979_v3 = vadd.f32 %v1325_v12, %v887_v8  ;;  %v981_v59 = vadd.f32 %v1325_v12, %v895_v35 }
 0x144   :  { %v988_v44 = vadd.f32 %v987_v40, %v973_v37  ;;  %v974_v45 = vadd.f32 %v1325_v12, %v866_v2  ;;  %v983_v53 = vadd.f32 %v1325_v12, %v903_v32  ;;  %v984_v63 = vadd.f32 %v1325_v12, %v906_v41 }
 0x145   :  { %v982_v61 = vadd.f32 %v1325_v12, %v898_v43 }
 0x146   :  { %v989_v47 = vadd.f32 %v988_v44, %v974_v45 }
 0x148   :  { %v990_v52 = vadd.f32 %v989_v47, %v975_v46 }
 0x14a   :  { %v991_v54 = vadd.f32 %v990_v52, %v976_v50 }
 0x14c   :  { %v992_v55 = vadd.f32 %v991_v54, %v977_v51 }
 0x14e   :  { %v993_v56 = vadd.f32 %v992_v55, %v978_v48 }
 0x150   :  { %v994_v58 = vadd.f32 %v993_v56, %v979_v3 }
 0x152   :  { %v995_v60 = vadd.f32 %v994_v58, %v980_v57 }
 0x154   :  { %v996_v62 = vadd.f32 %v995_v60, %v981_v59 }
 0x156   :  { %v997_v49 = vadd.f32 %v996_v62, %v982_v61 }
 0x158   :  { %v998_v0 = vadd.f32 %v997_v49, %v983_v53 }
 0x15a   :  { %v999_v1 = vadd.f32 %v998_v0, %v984_v63  ;;  %v1066_v0 = vlaneseq }
 0x15c   :  { %v1000_v4 = vrot.slane %v999_v1, 4 }
 0x15e   :  { %v1001_v5 = vadd.f32 %v1000_v4, %v999_v1  ;;  %v1067_v1 = vshrl.u32 %v1066_v0, 7  ;;  %v961_v4 = vld [vmem:[%s2094_s3] sm:$0x1] }
 0x160   :  { %v1002_v6 = vrot.slane %v1001_v5, 2 }
 0x162   :  { %v1003_v7 = vadd.f32 %v1002_v6, %v1001_v5  ;;  %v1068_v5 = vsub.s32 0, %v1067_v1 }
 0x164   :  { %v1004_v9 = vrot.slane %v1003_v7, 1 }
 0x166   :  { %v1005_v10 = vadd.f32 %v1004_v9, %v1003_v7 }
 0x168   :  { %v1007_v11 = vmul.f32 0.0078125, %v1005_v10 }
 0x16a   :  { %v1965_v8 = vsub.f32 %v969_v22, %v1007_v11  ;;  %v1967_v13 = vsub.f32 %v970_v23, %v1007_v11  ;;  %v1969_v14 = vsub.f32 %v971_v26, %v1007_v11  ;;  %v1971_v15 = vsub.f32 %v972_v31, %v1007_v11 }
 0x16b   :  { %v1973_v18 = vsub.f32 %v973_v37, %v1007_v11  ;;  %v1975_v12 = vsub.f32 %v974_v45, %v1007_v11  ;;  %v1977_v19 = vsub.f32 %v975_v46, %v1007_v11  ;;  %v1979_v20 = vsub.f32 %v976_v50, %v1007_v11 }
 0x16c   :  { %v1981_v38 = vsub.f32 %v977_v51, %v1007_v11  ;;  %v1983_v21 = vsub.f32 %v978_v48, %v1007_v11  ;;  %v1985_v22 = vsub.f32 %v979_v3, %v1007_v11  ;;  %v1987_v23 = vsub.f32 %v980_v57, %v1007_v11 }
 0x16d   :  { %v1989_v26 = vsub.f32 %v981_v59, %v1007_v11  ;;  %v1991_v24 = vsub.f32 %v982_v61, %v1007_v11  ;;  %v1993_v27 = vsub.f32 %v983_v53, %v1007_v11  ;;  %v1995_v28 = vsub.f32 %v984_v63, %v1007_v11 }
 0x16e   :  { %v1024_v29 = vmul.f32 %v1965_v8, %v1965_v8  ;;  %v1025_v30 = vmul.f32 %v1967_v13, %v1967_v13  ;;  %v1026_v31 = vmul.f32 %v1969_v14, %v1969_v14  ;;  %v1027_v32 = vmul.f32 %v1971_v15, %v1971_v15 }
 0x16f   :  { %v1028_v34 = vmul.f32 %v1973_v18, %v1973_v18  ;;  %v1029_v35 = vmul.f32 %v1975_v12, %v1975_v12  ;;  %v1030_v17 = vmul.f32 %v1977_v19, %v1977_v19  ;;  %v1031_v37 = vmul.f32 %v1979_v20, %v1979_v20 }
 0x170   :  { %v1040_v16 = vadd.f32 %v1025_v30, %v1024_v29  ;;  %v1032_v41 = vmul.f32 %v1981_v38, %v1981_v38  ;;  %v1033_v2 = vmul.f32 %v1983_v21, %v1983_v21  ;;  %v1034_v44 = vmul.f32 %v1985_v22, %v1985_v22 }
 0x171   :  { %v1035_v46 = vmul.f32 %v1987_v23, %v1987_v23  ;;  %v1036_v50 = vmul.f32 %v1989_v26, %v1989_v26  ;;  %v1037_v51 = vmul.f32 %v1991_v24, %v1991_v24  ;;  %v1038_v48 = vmul.f32 %v1993_v27, %v1993_v27 }
 0x172   :  { %v1041_v39 = vadd.f32 %v1040_v16, %v1026_v31  ;;  %v1039_v3 = vmul.f32 %v1995_v28, %v1995_v28  ;;  %v1326_v31 = vld [vmem:[%s2095_s4] ss:$0 sm:$0xff] }
 0x174   :  { %v1042_v33 = vadd.f32 %v1041_v39, %v1027_v32 }
 0x176   :  { %v1043_v25 = vadd.f32 %v1042_v33, %v1028_v34 }
 0x178   :  { %v1044_v36 = vadd.f32 %v1043_v25, %v1029_v35 }
 0x17a   :  { %v1045_v40 = vadd.f32 %v1044_v36, %v1030_v17 }
 0x17c   :  { %v1046_v42 = vadd.f32 %v1045_v40, %v1031_v37 }
 0x17e   :  { %v1047_v43 = vadd.f32 %v1046_v42, %v1032_v41 }
 0x180   :  { %v1048_v45 = vadd.f32 %v1047_v43, %v1033_v2 }
 0x182   :  { %v1049_v47 = vadd.f32 %v1048_v45, %v1034_v44 }
 0x184   :  { %v1050_v52 = vadd.f32 %v1049_v47, %v1035_v46 }
 0x186   :  { %v1051_v54 = vadd.f32 %v1050_v52, %v1036_v50 }
 0x188   :  { %v1052_v55 = vadd.f32 %v1051_v54, %v1037_v51 }
 0x18a   :  { %v1053_v56 = vadd.f32 %v1052_v55, %v1038_v48 }
 0x18c   :  { %v1054_v57 = vadd.f32 %v1053_v56, %v1039_v3 }
 0x18e   :  { %v1055_v58 = vrot.slane %v1054_v57, 4 }
 0x190   :  { %v1056_v59 = vadd.f32 %v1055_v58, %v1054_v57 }
 0x192   :  { %v1057_v60 = vrot.slane %v1056_v59, 2 }
 0x194   :  { %v1058_v61 = vadd.f32 %v1057_v60, %v1056_v59 }
 0x196   :  { %v1059_v62 = vrot.slane %v1058_v61, 1 }
 0x198   :  { %v1060_v53 = vadd.f32 %v1059_v62, %v1058_v61 }
 0x19a   :  { %v1061_v49 = vmul.f32 0.0078125, %v1060_v53 }
 0x19c   :  { %v1062_v63 = vadd.f32 1e-05, %v1061_v49 }
 0x19e   :  { %1670 = vrsqrt.f32 %v1062_v63 }
 0x1a8   :  { %v1671_v6 = vpop.eup %1670 }
 0x1a9   :  { %v1064_v7 = vmul.f32 %v1671_v6, %v961_v4 }
 0x1ab   :  { %v1069_v9 = vrot.slane %v1064_v7, %v1068_v5 }
 0x1ad   :  { %v1071_v10 = vmul.f32 %v1069_v9, %v1965_v8  ;;  %v1072_v11 = vmul.f32 %v1069_v9, %v1967_v13  ;;  %v1073_v29 = vmul.f32 %v1069_v9, %v1969_v14  ;;  %v1074_v30 = vmul.f32 %v1069_v9, %v1971_v15 }
 0x1ae   :  { %v1075_v16 = vmul.f32 %v1069_v9, %v1973_v18  ;;  %v1076_v32 = vmul.f32 %v1069_v9, %v1975_v12  ;;  %v1077_v39 = vmul.f32 %v1069_v9, %v1977_v19  ;;  %v1078_v34 = vmul.f32 %v1069_v9, %v1979_v20 }
 0x1af   :  { %v1079_v8 = vmul.f32 %v1069_v9, %v1981_v38  ;;  %v1080_v13 = vmul.f32 %v1069_v9, %v1983_v21  ;;  %v1081_v14 = vmul.f32 %v1069_v9, %v1985_v22  ;;  %v1082_v15 = vmul.f32 %v1069_v9, %v1987_v23 }
 0x1b0   :  { %v1083_v33 = vmul.f32 %v1069_v9, %v1989_v26  ;;  %v1084_v35 = vmul.f32 %v1069_v9, %v1991_v24  ;;  %v1085_v18 = vmul.f32 %v1069_v9, %v1993_v27  ;;  %v1086_v12 = vmul.f32 %v1069_v9, %v1995_v28 }
 0x1b1   :  { %v1093_v25 = vadd.f32 %v1326_v31, %v1071_v10  ;;  %v1094_v19 = vadd.f32 %v1326_v31, %v1072_v11  ;;  %v1095_v17 = vadd.f32 %v1326_v31, %v1073_v29  ;;  %v1096_v20 = vadd.f32 %v1326_v31, %v1074_v30 }
 0x1b2   :  { %v1097_v36 = vadd.f32 %v1326_v31, %v1075_v16  ;;  %v1098_v38 = vadd.f32 %v1326_v31, %v1076_v32  ;;  %v1099_v37 = vadd.f32 %v1326_v31, %v1077_v39  ;;  %v1100_v21 = vadd.f32 %v1326_v31, %v1078_v34 }
 0x1b3   :  { %v1101_v40 = vadd.f32 %v1326_v31, %v1079_v8  ;;  %v1102_v22 = vadd.f32 %v1326_v31, %v1080_v13  ;;  %v1103_v41 = vadd.f32 %v1326_v31, %v1081_v14  ;;  %v1104_v23 = vadd.f32 %v1326_v31, %v1082_v15 }
 0x1b4   :  { %v1105_v42 = vadd.f32 %v1326_v31, %v1083_v33  ;;  %v1106_v26 = vadd.f32 %v1326_v31, %v1084_v35  ;;  %v1107_v2 = vadd.f32 %v1326_v31, %v1085_v18  ;;  %v1108_v24 = vadd.f32 %v1326_v31, %v1086_v12 }
 0x1b5   :  { %vm1109_vm1 = vcmp.ge.f32.partialorder %v1093_v25, 0.0  ;;  %vm1110_vm2 = vcmp.ge.f32.partialorder %v1094_v19, 0.0  ;;  %vm1111_vm3 = vcmp.ge.f32.partialorder %v1095_v17, 0.0  ;;  %vm1112_vm4 = vcmp.ge.f32.partialorder %v1096_v20, 0.0 }
 0x1b6   :  { %vm1113_vm5 = vcmp.ge.f32.partialorder %v1097_v36, 0.0  ;;  %vm1114_vm6 = vcmp.ge.f32.partialorder %v1098_v38, 0.0  ;;  %vm1115_vm7 = vcmp.ge.f32.partialorder %v1099_v37, 0.0  ;;  %vm1116_vm8 = vcmp.ge.f32.partialorder %v1100_v21, 0.0 }
 0x1b7   :  { %vm1117_vm9 = vcmp.ge.f32.partialorder %v1101_v40, 0.0  ;;  %vm1118_vm10 = vcmp.ge.f32.partialorder %v1102_v22, 0.0  ;;  %vm1119_vm11 = vcmp.ge.f32.partialorder %v1103_v41, 0.0  ;;  %vm1120_vm12 = vcmp.ge.f32.partialorder %v1104_v23, 0.0 }
 0x1b8   :  { %vm1121_vm13 = vcmp.ge.f32.partialorder %v1105_v42, 0.0  ;;  %vm1122_vm14 = vcmp.ge.f32.partialorder %v1106_v26, 0.0  ;;  %vm1123_vm15 = vcmp.ge.f32.partialorder %v1107_v2, 0.0  ;;  %vm1124_vm0 = vcmp.ge.f32.partialorder %v1108_v24, 0.0 }
 0x1b9   :  { %v1125_v27 = vmul.f32 0.2, %v1093_v25  ;;  %v1126_v28 = vmul.f32 0.2, %v1094_v19  ;;  %v1127_v43 = vmul.f32 0.2, %v1095_v17 }
 0x1ba   :  { %v1128_v44 = vmul.f32 0.2, %v1096_v20  ;;  %v1129_v45 = vmul.f32 0.2, %v1097_v36  ;;  %v1130_v46 = vmul.f32 0.2, %v1098_v38 }
 0x1bb   :  { %v1131_v47 = vmul.f32 0.2, %v1099_v37  ;;  %v1132_v50 = vmul.f32 0.2, %v1100_v21  ;;  %v1133_v52 = vmul.f32 0.2, %v1101_v40  ;;  %v1141_v51 = vsel %vm1109_vm1, %v1093_v25, %v1125_v27 }
 0x1bc   :  { %v1134_v54 = vmul.f32 0.2, %v1102_v22  ;;  %v1135_v48 = vmul.f32 0.2, %v1103_v41  ;;  %v1136_v55 = vmul.f32 0.2, %v1104_v23  ;;  %v1142_v3 = vsel %vm1110_vm2, %v1094_v19, %v1126_v28 }
 0x1bd   :  { %v1137_v56 = vmul.f32 0.2, %v1105_v42  ;;  %v1138_v57 = vmul.f32 0.2, %v1106_v26  ;;  %v1139_v58 = vmul.f32 0.2, %v1107_v2  ;;  %v1143_v59 = vsel %vm1111_vm3, %v1095_v17, %v1127_v43 }
 0x1be   :  { %v1140_v60 = vmul.f32 0.2, %v1108_v24  ;;  %v1144_v61 = vsel %vm1112_vm4, %v1096_v20, %v1128_v44  ;;  %v1145_v62 = vsel %vm1113_vm5, %v1097_v36, %v1129_v45  ;;  %v1146_v53 = vsel %vm1114_vm6, %v1098_v38, %v1130_v46 }
 0x1bf   :  { %v1147_v49 = vsel %vm1115_vm7, %v1099_v37, %v1131_v47  ;;  %v1148_v63 = vsel %vm1116_vm8, %v1100_v21, %v1132_v50  ;;  %v1149_v0 = vsel %vm1117_vm9, %v1101_v40, %v1133_v52  ;;  %v1150_v1 = vsel %vm1118_vm10, %v1102_v22, %v1134_v54 }
 0x1c0   :  { %v1151_v4 = vsel %vm1119_vm11, %v1103_v41, %v1135_v48  ;;  %v1152_v5 = vsel %vm1120_vm12, %v1104_v23, %v1136_v55  ;;  %v1153_v6 = vsel %vm1121_vm13, %v1105_v42, %v1137_v56  ;;  %v1154_v7 = vsel %vm1122_vm14, %v1106_v26, %v1138_v57 }
 0x1c1   :  { %v1155_v9 = vsel %vm1123_vm15, %v1107_v2, %v1139_v58  ;;  %v1156_v10 = vsel %vm1124_vm0, %v1108_v24, %v1140_v60  ;;  %v1362_v11 = vpack.c.bf16 %v1142_v3, %v1141_v51  ;;  %v1367_v29 = vpack.c.bf16 %v1144_v61, %v1143_v59 }
 0x1c2   :  { %v1372_v30 = vpack.c.bf16 %v1146_v53, %v1145_v62  ;;  %v1377_v31 = vpack.c.bf16 %v1148_v63, %v1147_v49  ;;  %v1382_v16 = vpack.c.bf16 %v1150_v1, %v1149_v0  ;;  %v1387_v32 = vpack.c.bf16 %v1152_v5, %v1151_v4 }
 0x1c3   :  { %1363 = vst [vmem:[%s2096_s5] sm:$0xff] %v1362_v11   ;;  %1399 = vst [vmem:[%s2096_s5 + $0x8] sm:$0xff] %v1367_v29   ;;  %v1392_v39 = vpack.c.bf16 %v1154_v7, %v1153_v6  ;;  %v1397_v34 = vpack.c.bf16 %v1156_v10, %v1155_v9 }
 0x1c4   :  { %1400 = vst [vmem:[%s2096_s5 + $0x10] sm:$0xff] %v1372_v30   ;;  %1401 = vst [vmem:[%s2096_s5 + $0x18] sm:$0xff] %v1377_v31  }
 0x1c5   :  { %1402 = vst [vmem:[%s2096_s5 + $0x20] sm:$0xff] %v1382_v16   ;;  %1403 = vst [vmem:[%s2096_s5 + $0x28] sm:$0xff] %v1387_v32  }
 0x1c6   :  { %1404 = vst [vmem:[%s2096_s5 + $0x30] sm:$0xff] %v1392_v39   ;;  %1405 = vst [vmem:[%s2096_s5 + $0x38] sm:$0xff] %v1397_v34  }

// kernel: discriminator_forward.12
= control target key start
LH: loop header
LB: loop body
LE: loop exit
PB: predicated region body
PF: predicated region fallthrough
CT: control target
= control target key end

     0   :  { %s1210_s18 = smov 0   ;;  %s1212_s19 = smov 0   ;;  %s1326_s0 = inlined_call_operand.vmem [shape: bf16[32,1152], index: 0, kind: input, shape index: {}]   ;;  %s1327_s1 = inlined_call_operand.vmem [shape: bf16[1152,128], index: 1, kind: input, shape index: {}]   ;;  %s1328_s2 = inlined_call_operand.vmem [shape: f32[1,128], index: 2, kind: input, shape index: {}]   ;;  %s1329_s3 = inlined_call_operand.vmem [shape: f32[1,128], index: 3, kind: input, shape index: {}]   ;;  %s1330_s4 = inlined_call_operand.vmem [shape: f32[1,128], index: 4, kind: input, shape index: {}]   ;;  %s1331_s5 = inlined_call_operand.vmem [shape: bf16[32,128], index: 5, kind: output, shape index: {}]  }
   0x1   :  { %s1214_s20 = smov 0   ;;  %s1216_s21 = smov 0  }
   0x2   :  { %s1218_s22 = smov 0  }
   0x3 LB: > { %s24_s23 = sadd.s32 1, %s1173_s21  ;;  %p41_p1 = scmp.ne.s32.totalorder %s1165_s19, %s1161_s18  ;;  %s1177_s22 = sphi %s1218_s22, %s15_s22   ;;  %s1173_s21 = sphi %s1216_s21, %s1335_s21   ;;  %s1169_s20 = sphi %s1214_s20, %s1334_s20   ;;  %s1165_s19 = sphi %s1212_s19, %s1333_s19   ;;  %s1161_s18 = sphi %s1210_s18, %s1332_s18  }
   0x4   : > { %p25_p0 = scmp.ge.s32.totalorder %s24_s23, 3  ;;  %p42_p2 = scmp.eq.s32.totalorder %s1177_s22, 0 }
   0x5   : > { %s34_s25 = sadd.s32 1, %s1165_s19  ;;  %p935_p5 = scmp.ge.s32.totalorder %s1177_s22, 3 }
   0x6   : > { %s1337_s23 = smov (%p25_p0, %s24_s23), 0  ;;  %p43_p3 = por %p42_p2, %p41_p1 }
   0x7   : > { %s31_s24 = ssub.s32 %s1173_s21, %s1337_s23  ;;  %217 = sbr.rel (%p935_p5) target bundleno = 23 (0x17), region = 28 }
   0x8   : > { %p32_p4 = scmp.eq.s32.totalorder %s31_s24, 0 }
   0xa   : > { %s1245_s26 = scalar_select %p32_p4, %s1165_s19, %s34_s25  }
   0xe   : > { %220 = sbr.rel (!%p43_p3) target bundleno = 23 (0x17), region = 32  ;;  %s222_s27 = sand.u32 (%p43_p3), 1, %s1165_s19  }
   0xf   : > { %s988_s28 = smul.u32 (%p43_p3), 12, %s1173_s21 }
  0x10   : > { %s1062_s29 = smul.u32 (%p43_p3), 48, %s222_s27 }
  0x11   : > { %s227_s7 = scalar_lea.vmem (%p43_p3), %s1326_s0, %s988_s28 }
  0x12   : > { %v242_v0 = vld [vmem:[%s227_s7] sm:$0xff] (%p43_p3)  ;;  %v246_v2 = vld [vmem:[%s227_s7 + $0x48] sm:$0xff] (%p43_p3)  ;;  %s224_s8 = scalar_lea.vmem (%p43_p3), [#allocation3], %s1062_s29  ;;  %v941_v6 = vld [vmem:[%s227_s7 + $0x50] sm:$0xf] (%p43_p3) }
  0x13   : > { %v244_v1 = vld [vmem:[%s227_s7 + $0x24] sm:$0xff] (%p43_p3)  ;;  %243 = vst [vmem:[%s224_s8] sm:$0xff] (%p43_p3), %v242_v0  ;;  %247 = vst [vmem:[%s224_s8 + $0x18] sm:$0xff] (%p43_p3), %v246_v2  ;;  %v248_v3 = vld [vmem:[%s227_s7 + $0x6c] sm:$0xff] (%p43_p3) }
  0x14   : > { %245 = vst [vmem:[%s224_s8 + $0xc] sm:$0xff] (%p43_p3), %v244_v1  ;;  %v937_v4 = vld [vmem:[%s227_s7 + $0x8] sm:$0xf] (%p43_p3)  ;;  %v939_v5 = vld [vmem:[%s227_s7 + $0x2c] sm:$0xf] (%p43_p3)  ;;  %249 = vst [vmem:[%s224_s8 + $0x24] sm:$0xff] (%p43_p3), %v248_v3 }
  0x15   : > { %938 = vst [vmem:[%s224_s8 + $0x8] sm:$0xf] %v937_v4  ;;  %940 = vst [vmem:[%s224_s8 + $0x14] sm:$0xf] %v939_v5  ;;  %v943_v7 = vld [vmem:[%s227_s7 + $0x74] sm:$0xf] }
  0x16   : > { %942 = vst [vmem:[%s224_s8 + $0x20] sm:$0xf] %v941_v6  ;;  %944 = vst [vmem:[%s224_s8 + $0x2c] sm:$0xf] %v943_v7 }
  0x17 PF: > { %p945_p6 = scmp.ge.s32.totalorder %s1177_s22, 1  ;;  %p281_p7 = scmp.lt.s32.totalorder %s1177_s22, 4 }
  0x19   : > { %p282_p8 = pnand %p945_p6, %p281_p7 }
  0x1a   : > { %s288_s9 = sand.u32 (!%p282_p8), 1, %s1161_s18   ;;  %s332_s10 = smul.u32 (!%p282_p8), 48, %s1169_s20 }
  0x1b   : > { %285 = sbr.rel (%p282_p8) target bundleno = 381 (0x17d), region = 62  ;;  %p947_p10 = scmp.ne.s32.totalorder (!%p282_p8), %s1169_s20, 0 }
  0x1c   : > { %s1063_s11 = smul.u32 (!%p282_p8), 48, %s288_s9  ;;  %p333_p9 = scmp.lt.s32.totalorder (!%p282_p8), %s332_s10, 143 }
  0x1e   : > { %s1262_s16 = scalar_lea.vmem (!%p282_p8), [#allocation3], %s1063_s11 }
  0x22   : > { %s1339_s10 = smov (!%p333_p9, %s332_s10), 143  ;;  %358 = sbr.rel (%p947_p10) target bundleno = 41 (0x29), region = 70 }
  0x23   : > { %s946_s12 = sshll.u32 %s1339_s10, 2  ;;  %v1179_v8 = vmov (!%p947_p10), 0.0  }
  0x24   : > { %s1260_s15 = scalar_lea.vmem %s1327_s1, %s946_s12  ;;  %359 = vst [vmem:[#allocation2] sm:$0xff] (!%p947_p10), %v1179_v8  ;;  %360 = vst [vmem:[#allocation2 + $0x8] sm:$0xff] (!%p947_p10), %v1179_v8 }
  0x25   : > { %361 = vst [vmem:[#allocation2 + $0x10] sm:$0xff] (!%p947_p10), %v1179_v8  ;;  %362 = vst [vmem:[#allocation2 + $0x18] sm:$0xff] (!%p947_p10), %v1179_v8 }
  0x29 PF: > { %v1105_v9 = vld [vmem:[%s1260_s15 + $0x40] sm:$0xff]   ;;  %v1108_v12 = vld [vmem:[%s1260_s15 + $0x48] sm:$0xff]   ;;  %v1111_v15 = vld [vmem:[%s1260_s15 + $0x50] sm:$0xff]   ;;  %p978_p11 = scmp.ne.s32.totalorder %s1169_s20, 2 }
  0x2a   : > { %v1106_v10 = vld [vmem:[%s1260_s15] sm:$0xff]   ;;  %1004 = vmatprep.subr.bf16.mxu0 %v1105_v9  ;;  %v1109_v13 = vld [vmem:[%s1260_s15 + $0x8] sm:$0xff]   ;;  %v1112_v16 = vld [vmem:[%s1260_s15 + $0x10] sm:$0xff]  }
  0x2b   : > { %v1107_v11 = vld [vmem:[%s1260_s15 + $0x80] sm:$0xff]   ;;  %1005 = vmatpush3.bf16.msra.mxu0 %v1106_v10  ;;  %v1110_v14 = vld [vmem:[%s1260_s15 + $0x88] sm:$0xff]   ;;  %v1113_v17 = vld [vmem:[%s1260_s15 + $0x90] sm:$0xff]  }
  0x2c   : > { %1042 = vmatprep.subr.bf16.mxu1 %v1107_v11  ;;  %1006 = vmatprep.subr.bf16.mxu0 %v1108_v12  ;;  %v1114_v18 = vld [vmem:[%s1260_s15 + $0x58] sm:$0xff]   ;;  %v1117_v21 = vld [vmem:[%s1260_s15 + $0x60] sm:$0xff]   ;;  %v1120_v24 = vld [vmem:[%s1260_s15 + $0x68] sm:$0xff]  }
  0x2d   : > { %1043 = vmatpush3.bf16.msra.mxu1 %v1107_v11  ;;  %v1115_v19 = vld [vmem:[%s1260_s15 + $0x18] sm:$0xff]   ;;  %v1119_v22 = vld [vmem:[%s1260_s15 + $0xa0] sm:$0xff]   ;;  %v1122_v25 = vld [vmem:[%s1260_s15 + $0xa8] sm:$0xff]  }
  0x2e   : > { %1044 = vmatprep.subr.bf16.mxu1 %v1110_v14  ;;  %v1116_v20 = vld [vmem:[%s1260_s15 + $0x98] sm:$0xff]   ;;  %v1118_v23 = vld [vmem:[%s1260_s15 + $0x20] sm:$0xff]   ;;  %v1121_v26 = vld [vmem:[%s1260_s15 + $0x28] sm:$0xff]  }
  0x2f   : > { %1007 = vmatpush3.bf16.msra.mxu0 %v1109_v13  ;;  %v1123_v27 = vld [vmem:[%s1260_s15 + $0x70] sm:$0xff]   ;;  %v1126_v30 = vld [vmem:[%s1260_s15 + $0x78] sm:$0xff]   ;;  %v363_v45 = vld [vmem:[#allocation2] sm:$0xff] }
  0x30   : > { %1008 = vmatprep.subr.bf16.mxu0 %v1111_v15  ;;  %v1124_v28 = vld [vmem:[%s1260_s15 + $0x30] sm:$0xff]   ;;  %v1128_v31 = vld [vmem:[%s1260_s15 + $0xb8] sm:$0xff]   ;;  %v364_v50 = vld [vmem:[#allocation2 + $0x8] sm:$0xff] }
  0x31   : > { %1045 = vmatpush3.bf16.msra.mxu1 %v1110_v14  ;;  %v1125_v29 = vld [vmem:[%s1260_s15 + $0xb0] sm:$0xff]   ;;  %v1127_v34 = vld [vmem:[%s1260_s15 + $0x38] sm:$0xff]   ;;  %v979_v7 = vld [vmem:[%s1328_s2] ss:$0 sm:$0xff] (!%p978_p11) }
  0x32   : > { %1046 = vmatprep.subr.bf16.mxu1 %v1113_v17  ;;  %v1131_v32 = vld [vmem:[%s1262_s16 + $0x4] ss:$12 sps:$4 sm:$0xff]   ;;  %v1132_v33 = vld [vmem:[%s1262_s16 + $0x8] ss:$12 sps:$4 sm:$0xff]   ;;  %v1129_v35 = vld [vmem:[%s1262_s16] ss:$12 sps:$4 sm:$0xff]  }
  0x33   : > { %1009 = vmatpush3.bf16.msra.mxu0 %v1112_v16  ;;  %631 = vmatprep.mubr.bf16.mxu0 %v1131_v32  ;;  %v1134_v36 = vld [vmem:[%s1262_s16 + $0x1c] ss:$12 sps:$4 sm:$0xff]   ;;  %v1133_v37 = vld [vmem:[%s1262_s16 + $0x20] ss:$12 sps:$4 sm:$0xff]   ;;  %v1136_v38 = vld [vmem:[%s1262_s16 + $0x18] ss:$12 sps:$4 sm:$0xff]  }
  0x34   : > { %1010 = vmatprep.subr.bf16.mxu0 %v1114_v18  ;;  %1058 = vmatprep.mubr.bf16.mxu1 %v1132_v33  ;;  %v365_v59 = vld [vmem:[#allocation2 + $0x10] sm:$0xff]  ;;  %v366_v63 = vld [vmem:[#allocation2 + $0x18] sm:$0xff] }
  0x35   : > { %1047 = vmatpush3.bf16.msra.mxu1 %v1113_v17 }
  0x36   : > { %1048 = vmatprep.subr.bf16.mxu1 %v1116_v20 }
  0x37   : > { %1011 = vmatpush3.bf16.msra.mxu0 %v1115_v19 }
  0x38   : > { %1012 = vmatprep.subr.bf16.mxu0 %v1117_v21 }
  0x39   : > { %1049 = vmatpush3.bf16.msra.mxu1 %v1116_v20 }
  0x3a   : > { %1050 = vmatprep.subr.bf16.mxu1 %v1119_v22 }
  0x3b   : > { %1013 = vmatpush3.bf16.msra.mxu0 %v1118_v23 }
  0x3c   : > { %1014 = vmatprep.subr.bf16.mxu0 %v1120_v24 }
  0x3d   : > { %1051 = vmatpush3.bf16.msra.mxu1 %v1119_v22 }
  0x3e   : > { %1052 = vmatprep.subr.bf16.mxu1 %v1122_v25 }
  0x3f   : > { %1015 = vmatpush3.bf16.msra.mxu0 %v1121_v26 }
  0x40   : > { %1016 = vmatprep.subr.bf16.mxu0 %v1123_v27 }
  0x41   : > { %1053 = vmatpush3.bf16.msra.mxu1 %v1122_v25 }
  0x42   : > { %1054 = vmatprep.subr.bf16.mxu1 %v1125_v29 }
  0x43   : > { %1017 = vmatpush3.bf16.msra.mxu0 %v1124_v28 }
  0x44   : > { %1018 = vmatprep.subr.bf16.mxu0 %v1126_v30 }
  0x45   : > { %1055 = vmatpush3.bf16.msra.mxu1 %v1125_v29 }
  0x46   : > { %1056 = vmatprep.subr.bf16.mxu1 %v1128_v31 }
  0x47   : > { %1019 = vmatpush3.bf16.msra.mxu0 %v1127_v34 }
  0x49   : > { %1057 = vmatpush3.bf16.msra.mxu1 %v1128_v31 }
  0x4a   : > { %632 = vmatmul.mubr.bf16.vlgmr.msra.gmra.mrb[0].mxu0 %v1129_v35 }
  0x4b   : > { %639 = vmatprep.mubr.bf16.mxu0 %v1134_v36 }
  0x4c   : > { %1059 = vmatmul.mubr.bf16.vlgmr.msra.gmra.mrb[0].mxu1 %v1133_v37 }
  0x52   : > { %640 = vmatmul.mubr.bf16.gmra.mrb[4].mxu0 %v1136_v38 }
 0x11d   : > { %v1020_v39 = vpop.f32.mrb[0].mxu0 }
 0x11e   : > { %v1021_v40 = vpop.f32.mrb[1].mxu0 }
 0x11f   : > { %v1022_v41 = vadd.f32 %v1021_v40, %v1020_v39  ;;  %v1023_v42 = vpop.f32.mrb[2].mxu0  ;;  %v1060_v43 = vpop.f32.mrb[0].mxu1 }
 0x120   : > { %v1024_v44 = vpop.f32.mrb[3].mxu0  ;;  %v682_v46 = vpop.f32.mrb[1].mxu1 }
 0x121   : > { %v1025_v47 = vadd.f32 %v1024_v44, %v1023_v42  ;;  %v683_v48 = vadd.f32 %v1022_v41, %v682_v46  ;;  %v1061_v49 = vpop.f32.mrb[2].mxu1  ;;  %v759_v41 = vlaneseq (!%p978_p11) }
 0x122   : > { %v685_v51 = vpop.f32.mrb[3].mxu1 }
 0x123   : > { %v697_v52 = vadd.f32 %v683_v48, %v363_v45  ;;  %v686_v53 = vadd.f32 %v1025_v47, %v685_v51  ;;  %v760_v42 = vshrl.u32 (!%p978_p11), %v759_v41, 7  ;;  %v980_v48 = vld [vmem:[%s1330_s4] ss:$0 sm:$0xff] (!%p978_p11) }
 0x125   : > { %701 = vst [vmem:[#allocation2] sm:$0xff] %v697_v52  ;;  %v698_v54 = vadd.f32 %v686_v53, %v364_v50  ;;  %v1026_v55 = vpop.f32.mrb[4].mxu0  ;;  %v761_v44 = vsub.s32 (!%p978_p11), 0, %v760_v42 }
 0x126   : > { %v1027_v56 = vpop.f32.mrb[5].mxu0 }
 0x127   : > { %702 = vst [vmem:[#allocation2 + $0x8] sm:$0xff] %v698_v54  ;;  %v1028_v57 = vadd.f32 %v1027_v56, %v1026_v55  ;;  %v1029_v58 = vpop.f32.mrb[6].mxu0 }
 0x128   : > { %v1030_v60 = vpop.f32.mrb[7].mxu0 }
 0x129   : > { %v691_v61 = vadd.f32 %v1060_v43, %v1028_v57  ;;  %v1031_v62 = vadd.f32 %v1030_v60, %v1029_v58  ;;  %708 = sbr.rel (%p978_p11) target bundleno = 381 (0x17d), region = 74  ;;  %v714_v43 = vld [vmem:[%s1329_s3] sm:$0x1] (!%p978_p11) }
 0x12b   : > { %v699_v0 = vadd.f32 %v691_v61, %v365_v59  ;;  %v694_v1 = vadd.f32 %v1061_v49, %v1031_v62 }
 0x12c   : > { %v709_v3 = vld [vmem:[#allocation2] sm:$0xff] (!%p978_p11) }
 0x12d   : > { %703 = vst [vmem:[#allocation2 + $0x10] sm:$0xff] %v699_v0  ;;  %v700_v2 = vadd.f32 %v694_v1, %v366_v63  ;;  %v722_v8 = vadd.f32 (!%p978_p11), %v979_v7, %v709_v3 }
 0x12e   : > { %v710_v4 = vld [vmem:[#allocation2 + $0x8] sm:$0xff] (!%p978_p11) }
 0x12f   : > { %704 = vst [vmem:[#allocation2 + $0x18] sm:$0xff] %v700_v2  ;;  %v723_v9 = vadd.f32 (!%p978_p11), %v979_v7, %v710_v4 }
 0x131   : > { %v726_v12 = vadd.f32 %v723_v9, %v722_v8 }
 0x134   : > { %v711_v5 = vld [vmem:[#allocation2 + $0x10] sm:$0xff] }
 0x135   : > { %v724_v10 = vadd.f32 %v979_v7, %v711_v5 }
 0x136   : > { %v712_v6 = vld [vmem:[#allocation2 + $0x18] sm:$0xff] }
 0x137   : > { %v725_v11 = vadd.f32 %v979_v7, %v712_v6  ;;  %v727_v13 = vadd.f32 %v726_v12, %v724_v10 }
 0x139   : > { %v728_v14 = vadd.f32 %v727_v13, %v725_v11 }
 0x13b   : > { %v729_v15 = vrot.slane %v728_v14, 4 }
 0x13d   : > { %v730_v16 = vadd.f32 %v729_v15, %v728_v14 }
 0x13f   : > { %v731_v17 = vrot.slane %v730_v16, 2 }
 0x141   : > { %v732_v18 = vadd.f32 %v731_v17, %v730_v16 }
 0x143   : > { %v733_v19 = vrot.slane %v732_v18, 1 }
 0x145   : > { %v734_v20 = vadd.f32 %v733_v19, %v732_v18 }
 0x147   : > { %v736_v21 = vmul.f32 0.03125, %v734_v20 }
 0x149   : > { %v737_v22 = vsub.f32 %v722_v8, %v736_v21  ;;  %v738_v23 = vsub.f32 %v723_v9, %v736_v21  ;;  %v739_v24 = vsub.f32 %v724_v10, %v736_v21  ;;  %v740_v25 = vsub.f32 %v725_v11, %v736_v21 }
 0x14b   : > { %v741_v26 = vmul.f32 %v737_v22, %v737_v22  ;;  %v742_v27 = vmul.f32 %v738_v23, %v738_v23  ;;  %v743_v28 = vmul.f32 %v739_v24, %v739_v24  ;;  %v744_v29 = vmul.f32 %v740_v25, %v740_v25 }
 0x14d   : > { %v745_v30 = vadd.f32 %v742_v27, %v741_v26 }
 0x14f   : > { %v746_v31 = vadd.f32 %v745_v30, %v743_v28 }
 0x151   : > { %v747_v32 = vadd.f32 %v746_v31, %v744_v29 }
 0x153   : > { %v748_v33 = vrot.slane %v747_v32, 4 }
 0x155   : > { %v749_v34 = vadd.f32 %v748_v33, %v747_v32 }
 0x157   : > { %v750_v35 = vrot.slane %v749_v34, 2 }
 0x159   : > { %v751_v36 = vadd.f32 %v750_v35, %v749_v34 }
 0x15b   : > { %v752_v37 = vrot.slane %v751_v36, 1 }
 0x15d   : > { %v753_v38 = vadd.f32 %v752_v37, %v751_v36 }
 0x15f   : > { %v754_v39 = vmul.f32 0.03125, %v753_v38 }
 0x161   : > { %v755_v40 = vadd.f32 1e-05, %v754_v39 }
 0x163   : > { %1137 = vrsqrt.f32 %v755_v40 }
 0x16d   : > { %v1138_v45 = vpop.eup %1137 }
 0x16e   : > { %v757_v46 = vmul.f32 %v1138_v45, %v714_v43 }
 0x170   : > { %v762_v47 = vrot.slane %v757_v46, %v761_v44 }
 0x172   : > { %v764_v49 = vmul.f32 %v762_v47, %v737_v22  ;;  %v765_v50 = vmul.f32 %v762_v47, %v738_v23  ;;  %v766_v51 = vmul.f32 %v762_v47, %v739_v24  ;;  %v767_v52 = vmul.f32 %v762_v47, %v740_v25 }
 0x174   : > { %v774_v53 = vadd.f32 %v980_v48, %v764_v49  ;;  %v775_v54 = vadd.f32 %v980_v48, %v765_v50  ;;  %v776_v55 = vadd.f32 %v980_v48, %v766_v51  ;;  %v777_v56 = vadd.f32 %v980_v48, %v767_v52 }
 0x176   : > { %vm778_vm0 = vcmp.ge.f32.partialorder %v774_v53, 0.0  ;;  %vm779_vm1 = vcmp.ge.f32.partialorder %v775_v54, 0.0  ;;  %v782_v57 = vmul.f32 0.2, %v774_v53  ;;  %v783_v58 = vmul.f32 0.2, %v775_v54 }
 0x177   : > { %vm780_vm2 = vcmp.ge.f32.partialorder %v776_v55, 0.0  ;;  %vm781_vm3 = vcmp.ge.f32.partialorder %v777_v56, 0.0  ;;  %v784_v59 = vmul.f32 0.2, %v776_v55  ;;  %v785_v60 = vmul.f32 0.2, %v777_v56 }
 0x178   : > { %v786_v61 = vsel %vm778_vm0, %v774_v53, %v782_v57  ;;  %v787_v62 = vsel %vm779_vm1, %v775_v54, %v783_v58 }
 0x179   : > { %v996_v63 = vpack.c.bf16 %v787_v62, %v786_v61  ;;  %v788_v0 = vsel %vm780_vm2, %v776_v55, %v784_v59  ;;  %v789_v1 = vsel %vm781_vm3, %v777_v56, %v785_v60 }
 0x17a   : > { %v1001_v2 = vpack.c.bf16 %v789_v1, %v788_v0 }
 0x17b   : > { %997 = vst [vmem:[%s1331_s5] sm:$0xff] %v996_v63  }
 0x17c   : > { %1003 = vst [vmem:[%s1331_s5 + $0x8] sm:$0xff] %v1001_v2  }
 0x17d PF: > { %s15_s22 = sadd.s32 1, %s1177_s22   ;;  %s1332_s18 = smov %s1165_s19 }
 0x17e   : > { %p12_p12 = scmp.ge.s32.totalorder %s15_s22, 5   ;;  %s1333_s19 = smov %s1245_s26 }
 0x17f   : > { %s1334_s20 = smov %s1173_s21  ;;  %s1335_s21 = smov %s1337_s23 }
 0x180   :  { %14 = sbr.rel (!%p12_p12) target bundleno = 3 (0x3), region = 127 }

// kernel: discriminator_forward.13
= control target key start
LH: loop header
LB: loop body
LE: loop exit
PB: predicated region body
PF: predicated region fallthrough
CT: control target
= control target key end

     0   :  { %s1479_s18 = smov 0   ;;  %s1481_s19 = smov 0   ;;  %s1642_s0 = inlined_call_operand.vmem [shape: bf16[32,1152], index: 0, kind: input, shape index: {}]   ;;  %s1643_s1 = inlined_call_operand.vmem [shape: bf16[1152,256], index: 1, kind: input, shape index: {}]   ;;  %s1644_s2 = inlined_call_operand.vmem [shape: f32[1,256], index: 2, kind: input, shape index: {}]   ;;  %s1645_s3 = inlined_call_operand.vmem [shape: f32[1,256], index: 3, kind: input, shape index: {}]   ;;  %s1646_s4 = inlined_call_operand.vmem [shape: f32[1,256], index: 4, kind: input, shape index: {}]   ;;  %s1647_s5 = inlined_call_operand.vmem [shape: bf16[32,256], index: 5, kind: output, shape index: {}]  }
   0x1   :  { %s1483_s20 = smov 0   ;;  %s1485_s21 = smov 0  }
   0x2   :  { %s1487_s22 = smov 0  }
   0x3 LB: > { %s24_s23 = sadd.s32 1, %s1440_s21  ;;  %p41_p1 = scmp.ne.s32.totalorder %s1432_s19, %s1428_s18  ;;  %s1444_s22 = sphi %s1487_s22, %s15_s22   ;;  %s1440_s21 = sphi %s1485_s21, %s1651_s21   ;;  %s1436_s20 = sphi %s1483_s20, %s1650_s20   ;;  %s1432_s19 = sphi %s1481_s19, %s1649_s19   ;;  %s1428_s18 = sphi %s1479_s18, %s1648_s18  }
   0x4   : > { %p25_p0 = scmp.ge.s32.totalorder %s24_s23, 3  ;;  %p42_p2 = scmp.eq.s32.totalorder %s1444_s22, 0 }
   0x5   : > { %s34_s25 = sadd.s32 1, %s1432_s19  ;;  %p1186_p5 = scmp.ge.s32.totalorder %s1444_s22, 3 }
   0x6   : > { %s1653_s23 = smov (%p25_p0, %s24_s23), 0  ;;  %p43_p3 = por %p42_p2, %p41_p1 }
   0x7   : > { %s31_s24 = ssub.s32 %s1440_s21, %s1653_s23  ;;  %223 = sbr.rel (%p1186_p5) target bundleno = 23 (0x17), region = 28 }
   0x8   : > { %p32_p4 = scmp.eq.s32.totalorder %s31_s24, 0 }
   0xa   : > { %s1514_s26 = scalar_select %p32_p4, %s1432_s19, %s34_s25  }
   0xe   : > { %226 = sbr.rel (!%p43_p3) target bundleno = 23 (0x17), region = 32  ;;  %s228_s27 = sand.u32 (%p43_p3), 1, %s1432_s19  }
   0xf   : > { %s1263_s28 = smul.u32 (%p43_p3), 12, %s1440_s21 }
  0x10   : > { %s1277_s29 = smul.u32 (%p43_p3), 48, %s228_s27 }
  0x11   : > { %s233_s7 = scalar_lea.vmem (%p43_p3), %s1642_s0, %s1263_s28 }
  0x12   : > { %v248_v0 = vld [vmem:[%s233_s7] sm:$0xff] (%p43_p3)  ;;  %v252_v2 = vld [vmem:[%s233_s7 + $0x48] sm:$0xff] (%p43_p3)  ;;  %s230_s8 = scalar_lea.vmem (%p43_p3), [#allocation3], %s1277_s29  ;;  %v1192_v6 = vld [vmem:[%s233_s7 + $0x50] sm:$0xf] (%p43_p3) }
  0x13   : > { %v250_v1 = vld [vmem:[%s233_s7 + $0x24] sm:$0xff] (%p43_p3)  ;;  %249 = vst [vmem:[%s230_s8] sm:$0xff] (%p43_p3), %v248_v0  ;;  %253 = vst [vmem:[%s230_s8 + $0x18] sm:$0xff] (%p43_p3), %v252_v2  ;;  %v254_v3 = vld [vmem:[%s233_s7 + $0x6c] sm:$0xff] (%p43_p3) }
  0x14   : > { %251 = vst [vmem:[%s230_s8 + $0xc] sm:$0xff] (%p43_p3), %v250_v1  ;;  %v1188_v4 = vld [vmem:[%s233_s7 + $0x8] sm:$0xf] (%p43_p3)  ;;  %v1190_v5 = vld [vmem:[%s233_s7 + $0x2c] sm:$0xf] (%p43_p3)  ;;  %255 = vst [vmem:[%s230_s8 + $0x24] sm:$0xff] (%p43_p3), %v254_v3 }
  0x15   : > { %1189 = vst [vmem:[%s230_s8 + $0x8] sm:$0xf] %v1188_v4  ;;  %1191 = vst [vmem:[%s230_s8 + $0x14] sm:$0xf] %v1190_v5  ;;  %v1194_v7 = vld [vmem:[%s233_s7 + $0x74] sm:$0xf] }
  0x16   : > { %1193 = vst [vmem:[%s230_s8 + $0x20] sm:$0xf] %v1192_v6  ;;  %1195 = vst [vmem:[%s230_s8 + $0x2c] sm:$0xf] %v1194_v7 }
  0x17 PF: > { %p1196_p6 = scmp.ge.s32.totalorder %s1444_s22, 1  ;;  %p290_p7 = scmp.lt.s32.totalorder %s1444_s22, 4 }
  0x19   : > { %p291_p8 = pnand %p1196_p6, %p290_p7 }
  0x1a   : > { %s297_s9 = sand.u32 (!%p291_p8), 1, %s1428_s18   ;;  %s347_s10 = smul.u32 (!%p291_p8), 48, %s1436_s20 }
  0x1b   : > { %294 = sbr.rel (%p291_p8) target bundleno = 421 (0x1a5), region = 62  ;;  %p1199_p10 = scmp.ne.s32.totalorder (!%p291_p8), %s1436_s20, 0 }
  0x1c   : > { %s1278_s11 = smul.u32 (!%p291_p8), 48, %s297_s9  ;;  %p349_p9 = scmp.lt.s32.totalorder (!%p291_p8), %s347_s10, 143 }
  0x1e   : > { %s1531_s16 = scalar_lea.vmem (!%p291_p8), [#allocation3], %s1278_s11 }
  0x22   : > { %s1655_s10 = smov (!%p349_p9, %s347_s10), 143  ;;  %384 = sbr.rel (%p1199_p10) target bundleno = 41 (0x29), region = 70 }
  0x23   : > { %s1264_s12 = sshll.u32 %s1655_s10, 3  ;;  %v1446_v8 = vmov (!%p1199_p10), 0.0  }
  0x24   : > { %s1529_s15 = scalar_lea.vmem %s1643_s1, %s1264_s12  ;;  %385 = vst [vmem:[#allocation2] sm:$0xff] (!%p1199_p10), %v1446_v8  ;;  %386 = vst [vmem:[#allocation2 + $0x8] sm:$0xff] (!%p1199_p10), %v1446_v8 }
  0x25   : > { %387 = vst [vmem:[#allocation2 + $0x10] sm:$0xff] (!%p1199_p10), %v1446_v8  ;;  %388 = vst [vmem:[#allocation2 + $0x18] sm:$0xff] (!%p1199_p10), %v1446_v8 }
  0x26   : > { %389 = vst [vmem:[#allocation2 + $0x20] sm:$0xff] (!%p1199_p10), %v1446_v8  ;;  %390 = vst [vmem:[#allocation2 + $0x28] sm:$0xff] (!%p1199_p10), %v1446_v8 }
  0x27   : > { %391 = vst [vmem:[#allocation2 + $0x30] sm:$0xff] (!%p1199_p10), %v1446_v8  ;;  %392 = vst [vmem:[#allocation2 + $0x38] sm:$0xff] (!%p1199_p10), %v1446_v8 }
  0x29 PF: > { %v1322_v9 = vld [vmem:[%s1529_s15 + $0x4] ss:$8 sps:$4 sm:$0xff]   ;;  %v1324_v10 = vld [vmem:[%s1529_s15] ss:$8 sps:$4 sm:$0xff]   ;;  %v1447_v11 = vmov 0   ;;  %p1254_p11 = scmp.ne.s32.totalorder %s1436_s20, 2 }
  0x2a   : > { %814 = vmatprep.mubr.bf16.mxu0 %v1447_v11  ;;  %729 = vmatprep.subr.bf16.mxu1 %v1322_v9  ;;  %v1325_v12 = vld [vmem:[%s1529_s15 + $0x14] ss:$8 sps:$4 sm:$0xff]   ;;  %v1327_v13 = vld [vmem:[%s1529_s15 + $0x10] ss:$8 sps:$4 sm:$0xff]   ;;  %v1328_v14 = vld [vmem:[%s1529_s15 + $0x24] ss:$8 sps:$4 sm:$0xff]  }
  0x2b   : > { %730 = vmatpush1.bf16.msra.mxu1 %v1324_v10  ;;  %v1330_v15 = vld [vmem:[%s1529_s15 + $0x20] ss:$8 sps:$4 sm:$0xff]   ;;  %v1331_v16 = vld [vmem:[%s1529_s15 + $0x34] ss:$8 sps:$4 sm:$0xff]   ;;  %v1333_v17 = vld [vmem:[%s1529_s15 + $0x30] ss:$8 sps:$4 sm:$0xff]  }
  0x2c   : > { %731 = vmatprep.subr.bf16.mxu1 %v1325_v12  ;;  %v1346_v18 = vld [vmem:[%s1529_s15 + $0x104] ss:$8 sps:$4 sm:$0xff]   ;;  %v1348_v19 = vld [vmem:[%s1529_s15 + $0x100] ss:$8 sps:$4 sm:$0xff]   ;;  %v1352_v21 = vld [vmem:[%s1529_s15 + $0x114] ss:$8 sps:$4 sm:$0xff]  }
  0x2d   : > { %v1334_v20 = vld [vmem:[%s1529_s15 + $0x44] ss:$8 sps:$4 sm:$0xff]   ;;  %782 = vmatprep.subr.bf16.mxu0 %v1346_v18  ;;  %v1354_v22 = vld [vmem:[%s1529_s15 + $0x110] ss:$8 sps:$4 sm:$0xff]   ;;  %v1336_v23 = vld [vmem:[%s1529_s15 + $0x40] ss:$8 sps:$4 sm:$0xff]  }
  0x2e   : > { %783 = vmatpush1.bf16.msra.mxu0 %v1348_v19  ;;  %v1337_v24 = vld [vmem:[%s1529_s15 + $0x54] ss:$8 sps:$4 sm:$0xff]   ;;  %v1358_v25 = vld [vmem:[%s1529_s15 + $0x124] ss:$8 sps:$4 sm:$0xff]   ;;  %v1360_v26 = vld [vmem:[%s1529_s15 + $0x120] ss:$8 sps:$4 sm:$0xff]  }
  0x2f   : > { %732 = vmatpush1.bf16.msra.mxu1 %v1327_v13  ;;  %784 = vmatprep.subr.bf16.mxu0 %v1352_v21  ;;  %v1339_v27 = vld [vmem:[%s1529_s15 + $0x50] ss:$8 sps:$4 sm:$0xff]   ;;  %v1364_v28 = vld [vmem:[%s1529_s15 + $0x134] ss:$8 sps:$4 sm:$0xff]   ;;  %v1340_v29 = vld [vmem:[%s1529_s15 + $0x64] ss:$8 sps:$4 sm:$0xff]  }
  0x30   : > { %733 = vmatprep.subr.bf16.mxu1 %v1328_v14  ;;  %v1366_v30 = vld [vmem:[%s1529_s15 + $0x130] ss:$8 sps:$4 sm:$0xff]   ;;  %v1342_v31 = vld [vmem:[%s1529_s15 + $0x60] ss:$8 sps:$4 sm:$0xff]   ;;  %v1370_v32 = vld [vmem:[%s1529_s15 + $0x144] ss:$8 sps:$4 sm:$0xff]  }
  0x31   : > { %v1343_v33 = vld [vmem:[%s1529_s15 + $0x74] ss:$8 sps:$4 sm:$0xff]   ;;  %v1372_v34 = vld [vmem:[%s1529_s15 + $0x140] ss:$8 sps:$4 sm:$0xff]   ;;  %v1345_v35 = vld [vmem:[%s1529_s15 + $0x70] ss:$8 sps:$4 sm:$0xff]  }
  0x32   : > { %785 = vmatpush1.bf16.msra.mxu0 %v1354_v22  ;;  %v1376_v36 = vld [vmem:[%s1529_s15 + $0x154] ss:$8 sps:$4 sm:$0xff]   ;;  %v1349_v37 = vld [vmem:[%s1529_s15 + $0x84] ss:$8 sps:$4 sm:$0xff]   ;;  %v1378_v38 = vld [vmem:[%s1529_s15 + $0x150] ss:$8 sps:$4 sm:$0xff]  }
  0x33   : > { %734 = vmatpush1.bf16.msra.mxu1 %v1330_v15  ;;  %786 = vmatprep.subr.bf16.mxu0 %v1358_v25  ;;  %v1351_v39 = vld [vmem:[%s1529_s15 + $0x80] ss:$8 sps:$4 sm:$0xff]   ;;  %v1382_v40 = vld [vmem:[%s1529_s15 + $0x164] ss:$8 sps:$4 sm:$0xff]   ;;  %v1355_v41 = vld [vmem:[%s1529_s15 + $0x94] ss:$8 sps:$4 sm:$0xff]  }
  0x34   : > { %735 = vmatprep.subr.bf16.mxu1 %v1331_v16  ;;  %v1357_v42 = vld [vmem:[%s1529_s15 + $0x90] ss:$8 sps:$4 sm:$0xff]   ;;  %v1384_v43 = vld [vmem:[%s1529_s15 + $0x160] ss:$8 sps:$4 sm:$0xff]   ;;  %v1388_v45 = vld [vmem:[%s1529_s15 + $0x174] ss:$8 sps:$4 sm:$0xff]  }
  0x35   : > { %v1397_v44 = vld [vmem:[%s1531_s16 + $0x4] ss:$12 sps:$4 sm:$0xff]   ;;  %v1394_v50 = vld [vmem:[%s1531_s16 + $0x8] ss:$12 sps:$4 sm:$0xff]   ;;  %v1398_v55 = vld [vmem:[%s1531_s16 + $0x20] ss:$12 sps:$4 sm:$0xff]  }
  0x36   : > { %787 = vmatpush1.bf16.msra.mxu0 %v1360_v26  ;;  %v1361_v46 = vld [vmem:[%s1529_s15 + $0xa4] ss:$8 sps:$4 sm:$0xff]   ;;  %761 = vmatprep.mubr.bf16.mxu1 %v1397_v44  ;;  %v1390_v47 = vld [vmem:[%s1529_s15 + $0x170] ss:$8 sps:$4 sm:$0xff]   ;;  %v1363_v48 = vld [vmem:[%s1529_s15 + $0xa0] ss:$8 sps:$4 sm:$0xff]  }
  0x37   : > { %736 = vmatpush1.bf16.msra.mxu1 %v1333_v17  ;;  %788 = vmatprep.subr.bf16.mxu0 %v1364_v28  ;;  %v1367_v49 = vld [vmem:[%s1529_s15 + $0xb4] ss:$8 sps:$4 sm:$0xff]   ;;  %v1369_v51 = vld [vmem:[%s1529_s15 + $0xb0] ss:$8 sps:$4 sm:$0xff]   ;;  %v1373_v52 = vld [vmem:[%s1529_s15 + $0xc4] ss:$8 sps:$4 sm:$0xff]  }
  0x38   : > { %737 = vmatprep.subr.bf16.mxu1 %v1334_v20  ;;  %v1375_v53 = vld [vmem:[%s1529_s15 + $0xc0] ss:$8 sps:$4 sm:$0xff]   ;;  %v1379_v54 = vld [vmem:[%s1529_s15 + $0xd4] ss:$8 sps:$4 sm:$0xff]   ;;  %v1381_v56 = vld [vmem:[%s1529_s15 + $0xd0] ss:$8 sps:$4 sm:$0xff]  }
  0x39   : > { %v1385_v57 = vld [vmem:[%s1529_s15 + $0xe4] ss:$8 sps:$4 sm:$0xff]   ;;  %v1387_v58 = vld [vmem:[%s1529_s15 + $0xe0] ss:$8 sps:$4 sm:$0xff]   ;;  %v1391_v59 = vld [vmem:[%s1529_s15 + $0xf4] ss:$8 sps:$4 sm:$0xff]  }
  0x3a   : > { %789 = vmatpush1.bf16.msra.mxu0 %v1366_v30  ;;  %v1393_v60 = vld [vmem:[%s1529_s15 + $0xf0] ss:$8 sps:$4 sm:$0xff]   ;;  %v393_v8 = vld [vmem:[#allocation2] sm:$0xff] }
  0x3b   : > { %738 = vmatpush1.bf16.msra.mxu1 %v1336_v23  ;;  %790 = vmatprep.subr.bf16.mxu0 %v1370_v32  ;;  %v1395_v61 = vld [vmem:[%s1531_s16] ss:$12 sps:$4 sm:$0xff]   ;;  %v1399_v62 = vld [vmem:[%s1531_s16 + $0x1c] ss:$12 sps:$4 sm:$0xff]   ;;  %v1401_v63 = vld [vmem:[%s1531_s16 + $0x18] ss:$12 sps:$4 sm:$0xff]  }
  0x3c   : > { %739 = vmatprep.subr.bf16.mxu1 %v1337_v24  ;;  %v395_v14 = vld [vmem:[#allocation2 + $0x10] sm:$0xff]  ;;  %v396_v18 = vld [vmem:[#allocation2 + $0x18] sm:$0xff]  ;;  %v397_v24 = vld [vmem:[#allocation2 + $0x20] sm:$0xff] }
  0x3d   : > { %v399_v30 = vld [vmem:[#allocation2 + $0x30] sm:$0xff] }
  0x3e   : > { %791 = vmatpush1.bf16.msra.mxu0 %v1372_v34  ;;  %v400_v34 = vld [vmem:[#allocation2 + $0x38] sm:$0xff] }
  0x3f   : > { %740 = vmatpush1.bf16.msra.mxu1 %v1339_v27  ;;  %792 = vmatprep.subr.bf16.mxu0 %v1376_v36  ;;  %v398_v27 = vld [vmem:[#allocation2 + $0x28] sm:$0xff] }
  0x40   : > { %741 = vmatprep.subr.bf16.mxu1 %v1340_v29 }
  0x42   : > { %793 = vmatpush1.bf16.msra.mxu0 %v1378_v38 }
  0x43   : > { %742 = vmatpush1.bf16.msra.mxu1 %v1342_v31  ;;  %794 = vmatprep.subr.bf16.mxu0 %v1382_v40  ;;  %v867_v40 = vlaneseq (!%p1254_p11) }
  0x44   : > { %743 = vmatprep.subr.bf16.mxu1 %v1343_v33 }
  0x46   : > { %795 = vmatpush1.bf16.msra.mxu0 %v1384_v43 }
  0x47   : > { %744 = vmatpush1.bf16.msra.mxu1 %v1345_v35  ;;  %796 = vmatprep.subr.bf16.mxu0 %v1388_v45 }
  0x48   : > { %745 = vmatprep.subr.bf16.mxu1 %v1349_v37 }
  0x4a   : > { %797 = vmatpush1.bf16.msra.mxu0 %v1390_v47 }
  0x4b   : > { %746 = vmatpush1.bf16.msra.mxu1 %v1351_v39 }
  0x4c   : > { %747 = vmatprep.subr.bf16.mxu1 %v1355_v41  ;;  %v1591_v41 = vshrl.u32 (!%p1254_p11), %v867_v40, 7 }
  0x4d   : > { %815 = vmatmul.mubr.bf16.vlgmr.msra.gmra.mrb[0].mxu0 %v1394_v50 }
  0x4e   : > { %824 = vmatprep.mubr.bf16.mxu0 %v1447_v11  ;;  %v394_v11 = vld [vmem:[#allocation2 + $0x8] sm:$0xff]  ;;  %v1597_v44 = vsub.s32 (!%p1254_p11), 0, %v1591_v41  ;;  %v1600_v45 = vsub.s32 (!%p1254_p11), 1, %v1591_v41 }
  0x4f   : > { %748 = vmatpush1.bf16.msra.mxu1 %v1357_v42  ;;  %v863_v42 = vld [vmem:[%s1644_s2] sm:$0x3] (!%p1254_p11) }
  0x50   : > { %749 = vmatprep.subr.bf16.mxu1 %v1361_v46 }
  0x53   : > { %750 = vmatpush1.bf16.msra.mxu1 %v1363_v48 }
  0x54   : > { %751 = vmatprep.subr.bf16.mxu1 %v1367_v49 }
  0x55   : > { %825 = vmatmul.mubr.bf16.gmra.mrb[4].mxu0 %v1398_v55 }
  0x57   : > { %752 = vmatpush1.bf16.msra.mxu1 %v1369_v51  ;;  %v870_v51 = vrot.slane (!%p1254_p11), %v863_v42, %v1597_v44 }
  0x58   : > { %753 = vmatprep.subr.bf16.mxu1 %v1373_v52  ;;  %v874_v52 = vrot.slane (!%p1254_p11), %v863_v42, %v1600_v45 }
  0x5b   : > { %754 = vmatpush1.bf16.msra.mxu1 %v1375_v53 }
  0x5c   : > { %755 = vmatprep.subr.bf16.mxu1 %v1379_v54 }
  0x5f   : > { %756 = vmatpush1.bf16.msra.mxu1 %v1381_v56 }
  0x60   : > { %757 = vmatprep.subr.bf16.mxu1 %v1385_v57 }
  0x63   : > { %758 = vmatpush1.bf16.msra.mxu1 %v1387_v58 }
  0x64   : > { %759 = vmatprep.subr.bf16.mxu1 %v1391_v59 }
  0x67   : > { %760 = vmatpush1.bf16.msra.mxu1 %v1393_v60 }
  0x6a   : > { %762 = vmatmul.mubr.bf16.vlgmr.msra.gmra.mrb[0].mxu1 %v1395_v61 }
  0x6b   : > { %771 = vmatprep.mubr.bf16.mxu1 %v1399_v62 }
  0x72   : > { %772 = vmatmul.mubr.bf16.gmra.mrb[4].mxu1 %v1401_v63 }
 0x120   : > { %v816_v0 = vpop.f32.mrb[0].mxu0 }
 0x121   : > { %v818_v1 = vpop.f32.mrb[1].mxu0 }
 0x122   : > { %v820_v2 = vpop.f32.mrb[2].mxu0 }
 0x123   : > { %v822_v3 = vpop.f32.mrb[3].mxu0 }
 0x128   : > { %v826_v4 = vpop.f32.mrb[4].mxu0 }
 0x129   : > { %v828_v5 = vpop.f32.mrb[5].mxu0 }
 0x12a   : > { %v830_v6 = vpop.f32.mrb[6].mxu0 }
 0x12b   : > { %v832_v7 = vpop.f32.mrb[7].mxu0 }
 0x13d   : > { %v763_v9 = vpop.f32.mrb[0].mxu1 }
 0x13e   : > { %v817_v10 = vadd.f32 %v816_v0, %v763_v9  ;;  %v765_v12 = vpop.f32.mrb[1].mxu1 }
 0x13f   : > { %v819_v13 = vadd.f32 %v818_v1, %v765_v12  ;;  %v767_v15 = vpop.f32.mrb[2].mxu1 }
 0x140   : > { %v835_v16 = vadd.f32 %v817_v10, %v393_v8  ;;  %v821_v17 = vadd.f32 %v820_v2, %v767_v15  ;;  %v769_v19 = vpop.f32.mrb[3].mxu1 }
 0x141   : > { %v836_v20 = vadd.f32 %v819_v13, %v394_v11  ;;  %v823_v21 = vadd.f32 %v822_v3, %v769_v19 }
 0x142   : > { %843 = vst [vmem:[#allocation2] sm:$0xff] %v835_v16  ;;  %v837_v22 = vadd.f32 %v821_v17, %v395_v14 }
 0x143   : > { %844 = vst [vmem:[#allocation2 + $0x8] sm:$0xff] %v836_v20  ;;  %v838_v23 = vadd.f32 %v823_v21, %v396_v18 }
 0x144   : > { %845 = vst [vmem:[#allocation2 + $0x10] sm:$0xff] %v837_v22 }
 0x145   : > { %846 = vst [vmem:[#allocation2 + $0x18] sm:$0xff] %v838_v23  ;;  %v773_v25 = vpop.f32.mrb[4].mxu1 }
 0x146   : > { %v827_v26 = vadd.f32 %v826_v4, %v773_v25  ;;  %v775_v28 = vpop.f32.mrb[5].mxu1 }
 0x147   : > { %v829_v29 = vadd.f32 %v828_v5, %v775_v28  ;;  %v777_v31 = vpop.f32.mrb[6].mxu1  ;;  %854 = sbr.rel (%p1254_p11) target bundleno = 421 (0x1a5), region = 74 }
 0x148   : > { %v839_v32 = vadd.f32 %v827_v26, %v397_v24  ;;  %v831_v33 = vadd.f32 %v830_v6, %v777_v31  ;;  %v779_v35 = vpop.f32.mrb[7].mxu1 }
 0x149   : > { %v840_v36 = vadd.f32 %v829_v29, %v398_v27  ;;  %v833_v37 = vadd.f32 %v832_v7, %v779_v35  ;;  %v855_v43 = vld [vmem:[#allocation2] sm:$0xff] (!%p1254_p11) }
 0x14a   : > { %847 = vst [vmem:[#allocation2 + $0x20] sm:$0xff] %v839_v32  ;;  %v841_v38 = vadd.f32 %v831_v33, %v399_v30  ;;  %v856_v46 = vld [vmem:[#allocation2 + $0x8] sm:$0xff] (!%p1254_p11)  ;;  %v877_v55 = vadd.f32 (!%p1254_p11), %v870_v51, %v855_v43 }
 0x14b   : > { %848 = vst [vmem:[#allocation2 + $0x28] sm:$0xff] %v840_v36  ;;  %v842_v39 = vadd.f32 %v833_v37, %v400_v34  ;;  %v857_v47 = vld [vmem:[#allocation2 + $0x10] sm:$0xff] (!%p1254_p11)  ;;  %v878_v56 = vadd.f32 (!%p1254_p11), %v874_v52, %v856_v46 }
 0x14c   : > { %849 = vst [vmem:[#allocation2 + $0x30] sm:$0xff] %v841_v38  ;;  %v858_v48 = vld [vmem:[#allocation2 + $0x18] sm:$0xff] (!%p1254_p11)  ;;  %v879_v57 = vadd.f32 (!%p1254_p11), %v870_v51, %v857_v47 }
 0x14d   : > { %850 = vst [vmem:[#allocation2 + $0x38] sm:$0xff] %v842_v39  ;;  %v880_v58 = vadd.f32 (!%p1254_p11), %v874_v52, %v858_v48 }
 0x14e   : > { %v885_v63 = vadd.f32 %v879_v57, %v877_v55 }
 0x14f   : > { %v894_v0 = vadd.f32 %v880_v58, %v878_v56 }
 0x151   : > { %v859_v49 = vld [vmem:[#allocation2 + $0x20] sm:$0xff] }
 0x152   : > { %v860_v50 = vld [vmem:[#allocation2 + $0x28] sm:$0xff]  ;;  %v881_v59 = vadd.f32 %v870_v51, %v859_v49 }
 0x153   : > { %v861_v53 = vld [vmem:[#allocation2 + $0x30] sm:$0xff]  ;;  %v882_v60 = vadd.f32 %v874_v52, %v860_v50 }
 0x154   : > { %v862_v54 = vld [vmem:[#allocation2 + $0x38] sm:$0xff]  ;;  %v883_v61 = vadd.f32 %v870_v51, %v861_v53  ;;  %v886_v1 = vadd.f32 %v885_v63, %v881_v59 }
 0x155   : > { %v884_v62 = vadd.f32 %v874_v52, %v862_v54  ;;  %v895_v2 = vadd.f32 %v894_v0, %v882_v60 }
 0x156   : > { %v887_v3 = vadd.f32 %v886_v1, %v883_v61 }
 0x157   : > { %v896_v4 = vadd.f32 %v895_v2, %v884_v62 }
 0x158   : > { %v888_v5 = vrot.slane %v887_v3, 4 }
 0x159   : > { %v897_v6 = vrot.slane %v896_v4, 4 }
 0x15a   : > { %v889_v7 = vadd.f32 %v888_v5, %v887_v3 }
 0x15b   : > { %v898_v8 = vadd.f32 %v897_v6, %v896_v4  ;;  %v864_v4 = vld [vmem:[%s1645_s3] sm:$0x3] }
 0x15c   : > { %v890_v9 = vrot.slane %v889_v7, 2  ;;  %v865_v6 = vld [vmem:[%s1646_s4] sm:$0x3] }
 0x15d   : > { %v899_v10 = vrot.slane %v898_v8, 2 }
 0x15e   : > { %v891_v11 = vadd.f32 %v890_v9, %v889_v7 }
 0x15f   : > { %v900_v12 = vadd.f32 %v899_v10, %v898_v8  ;;  %v988_v10 = vrot.slane %v865_v6, %v1597_v44 }
 0x160   : > { %v892_v13 = vrot.slane %v891_v11, 1 }
 0x161   : > { %v901_v14 = vrot.slane %v900_v12, 1 }
 0x162   : > { %v893_v15 = vadd.f32 %v892_v13, %v891_v11 }
 0x163   : > { %v902_v16 = vadd.f32 %v901_v14, %v900_v12 }
 0x164   : > { %v904_v17 = vmul.f32 0.03125, %v893_v15 }
 0x165   : > { %v905_v18 = vmul.f32 0.03125, %v902_v16 }
 0x166   : > { %v906_v19 = vsub.f32 %v877_v55, %v904_v17  ;;  %v908_v21 = vsub.f32 %v879_v57, %v904_v17  ;;  %v910_v23 = vsub.f32 %v881_v59, %v904_v17  ;;  %v912_v25 = vsub.f32 %v883_v61, %v904_v17 }
 0x167   : > { %v907_v20 = vsub.f32 %v878_v56, %v905_v18  ;;  %v909_v22 = vsub.f32 %v880_v58, %v905_v18  ;;  %v911_v24 = vsub.f32 %v882_v60, %v905_v18  ;;  %v913_v26 = vsub.f32 %v884_v62, %v905_v18 }
 0x168   : > { %v914_v27 = vmul.f32 %v906_v19, %v906_v19  ;;  %v916_v29 = vmul.f32 %v908_v21, %v908_v21  ;;  %v918_v31 = vmul.f32 %v910_v23, %v910_v23  ;;  %v920_v33 = vmul.f32 %v912_v25, %v912_v25 }
 0x169   : > { %v915_v28 = vmul.f32 %v907_v20, %v907_v20  ;;  %v917_v30 = vmul.f32 %v909_v22, %v909_v22  ;;  %v919_v32 = vmul.f32 %v911_v24, %v911_v24  ;;  %v921_v34 = vmul.f32 %v913_v26, %v913_v26 }
 0x16a   : > { %v922_v35 = vadd.f32 %v916_v29, %v914_v27  ;;  %v1448_v60 = vmov 1966171168  }
 0x16b   : > { %v931_v36 = vadd.f32 %v917_v30, %v915_v28  ;;  %v950_v61 = vunpack.c.l.s4 %v1448_v60 }
 0x16c   : > { %v923_v37 = vadd.f32 %v922_v35, %v918_v31 }
 0x16d   : > { %v932_v38 = vadd.f32 %v931_v36, %v919_v32  ;;  %v951_v62 = vunpack.c.0.s8 %v950_v61 }
 0x16e   : > { %v924_v39 = vadd.f32 %v923_v37, %v920_v33 }
 0x16f   : > { %v933_v40 = vadd.f32 %v932_v38, %v921_v34  ;;  %v954_v0 = vsub.s32 %v951_v62, %v1591_v41  ;;  %v992_v41 = vrot.slane %v865_v6, %v1600_v45 }
 0x170   : > { %v925_v42 = vrot.slane %v924_v39, 4 }
 0x171   : > { %v934_v43 = vrot.slane %v933_v40, 4 }
 0x172   : > { %v926_v46 = vadd.f32 %v925_v42, %v924_v39 }
 0x173   : > { %v935_v47 = vadd.f32 %v934_v43, %v933_v40 }
 0x174   : > { %v927_v48 = vrot.slane %v926_v46, 2 }
 0x175   : > { %v936_v49 = vrot.slane %v935_v47, 2 }
 0x176   : > { %v928_v50 = vadd.f32 %v927_v48, %v926_v46 }
 0x177   : > { %v937_v51 = vadd.f32 %v936_v49, %v935_v47 }
 0x178   : > { %v929_v52 = vrot.slane %v928_v50, 1 }
 0x179   : > { %v938_v53 = vrot.slane %v937_v51, 1 }
 0x17a   : > { %v930_v54 = vadd.f32 %v929_v52, %v928_v50 }
 0x17b   : > { %v939_v55 = vadd.f32 %v938_v53, %v937_v51 }
 0x17c   : > { %v940_v56 = vmul.f32 0.03125, %v930_v54 }
 0x17d   : > { %v941_v57 = vmul.f32 0.03125, %v939_v55 }
 0x17e   : > { %v942_v58 = vadd.f32 1e-05, %v940_v56 }
 0x17f   : > { %v943_v59 = vadd.f32 1e-05, %v941_v57 }
 0x180   : > { %1402 = vrsqrt.f32 %v942_v58 }
 0x181   : > { %1404 = vrsqrt.f32 %v943_v59 }
 0x18a   : > { %v1403_v63 = vpop.eup %1402 }
 0x18b   : > { %v1405_v1 = vpop.eup %1404 }
 0x18c   : > { %v948_v2 = vcombine.low %v1403_v63, %v1405_v1 }
 0x18e   : > { %v955_v3 = vrot.slane %v948_v2, %v954_v0 }
 0x190   : > { %v962_v5 = vrot.slane %v955_v3, %v954_v0 }
 0x192   : > { %v964_v7 = vmul.f32 %v962_v5, %v864_v4 }
 0x194   : > { %v969_v8 = vrot.slane %v964_v7, %v1597_v44  ;;  %v973_v9 = vrot.slane %v964_v7, %v1600_v45 }
 0x196   : > { %v976_v11 = vmul.f32 %v969_v8, %v906_v19  ;;  %v977_v12 = vmul.f32 %v973_v9, %v907_v20  ;;  %v978_v13 = vmul.f32 %v969_v8, %v908_v21  ;;  %v979_v14 = vmul.f32 %v973_v9, %v909_v22 }
 0x197   : > { %v980_v15 = vmul.f32 %v969_v8, %v910_v23  ;;  %v981_v16 = vmul.f32 %v973_v9, %v911_v24  ;;  %v982_v17 = vmul.f32 %v969_v8, %v912_v25  ;;  %v983_v18 = vmul.f32 %v973_v9, %v913_v26 }
 0x198   : > { %v995_v27 = vadd.f32 %v988_v10, %v976_v11  ;;  %v996_v28 = vadd.f32 %v992_v41, %v977_v12  ;;  %v997_v29 = vadd.f32 %v988_v10, %v978_v13  ;;  %v998_v30 = vadd.f32 %v992_v41, %v979_v14 }
 0x199   : > { %v999_v31 = vadd.f32 %v988_v10, %v980_v15  ;;  %v1000_v32 = vadd.f32 %v992_v41, %v981_v16  ;;  %v1001_v33 = vadd.f32 %v988_v10, %v982_v17  ;;  %v1002_v34 = vadd.f32 %v992_v41, %v983_v18 }
 0x19a   : > { %vm1003_vm0 = vcmp.ge.f32.partialorder %v995_v27, 0.0  ;;  %vm1004_vm1 = vcmp.ge.f32.partialorder %v996_v28, 0.0  ;;  %v1011_v44 = vmul.f32 0.2, %v995_v27  ;;  %v1012_v45 = vmul.f32 0.2, %v996_v28 }
 0x19b   : > { %vm1005_vm2 = vcmp.ge.f32.partialorder %v997_v29, 0.0  ;;  %vm1006_vm3 = vcmp.ge.f32.partialorder %v998_v30, 0.0  ;;  %v1013_v19 = vmul.f32 0.2, %v997_v29  ;;  %v1014_v20 = vmul.f32 0.2, %v998_v30 }
 0x19c   : > { %v1019_v21 = vsel %vm1003_vm0, %v995_v27, %v1011_v44  ;;  %v1020_v22 = vsel %vm1004_vm1, %v996_v28, %v1012_v45  ;;  %vm1007_vm4 = vcmp.ge.f32.partialorder %v999_v31, 0.0  ;;  %vm1008_vm5 = vcmp.ge.f32.partialorder %v1000_v32, 0.0 }
 0x19d   : > { %v1265_v23 = vpack.c.bf16 %v1020_v22, %v1019_v21  ;;  %v1021_v24 = vsel %vm1005_vm2, %v997_v29, %v1013_v19  ;;  %v1022_v25 = vsel %vm1006_vm3, %v998_v30, %v1014_v20  ;;  %v1015_v26 = vmul.f32 0.2, %v999_v31 }
 0x19e   : > { %v1266_v35 = vpack.c.bf16 %v1022_v25, %v1021_v24  ;;  %v1016_v36 = vmul.f32 0.2, %v1000_v32  ;;  %vm1009_vm6 = vcmp.ge.f32.partialorder %v1001_v33, 0.0  ;;  %vm1010_vm7 = vcmp.ge.f32.partialorder %v1002_v34, 0.0 }
 0x19f   : > { %1051 = vst [vmem:[%s1647_s5] sm:$0xff] %v1265_v23  ;;  %v1023_v37 = vsel %vm1007_vm4, %v999_v31, %v1015_v26  ;;  %v1017_v38 = vmul.f32 0.2, %v1001_v33  ;;  %v1018_v39 = vmul.f32 0.2, %v1002_v34 }
 0x1a0   : > { %1052 = vst [vmem:[%s1647_s5 + $0x8] sm:$0xff] %v1266_v35  ;;  %v1024_v40 = vsel %vm1008_vm5, %v1000_v32, %v1016_v36 }
 0x1a1   : > { %v1267_v42 = vpack.c.bf16 %v1024_v40, %v1023_v37  ;;  %v1025_v43 = vsel %vm1009_vm6, %v1001_v33, %v1017_v38  ;;  %v1026_v46 = vsel %vm1010_vm7, %v1002_v34, %v1018_v39 }
 0x1a2   : > { %v1268_v47 = vpack.c.bf16 %v1026_v46, %v1025_v43 }
 0x1a3   : > { %1053 = vst [vmem:[%s1647_s5 + $0x10] sm:$0xff] %v1267_v42 }
 0x1a4   : > { %1054 = vst [vmem:[%s1647_s5 + $0x18] sm:$0xff] %v1268_v47 }
 0x1a5 PF: > { %s15_s22 = sadd.s32 1, %s1444_s22   ;;  %s1648_s18 = smov %s1432_s19 }
 0x1a6   : > { %p12_p12 = scmp.ge.s32.totalorder %s15_s22, 5   ;;  %s1649_s19 = smov %s1514_s26 }
 0x1a7   : > { %s1650_s20 = smov %s1440_s21  ;;  %s1651_s21 = smov %s1653_s23 }
 0x1a8   :  { %14 = sbr.rel (!%p12_p12) target bundleno = 3 (0x3), region = 127 }

// kernel: discriminator_forward.14
= control target key start
LH: loop header
LB: loop body
LE: loop exit
PB: predicated region body
PF: predicated region fallthrough
CT: control target
= control target key end

     0   :  { %s1202_s18 = smov 0   ;;  %s1204_s19 = smov 0   ;;  %s1317_s0 = inlined_call_operand.vmem [shape: bf16[8,2304], index: 0, kind: input, shape index: {}]   ;;  %s1318_s1 = inlined_call_operand.vmem [shape: bf16[2304,256], index: 1, kind: input, shape index: {}]   ;;  %s1319_s2 = inlined_call_operand.vmem [shape: f32[1,256], index: 2, kind: input, shape index: {}]   ;;  %s1320_s3 = inlined_call_operand.vmem [shape: f32[1,256], index: 3, kind: input, shape index: {}]   ;;  %s1321_s4 = inlined_call_operand.vmem [shape: f32[1,256], index: 4, kind: input, shape index: {}]   ;;  %s1322_s5 = inlined_call_operand.vmem [shape: bf16[8,256], index: 5, kind: output, shape index: {}]  }
   0x1   :  { %s1206_s20 = smov 0  }
   0x2 LB: > { %s24_s21 = sadd.s32 1, %s1163_s19  ;;  %p975_p0 = scmp.ge.s32.totalorder %s1167_s20, 1  ;;  %s1167_s20 = sphi %s1206_s20, %s15_s20   ;;  %s1163_s19 = sphi %s1204_s19, %s1324_s19   ;;  %s1159_s18 = sphi %s1202_s18, %s1323_s18  }
   0x3   : > { %p25_p1 = scmp.ge.s32.totalorder %s24_s21, 6  ;;  %p249_p2 = scmp.lt.s32.totalorder %s1167_s20, 7 }
   0x5   : > { %s1326_s21 = smov (%p25_p1, %s24_s21), 0  ;;  %p250_p3 = pnand %p975_p0, %p249_p2 }
   0x6   : > { %s299_s22 = smul.u32 (!%p250_p3), 3, %s1159_s18  ;;  %p979_p6 = scmp.ne.s32.totalorder (!%p250_p3), %s1159_s18, 0 }
   0x7   : > { %253 = sbr.rel (%p250_p3) target bundleno = 381 (0x17d), region = 40 }
   0x8   : > { %s305_s23 = smul.u32 (!%p250_p3), 48, %s1159_s18  ;;  %p300_p4 = scmp.lt.s32.totalorder (!%p250_p3), %s299_s22, 17 }
   0xa   : > { %p307_p5 = scmp.lt.s32.totalorder (!%p250_p3), %s305_s23, 287 }
   0xe   : > { %s1328_s22 = smov (!%p300_p4, %s299_s22), 17  ;;  %s1330_s23 = smov (!%p307_p5, %s305_s23), 287 }
   0xf   : > { %s976_s24 = sshll.u32 %s1328_s22, 2  ;;  %s1037_s28 = sshll.u32 %s1330_s23, 3  ;;  %v1169_v0 = vmov (!%p979_p6), 0.0  }
  0x10   : > { %s1227_s27 = scalar_lea.vmem %s1317_s0, %s976_s24  ;;  %s1232_s6 = scalar_lea.vmem %s1318_s1, %s1037_s28  ;;  %343 = vst [vmem:[#allocation2] sm:$0xff] (!%p979_p6), %v1169_v0  ;;  %344 = vst [vmem:[#allocation2 + $0x8] sm:$0xff] (!%p979_p6), %v1169_v0 }
  0x11   : > { %342 = sbr.rel (%p979_p6) target bundleno = 24 (0x18), region = 44 }
  0x18 PF: > { %v1066_v1 = vld [vmem:[%s1232_s6 + $0x4] ss:$8 sps:$4 sm:$0xff]   ;;  %v1068_v2 = vld [vmem:[%s1232_s6] ss:$8 sps:$4 sm:$0xff]   ;;  %v1170_v3 = vmov 0   ;;  %p1031_p7 = scmp.ne.s32.totalorder %s1159_s18, 5 }
  0x19   : > { %721 = vmatprep.mubr.bf16.mxu1 %v1170_v3  ;;  %648 = vmatprep.subr.bf16.mxu0 %v1066_v1  ;;  %v1069_v4 = vld [vmem:[%s1232_s6 + $0x14] ss:$8 sps:$4 sm:$0xff]   ;;  %v1071_v5 = vld [vmem:[%s1232_s6 + $0x10] ss:$8 sps:$4 sm:$0xff]   ;;  %v1072_v6 = vld [vmem:[%s1232_s6 + $0x24] ss:$8 sps:$4 sm:$0xff]  }
  0x1a   : > { %649 = vmatpush1.bf16.msra.mxu0 %v1068_v2  ;;  %v1074_v7 = vld [vmem:[%s1232_s6 + $0x20] ss:$8 sps:$4 sm:$0xff]   ;;  %v1075_v8 = vld [vmem:[%s1232_s6 + $0x34] ss:$8 sps:$4 sm:$0xff]   ;;  %v1077_v9 = vld [vmem:[%s1232_s6 + $0x30] ss:$8 sps:$4 sm:$0xff]  }
  0x1b   : > { %650 = vmatprep.subr.bf16.mxu0 %v1069_v4  ;;  %v1090_v10 = vld [vmem:[%s1232_s6 + $0x104] ss:$8 sps:$4 sm:$0xff]   ;;  %v1092_v11 = vld [vmem:[%s1232_s6 + $0x100] ss:$8 sps:$4 sm:$0xff]   ;;  %v1096_v13 = vld [vmem:[%s1232_s6 + $0x114] ss:$8 sps:$4 sm:$0xff]   ;;  %v744_v4 = vlaneseq (!%p1031_p7) }
  0x1c   : > { %v1078_v12 = vld [vmem:[%s1232_s6 + $0x44] ss:$8 sps:$4 sm:$0xff]   ;;  %689 = vmatprep.subr.bf16.mxu1 %v1090_v10  ;;  %v1098_v14 = vld [vmem:[%s1232_s6 + $0x110] ss:$8 sps:$4 sm:$0xff]   ;;  %v1080_v15 = vld [vmem:[%s1232_s6 + $0x40] ss:$8 sps:$4 sm:$0xff]  }
  0x1d   : > { %690 = vmatpush1.bf16.msra.mxu1 %v1092_v11  ;;  %v1081_v16 = vld [vmem:[%s1232_s6 + $0x54] ss:$8 sps:$4 sm:$0xff]   ;;  %v1102_v17 = vld [vmem:[%s1232_s6 + $0x124] ss:$8 sps:$4 sm:$0xff]   ;;  %v1104_v18 = vld [vmem:[%s1232_s6 + $0x120] ss:$8 sps:$4 sm:$0xff]  }
  0x1e   : > { %651 = vmatpush1.bf16.msra.mxu0 %v1071_v5  ;;  %691 = vmatprep.subr.bf16.mxu1 %v1096_v13  ;;  %v1083_v19 = vld [vmem:[%s1232_s6 + $0x50] ss:$8 sps:$4 sm:$0xff]   ;;  %v1108_v20 = vld [vmem:[%s1232_s6 + $0x134] ss:$8 sps:$4 sm:$0xff]   ;;  %v1084_v21 = vld [vmem:[%s1232_s6 + $0x64] ss:$8 sps:$4 sm:$0xff]  }
  0x1f   : > { %652 = vmatprep.subr.bf16.mxu0 %v1072_v6  ;;  %v1110_v22 = vld [vmem:[%s1232_s6 + $0x130] ss:$8 sps:$4 sm:$0xff]   ;;  %v1086_v23 = vld [vmem:[%s1232_s6 + $0x60] ss:$8 sps:$4 sm:$0xff]   ;;  %v1114_v24 = vld [vmem:[%s1232_s6 + $0x144] ss:$8 sps:$4 sm:$0xff]  }
  0x20   : > { %v1087_v25 = vld [vmem:[%s1232_s6 + $0x74] ss:$8 sps:$4 sm:$0xff]   ;;  %v1116_v26 = vld [vmem:[%s1232_s6 + $0x140] ss:$8 sps:$4 sm:$0xff]   ;;  %v1089_v27 = vld [vmem:[%s1232_s6 + $0x70] ss:$8 sps:$4 sm:$0xff]  }
  0x21   : > { %692 = vmatpush1.bf16.msra.mxu1 %v1098_v14  ;;  %v1120_v28 = vld [vmem:[%s1232_s6 + $0x154] ss:$8 sps:$4 sm:$0xff]   ;;  %v1093_v29 = vld [vmem:[%s1232_s6 + $0x84] ss:$8 sps:$4 sm:$0xff]   ;;  %v1122_v30 = vld [vmem:[%s1232_s6 + $0x150] ss:$8 sps:$4 sm:$0xff]  }
  0x22   : > { %653 = vmatpush1.bf16.msra.mxu0 %v1074_v7  ;;  %693 = vmatprep.subr.bf16.mxu1 %v1102_v17  ;;  %v1095_v31 = vld [vmem:[%s1232_s6 + $0x80] ss:$8 sps:$4 sm:$0xff]   ;;  %v1126_v32 = vld [vmem:[%s1232_s6 + $0x164] ss:$8 sps:$4 sm:$0xff]   ;;  %v1099_v33 = vld [vmem:[%s1232_s6 + $0x94] ss:$8 sps:$4 sm:$0xff]  }
  0x23   : > { %654 = vmatprep.subr.bf16.mxu0 %v1075_v8  ;;  %v347_v34 = vld [vmem:[%s1227_s27] sm:$0xff]  ;;  %v1101_v37 = vld [vmem:[%s1232_s6 + $0x90] ss:$8 sps:$4 sm:$0xff]   ;;  %v1132_v38 = vld [vmem:[%s1232_s6 + $0x174] ss:$8 sps:$4 sm:$0xff]   ;;  %v745_v5 = vshrl.u32 (!%p1031_p7), %v744_v4, 7 }
  0x24   : > { %v981_v35 = vcombine.high %v347_v34, %v347_v34  ;;  %v1128_v36 = vld [vmem:[%s1232_s6 + $0x160] ss:$8 sps:$4 sm:$0xff]   ;;  %v1105_v39 = vld [vmem:[%s1232_s6 + $0xa4] ss:$8 sps:$4 sm:$0xff]   ;;  %v1134_v40 = vld [vmem:[%s1232_s6 + $0x170] ss:$8 sps:$4 sm:$0xff]   ;;  %v980_v53 = vcombine.low %v347_v34, %v347_v34 }
  0x25   : > { %694 = vmatpush1.bf16.msra.mxu1 %v1104_v18  ;;  %v1107_v41 = vld [vmem:[%s1232_s6 + $0xa0] ss:$8 sps:$4 sm:$0xff]   ;;  %v1111_v42 = vld [vmem:[%s1232_s6 + $0xb4] ss:$8 sps:$4 sm:$0xff]   ;;  %v1113_v44 = vld [vmem:[%s1232_s6 + $0xb0] ss:$8 sps:$4 sm:$0xff]  }
  0x26   : > { %655 = vmatpush1.bf16.msra.mxu0 %v1077_v9  ;;  %695 = vmatprep.subr.bf16.mxu1 %v1108_v20  ;;  %v1138_v43 = vld [vmem:[%s1227_s27 + $0x8] ss:$0 sps:$4 sm:$0xff]   ;;  %v1117_v45 = vld [vmem:[%s1232_s6 + $0xc4] ss:$8 sps:$4 sm:$0xff]   ;;  %v1123_v47 = vld [vmem:[%s1232_s6 + $0xd4] ss:$8 sps:$4 sm:$0xff]  }
  0x27   : > { %656 = vmatprep.subr.bf16.mxu0 %v1078_v12  ;;  %680 = vmatprep.mubr.bf16.mxu0 %v981_v35  ;;  %v1119_v46 = vld [vmem:[%s1232_s6 + $0xc0] ss:$8 sps:$4 sm:$0xff]   ;;  %v1125_v48 = vld [vmem:[%s1232_s6 + $0xd0] ss:$8 sps:$4 sm:$0xff]   ;;  %v1129_v49 = vld [vmem:[%s1232_s6 + $0xe4] ss:$8 sps:$4 sm:$0xff]  }
  0x28   : > { %v1131_v50 = vld [vmem:[%s1232_s6 + $0xe0] ss:$8 sps:$4 sm:$0xff]   ;;  %v1135_v51 = vld [vmem:[%s1232_s6 + $0xf4] ss:$8 sps:$4 sm:$0xff]   ;;  %v1137_v52 = vld [vmem:[%s1232_s6 + $0xf0] ss:$8 sps:$4 sm:$0xff]  }
  0x29   : > { %696 = vmatpush1.bf16.msra.mxu1 %v1110_v22  ;;  %v345_v58 = vld [vmem:[#allocation2] sm:$0xff]  ;;  %v346_v61 = vld [vmem:[#allocation2 + $0x8] sm:$0xff]  ;;  %v1289_v7 = vsub.s32 (!%p1031_p7), 0, %v745_v5  ;;  %v1291_v8 = vsub.s32 (!%p1031_p7), 1, %v745_v5 }
  0x2a   : > { %657 = vmatpush1.bf16.msra.mxu0 %v1080_v15  ;;  %697 = vmatprep.subr.bf16.mxu1 %v1114_v24  ;;  %v740_v6 = vld [vmem:[%s1319_s2] sm:$0x3] (!%p1031_p7) }
  0x2b   : > { %658 = vmatprep.subr.bf16.mxu0 %v1081_v16  ;;  %v747_v11 = vrot.slane (!%p1031_p7), %v740_v6, %v1289_v7  ;;  %v751_v12 = vrot.slane (!%p1031_p7), %v740_v6, %v1291_v8 }
  0x2d   : > { %698 = vmatpush1.bf16.msra.mxu1 %v1116_v26 }
  0x2e   : > { %659 = vmatpush1.bf16.msra.mxu0 %v1083_v19  ;;  %699 = vmatprep.subr.bf16.mxu1 %v1120_v28 }
  0x2f   : > { %660 = vmatprep.subr.bf16.mxu0 %v1084_v21 }
  0x31   : > { %700 = vmatpush1.bf16.msra.mxu1 %v1122_v30 }
  0x32   : > { %661 = vmatpush1.bf16.msra.mxu0 %v1086_v23  ;;  %701 = vmatprep.subr.bf16.mxu1 %v1126_v32 }
  0x33   : > { %662 = vmatprep.subr.bf16.mxu0 %v1087_v25 }
  0x35   : > { %702 = vmatpush1.bf16.msra.mxu1 %v1128_v36 }
  0x36   : > { %663 = vmatpush1.bf16.msra.mxu0 %v1089_v27  ;;  %703 = vmatprep.subr.bf16.mxu1 %v1132_v38 }
  0x37   : > { %664 = vmatprep.subr.bf16.mxu0 %v1093_v29 }
  0x39   : > { %704 = vmatpush1.bf16.msra.mxu1 %v1134_v40 }
  0x3a   : > { %665 = vmatpush1.bf16.msra.mxu0 %v1095_v31 }
  0x3b   : > { %666 = vmatprep.subr.bf16.mxu0 %v1099_v33 }
  0x3c   : > { %722 = vmatmul.mubr.bf16.vlgmr.msra.gmra.mrb[0].mxu1 %v1138_v43 }
  0x3e   : > { %667 = vmatpush1.bf16.msra.mxu0 %v1101_v37 }
  0x3f   : > { %668 = vmatprep.subr.bf16.mxu0 %v1105_v39 }
  0x42   : > { %669 = vmatpush1.bf16.msra.mxu0 %v1107_v41 }
  0x43   : > { %670 = vmatprep.subr.bf16.mxu0 %v1111_v42 }
  0x46   : > { %671 = vmatpush1.bf16.msra.mxu0 %v1113_v44 }
  0x47   : > { %672 = vmatprep.subr.bf16.mxu0 %v1117_v45 }
  0x4a   : > { %673 = vmatpush1.bf16.msra.mxu0 %v1119_v46 }
  0x4b   : > { %674 = vmatprep.subr.bf16.mxu0 %v1123_v47 }
  0x4e   : > { %675 = vmatpush1.bf16.msra.mxu0 %v1125_v48 }
  0x4f   : > { %676 = vmatprep.subr.bf16.mxu0 %v1129_v49  ;;  %v1171_v49 = vmov (!%p1031_p7), 1966171168  }
  0x52   : > { %677 = vmatpush1.bf16.msra.mxu0 %v1131_v50  ;;  %v797_v50 = vunpack.c.l.s4 (!%p1031_p7), %v1171_v49 }
  0x53   : > { %678 = vmatprep.subr.bf16.mxu0 %v1135_v51 }
  0x54   : > { %v798_v51 = vunpack.c.0.s8 (!%p1031_p7), %v797_v50 }
  0x56   : > { %679 = vmatpush1.bf16.msra.mxu0 %v1137_v52 }
  0x59   : > { %681 = vmatmul.mubr.bf16.vlgmr.msra.gmra.mrb[0].mxu0 %v980_v53  ;;  %v801_v53 = vsub.s32 (!%p1031_p7), %v798_v51, %v745_v5 }
 0x10f   : > { %v723_v54 = vpop.f32.mrb[0].mxu1 }
 0x110   : > { %v725_v55 = vpop.f32.mrb[1].mxu1 }
 0x111   : > { %v727_v56 = vpop.f32.mrb[2].mxu1 }
 0x112   : > { %v728_v57 = vpop.f32.mrb[3].mxu1 }
 0x113   : > { %v741_v57 = vld [vmem:[%s1320_s3] sm:$0x3] (!%p1031_p7) }
 0x12c   : > { %v682_v59 = vpop.f32.mrb[0].mxu0  ;;  %737 = sbr.rel (%p1031_p7) target bundleno = 381 (0x17d), region = 48 }
 0x12d   : > { %v724_v60 = vadd.f32 %v723_v54, %v682_v59  ;;  %v684_v62 = vpop.f32.mrb[1].mxu0  ;;  %v742_v59 = vld [vmem:[%s1321_s4] sm:$0x3] (!%p1031_p7) }
 0x12e   : > { %v726_v63 = vadd.f32 %v725_v55, %v684_v62  ;;  %v686_v0 = vpop.f32.mrb[2].mxu0 }
 0x12f   : > { %v730_v1 = vadd.f32 %v724_v60, %v345_v58  ;;  %v687_v2 = vpop.f32.mrb[3].mxu0  ;;  %v833_v0 = vrot.slane (!%p1031_p7), %v742_v59, %v1291_v8 }
 0x130   : > { %v731_v3 = vadd.f32 %v726_v63, %v346_v61  ;;  %v829_v63 = vrot.slane (!%p1031_p7), %v742_v59, %v1289_v7 }
 0x131   : > { %732 = vst [vmem:[#allocation2] sm:$0xff] %v730_v1 }
 0x132   : > { %733 = vst [vmem:[#allocation2 + $0x8] sm:$0xff] %v731_v3 }
 0x138   : > { %v738_v9 = vld [vmem:[#allocation2] sm:$0xff] }
 0x139   : > { %v739_v10 = vld [vmem:[#allocation2 + $0x8] sm:$0xff]  ;;  %v754_v13 = vadd.f32 %v747_v11, %v738_v9 }
 0x13a   : > { %v755_v14 = vadd.f32 %v751_v12, %v739_v10 }
 0x13b   : > { %v756_v15 = vrot.slane %v754_v13, 4 }
 0x13c   : > { %v762_v16 = vrot.slane %v755_v14, 4 }
 0x13d   : > { %v757_v17 = vadd.f32 %v756_v15, %v754_v13 }
 0x13e   : > { %v763_v18 = vadd.f32 %v762_v16, %v755_v14 }
 0x13f   : > { %v758_v19 = vrot.slane %v757_v17, 2 }
 0x140   : > { %v764_v20 = vrot.slane %v763_v18, 2 }
 0x141   : > { %v759_v21 = vadd.f32 %v758_v19, %v757_v17 }
 0x142   : > { %v765_v22 = vadd.f32 %v764_v20, %v763_v18 }
 0x143   : > { %v760_v23 = vrot.slane %v759_v21, 1 }
 0x144   : > { %v766_v24 = vrot.slane %v765_v22, 1 }
 0x145   : > { %v761_v25 = vadd.f32 %v760_v23, %v759_v21 }
 0x146   : > { %v767_v26 = vadd.f32 %v766_v24, %v765_v22 }
 0x147   : > { %v769_v27 = vmul.f32 0.125, %v761_v25 }
 0x148   : > { %v770_v28 = vmul.f32 0.125, %v767_v26 }
 0x149   : > { %v771_v29 = vsub.f32 %v754_v13, %v769_v27 }
 0x14a   : > { %v772_v30 = vsub.f32 %v755_v14, %v770_v28 }
 0x14b   : > { %v773_v31 = vmul.f32 %v771_v29, %v771_v29 }
 0x14c   : > { %v774_v32 = vmul.f32 %v772_v30, %v772_v30 }
 0x14d   : > { %v775_v33 = vrot.slane %v773_v31, 4 }
 0x14e   : > { %v781_v34 = vrot.slane %v774_v32, 4 }
 0x14f   : > { %v776_v35 = vadd.f32 %v775_v33, %v773_v31 }
 0x150   : > { %v782_v36 = vadd.f32 %v781_v34, %v774_v32 }
 0x151   : > { %v777_v37 = vrot.slane %v776_v35, 2 }
 0x152   : > { %v783_v38 = vrot.slane %v782_v36, 2 }
 0x153   : > { %v778_v39 = vadd.f32 %v777_v37, %v776_v35 }
 0x154   : > { %v784_v40 = vadd.f32 %v783_v38, %v782_v36 }
 0x155   : > { %v779_v41 = vrot.slane %v778_v39, 1 }
 0x156   : > { %v785_v42 = vrot.slane %v784_v40, 1 }
 0x157   : > { %v780_v43 = vadd.f32 %v779_v41, %v778_v39 }
 0x158   : > { %v786_v44 = vadd.f32 %v785_v42, %v784_v40 }
 0x159   : > { %v787_v45 = vmul.f32 0.125, %v780_v43 }
 0x15a   : > { %v788_v46 = vmul.f32 0.125, %v786_v44 }
 0x15b   : > { %v789_v47 = vadd.f32 1e-05, %v787_v45 }
 0x15c   : > { %v790_v48 = vadd.f32 1e-05, %v788_v46 }
 0x15d   : > { %1141 = vrsqrt.f32 %v789_v47 }
 0x15e   : > { %1143 = vrsqrt.f32 %v790_v48 }
 0x167   : > { %v1142_v52 = vpop.eup %1141 }
 0x168   : > { %v1144_v54 = vpop.eup %1143 }
 0x169   : > { %v795_v55 = vcombine.low %v1142_v52, %v1144_v54 }
 0x16b   : > { %v802_v56 = vrot.slane %v795_v55, %v801_v53 }
 0x16d   : > { %v809_v58 = vrot.slane %v802_v56, %v801_v53 }
 0x16f   : > { %v811_v60 = vmul.f32 %v809_v58, %v741_v57 }
 0x171   : > { %v816_v61 = vrot.slane %v811_v60, %v1289_v7  ;;  %v820_v62 = vrot.slane %v811_v60, %v1291_v8 }
 0x173   : > { %v823_v1 = vmul.f32 %v816_v61, %v771_v29  ;;  %v824_v2 = vmul.f32 %v820_v62, %v772_v30 }
 0x175   : > { %v836_v3 = vadd.f32 %v829_v63, %v823_v1  ;;  %v837_v4 = vadd.f32 %v833_v0, %v824_v2 }
 0x177   : > { %vm838_vm0 = vcmp.ge.f32.partialorder %v836_v3, 0.0  ;;  %vm839_vm1 = vcmp.ge.f32.partialorder %v837_v4, 0.0  ;;  %v840_v5 = vmul.f32 0.2, %v836_v3  ;;  %v841_v6 = vmul.f32 0.2, %v837_v4 }
 0x179   : > { %v842_v9 = vsel %vm838_vm0, %v836_v3, %v840_v5  ;;  %v843_v10 = vsel %vm839_vm1, %v837_v4, %v841_v6 }
 0x17a   : > { %v1038_v11 = vpack.c.bf16 %v843_v10, %v842_v9 }
 0x17c   : > { %852 = vst [vmem:[%s1322_s5] sm:$0xff] %v1038_v11 }
 0x17d PF: > { %s15_s20 = sadd.s32 1, %s1167_s20   ;;  %s1323_s18 = smov %s1163_s19 }
 0x17e   : > { %p12_p8 = scmp.ge.s32.totalorder %s15_s20, 8   ;;  %s1324_s19 = smov %s1326_s21 }
 0x180   :  { %14 = sbr.rel (!%p12_p8) target bundleno = 2 (0x2), region = 90 }

// kernel: discriminator_forward.15
= control target key start
LH: loop header
LB: loop body
LE: loop exit
PB: predicated region body
PF: predicated region fallthrough
CT: control target
= control target key end

     0   :  { %s1770_s0 = inlined_call_operand.vmem [shape: bf16[8,2304], index: 0, kind: input, shape index: {}]   ;;  %s1771_s1 = inlined_call_operand.vmem [shape: bf16[2304,512], index: 1, kind: input, shape index: {}]   ;;  %s1772_s2 = inlined_call_operand.vmem [shape: f32[1,512], index: 2, kind: input, shape index: {}]   ;;  %s1773_s3 = inlined_call_operand.vmem [shape: f32[1,512], index: 3, kind: input, shape index: {}]   ;;  %s1774_s4 = inlined_call_operand.vmem [shape: f32[1,512], index: 4, kind: input, shape index: {}]   ;;  %s1775_s5 = inlined_call_operand.vmem [shape: bf16[8,512], index: 5, kind: output, shape index: {}]  }
   0x1   :  { %1777 = sst [smem:[#allocation5_spill]] %s1771_s1 }
   0x2   :  { %s1479_s18 = smov 0   ;;  %s1481_s19 = smov 0  }
   0x3   :  { %s1483_s20 = smov 0   ;;  %s1485_s21 = smov 0  }
   0x4   :  { %s1487_s22 = smov 0   ;;  %s1489_s23 = smov 0  }
   0x5   :  { %s1491_s24 = smov 0  }
   0x6 LB: > { %s24_s25 = sadd.s32 1, %s1436_s22  ;;  %s27_s26 = sadd.s32 1, %s1440_s23  ;;  %s1444_s24 = sphi %s1491_s24, %s15_s24   ;;  %s1440_s23 = sphi %s1489_s23, %s1786_s23   ;;  %s1436_s22 = sphi %s1487_s22, %s1785_s22   ;;  %s1432_s21 = sphi %s1485_s21, %s1784_s21   ;;  %s1428_s20 = sphi %s1483_s20, %s1783_s20   ;;  %s1424_s19 = sphi %s1481_s19, %s1782_s19   ;;  %s1420_s18 = sphi %s1479_s18, %s1781_s18  }
   0x7   : > { %p25_p0 = scmp.ge.s32.totalorder %s24_s25, 6  ;;  %p69_p1 = scmp.ne.s32.totalorder %s1424_s19, %s1420_s18 }
   0x8   : > { %p70_p2 = scmp.eq.s32.totalorder %s1444_s24, 0  ;;  %s62_s30 = sadd.s32 1, %s1424_s19 }
   0x9   : > { %s1788_s25 = smov (%p25_p0, %s24_s25), 0  ;;  %s1790_s26 = smov (!%p25_p0, %s27_s26), %s1440_s23 }
   0xa   : > { %p71_p3 = por %p70_p2, %p69_p1  ;;  %p29_p4 = scmp.ge.s32.totalorder %s1790_s26, 2 }
   0xb   : > { %s57_s27 = ssub.s32 %s1436_s22, %s1788_s25  ;;  %p1181_p6 = scmp.ge.s32.totalorder %s1444_s24, 12 }
   0xc   : > { %s1792_s26 = smov (%p29_p4, %s1790_s26), 0 }
   0xd   : > { %1778 = sst [smem:[#allocation4_spill]] %s1792_s26  ;;  %s58_s28 = ssub.s32 %s1440_s23, %s1792_s26 }
   0xe   : > { %s59_s29 = sor.u32 %s58_s28, %s57_s27  ;;  %199 = sbr.rel (%p1181_p6) target bundleno = 55 (0x37), region = 16 }
   0xf   : > { %p60_p5 = scmp.eq.s32.totalorder %s59_s29, 0 }
  0x11   : > { %s1530_s6 = scalar_select %p60_p5, %s1424_s19, %s62_s30  }
  0x15   : > { %211 = sbr.rel (!%p71_p3) target bundleno = 55 (0x37), region = 24  ;;  %s213_s7 = sand.u32 (%p71_p3), 1, %s1424_s19  }
  0x16   : > { %s1250_s8 = smul.u32 (%p71_p3), 384, %s213_s7  ;;  %s1182_s9 = sshll.u32 (%p71_p3), %s1440_s23, 1 }
  0x17   : > { %s1248_s10 = smul.u32 (%p71_p3), 192, %s1436_s22  ;;  %s1779_s1 = sld [smem:[#allocation5_spill]] (%p71_p3) }
  0x18   : > { %s1544_s16 = scalar_lea.vmem (%p71_p3), [#allocation3], %s1250_s8 }
  0x19   : > { %s219_s11 = sadd.s32 (%p71_p3), %s1248_s10, %s1182_s9 }
  0x1a   : > { %s1184_s12 = sshll.u32 (%p71_p3), %s219_s11, 2 }
  0x1d   : > { %s1539_s15 = scalar_lea.vmem %s1779_s1, %s1184_s12 }
  0x1e   : > { %v343_v0 = vld [vmem:[%s1539_s15] sm:$0xff]  ;;  %v345_v1 = vld [vmem:[%s1539_s15 + $0x10] sm:$0xff] }
  0x1f   : > { %v347_v2 = vld [vmem:[%s1539_s15 + $0x20] sm:$0xff]  ;;  %344 = vst [vmem:[%s1544_s16] sm:$0xff] %v343_v0  ;;  %346 = vst [vmem:[%s1544_s16 + $0x8] sm:$0xff] %v345_v1  ;;  %v349_v3 = vld [vmem:[%s1539_s15 + $0x30] sm:$0xff] }
  0x20   : > { %348 = vst [vmem:[%s1544_s16 + $0x10] sm:$0xff] %v347_v2  ;;  %v351_v4 = vld [vmem:[%s1539_s15 + $0x40] sm:$0xff]  ;;  %v353_v5 = vld [vmem:[%s1539_s15 + $0x50] sm:$0xff]  ;;  %350 = vst [vmem:[%s1544_s16 + $0x18] sm:$0xff] %v349_v3 }
  0x21   : > { %352 = vst [vmem:[%s1544_s16 + $0x20] sm:$0xff] %v351_v4  ;;  %354 = vst [vmem:[%s1544_s16 + $0x28] sm:$0xff] %v353_v5  ;;  %v355_v6 = vld [vmem:[%s1539_s15 + $0x60] sm:$0xff]  ;;  %v357_v7 = vld [vmem:[%s1539_s15 + $0x70] sm:$0xff] }
  0x22   : > { %v359_v8 = vld [vmem:[%s1539_s15 + $0x80] sm:$0xff]  ;;  %356 = vst [vmem:[%s1544_s16 + $0x30] sm:$0xff] %v355_v6  ;;  %358 = vst [vmem:[%s1544_s16 + $0x38] sm:$0xff] %v357_v7  ;;  %v361_v9 = vld [vmem:[%s1539_s15 + $0x90] sm:$0xff] }
  0x23   : > { %360 = vst [vmem:[%s1544_s16 + $0x40] sm:$0xff] %v359_v8  ;;  %v363_v10 = vld [vmem:[%s1539_s15 + $0xa0] sm:$0xff]  ;;  %v365_v11 = vld [vmem:[%s1539_s15 + $0xb0] sm:$0xff]  ;;  %362 = vst [vmem:[%s1544_s16 + $0x48] sm:$0xff] %v361_v9 }
  0x24   : > { %364 = vst [vmem:[%s1544_s16 + $0x50] sm:$0xff] %v363_v10  ;;  %366 = vst [vmem:[%s1544_s16 + $0x58] sm:$0xff] %v365_v11  ;;  %v367_v12 = vld [vmem:[%s1539_s15 + $0xc0] sm:$0xff]  ;;  %v369_v13 = vld [vmem:[%s1539_s15 + $0xd0] sm:$0xff] }
  0x25   : > { %v371_v14 = vld [vmem:[%s1539_s15 + $0xe0] sm:$0xff]  ;;  %368 = vst [vmem:[%s1544_s16 + $0x60] sm:$0xff] %v367_v12  ;;  %370 = vst [vmem:[%s1544_s16 + $0x68] sm:$0xff] %v369_v13  ;;  %v373_v15 = vld [vmem:[%s1539_s15 + $0xf0] sm:$0xff] }
  0x26   : > { %372 = vst [vmem:[%s1544_s16 + $0x70] sm:$0xff] %v371_v14  ;;  %v375_v16 = vld [vmem:[%s1539_s15 + $0x100] sm:$0xff]  ;;  %v377_v17 = vld [vmem:[%s1539_s15 + $0x110] sm:$0xff]  ;;  %374 = vst [vmem:[%s1544_s16 + $0x78] sm:$0xff] %v373_v15 }
  0x27   : > { %376 = vst [vmem:[%s1544_s16 + $0x80] sm:$0xff] %v375_v16  ;;  %378 = vst [vmem:[%s1544_s16 + $0x88] sm:$0xff] %v377_v17  ;;  %v379_v18 = vld [vmem:[%s1539_s15 + $0x120] sm:$0xff]  ;;  %v381_v19 = vld [vmem:[%s1539_s15 + $0x130] sm:$0xff] }
  0x28   : > { %v383_v20 = vld [vmem:[%s1539_s15 + $0x140] sm:$0xff]  ;;  %380 = vst [vmem:[%s1544_s16 + $0x90] sm:$0xff] %v379_v18  ;;  %382 = vst [vmem:[%s1544_s16 + $0x98] sm:$0xff] %v381_v19  ;;  %v385_v21 = vld [vmem:[%s1539_s15 + $0x150] sm:$0xff] }
  0x29   : > { %384 = vst [vmem:[%s1544_s16 + $0xa0] sm:$0xff] %v383_v20  ;;  %v387_v22 = vld [vmem:[%s1539_s15 + $0x160] sm:$0xff]  ;;  %v389_v23 = vld [vmem:[%s1539_s15 + $0x170] sm:$0xff]  ;;  %386 = vst [vmem:[%s1544_s16 + $0xa8] sm:$0xff] %v385_v21 }
  0x2a   : > { %388 = vst [vmem:[%s1544_s16 + $0xb0] sm:$0xff] %v387_v22  ;;  %390 = vst [vmem:[%s1544_s16 + $0xb8] sm:$0xff] %v389_v23  ;;  %v391_v24 = vld [vmem:[%s1539_s15 + $0x180] sm:$0xff]  ;;  %v393_v25 = vld [vmem:[%s1539_s15 + $0x190] sm:$0xff] }
  0x2b   : > { %v395_v26 = vld [vmem:[%s1539_s15 + $0x1a0] sm:$0xff]  ;;  %392 = vst [vmem:[%s1544_s16 + $0xc0] sm:$0xff] %v391_v24  ;;  %394 = vst [vmem:[%s1544_s16 + $0xc8] sm:$0xff] %v393_v25  ;;  %v397_v27 = vld [vmem:[%s1539_s15 + $0x1b0] sm:$0xff] }
  0x2c   : > { %396 = vst [vmem:[%s1544_s16 + $0xd0] sm:$0xff] %v395_v26  ;;  %v399_v28 = vld [vmem:[%s1539_s15 + $0x1c0] sm:$0xff]  ;;  %v401_v29 = vld [vmem:[%s1539_s15 + $0x1d0] sm:$0xff]  ;;  %398 = vst [vmem:[%s1544_s16 + $0xd8] sm:$0xff] %v397_v27 }
  0x2d   : > { %400 = vst [vmem:[%s1544_s16 + $0xe0] sm:$0xff] %v399_v28  ;;  %402 = vst [vmem:[%s1544_s16 + $0xe8] sm:$0xff] %v401_v29  ;;  %v403_v30 = vld [vmem:[%s1539_s15 + $0x1e0] sm:$0xff]  ;;  %v405_v31 = vld [vmem:[%s1539_s15 + $0x1f0] sm:$0xff] }
  0x2e   : > { %v407_v32 = vld [vmem:[%s1539_s15 + $0x200] sm:$0xff]  ;;  %404 = vst [vmem:[%s1544_s16 + $0xf0] sm:$0xff] %v403_v30  ;;  %406 = vst [vmem:[%s1544_s16 + $0xf8] sm:$0xff] %v405_v31  ;;  %v409_v33 = vld [vmem:[%s1539_s15 + $0x210] sm:$0xff] }
  0x2f   : > { %408 = vst [vmem:[%s1544_s16 + $0x100] sm:$0xff] %v407_v32  ;;  %v411_v34 = vld [vmem:[%s1539_s15 + $0x220] sm:$0xff]  ;;  %v413_v35 = vld [vmem:[%s1539_s15 + $0x230] sm:$0xff]  ;;  %410 = vst [vmem:[%s1544_s16 + $0x108] sm:$0xff] %v409_v33 }
  0x30   : > { %412 = vst [vmem:[%s1544_s16 + $0x110] sm:$0xff] %v411_v34  ;;  %414 = vst [vmem:[%s1544_s16 + $0x118] sm:$0xff] %v413_v35  ;;  %v415_v36 = vld [vmem:[%s1539_s15 + $0x240] sm:$0xff]  ;;  %v417_v37 = vld [vmem:[%s1539_s15 + $0x250] sm:$0xff] }
  0x31   : > { %v419_v38 = vld [vmem:[%s1539_s15 + $0x260] sm:$0xff]  ;;  %416 = vst [vmem:[%s1544_s16 + $0x120] sm:$0xff] %v415_v36  ;;  %418 = vst [vmem:[%s1544_s16 + $0x128] sm:$0xff] %v417_v37  ;;  %v421_v39 = vld [vmem:[%s1539_s15 + $0x270] sm:$0xff] }
  0x32   : > { %420 = vst [vmem:[%s1544_s16 + $0x130] sm:$0xff] %v419_v38  ;;  %v423_v40 = vld [vmem:[%s1539_s15 + $0x280] sm:$0xff]  ;;  %v425_v41 = vld [vmem:[%s1539_s15 + $0x290] sm:$0xff]  ;;  %422 = vst [vmem:[%s1544_s16 + $0x138] sm:$0xff] %v421_v39 }
  0x33   : > { %424 = vst [vmem:[%s1544_s16 + $0x140] sm:$0xff] %v423_v40  ;;  %426 = vst [vmem:[%s1544_s16 + $0x148] sm:$0xff] %v425_v41  ;;  %v427_v42 = vld [vmem:[%s1539_s15 + $0x2a0] sm:$0xff]  ;;  %v429_v43 = vld [vmem:[%s1539_s15 + $0x2b0] sm:$0xff] }
  0x34   : > { %v431_v44 = vld [vmem:[%s1539_s15 + $0x2c0] sm:$0xff]  ;;  %428 = vst [vmem:[%s1544_s16 + $0x150] sm:$0xff] %v427_v42  ;;  %430 = vst [vmem:[%s1544_s16 + $0x158] sm:$0xff] %v429_v43  ;;  %v433_v45 = vld [vmem:[%s1539_s15 + $0x2d0] sm:$0xff] }
  0x35   : > { %432 = vst [vmem:[%s1544_s16 + $0x160] sm:$0xff] %v431_v44  ;;  %v435_v46 = vld [vmem:[%s1539_s15 + $0x2e0] sm:$0xff]  ;;  %v437_v47 = vld [vmem:[%s1539_s15 + $0x2f0] sm:$0xff]  ;;  %434 = vst [vmem:[%s1544_s16 + $0x168] sm:$0xff] %v433_v45 }
  0x36   : > { %436 = vst [vmem:[%s1544_s16 + $0x170] sm:$0xff] %v435_v46  ;;  %438 = vst [vmem:[%s1544_s16 + $0x178] sm:$0xff] %v437_v47 }
  0x37 PF: > { %p1185_p7 = scmp.ge.s32.totalorder %s1444_s24, 1  ;;  %p467_p8 = scmp.lt.s32.totalorder %s1444_s24, 13 }
  0x39   : > { %p468_p9 = pnand %p1185_p7, %p467_p8 }
  0x3a   : > { %s474_s17 = sand.u32 (!%p468_p9), 1, %s1420_s18   ;;  %s518_s27 = smul.u32 (!%p468_p9), 3, %s1428_s20 }
  0x3b   : > { %471 = sbr.rel (%p468_p9) target bundleno = 435 (0x1b3), region = 74  ;;  %s1187_s29 = sshll.u32 (!%p468_p9), %s1432_s21, 1 }
  0x3c   : > { %s1251_s28 = smul.u32 (!%p468_p9), 384, %s474_s17  ;;  %p519_p10 = scmp.lt.s32.totalorder (!%p468_p9), %s518_s27, 17 }
  0x3d   : > { %p527_p11 = scmp.lt.s32.totalorder (!%p468_p9), %s1187_s29, 3  ;;  %p1192_p12 = scmp.ne.s32.totalorder (!%p468_p9), %s1428_s20, 0 }
  0x42   : > { %s1794_s27 = smov (!%p519_p10, %s518_s27), 17  ;;  %s1796_s29 = smov (!%p527_p11, %s1187_s29), 3 }
  0x43   : > { %s1186_s30 = sshll.u32 %s1794_s27, 2  ;;  %s529_s11 = scalar_lea.vmem %s1772_s2, %s1796_s29  ;;  %v1446_v48 = vmov (!%p1192_p12), 0.0  }
  0x44   : > { %s1649_s9 = scalar_lea.vmem %s1770_s0, %s1186_s30  ;;  %s534_s13 = scalar_lea.vmem %s1773_s3, %s1796_s29  ;;  %552 = vst [vmem:[#allocation2] sm:$0xff] (!%p1192_p12), %v1446_v48  ;;  %553 = vst [vmem:[#allocation2 + $0x8] sm:$0xff] (!%p1192_p12), %v1446_v48 }
  0x45   : > { %s539_s16 = scalar_lea.vmem %s1774_s4, %s1796_s29  ;;  %s1191_s17 = sshll.u32 %s1796_s29, 2 }
  0x46   : > { %s1667_s26 = scalar_lea.vmem %s1775_s5, %s1191_s17  ;;  %s1669_s30 = scalar_lea.vmem [#allocation3], %s1251_s28 }
  0x47   : > { %551 = sbr.rel (%p1192_p12) target bundleno = 78 (0x4e), region = 82 }
  0x4e PF: > { %v1311_v49 = vld [vmem:[%s1669_s30 + $0x4] ss:$8 sps:$4 sm:$0xff]   ;;  %v1313_v50 = vld [vmem:[%s1669_s30] ss:$8 sps:$4 sm:$0xff]   ;;  %v1447_v51 = vmov 0   ;;  %v556_v18 = vld [vmem:[%s1649_s9] sm:$0xff] }
  0x4f   : > { %930 = vmatprep.mubr.bf16.mxu1 %v1447_v51  ;;  %857 = vmatprep.subr.bf16.mxu0 %v1311_v49  ;;  %v1314_v52 = vld [vmem:[%s1669_s30 + $0x14] ss:$8 sps:$4 sm:$0xff]   ;;  %v1316_v53 = vld [vmem:[%s1669_s30 + $0x10] ss:$8 sps:$4 sm:$0xff]   ;;  %v1317_v54 = vld [vmem:[%s1669_s30 + $0x24] ss:$8 sps:$4 sm:$0xff]   ;;  %v1194_v19 = vcombine.high %v556_v18, %v556_v18  ;;  %v1193_v37 = vcombine.low %v556_v18, %v556_v18 }
  0x50   : > { %858 = vmatpush1.bf16.msra.mxu0 %v1313_v50  ;;  %v1319_v55 = vld [vmem:[%s1669_s30 + $0x20] ss:$8 sps:$4 sm:$0xff]   ;;  %v1320_v56 = vld [vmem:[%s1669_s30 + $0x34] ss:$8 sps:$4 sm:$0xff]   ;;  %v1322_v57 = vld [vmem:[%s1669_s30 + $0x30] ss:$8 sps:$4 sm:$0xff]  }
  0x51   : > { %859 = vmatprep.subr.bf16.mxu0 %v1314_v52  ;;  %v1335_v58 = vld [vmem:[%s1669_s30 + $0x104] ss:$8 sps:$4 sm:$0xff]   ;;  %v1337_v59 = vld [vmem:[%s1669_s30 + $0x100] ss:$8 sps:$4 sm:$0xff]   ;;  %v1341_v61 = vld [vmem:[%s1669_s30 + $0x114] ss:$8 sps:$4 sm:$0xff]   ;;  %889 = vmatprep.mubr.bf16.mxu0 %v1194_v19 }
  0x52   : > { %v1323_v60 = vld [vmem:[%s1669_s30 + $0x44] ss:$8 sps:$4 sm:$0xff]   ;;  %898 = vmatprep.subr.bf16.mxu1 %v1335_v58  ;;  %v1343_v62 = vld [vmem:[%s1669_s30 + $0x110] ss:$8 sps:$4 sm:$0xff]   ;;  %v1325_v63 = vld [vmem:[%s1669_s30 + $0x40] ss:$8 sps:$4 sm:$0xff]  }
  0x53   : > { %899 = vmatpush1.bf16.msra.mxu1 %v1337_v59  ;;  %v1326_v0 = vld [vmem:[%s1669_s30 + $0x54] ss:$8 sps:$4 sm:$0xff]   ;;  %v1347_v1 = vld [vmem:[%s1669_s30 + $0x124] ss:$8 sps:$4 sm:$0xff]   ;;  %v1349_v2 = vld [vmem:[%s1669_s30 + $0x120] ss:$8 sps:$4 sm:$0xff]  }
  0x54   : > { %860 = vmatpush1.bf16.msra.mxu0 %v1316_v53  ;;  %900 = vmatprep.subr.bf16.mxu1 %v1341_v61  ;;  %v1328_v3 = vld [vmem:[%s1669_s30 + $0x50] ss:$8 sps:$4 sm:$0xff]   ;;  %v1353_v4 = vld [vmem:[%s1669_s30 + $0x134] ss:$8 sps:$4 sm:$0xff]   ;;  %v1329_v5 = vld [vmem:[%s1669_s30 + $0x64] ss:$8 sps:$4 sm:$0xff]  }
  0x55   : > { %861 = vmatprep.subr.bf16.mxu0 %v1317_v54  ;;  %v1355_v6 = vld [vmem:[%s1669_s30 + $0x130] ss:$8 sps:$4 sm:$0xff]   ;;  %v1331_v7 = vld [vmem:[%s1669_s30 + $0x60] ss:$8 sps:$4 sm:$0xff]   ;;  %v1359_v8 = vld [vmem:[%s1669_s30 + $0x144] ss:$8 sps:$4 sm:$0xff]  }
  0x56   : > { %v1332_v9 = vld [vmem:[%s1669_s30 + $0x74] ss:$8 sps:$4 sm:$0xff]   ;;  %v1361_v10 = vld [vmem:[%s1669_s30 + $0x140] ss:$8 sps:$4 sm:$0xff]   ;;  %v1334_v11 = vld [vmem:[%s1669_s30 + $0x70] ss:$8 sps:$4 sm:$0xff]  }
  0x57   : > { %901 = vmatpush1.bf16.msra.mxu1 %v1343_v62  ;;  %v1365_v12 = vld [vmem:[%s1669_s30 + $0x154] ss:$8 sps:$4 sm:$0xff]   ;;  %v1338_v13 = vld [vmem:[%s1669_s30 + $0x84] ss:$8 sps:$4 sm:$0xff]   ;;  %v1367_v14 = vld [vmem:[%s1669_s30 + $0x150] ss:$8 sps:$4 sm:$0xff]  }
  0x58   : > { %862 = vmatpush1.bf16.msra.mxu0 %v1319_v55  ;;  %902 = vmatprep.subr.bf16.mxu1 %v1347_v1  ;;  %v1340_v15 = vld [vmem:[%s1669_s30 + $0x80] ss:$8 sps:$4 sm:$0xff]   ;;  %v1371_v16 = vld [vmem:[%s1669_s30 + $0x164] ss:$8 sps:$4 sm:$0xff]   ;;  %v1344_v17 = vld [vmem:[%s1669_s30 + $0x94] ss:$8 sps:$4 sm:$0xff]  }
  0x59   : > { %863 = vmatprep.subr.bf16.mxu0 %v1320_v56  ;;  %v1373_v20 = vld [vmem:[%s1669_s30 + $0x160] ss:$8 sps:$4 sm:$0xff]   ;;  %v1346_v21 = vld [vmem:[%s1669_s30 + $0x90] ss:$8 sps:$4 sm:$0xff]   ;;  %v1377_v22 = vld [vmem:[%s1669_s30 + $0x174] ss:$8 sps:$4 sm:$0xff]  }
  0x5a   : > { %v1350_v23 = vld [vmem:[%s1669_s30 + $0xa4] ss:$8 sps:$4 sm:$0xff]   ;;  %v1379_v24 = vld [vmem:[%s1669_s30 + $0x170] ss:$8 sps:$4 sm:$0xff]   ;;  %v1352_v25 = vld [vmem:[%s1669_s30 + $0xa0] ss:$8 sps:$4 sm:$0xff]  }
  0x5b   : > { %903 = vmatpush1.bf16.msra.mxu1 %v1349_v2  ;;  %v1356_v26 = vld [vmem:[%s1669_s30 + $0xb4] ss:$8 sps:$4 sm:$0xff]   ;;  %v1383_v27 = vld [vmem:[%s1649_s9 + $0x8] ss:$0 sps:$4 sm:$0xff]   ;;  %v1362_v29 = vld [vmem:[%s1669_s30 + $0xc4] ss:$8 sps:$4 sm:$0xff]  }
  0x5c   : > { %864 = vmatpush1.bf16.msra.mxu0 %v1322_v57  ;;  %904 = vmatprep.subr.bf16.mxu1 %v1353_v4  ;;  %v1358_v28 = vld [vmem:[%s1669_s30 + $0xb0] ss:$8 sps:$4 sm:$0xff]   ;;  %v1364_v30 = vld [vmem:[%s1669_s30 + $0xc0] ss:$8 sps:$4 sm:$0xff]   ;;  %v1368_v31 = vld [vmem:[%s1669_s30 + $0xd4] ss:$8 sps:$4 sm:$0xff]  }
  0x5d   : > { %865 = vmatprep.subr.bf16.mxu0 %v1323_v60  ;;  %v1370_v32 = vld [vmem:[%s1669_s30 + $0xd0] ss:$8 sps:$4 sm:$0xff]   ;;  %v1374_v33 = vld [vmem:[%s1669_s30 + $0xe4] ss:$8 sps:$4 sm:$0xff]   ;;  %v1376_v34 = vld [vmem:[%s1669_s30 + $0xe0] ss:$8 sps:$4 sm:$0xff]  }
  0x5e   : > { %v1380_v35 = vld [vmem:[%s1669_s30 + $0xf4] ss:$8 sps:$4 sm:$0xff]   ;;  %v1382_v36 = vld [vmem:[%s1669_s30 + $0xf0] ss:$8 sps:$4 sm:$0xff]   ;;  %p1244_p13 = scmp.ne.s32.totalorder %s1428_s20, 5 }
  0x5f   : > { %905 = vmatpush1.bf16.msra.mxu1 %v1355_v6  ;;  %v554_v42 = vld [vmem:[#allocation2] sm:$0xff]  ;;  %v555_v45 = vld [vmem:[#allocation2 + $0x8] sm:$0xff]  ;;  %v953_v52 = vlaneseq (!%p1244_p13) }
  0x60   : > { %866 = vmatpush1.bf16.msra.mxu0 %v1325_v63  ;;  %906 = vmatprep.subr.bf16.mxu1 %v1359_v8  ;;  %v949_v54 = vld [vmem:[%s529_s11] sm:$0x3] (!%p1244_p13) }
  0x61   : > { %867 = vmatprep.subr.bf16.mxu0 %v1326_v0  ;;  %v954_v53 = vshrl.u32 (!%p1244_p13), %v953_v52, 7 }
  0x63   : > { %907 = vmatpush1.bf16.msra.mxu1 %v1361_v10  ;;  %v1728_v55 = vsub.s32 (!%p1244_p13), 0, %v954_v53  ;;  %v1730_v56 = vsub.s32 (!%p1244_p13), 1, %v954_v53 }
  0x64   : > { %868 = vmatpush1.bf16.msra.mxu0 %v1328_v3  ;;  %908 = vmatprep.subr.bf16.mxu1 %v1365_v12 }
  0x65   : > { %869 = vmatprep.subr.bf16.mxu0 %v1329_v5  ;;  %v956_v59 = vrot.slane (!%p1244_p13), %v949_v54, %v1728_v55  ;;  %v960_v60 = vrot.slane (!%p1244_p13), %v949_v54, %v1730_v56 }
  0x67   : > { %909 = vmatpush1.bf16.msra.mxu1 %v1367_v14 }
  0x68   : > { %870 = vmatpush1.bf16.msra.mxu0 %v1331_v7  ;;  %910 = vmatprep.subr.bf16.mxu1 %v1371_v16 }
  0x69   : > { %871 = vmatprep.subr.bf16.mxu0 %v1332_v9 }
  0x6b   : > { %911 = vmatpush1.bf16.msra.mxu1 %v1373_v20 }
  0x6c   : > { %872 = vmatpush1.bf16.msra.mxu0 %v1334_v11  ;;  %912 = vmatprep.subr.bf16.mxu1 %v1377_v22 }
  0x6d   : > { %873 = vmatprep.subr.bf16.mxu0 %v1338_v13 }
  0x6f   : > { %913 = vmatpush1.bf16.msra.mxu1 %v1379_v24 }
  0x70   : > { %874 = vmatpush1.bf16.msra.mxu0 %v1340_v15 }
  0x71   : > { %875 = vmatprep.subr.bf16.mxu0 %v1344_v17 }
  0x72   : > { %931 = vmatmul.mubr.bf16.vlgmr.msra.gmra.mrb[0].mxu1 %v1383_v27 }
  0x74   : > { %876 = vmatpush1.bf16.msra.mxu0 %v1346_v21 }
  0x75   : > { %877 = vmatprep.subr.bf16.mxu0 %v1350_v23 }
  0x78   : > { %878 = vmatpush1.bf16.msra.mxu0 %v1352_v25 }
  0x79   : > { %879 = vmatprep.subr.bf16.mxu0 %v1356_v26 }
  0x7c   : > { %880 = vmatpush1.bf16.msra.mxu0 %v1358_v28 }
  0x7d   : > { %881 = vmatprep.subr.bf16.mxu0 %v1362_v29 }
  0x80   : > { %882 = vmatpush1.bf16.msra.mxu0 %v1364_v30 }
  0x81   : > { %883 = vmatprep.subr.bf16.mxu0 %v1368_v31 }
  0x84   : > { %884 = vmatpush1.bf16.msra.mxu0 %v1370_v32 }
  0x85   : > { %885 = vmatprep.subr.bf16.mxu0 %v1374_v33  ;;  %v1448_v33 = vmov (!%p1244_p13), 1966171168  }
  0x88   : > { %886 = vmatpush1.bf16.msra.mxu0 %v1376_v34  ;;  %v1006_v34 = vunpack.c.l.s4 (!%p1244_p13), %v1448_v33 }
  0x89   : > { %887 = vmatprep.subr.bf16.mxu0 %v1380_v35 }
  0x8a   : > { %v1007_v35 = vunpack.c.0.s8 (!%p1244_p13), %v1006_v34 }
  0x8c   : > { %888 = vmatpush1.bf16.msra.mxu0 %v1382_v36 }
  0x8f   : > { %890 = vmatmul.mubr.bf16.vlgmr.msra.gmra.mrb[0].mxu0 %v1193_v37  ;;  %v1010_v37 = vsub.s32 (!%p1244_p13), %v1007_v35, %v954_v53 }
 0x145   : > { %v932_v38 = vpop.f32.mrb[0].mxu1 }
 0x146   : > { %v934_v39 = vpop.f32.mrb[1].mxu1 }
 0x147   : > { %v936_v40 = vpop.f32.mrb[2].mxu1 }
 0x148   : > { %v937_v41 = vpop.f32.mrb[3].mxu1 }
 0x149   : > { %v950_v41 = vld [vmem:[%s534_s13] sm:$0x3] (!%p1244_p13) }
 0x162   : > { %v891_v43 = vpop.f32.mrb[0].mxu0  ;;  %946 = sbr.rel (%p1244_p13) target bundleno = 435 (0x1b3), region = 86 }
 0x163   : > { %v933_v44 = vadd.f32 %v932_v38, %v891_v43  ;;  %v893_v46 = vpop.f32.mrb[1].mxu0  ;;  %v951_v43 = vld [vmem:[%s539_s16] sm:$0x3] (!%p1244_p13) }
 0x164   : > { %v935_v47 = vadd.f32 %v934_v39, %v893_v46  ;;  %v895_v48 = vpop.f32.mrb[2].mxu0 }
 0x165   : > { %v939_v49 = vadd.f32 %v933_v44, %v554_v42  ;;  %v896_v50 = vpop.f32.mrb[3].mxu0  ;;  %v1042_v48 = vrot.slane (!%p1244_p13), %v951_v43, %v1730_v56 }
 0x166   : > { %v940_v51 = vadd.f32 %v935_v47, %v555_v45  ;;  %v1038_v47 = vrot.slane (!%p1244_p13), %v951_v43, %v1728_v55 }
 0x167   : > { %941 = vst [vmem:[#allocation2] sm:$0xff] %v939_v49 }
 0x168   : > { %942 = vst [vmem:[#allocation2 + $0x8] sm:$0xff] %v940_v51 }
 0x16e   : > { %v947_v57 = vld [vmem:[#allocation2] sm:$0xff] }
 0x16f   : > { %v948_v58 = vld [vmem:[#allocation2 + $0x8] sm:$0xff]  ;;  %v963_v61 = vadd.f32 %v956_v59, %v947_v57 }
 0x170   : > { %v964_v62 = vadd.f32 %v960_v60, %v948_v58 }
 0x171   : > { %v965_v63 = vrot.slane %v963_v61, 4 }
 0x172   : > { %v971_v0 = vrot.slane %v964_v62, 4 }
 0x173   : > { %v966_v1 = vadd.f32 %v965_v63, %v963_v61 }
 0x174   : > { %v972_v2 = vadd.f32 %v971_v0, %v964_v62 }
 0x175   : > { %v967_v3 = vrot.slane %v966_v1, 2 }
 0x176   : > { %v973_v4 = vrot.slane %v972_v2, 2 }
 0x177   : > { %v968_v5 = vadd.f32 %v967_v3, %v966_v1 }
 0x178   : > { %v974_v6 = vadd.f32 %v973_v4, %v972_v2 }
 0x179   : > { %v969_v7 = vrot.slane %v968_v5, 1 }
 0x17a   : > { %v975_v8 = vrot.slane %v974_v6, 1 }
 0x17b   : > { %v970_v9 = vadd.f32 %v969_v7, %v968_v5 }
 0x17c   : > { %v976_v10 = vadd.f32 %v975_v8, %v974_v6 }
 0x17d   : > { %v978_v11 = vmul.f32 0.125, %v970_v9 }
 0x17e   : > { %v979_v12 = vmul.f32 0.125, %v976_v10 }
 0x17f   : > { %v980_v13 = vsub.f32 %v963_v61, %v978_v11 }
 0x180   : > { %v981_v14 = vsub.f32 %v964_v62, %v979_v12 }
 0x181   : > { %v982_v15 = vmul.f32 %v980_v13, %v980_v13 }
 0x182   : > { %v983_v16 = vmul.f32 %v981_v14, %v981_v14 }
 0x183   : > { %v984_v17 = vrot.slane %v982_v15, 4 }
 0x184   : > { %v990_v18 = vrot.slane %v983_v16, 4 }
 0x185   : > { %v985_v19 = vadd.f32 %v984_v17, %v982_v15 }
 0x186   : > { %v991_v20 = vadd.f32 %v990_v18, %v983_v16 }
 0x187   : > { %v986_v21 = vrot.slane %v985_v19, 2 }
 0x188   : > { %v992_v22 = vrot.slane %v991_v20, 2 }
 0x189   : > { %v987_v23 = vadd.f32 %v986_v21, %v985_v19 }
 0x18a   : > { %v993_v24 = vadd.f32 %v992_v22, %v991_v20 }
 0x18b   : > { %v988_v25 = vrot.slane %v987_v23, 1 }
 0x18c   : > { %v994_v26 = vrot.slane %v993_v24, 1 }
 0x18d   : > { %v989_v27 = vadd.f32 %v988_v25, %v987_v23 }
 0x18e   : > { %v995_v28 = vadd.f32 %v994_v26, %v993_v24 }
 0x18f   : > { %v996_v29 = vmul.f32 0.125, %v989_v27 }
 0x190   : > { %v997_v30 = vmul.f32 0.125, %v995_v28 }
 0x191   : > { %v998_v31 = vadd.f32 1e-05, %v996_v29 }
 0x192   : > { %v999_v32 = vadd.f32 1e-05, %v997_v30 }
 0x193   : > { %1386 = vrsqrt.f32 %v998_v31 }
 0x194   : > { %1388 = vrsqrt.f32 %v999_v32 }
 0x19d   : > { %v1387_v36 = vpop.eup %1386 }
 0x19e   : > { %v1389_v38 = vpop.eup %1388 }
 0x19f   : > { %v1004_v39 = vcombine.low %v1387_v36, %v1389_v38 }
 0x1a1   : > { %v1011_v40 = vrot.slane %v1004_v39, %v1010_v37 }
 0x1a3   : > { %v1018_v42 = vrot.slane %v1011_v40, %v1010_v37 }
 0x1a5   : > { %v1020_v44 = vmul.f32 %v1018_v42, %v950_v41 }
 0x1a7   : > { %v1025_v45 = vrot.slane %v1020_v44, %v1728_v55  ;;  %v1029_v46 = vrot.slane %v1020_v44, %v1730_v56 }
 0x1a9   : > { %v1032_v49 = vmul.f32 %v1025_v45, %v980_v13  ;;  %v1033_v50 = vmul.f32 %v1029_v46, %v981_v14 }
 0x1ab   : > { %v1045_v51 = vadd.f32 %v1038_v47, %v1032_v49  ;;  %v1046_v52 = vadd.f32 %v1042_v48, %v1033_v50 }
 0x1ad   : > { %vm1047_vm0 = vcmp.ge.f32.partialorder %v1045_v51, 0.0  ;;  %vm1048_vm1 = vcmp.ge.f32.partialorder %v1046_v52, 0.0  ;;  %v1049_v53 = vmul.f32 0.2, %v1045_v51  ;;  %v1050_v54 = vmul.f32 0.2, %v1046_v52 }
 0x1af   : > { %v1051_v57 = vsel %vm1047_vm0, %v1045_v51, %v1049_v53  ;;  %v1052_v58 = vsel %vm1048_vm1, %v1046_v52, %v1050_v54 }
 0x1b0   : > { %v1249_v59 = vpack.c.bf16 %v1052_v58, %v1051_v57 }
 0x1b2   : > { %1061 = vst [vmem:[%s1667_s26] sm:$0xff] %v1249_v59 }
 0x1b3 PF: > { %s15_s24 = sadd.s32 1, %s1444_s24   ;;  %s1780_s29 = sld [smem:[#allocation4_spill]] }
 0x1b4   : > { %p12_p0 = scmp.ge.s32.totalorder %s15_s24, 14   ;;  %s1781_s18 = smov %s1424_s19 }
 0x1b5   : > { %s1782_s19 = smov %s1530_s6  ;;  %s1783_s20 = smov %s1436_s22 }
 0x1b6   : > { %s1784_s21 = smov %s1440_s23  ;;  %s1785_s22 = smov %s1788_s25 }
 0x1b7   :  { %14 = sbr.rel (!%p12_p0) target bundleno = 6 (0x6), region = 133 }
 0x1b9   : > { %s1786_s23 = smov %s1780_s29 }

// kernel: discriminator_forward.16
= control target key start
LH: loop header
LB: loop body
LE: loop exit
PB: predicated region body
PF: predicated region fallthrough
CT: control target
= control target key end

     0   :  { %s1758_s18 = smov 0   ;;  %s1760_s19 = smov 0   ;;  %s2130_s0 = inlined_call_operand.vmem [shape: bf16[2,4608], index: 0, kind: input, shape index: {}]   ;;  %s2131_s1 = inlined_call_operand.vmem [shape: bf16[4608,512], index: 1, kind: input, shape index: {}]   ;;  %s2132_s2 = inlined_call_operand.vmem [shape: f32[1,512], index: 2, kind: input, shape index: {}]   ;;  %s2133_s3 = inlined_call_operand.vmem [shape: f32[1,512], index: 3, kind: input, shape index: {}]   ;;  %s2134_s4 = inlined_call_operand.vmem [shape: f32[1,512], index: 4, kind: input, shape index: {}]   ;;  %s2135_s5 = inlined_call_operand.vmem [shape: bf16[2,512], index: 5, kind: output, shape index: {}]  }
   0x1   :  { %s1762_s20 = smov 0   ;;  %s1764_s21 = smov 0  }
   0x2   :  { %s1766_s22 = smov 0   ;;  %s1768_s23 = smov 0  }
   0x3   :  { %s1770_s24 = smov 0  }
   0x4 LB: > { %s24_s25 = sadd.s32 1, %s1715_s22  ;;  %s27_s26 = sadd.s32 1, %s1719_s23  ;;  %s1723_s24 = sphi %s1770_s24, %s15_s24   ;;  %s1719_s23 = sphi %s1768_s23, %s2141_s23   ;;  %s1715_s22 = sphi %s1766_s22, %s2140_s22   ;;  %s1711_s21 = sphi %s1764_s21, %s2139_s21   ;;  %s1707_s20 = sphi %s1762_s20, %s2138_s20   ;;  %s1703_s19 = sphi %s1760_s19, %s2137_s19   ;;  %s1699_s18 = sphi %s1758_s18, %s2136_s18  }
   0x5   : > { %p25_p0 = scmp.ge.s32.totalorder %s24_s25, 9  ;;  %p69_p1 = scmp.ne.s32.totalorder %s1703_s19, %s1699_s18 }
   0x6   : > { %p70_p2 = scmp.eq.s32.totalorder %s1723_s24, 0  ;;  %s62_s30 = sadd.s32 1, %s1703_s19 }
   0x7   : > { %s2143_s25 = smov (%p25_p0, %s24_s25), 0  ;;  %s2145_s26 = smov (!%p25_p0, %s27_s26), %s1719_s23 }
   0x8   : > { %p71_p3 = por %p70_p2, %p69_p1  ;;  %p29_p4 = scmp.ge.s32.totalorder %s2145_s26, 2 }
   0x9   : > { %s57_s27 = ssub.s32 %s1715_s22, %s2143_s25  ;;  %p1423_p6 = scmp.ge.s32.totalorder %s1723_s24, 18 }
   0xa   : > { %s2147_s26 = smov (%p29_p4, %s2145_s26), 0 }
   0xb   : > { %s58_s28 = ssub.s32 %s1719_s23, %s2147_s26  ;;  %199 = sbr.rel (%p1423_p6) target bundleno = 57 (0x39), region = 16 }
   0xc   : > { %s59_s29 = sor.u32 %s58_s28, %s57_s27 }
   0xd   : > { %p60_p5 = scmp.eq.s32.totalorder %s59_s29, 0 }
   0xf   : > { %s1809_s6 = scalar_select %p60_p5, %s1703_s19, %s62_s30  }
  0x12   : > { %210 = sbr.rel (!%p71_p3) target bundleno = 57 (0x39), region = 24  ;;  %s212_s7 = sand.u32 (%p71_p3), 1, %s1703_s19  }
  0x13   : > { %s1426_s8 = sshll.u32 (%p71_p3), %s1719_s23, 1  ;;  %s1424_s9 = sshll.u32 (%p71_p3), %s212_s7, 9 }
  0x14   : > { %s1507_s10 = sshll.u32 (%p71_p3), %s1715_s22, 8  ;;  %s1823_s16 = scalar_lea.vmem (%p71_p3), [#allocation3], %s1424_s9 }
  0x15   : > { %s218_s11 = sadd.s32 (%p71_p3), %s1507_s10, %s1426_s8 }
  0x16   : > { %s1428_s12 = sshll.u32 (%p71_p3), %s218_s11, 2 }
  0x17   : > { %s1818_s15 = scalar_lea.vmem (%p71_p3), %s2131_s1, %s1428_s12 }
  0x18   : > { %v374_v0 = vld [vmem:[%s1818_s15] sm:$0xff] (%p71_p3)  ;;  %v376_v1 = vld [vmem:[%s1818_s15 + $0x10] sm:$0xff] (%p71_p3) }
  0x19   : > { %v378_v2 = vld [vmem:[%s1818_s15 + $0x20] sm:$0xff]  ;;  %375 = vst [vmem:[%s1823_s16] sm:$0xff] %v374_v0  ;;  %377 = vst [vmem:[%s1823_s16 + $0x8] sm:$0xff] %v376_v1  ;;  %v380_v3 = vld [vmem:[%s1818_s15 + $0x30] sm:$0xff] }
  0x1a   : > { %379 = vst [vmem:[%s1823_s16 + $0x10] sm:$0xff] %v378_v2  ;;  %v382_v4 = vld [vmem:[%s1818_s15 + $0x40] sm:$0xff]  ;;  %v384_v5 = vld [vmem:[%s1818_s15 + $0x50] sm:$0xff]  ;;  %381 = vst [vmem:[%s1823_s16 + $0x18] sm:$0xff] %v380_v3 }
  0x1b   : > { %383 = vst [vmem:[%s1823_s16 + $0x20] sm:$0xff] %v382_v4  ;;  %385 = vst [vmem:[%s1823_s16 + $0x28] sm:$0xff] %v384_v5  ;;  %v386_v6 = vld [vmem:[%s1818_s15 + $0x60] sm:$0xff]  ;;  %v388_v7 = vld [vmem:[%s1818_s15 + $0x70] sm:$0xff] }
  0x1c   : > { %v390_v8 = vld [vmem:[%s1818_s15 + $0x80] sm:$0xff]  ;;  %387 = vst [vmem:[%s1823_s16 + $0x30] sm:$0xff] %v386_v6  ;;  %389 = vst [vmem:[%s1823_s16 + $0x38] sm:$0xff] %v388_v7  ;;  %v392_v9 = vld [vmem:[%s1818_s15 + $0x90] sm:$0xff] }
  0x1d   : > { %391 = vst [vmem:[%s1823_s16 + $0x40] sm:$0xff] %v390_v8  ;;  %v394_v10 = vld [vmem:[%s1818_s15 + $0xa0] sm:$0xff]  ;;  %v396_v11 = vld [vmem:[%s1818_s15 + $0xb0] sm:$0xff]  ;;  %393 = vst [vmem:[%s1823_s16 + $0x48] sm:$0xff] %v392_v9 }
  0x1e   : > { %395 = vst [vmem:[%s1823_s16 + $0x50] sm:$0xff] %v394_v10  ;;  %397 = vst [vmem:[%s1823_s16 + $0x58] sm:$0xff] %v396_v11  ;;  %v398_v12 = vld [vmem:[%s1818_s15 + $0xc0] sm:$0xff]  ;;  %v400_v13 = vld [vmem:[%s1818_s15 + $0xd0] sm:$0xff] }
  0x1f   : > { %v402_v14 = vld [vmem:[%s1818_s15 + $0xe0] sm:$0xff]  ;;  %399 = vst [vmem:[%s1823_s16 + $0x60] sm:$0xff] %v398_v12  ;;  %401 = vst [vmem:[%s1823_s16 + $0x68] sm:$0xff] %v400_v13  ;;  %v404_v15 = vld [vmem:[%s1818_s15 + $0xf0] sm:$0xff] }
  0x20   : > { %403 = vst [vmem:[%s1823_s16 + $0x70] sm:$0xff] %v402_v14  ;;  %v406_v16 = vld [vmem:[%s1818_s15 + $0x100] sm:$0xff]  ;;  %v408_v17 = vld [vmem:[%s1818_s15 + $0x110] sm:$0xff]  ;;  %405 = vst [vmem:[%s1823_s16 + $0x78] sm:$0xff] %v404_v15 }
  0x21   : > { %407 = vst [vmem:[%s1823_s16 + $0x80] sm:$0xff] %v406_v16  ;;  %409 = vst [vmem:[%s1823_s16 + $0x88] sm:$0xff] %v408_v17  ;;  %v410_v18 = vld [vmem:[%s1818_s15 + $0x120] sm:$0xff]  ;;  %v412_v19 = vld [vmem:[%s1818_s15 + $0x130] sm:$0xff] }
  0x22   : > { %v414_v20 = vld [vmem:[%s1818_s15 + $0x140] sm:$0xff]  ;;  %411 = vst [vmem:[%s1823_s16 + $0x90] sm:$0xff] %v410_v18  ;;  %413 = vst [vmem:[%s1823_s16 + $0x98] sm:$0xff] %v412_v19  ;;  %v416_v21 = vld [vmem:[%s1818_s15 + $0x150] sm:$0xff] }
  0x23   : > { %415 = vst [vmem:[%s1823_s16 + $0xa0] sm:$0xff] %v414_v20  ;;  %v418_v22 = vld [vmem:[%s1818_s15 + $0x160] sm:$0xff]  ;;  %v420_v23 = vld [vmem:[%s1818_s15 + $0x170] sm:$0xff]  ;;  %417 = vst [vmem:[%s1823_s16 + $0xa8] sm:$0xff] %v416_v21 }
  0x24   : > { %419 = vst [vmem:[%s1823_s16 + $0xb0] sm:$0xff] %v418_v22  ;;  %421 = vst [vmem:[%s1823_s16 + $0xb8] sm:$0xff] %v420_v23  ;;  %v422_v24 = vld [vmem:[%s1818_s15 + $0x180] sm:$0xff]  ;;  %v424_v25 = vld [vmem:[%s1818_s15 + $0x190] sm:$0xff] }
  0x25   : > { %v426_v26 = vld [vmem:[%s1818_s15 + $0x1a0] sm:$0xff]  ;;  %423 = vst [vmem:[%s1823_s16 + $0xc0] sm:$0xff] %v422_v24  ;;  %425 = vst [vmem:[%s1823_s16 + $0xc8] sm:$0xff] %v424_v25  ;;  %v428_v27 = vld [vmem:[%s1818_s15 + $0x1b0] sm:$0xff] }
  0x26   : > { %427 = vst [vmem:[%s1823_s16 + $0xd0] sm:$0xff] %v426_v26  ;;  %v430_v28 = vld [vmem:[%s1818_s15 + $0x1c0] sm:$0xff]  ;;  %v432_v29 = vld [vmem:[%s1818_s15 + $0x1d0] sm:$0xff]  ;;  %429 = vst [vmem:[%s1823_s16 + $0xd8] sm:$0xff] %v428_v27 }
  0x27   : > { %431 = vst [vmem:[%s1823_s16 + $0xe0] sm:$0xff] %v430_v28  ;;  %433 = vst [vmem:[%s1823_s16 + $0xe8] sm:$0xff] %v432_v29  ;;  %v434_v30 = vld [vmem:[%s1818_s15 + $0x1e0] sm:$0xff]  ;;  %v436_v31 = vld [vmem:[%s1818_s15 + $0x1f0] sm:$0xff] }
  0x28   : > { %v438_v32 = vld [vmem:[%s1818_s15 + $0x200] sm:$0xff]  ;;  %435 = vst [vmem:[%s1823_s16 + $0xf0] sm:$0xff] %v434_v30  ;;  %437 = vst [vmem:[%s1823_s16 + $0xf8] sm:$0xff] %v436_v31  ;;  %v440_v33 = vld [vmem:[%s1818_s15 + $0x210] sm:$0xff] }
  0x29   : > { %439 = vst [vmem:[%s1823_s16 + $0x100] sm:$0xff] %v438_v32  ;;  %v442_v34 = vld [vmem:[%s1818_s15 + $0x220] sm:$0xff]  ;;  %v444_v35 = vld [vmem:[%s1818_s15 + $0x230] sm:$0xff]  ;;  %441 = vst [vmem:[%s1823_s16 + $0x108] sm:$0xff] %v440_v33 }
  0x2a   : > { %443 = vst [vmem:[%s1823_s16 + $0x110] sm:$0xff] %v442_v34  ;;  %445 = vst [vmem:[%s1823_s16 + $0x118] sm:$0xff] %v444_v35  ;;  %v446_v36 = vld [vmem:[%s1818_s15 + $0x240] sm:$0xff]  ;;  %v448_v37 = vld [vmem:[%s1818_s15 + $0x250] sm:$0xff] }
  0x2b   : > { %v450_v38 = vld [vmem:[%s1818_s15 + $0x260] sm:$0xff]  ;;  %447 = vst [vmem:[%s1823_s16 + $0x120] sm:$0xff] %v446_v36  ;;  %449 = vst [vmem:[%s1823_s16 + $0x128] sm:$0xff] %v448_v37  ;;  %v452_v39 = vld [vmem:[%s1818_s15 + $0x270] sm:$0xff] }
  0x2c   : > { %451 = vst [vmem:[%s1823_s16 + $0x130] sm:$0xff] %v450_v38  ;;  %v454_v40 = vld [vmem:[%s1818_s15 + $0x280] sm:$0xff]  ;;  %v456_v41 = vld [vmem:[%s1818_s15 + $0x290] sm:$0xff]  ;;  %453 = vst [vmem:[%s1823_s16 + $0x138] sm:$0xff] %v452_v39 }
  0x2d   : > { %455 = vst [vmem:[%s1823_s16 + $0x140] sm:$0xff] %v454_v40  ;;  %457 = vst [vmem:[%s1823_s16 + $0x148] sm:$0xff] %v456_v41  ;;  %v458_v42 = vld [vmem:[%s1818_s15 + $0x2a0] sm:$0xff]  ;;  %v460_v43 = vld [vmem:[%s1818_s15 + $0x2b0] sm:$0xff] }
  0x2e   : > { %v462_v44 = vld [vmem:[%s1818_s15 + $0x2c0] sm:$0xff]  ;;  %459 = vst [vmem:[%s1823_s16 + $0x150] sm:$0xff] %v458_v42  ;;  %461 = vst [vmem:[%s1823_s16 + $0x158] sm:$0xff] %v460_v43  ;;  %v464_v45 = vld [vmem:[%s1818_s15 + $0x2d0] sm:$0xff] }
  0x2f   : > { %463 = vst [vmem:[%s1823_s16 + $0x160] sm:$0xff] %v462_v44  ;;  %v466_v46 = vld [vmem:[%s1818_s15 + $0x2e0] sm:$0xff]  ;;  %v468_v47 = vld [vmem:[%s1818_s15 + $0x2f0] sm:$0xff]  ;;  %465 = vst [vmem:[%s1823_s16 + $0x168] sm:$0xff] %v464_v45 }
  0x30   : > { %467 = vst [vmem:[%s1823_s16 + $0x170] sm:$0xff] %v466_v46  ;;  %469 = vst [vmem:[%s1823_s16 + $0x178] sm:$0xff] %v468_v47  ;;  %v470_v48 = vld [vmem:[%s1818_s15 + $0x300] sm:$0xff]  ;;  %v472_v49 = vld [vmem:[%s1818_s15 + $0x310] sm:$0xff] }
  0x31   : > { %v474_v50 = vld [vmem:[%s1818_s15 + $0x320] sm:$0xff]  ;;  %471 = vst [vmem:[%s1823_s16 + $0x180] sm:$0xff] %v470_v48  ;;  %473 = vst [vmem:[%s1823_s16 + $0x188] sm:$0xff] %v472_v49  ;;  %v476_v51 = vld [vmem:[%s1818_s15 + $0x330] sm:$0xff] }
  0x32   : > { %475 = vst [vmem:[%s1823_s16 + $0x190] sm:$0xff] %v474_v50  ;;  %v478_v52 = vld [vmem:[%s1818_s15 + $0x340] sm:$0xff]  ;;  %v480_v53 = vld [vmem:[%s1818_s15 + $0x350] sm:$0xff]  ;;  %477 = vst [vmem:[%s1823_s16 + $0x198] sm:$0xff] %v476_v51 }
  0x33   : > { %479 = vst [vmem:[%s1823_s16 + $0x1a0] sm:$0xff] %v478_v52  ;;  %481 = vst [vmem:[%s1823_s16 + $0x1a8] sm:$0xff] %v480_v53  ;;  %v482_v54 = vld [vmem:[%s1818_s15 + $0x360] sm:$0xff]  ;;  %v484_v55 = vld [vmem:[%s1818_s15 + $0x370] sm:$0xff] }
  0x34   : > { %v486_v56 = vld [vmem:[%s1818_s15 + $0x380] sm:$0xff]  ;;  %483 = vst [vmem:[%s1823_s16 + $0x1b0] sm:$0xff] %v482_v54  ;;  %485 = vst [vmem:[%s1823_s16 + $0x1b8] sm:$0xff] %v484_v55  ;;  %v488_v57 = vld [vmem:[%s1818_s15 + $0x390] sm:$0xff] }
  0x35   : > { %487 = vst [vmem:[%s1823_s16 + $0x1c0] sm:$0xff] %v486_v56  ;;  %v490_v58 = vld [vmem:[%s1818_s15 + $0x3a0] sm:$0xff]  ;;  %v492_v59 = vld [vmem:[%s1818_s15 + $0x3b0] sm:$0xff]  ;;  %489 = vst [vmem:[%s1823_s16 + $0x1c8] sm:$0xff] %v488_v57 }
  0x36   : > { %491 = vst [vmem:[%s1823_s16 + $0x1d0] sm:$0xff] %v490_v58  ;;  %493 = vst [vmem:[%s1823_s16 + $0x1d8] sm:$0xff] %v492_v59  ;;  %v494_v60 = vld [vmem:[%s1818_s15 + $0x3c0] sm:$0xff]  ;;  %v496_v61 = vld [vmem:[%s1818_s15 + $0x3d0] sm:$0xff] }
  0x37   : > { %v498_v62 = vld [vmem:[%s1818_s15 + $0x3e0] sm:$0xff]  ;;  %495 = vst [vmem:[%s1823_s16 + $0x1e0] sm:$0xff] %v494_v60  ;;  %497 = vst [vmem:[%s1823_s16 + $0x1e8] sm:$0xff] %v496_v61  ;;  %v500_v63 = vld [vmem:[%s1818_s15 + $0x3f0] sm:$0xff] }
  0x38   : > { %499 = vst [vmem:[%s1823_s16 + $0x1f0] sm:$0xff] %v498_v62  ;;  %501 = vst [vmem:[%s1823_s16 + $0x1f8] sm:$0xff] %v500_v63 }
  0x39 PF: > { %p1429_p7 = scmp.ge.s32.totalorder %s1723_s24, 1  ;;  %p530_p8 = scmp.lt.s32.totalorder %s1723_s24, 19 }
  0x3b   : > { %p531_p9 = pnand %p1429_p7, %p530_p8 }
  0x3c   : > { %s537_s17 = sand.u32 (!%p531_p9), 1, %s1699_s18   ;;  %s1431_s27 = sshll.u32 (!%p531_p9), %s1707_s20, 2 }
  0x3d   : > { %534 = sbr.rel (%p531_p9) target bundleno = 464 (0x1d0), region = 74  ;;  %s1430_s28 = sshll.u32 (!%p531_p9), %s537_s17, 9 }
  0x3e   : > { %p580_p10 = scmp.lt.s32.totalorder (!%p531_p9), %s1431_s27, 35  ;;  %s1432_s29 = sshll.u32 (!%p531_p9), %s1711_s21, 1 }
  0x3f   : > { %p587_p11 = scmp.lt.s32.totalorder (!%p531_p9), %s1432_s29, 3  ;;  %s1979_s7 = scalar_lea.vmem (!%p531_p9), [#allocation3], %s1430_s28 }
  0x40   : > { %p1436_p12 = scmp.ne.s32.totalorder (!%p531_p9), %s1707_s20, 0 }
  0x44   : > { %s2149_s27 = smov (!%p580_p10, %s1431_s27), 35  ;;  %s2151_s29 = smov (!%p587_p11, %s1432_s29), 3 }
  0x45   : > { %s582_s8 = scalar_lea.vmem %s2130_s0, %s2149_s27  ;;  %s589_s18 = scalar_lea.vmem %s2132_s2, %s2151_s29  ;;  %v1725_v0 = vmov (!%p1436_p12), 0.0  }
  0x46   : > { %s594_s12 = scalar_lea.vmem %s2133_s3, %s2151_s29  ;;  %s599_s15 = scalar_lea.vmem %s2134_s4, %s2151_s29  ;;  %610 = vst [vmem:[#allocation2] sm:$0xf] (!%p1436_p12), %v1725_v0 }
  0x47   : > { %s604_s30 = scalar_lea.vmem %s2135_s5, %s2151_s29  ;;  %609 = sbr.rel (%p1436_p12) target bundleno = 78 (0x4e), region = 82 }
  0x4e PF: > { %v1569_v1 = vld [vmem:[%s1979_s7 + $0x4] ss:$8 sps:$4 sm:$0xff]   ;;  %v1573_v3 = vld [vmem:[%s1979_s7] ss:$8 sps:$4 sm:$0xff]   ;;  %v1575_v5 = vld [vmem:[%s1979_s7 + $0x14] ss:$8 sps:$4 sm:$0xff]   ;;  %v689_v41 = vlaneseq }
  0x4f   : > { %v1571_v2 = vld [vmem:[%s1979_s7 + $0x104] ss:$8 sps:$4 sm:$0xff]   ;;  %1026 = vmatprep.subr.bf16.mxu1 %v1569_v1  ;;  %v1574_v4 = vld [vmem:[%s1979_s7 + $0x100] ss:$8 sps:$4 sm:$0xff]   ;;  %v1577_v6 = vld [vmem:[%s1979_s7 + $0x114] ss:$8 sps:$4 sm:$0xff]  }
  0x50   : > { %1067 = vmatprep.subr.bf16.mxu0 %v1571_v2  ;;  %1027 = vmatpush1.bf16.msra.mxu1 %v1573_v3  ;;  %v1579_v7 = vld [vmem:[%s1979_s7 + $0x10] ss:$8 sps:$4 sm:$0xff]   ;;  %v1581_v9 = vld [vmem:[%s1979_s7 + $0x24] ss:$8 sps:$4 sm:$0xff]   ;;  %v1585_v11 = vld [vmem:[%s1979_s7 + $0x20] ss:$8 sps:$4 sm:$0xff]  }
  0x51   : > { %1068 = vmatpush1.bf16.msra.mxu0 %v1574_v4  ;;  %1028 = vmatprep.subr.bf16.mxu1 %v1575_v5  ;;  %v1580_v8 = vld [vmem:[%s1979_s7 + $0x110] ss:$8 sps:$4 sm:$0xff]   ;;  %v1583_v10 = vld [vmem:[%s1979_s7 + $0x124] ss:$8 sps:$4 sm:$0xff]   ;;  %v1586_v12 = vld [vmem:[%s1979_s7 + $0x120] ss:$8 sps:$4 sm:$0xff]  }
  0x52   : > { %1069 = vmatprep.subr.bf16.mxu0 %v1577_v6  ;;  %v1587_v13 = vld [vmem:[%s1979_s7 + $0x34] ss:$8 sps:$4 sm:$0xff]   ;;  %v1591_v15 = vld [vmem:[%s1979_s7 + $0x30] ss:$8 sps:$4 sm:$0xff]   ;;  %v1593_v17 = vld [vmem:[%s1979_s7 + $0x44] ss:$8 sps:$4 sm:$0xff]  }
  0x53   : > { %v1589_v14 = vld [vmem:[%s1979_s7 + $0x134] ss:$8 sps:$4 sm:$0xff]   ;;  %v1592_v16 = vld [vmem:[%s1979_s7 + $0x130] ss:$8 sps:$4 sm:$0xff]   ;;  %v1595_v18 = vld [vmem:[%s1979_s7 + $0x144] ss:$8 sps:$4 sm:$0xff]  }
  0x54   : > { %1029 = vmatpush1.bf16.msra.mxu1 %v1579_v7  ;;  %v1597_v19 = vld [vmem:[%s1979_s7 + $0x40] ss:$8 sps:$4 sm:$0xff]   ;;  %v1599_v21 = vld [vmem:[%s1979_s7 + $0x54] ss:$8 sps:$4 sm:$0xff]   ;;  %v1603_v23 = vld [vmem:[%s1979_s7 + $0x50] ss:$8 sps:$4 sm:$0xff]  }
  0x55   : > { %1070 = vmatpush1.bf16.msra.mxu0 %v1580_v8  ;;  %1030 = vmatprep.subr.bf16.mxu1 %v1581_v9  ;;  %v1598_v20 = vld [vmem:[%s1979_s7 + $0x140] ss:$8 sps:$4 sm:$0xff]   ;;  %v1601_v22 = vld [vmem:[%s1979_s7 + $0x154] ss:$8 sps:$4 sm:$0xff]   ;;  %v1604_v24 = vld [vmem:[%s1979_s7 + $0x150] ss:$8 sps:$4 sm:$0xff]  }
  0x56   : > { %1071 = vmatprep.subr.bf16.mxu0 %v1583_v10  ;;  %v1605_v25 = vld [vmem:[%s1979_s7 + $0x64] ss:$8 sps:$4 sm:$0xff]   ;;  %v1609_v27 = vld [vmem:[%s1979_s7 + $0x60] ss:$8 sps:$4 sm:$0xff]   ;;  %v1611_v29 = vld [vmem:[%s1979_s7 + $0x74] ss:$8 sps:$4 sm:$0xff]  }
  0x57   : > { %v1607_v26 = vld [vmem:[%s1979_s7 + $0x164] ss:$8 sps:$4 sm:$0xff]   ;;  %v1610_v28 = vld [vmem:[%s1979_s7 + $0x160] ss:$8 sps:$4 sm:$0xff]   ;;  %v1613_v30 = vld [vmem:[%s1979_s7 + $0x174] ss:$8 sps:$4 sm:$0xff]  }
  0x58   : > { %1031 = vmatpush1.bf16.msra.mxu1 %v1585_v11  ;;  %v1615_v31 = vld [vmem:[%s1979_s7 + $0x70] ss:$8 sps:$4 sm:$0xff]   ;;  %v1617_v33 = vld [vmem:[%s1979_s7 + $0x84] ss:$8 sps:$4 sm:$0xff]   ;;  %v1621_v35 = vld [vmem:[%s1979_s7 + $0x80] ss:$8 sps:$4 sm:$0xff]  }
  0x59   : > { %1072 = vmatpush1.bf16.msra.mxu0 %v1586_v12  ;;  %1032 = vmatprep.subr.bf16.mxu1 %v1587_v13  ;;  %v1616_v32 = vld [vmem:[%s1979_s7 + $0x170] ss:$8 sps:$4 sm:$0xff]   ;;  %v1619_v34 = vld [vmem:[%s1979_s7 + $0x184] ss:$8 sps:$4 sm:$0xff]   ;;  %v1622_v36 = vld [vmem:[%s1979_s7 + $0x180] ss:$8 sps:$4 sm:$0xff]  }
  0x5a   : > { %1073 = vmatprep.subr.bf16.mxu0 %v1589_v14  ;;  %v1623_v37 = vld [vmem:[%s1979_s7 + $0x94] ss:$8 sps:$4 sm:$0xff]   ;;  %v1726_v39 = vmov 1966171168   ;;  %v1627_v42 = vld [vmem:[%s1979_s7 + $0x90] ss:$8 sps:$4 sm:$0xff]  }
  0x5b   : > { %v1625_v38 = vld [vmem:[%s1979_s7 + $0x194] ss:$8 sps:$4 sm:$0xff]   ;;  %v687_v40 = vunpack.c.l.s4 %v1726_v39  ;;  %v1628_v43 = vld [vmem:[%s1979_s7 + $0x190] ss:$8 sps:$4 sm:$0xff]   ;;  %v1629_v44 = vld [vmem:[%s1979_s7 + $0xa4] ss:$8 sps:$4 sm:$0xff]  }
  0x5c   : > { %1033 = vmatpush1.bf16.msra.mxu1 %v1591_v15  ;;  %v1631_v45 = vld [vmem:[%s1979_s7 + $0x1a4] ss:$8 sps:$4 sm:$0xff]   ;;  %v2024_v47 = vshrl.u32 %v689_v41, 7  ;;  %v1633_v48 = vld [vmem:[%s1979_s7 + $0xa0] ss:$8 sps:$4 sm:$0xff]   ;;  %p1502_p13 = scmp.ne.s32.totalorder %s1707_s20, 8 }
  0x5d   : > { %1074 = vmatpush1.bf16.msra.mxu0 %v1592_v16  ;;  %1034 = vmatprep.subr.bf16.mxu1 %v1593_v17  ;;  %v688_v46 = vunpack.c.0.s8 %v687_v40  ;;  %v1634_v49 = vld [vmem:[%s1979_s7 + $0x1a0] ss:$8 sps:$4 sm:$0xff]   ;;  %v1635_v50 = vld [vmem:[%s1979_s7 + $0xb4] ss:$8 sps:$4 sm:$0xff]   ;;  %v1639_v54 = vld [vmem:[%s1979_s7 + $0xb0] ss:$8 sps:$4 sm:$0xff]  }
  0x5e   : > { %1075 = vmatprep.subr.bf16.mxu0 %v1595_v18  ;;  %v1637_v51 = vld [vmem:[%s1979_s7 + $0x1b4] ss:$8 sps:$4 sm:$0xff]   ;;  %v1640_v55 = vld [vmem:[%s1979_s7 + $0x1b0] ss:$8 sps:$4 sm:$0xff]   ;;  %v1641_v57 = vld [vmem:[%s1979_s7 + $0xc4] ss:$8 sps:$4 sm:$0xff]  }
  0x5f   : > { %v2031_v52 = vsub.s32 %v688_v46, %v2024_v47  ;;  %v1437_v53 = vld.sshfl [vmem:[%s582_s8] sm:$0x33 pattern:$0x75316420]  ;;  %v1643_v58 = vld [vmem:[%s1979_s7 + $0x1c4] ss:$8 sps:$4 sm:$0xff]  }
  0x60   : > { %1035 = vmatpush1.bf16.msra.mxu1 %v1597_v19  ;;  %v685_v56 = vcombine.high %v1437_v53, %v1437_v53  ;;  %v1645_v60 = vld [vmem:[%s1979_s7 + $0xc0] ss:$8 sps:$4 sm:$0xff]   ;;  %v1647_v63 = vld [vmem:[%s1979_s7 + $0xd4] ss:$8 sps:$4 sm:$0xff]   ;;  %v1651_v1 = vld [vmem:[%s1979_s7 + $0xd0] ss:$8 sps:$4 sm:$0xff]  }
  0x61   : > { %1076 = vmatpush1.bf16.msra.mxu0 %v1598_v20  ;;  %1036 = vmatprep.subr.bf16.mxu1 %v1599_v21  ;;  %v1646_v61 = vld [vmem:[%s1979_s7 + $0x1c0] ss:$8 sps:$4 sm:$0xff]   ;;  %v1649_v0 = vld [vmem:[%s1979_s7 + $0x1d4] ss:$8 sps:$4 sm:$0xff]   ;;  %v1652_v2 = vld [vmem:[%s1979_s7 + $0x1d0] ss:$8 sps:$4 sm:$0xff]   ;;  %v692_v9 = vrot.slane %v1437_v53, %v2031_v52 }
  0x62   : > { %1077 = vmatprep.subr.bf16.mxu0 %v1601_v22  ;;  %v699_v59 = vrot.slane %v685_v56, %v2031_v52  ;;  %v1653_v3 = vld [vmem:[%s1979_s7 + $0xe4] ss:$8 sps:$4 sm:$0xff]   ;;  %v1657_v5 = vld [vmem:[%s1979_s7 + $0xe0] ss:$8 sps:$4 sm:$0xff]   ;;  %v1659_v7 = vld [vmem:[%s1979_s7 + $0xf4] ss:$8 sps:$4 sm:$0xff]  }
  0x63   : > { %v1655_v4 = vld [vmem:[%s1979_s7 + $0x1e4] ss:$8 sps:$4 sm:$0xff]   ;;  %v1658_v6 = vld [vmem:[%s1979_s7 + $0x1e0] ss:$8 sps:$4 sm:$0xff]   ;;  %v1661_v8 = vld [vmem:[%s1979_s7 + $0x1f4] ss:$8 sps:$4 sm:$0xff]   ;;  %v700_v12 = vcombine.high %v692_v9, %v692_v9 }
  0x64   : > { %1037 = vmatpush1.bf16.msra.mxu1 %v1603_v23  ;;  %v701_v62 = vcombine.high %v699_v59, %v699_v59  ;;  %1058 = vmatprep.mubr.bf16.mxu1 %v699_v59  ;;  %v1663_v10 = vld [vmem:[%s1979_s7 + $0xf0] ss:$8 sps:$4 sm:$0xff]   ;;  %v1727_v13 = vmov 1983009808   ;;  %vm1159_vm0 = vcmask (!%p1502_p13), 1041408  }
  0x65   : > { %1078 = vmatpush1.bf16.msra.mxu0 %v1604_v24  ;;  %1038 = vmatprep.subr.bf16.mxu1 %v1605_v25  ;;  %v1664_v11 = vld [vmem:[%s1979_s7 + $0x1f0] ss:$8 sps:$4 sm:$0xff]   ;;  %v1112_v14 = vunpack.c.l.s4 %v1727_v13 }
  0x66   : > { %1079 = vmatprep.subr.bf16.mxu0 %v1607_v26  ;;  %1099 = vmatprep.mubr.bf16.mxu0 %v701_v62 }
  0x67   : > { %v1113_v15 = vunpack.c.0.s8 %v1112_v14 }
  0x68   : > { %1039 = vmatpush1.bf16.msra.mxu1 %v1609_v27 }
  0x69   : > { %1080 = vmatpush1.bf16.msra.mxu0 %v1610_v28  ;;  %1040 = vmatprep.subr.bf16.mxu1 %v1611_v29  ;;  %v2059_v22 = vsub.s32 %v1113_v15, %v2024_v47  ;;  %v611_v28 = vld [vmem:[#allocation2] sm:$0xf] }
  0x6a   : > { %1081 = vmatprep.subr.bf16.mxu0 %v1613_v30 }
  0x6c   : > { %1041 = vmatpush1.bf16.msra.mxu1 %v1615_v31  ;;  %v1126_v31 = vld [vmem:[%s589_s18] sm:$0x3] (!%p1502_p13) }
  0x6d   : > { %1082 = vmatpush1.bf16.msra.mxu0 %v1616_v32  ;;  %1042 = vmatprep.subr.bf16.mxu1 %v1617_v33  ;;  %v2069_v32 = vsub.s32 (!%p1502_p13), 0, %v2024_v47  ;;  %v2072_v33 = vsub.s32 (!%p1502_p13), 1, %v2024_v47 }
  0x6e   : > { %1083 = vmatprep.subr.bf16.mxu0 %v1619_v34 }
  0x6f   : > { %v1133_v34 = vrot.slane (!%p1502_p13), %v1126_v31, %v2069_v32 }
  0x70   : > { %1043 = vmatpush1.bf16.msra.mxu1 %v1621_v35  ;;  %v1137_v35 = vrot.slane (!%p1502_p13), %v1126_v31, %v2072_v33 }
  0x71   : > { %1084 = vmatpush1.bf16.msra.mxu0 %v1622_v36  ;;  %1044 = vmatprep.subr.bf16.mxu1 %v1623_v37 }
  0x72   : > { %1085 = vmatprep.subr.bf16.mxu0 %v1625_v38  ;;  %v1138_v36 = vcombine.low (!%p1502_p13), %v1133_v34, %v1137_v35 }
  0x74   : > { %1045 = vmatpush1.bf16.msra.mxu1 %v1627_v42  ;;  %v1145_v38 = vrot.slane (!%p1502_p13), %v1138_v36, %v2059_v22 }
  0x75   : > { %1086 = vmatpush1.bf16.msra.mxu0 %v1628_v43  ;;  %1046 = vmatprep.subr.bf16.mxu1 %v1629_v44 }
  0x76   : > { %1087 = vmatprep.subr.bf16.mxu0 %v1631_v45 }
  0x78   : > { %1047 = vmatpush1.bf16.msra.mxu1 %v1633_v48 }
  0x79   : > { %1088 = vmatpush1.bf16.msra.mxu0 %v1634_v49  ;;  %1048 = vmatprep.subr.bf16.mxu1 %v1635_v50 }
  0x7a   : > { %1089 = vmatprep.subr.bf16.mxu0 %v1637_v51 }
  0x7c   : > { %1049 = vmatpush1.bf16.msra.mxu1 %v1639_v54 }
  0x7d   : > { %1090 = vmatpush1.bf16.msra.mxu0 %v1640_v55  ;;  %1050 = vmatprep.subr.bf16.mxu1 %v1641_v57 }
  0x7e   : > { %1091 = vmatprep.subr.bf16.mxu0 %v1643_v58 }
  0x80   : > { %1051 = vmatpush1.bf16.msra.mxu1 %v1645_v60 }
  0x81   : > { %1092 = vmatpush1.bf16.msra.mxu0 %v1646_v61  ;;  %1052 = vmatprep.subr.bf16.mxu1 %v1647_v63 }
  0x82   : > { %1093 = vmatprep.subr.bf16.mxu0 %v1649_v0 }
  0x84   : > { %1053 = vmatpush1.bf16.msra.mxu1 %v1651_v1 }
  0x85   : > { %1094 = vmatpush1.bf16.msra.mxu0 %v1652_v2  ;;  %1054 = vmatprep.subr.bf16.mxu1 %v1653_v3 }
  0x86   : > { %1095 = vmatprep.subr.bf16.mxu0 %v1655_v4 }
  0x88   : > { %1055 = vmatpush1.bf16.msra.mxu1 %v1657_v5 }
  0x89   : > { %1096 = vmatpush1.bf16.msra.mxu0 %v1658_v6  ;;  %1056 = vmatprep.subr.bf16.mxu1 %v1659_v7 }
  0x8a   : > { %1097 = vmatprep.subr.bf16.mxu0 %v1661_v8 }
  0x8c   : > { %1057 = vmatpush1.bf16.msra.mxu1 %v1663_v10 }
  0x8d   : > { %1098 = vmatpush1.bf16.msra.mxu0 %v1664_v11 }
  0x8f   : > { %1059 = vmatmul.mubr.bf16.vlgmr.msra.gmra.mrb[0].mxu1 %v692_v9 }
  0x90   : > { %1100 = vmatmul.mubr.bf16.vlgmr.msra.gmra.mrb[0].mxu0 %v700_v12 }
 0x162   : > { %v1060_v16 = vpop.f32.mrb[0].mxu1 }
 0x163   : > { %v1101_v17 = vpop.f32.mrb[0].mxu0  ;;  %v1062_v19 = vpop.f32.mrb[1].mxu1 }
 0x164   : > { %v1102_v18 = vadd.f32 %v1101_v17, %v1060_v16  ;;  %v1103_v20 = vpop.f32.mrb[1].mxu0  ;;  %v1064_v23 = vpop.f32.mrb[2].mxu1 }
 0x165   : > { %v1104_v21 = vadd.f32 %v1103_v20, %v1062_v19  ;;  %v1105_v24 = vpop.f32.mrb[2].mxu0  ;;  %v1065_v25 = vpop.f32.mrb[3].mxu1  ;;  %v1128_v23 = vld [vmem:[%s599_s15] sm:$0x3] (!%p1502_p13) }
 0x166   : > { %v1106_v26 = vpop.f32.mrb[3].mxu0  ;;  %v1127_v25 = vld [vmem:[%s594_s12] sm:$0x3] (!%p1502_p13) }
 0x167   : > { %v1110_v27 = vcombine.low %v1102_v18, %v1104_v21  ;;  %1124 = sbr.rel (%p1502_p13) target bundleno = 464 (0x1d0), region = 86 }
 0x169   : > { %v1117_v29 = vrot.slane %v1110_v27, %v2059_v22  ;;  %v1263_v27 = vrot.slane (!%p1502_p13), %v1128_v23, %v2069_v32 }
 0x16b   : > { %v1119_v30 = vadd.f32 %v1117_v29, %v611_v28  ;;  %v1267_v28 = vrot.slane (!%p1502_p13), %v1128_v23, %v2072_v33 }
 0x16d   : > { %1120 = vst [vmem:[#allocation2] sm:$0xf] %v1119_v30  ;;  %v1268_v34 = vcombine.low (!%p1502_p13), %v1263_v27, %v1267_v28 }
 0x174   : > { %v1125_v37 = vld [vmem:[#allocation2] sm:$0xf] }
 0x175   : > { %v1147_v39 = vadd.f32 %v1145_v38, %v1125_v37  ;;  %v1275_v37 = vrot.slane %v1268_v34, %v2059_v22 }
 0x177   : > { %v1155_v40 = vrot.slane %v1147_v39, %v2059_v22 }
 0x179   : > { %v1156_v41 = vcombine.high %v1155_v40, %v1155_v40  ;;  %v1160_v42 = vsel %vm1159_vm0, %v1155_v40, 0.0 }
 0x17a   : > { %v1161_v43 = vrot.slane %v1160_v42, 4 }
 0x17b   : > { %v1167_v44 = vsel %vm1159_vm0, %v1156_v41, 0.0 }
 0x17c   : > { %v1162_v45 = vadd.f32 %v1161_v43, %v1160_v42  ;;  %v1168_v46 = vrot.slane %v1167_v44, 4 }
 0x17e   : > { %v1163_v47 = vrot.slane %v1162_v45, 2  ;;  %v1169_v48 = vadd.f32 %v1168_v46, %v1167_v44 }
 0x180   : > { %v1164_v49 = vadd.f32 %v1163_v47, %v1162_v45  ;;  %v1170_v50 = vrot.slane %v1169_v48, 2 }
 0x182   : > { %v1165_v51 = vrot.slane %v1164_v49, 1  ;;  %v1171_v53 = vadd.f32 %v1170_v50, %v1169_v48 }
 0x184   : > { %v1166_v54 = vadd.f32 %v1165_v51, %v1164_v49  ;;  %v1172_v55 = vrot.slane %v1171_v53, 1 }
 0x186   : > { %v1173_v56 = vadd.f32 %v1172_v55, %v1171_v53  ;;  %v1175_v57 = vmul.f32 0.5, %v1166_v54 }
 0x188   : > { %v1176_v58 = vmul.f32 0.5, %v1173_v56 }
 0x18a   : > { %v1179_v59 = vcombine.low %v1175_v57, %v1176_v58 }
 0x18c   : > { %v1186_v60 = vrot.slane %v1179_v59, %v2059_v22 }
 0x18e   : > { %v1188_v61 = vsub.f32 %v1147_v39, %v1186_v60 }
 0x190   : > { %v1189_v62 = vmul.f32 %v1188_v61, %v1188_v61 }
 0x192   : > { %v1197_v63 = vrot.slane %v1189_v62, %v2059_v22 }
 0x194   : > { %v1198_v0 = vcombine.high %v1197_v63, %v1197_v63  ;;  %v1201_v1 = vsel %vm1159_vm0, %v1197_v63, 0.0 }
 0x195   : > { %v1202_v2 = vrot.slane %v1201_v1, 4 }
 0x196   : > { %v1208_v3 = vsel %vm1159_vm0, %v1198_v0, 0.0 }
 0x197   : > { %v1203_v4 = vadd.f32 %v1202_v2, %v1201_v1  ;;  %v1209_v5 = vrot.slane %v1208_v3, 4 }
 0x199   : > { %v1204_v6 = vrot.slane %v1203_v4, 2  ;;  %v1210_v7 = vadd.f32 %v1209_v5, %v1208_v3 }
 0x19b   : > { %v1205_v8 = vadd.f32 %v1204_v6, %v1203_v4  ;;  %v1211_v9 = vrot.slane %v1210_v7, 2 }
 0x19d   : > { %v1206_v10 = vrot.slane %v1205_v8, 1  ;;  %v1212_v11 = vadd.f32 %v1211_v9, %v1210_v7 }
 0x19f   : > { %v1207_v12 = vadd.f32 %v1206_v10, %v1205_v8  ;;  %v1213_v13 = vrot.slane %v1212_v11, 1 }
 0x1a1   : > { %v1214_v14 = vadd.f32 %v1213_v13, %v1212_v11  ;;  %v1215_v15 = vmul.f32 0.5, %v1207_v12 }
 0x1a3   : > { %v1216_v16 = vmul.f32 0.5, %v1214_v14  ;;  %v1217_v17 = vadd.f32 1e-05, %v1215_v15 }
 0x1a5   : > { %v1218_v18 = vadd.f32 1e-05, %v1216_v16  ;;  %1665 = vrsqrt.f32 %v1217_v17 }
 0x1a7   : > { %1667 = vrsqrt.f32 %v1218_v18 }
 0x1af   : > { %v1666_v19 = vpop.eup %1665 }
 0x1b1   : > { %v1668_v20 = vpop.eup %1667 }
 0x1b2   : > { %v1223_v21 = vcombine.low %v1666_v19, %v1668_v20 }
 0x1b4   : > { %v1230_v24 = vrot.slane %v1223_v21, %v2031_v52 }
 0x1b6   : > { %v1237_v26 = vrot.slane %v1230_v24, %v2031_v52 }
 0x1b8   : > { %v1239_v29 = vmul.f32 %v1237_v26, %v1127_v25 }
 0x1ba   : > { %v1244_v30 = vrot.slane %v1239_v29, %v2069_v32  ;;  %v1248_v31 = vrot.slane %v1239_v29, %v2072_v33 }
 0x1bc   : > { %v1249_v35 = vcombine.low %v1244_v30, %v1248_v31 }
 0x1be   : > { %v1256_v36 = vrot.slane %v1249_v35, %v2059_v22 }
 0x1c0   : > { %v1258_v38 = vmul.f32 %v1256_v36, %v1188_v61 }
 0x1c2   : > { %v1277_v39 = vadd.f32 %v1275_v37, %v1258_v38 }
 0x1c4   : > { %vm1278_vm1 = vcmp.ge.f32.partialorder %v1277_v39, 0.0  ;;  %v1279_v40 = vmul.f32 0.2, %v1277_v39 }
 0x1c6   : > { %v1280_v41 = vsel %vm1278_vm1, %v1277_v39, %v1279_v40 }
 0x1c7   : > { %v1288_v42 = vrot.slane %v1280_v41, %v2059_v22 }
 0x1c9   : > { %v1289_v43 = vcombine.high %v1288_v42, %v1288_v42 }
 0x1cb   : > { %v1503_v44 = vpack.c.bf16 %v1289_v43, %v1288_v42 }
 0x1cd   : > { %v1303_v45 = vrot.slane %v1503_v44, %v2031_v52 }
 0x1cf   : > { %1504 = vst.sshfl [vmem:[%s604_s30] sm:$0x5 pattern:$0x73625140] %v1303_v45 }
 0x1d0 PF: > { %s15_s24 = sadd.s32 1, %s1723_s24   ;;  %s2136_s18 = smov %s1703_s19 }
 0x1d1   : > { %p12_p0 = scmp.ge.s32.totalorder %s15_s24, 20   ;;  %s2137_s19 = smov %s1809_s6 }
 0x1d2   : > { %s2138_s20 = smov %s1715_s22  ;;  %s2139_s21 = smov %s1719_s23 }
 0x1d3   : > { %s2140_s22 = smov %s2143_s25  ;;  %s2141_s23 = smov %s2147_s26 }
 0x1d4   :  { %14 = sbr.rel (!%p12_p0) target bundleno = 4 (0x4), region = 133 }

// kernel: discriminator_forward.17
= control target key start
LH: loop header
LB: loop body
LE: loop exit
PB: predicated region body
PF: predicated region fallthrough
CT: control target
= control target key end

     0   :  { %v30_v35 = vlaneseq  ;;  %vm393_vm0 = vcmask 1041409   ;;  %vm2091_vm1 = vcmask 1041408   ;;  %vm2123_vm10 = vcmask 1024   ;;  %s3338_s1 = inlined_call_operand.vmem [shape: bf16[512,1024], index: 1, kind: input, shape index: {}]   ;;  %s3339_s0 = inlined_call_operand.vmem [shape: bf16[2,1,512], index: 0, kind: input, shape index: {}]   ;;  %s3340_s2 = inlined_call_operand.vmem [shape: f32[1,1024], index: 2, kind: input, shape index: {}]   ;;  %s3341_s3 = inlined_call_operand.vmem [shape: f32[1,1024], index: 3, kind: input, shape index: {}]   ;;  %s3342_s4 = inlined_call_operand.<no memory space> [shape: f32[1,1], index: 4, kind: input, shape index: {}]   ;;  %s3343_s5 = inlined_call_operand.vmem [shape: f32[2,1], index: 5, kind: output, shape index: {}]  }
   0x1   :  { %v78_v0 = vld [vmem:[%s3338_s1] sm:$0xff]  ;;  %v79_v2 = vld [vmem:[%s3338_s1 + $0x8] sm:$0xff] }
   0x2   :  { %v82_v1 = vld [vmem:[%s3338_s1 + $0x20] sm:$0xff]  ;;  %v83_v4 = vld [vmem:[%s3338_s1 + $0x28] sm:$0xff]  ;;  %v2521_v44 = vshrl.u32 %v30_v35, 7 }
   0x3   :  { %v2130_v3 = vcombine.high %v78_v0, %v82_v1  ;;  %v2129_v5 = vcombine.low %v78_v0, %v82_v1  ;;  %v86_v6 = vld [vmem:[%s3338_s1 + $0x40] sm:$0xff]  ;;  %v2132_v8 = vcombine.high %v79_v2, %v83_v4  ;;  %v2131_v9 = vcombine.low %v79_v2, %v83_v4  ;;  %v87_v11 = vld [vmem:[%s3338_s1 + $0x48] sm:$0xff] }
   0x4   :  { %v90_v7 = vld [vmem:[%s3338_s1 + $0x60] sm:$0xff]  ;;  %v91_v12 = vld [vmem:[%s3338_s1 + $0x68] sm:$0xff]  ;;  %v2536_v53 = vsub.s32 2, %v2521_v44 }
   0x5   :  { %v2138_v10 = vcombine.high %v86_v6, %v90_v7  ;;  %v94_v13 = vld [vmem:[%s3338_s1 + $0x80] sm:$0xff]  ;;  %1689 = vmatprep.subr.bf16.mxu0 %v2130_v3  ;;  %v2140_v14 = vcombine.high %v87_v11, %v91_v12  ;;  %v95_v16 = vld [vmem:[%s3338_s1 + $0x88] sm:$0xff]  ;;  %1771 = vmatprep.subr.bf16.mxu1 %v2132_v8  ;;  %v2137_v18 = vcombine.low %v86_v6, %v90_v7 }
   0x6   :  { %v98_v15 = vld [vmem:[%s3338_s1 + $0xa0] sm:$0xff]  ;;  %v99_v17 = vld [vmem:[%s3338_s1 + $0xa8] sm:$0xff]  ;;  %1690 = vmatpush1.bf16.msra.mxu0 %v2129_v5  ;;  %1772 = vmatpush1.bf16.msra.mxu1 %v2131_v9  ;;  %v2139_v19 = vcombine.low %v87_v11, %v91_v12 }
   0x7   :  { %1691 = vmatprep.subr.bf16.mxu0 %v2138_v10  ;;  %v2146_v20 = vcombine.high %v94_v13, %v98_v15  ;;  %1773 = vmatprep.subr.bf16.mxu1 %v2140_v14  ;;  %v2148_v21 = vcombine.high %v95_v16, %v99_v17  ;;  %v102_v22 = vld [vmem:[%s3338_s1 + $0xc0] sm:$0xff]  ;;  %v103_v24 = vld [vmem:[%s3338_s1 + $0xc8] sm:$0xff]  ;;  %v2145_v26 = vcombine.low %v94_v13, %v98_v15 }
   0x8   :  { %v106_v23 = vld [vmem:[%s3338_s1 + $0xe0] sm:$0xff]  ;;  %v107_v25 = vld [vmem:[%s3338_s1 + $0xe8] sm:$0xff]  ;;  %v2147_v27 = vcombine.low %v95_v16, %v99_v17 }
   0x9   :  { %v2154_v28 = vcombine.high %v102_v22, %v106_v23  ;;  %v2156_v29 = vcombine.high %v103_v24, %v107_v25  ;;  %v110_v30 = vld [vmem:[%s3338_s1 + $0x100] sm:$0xff]  ;;  %v111_v32 = vld [vmem:[%s3338_s1 + $0x108] sm:$0xff]  ;;  %v2153_v34 = vcombine.low %v102_v22, %v106_v23  ;;  %v2155_v36 = vcombine.low %v103_v24, %v107_v25 }
   0xa   :  { %1692 = vmatpush1.bf16.msra.mxu0 %v2137_v18  ;;  %1774 = vmatpush1.bf16.msra.mxu1 %v2139_v19  ;;  %v114_v31 = vld [vmem:[%s3338_s1 + $0x120] sm:$0xff]  ;;  %v115_v33 = vld [vmem:[%s3338_s1 + $0x128] sm:$0xff] }
   0xb   :  { %1693 = vmatprep.subr.bf16.mxu0 %v2146_v20  ;;  %1775 = vmatprep.subr.bf16.mxu1 %v2148_v21  ;;  %v2162_v37 = vcombine.high %v110_v30, %v114_v31  ;;  %v2164_v38 = vcombine.high %v111_v32, %v115_v33  ;;  %v118_v39 = vld [vmem:[%s3338_s1 + $0x140] sm:$0xff]  ;;  %v119_v41 = vld [vmem:[%s3338_s1 + $0x148] sm:$0xff]  ;;  %v2161_v43 = vcombine.low %v110_v30, %v114_v31 }
   0xc   :  { %v122_v40 = vld [vmem:[%s3338_s1 + $0x160] sm:$0xff]  ;;  %v123_v42 = vld [vmem:[%s3338_s1 + $0x168] sm:$0xff]  ;;  %v2163_v45 = vcombine.low %v111_v32, %v115_v33 }
   0xd   :  { %v2170_v46 = vcombine.high %v118_v39, %v122_v40  ;;  %v2172_v47 = vcombine.high %v119_v41, %v123_v42  ;;  %v126_v48 = vld [vmem:[%s3338_s1 + $0x180] sm:$0xff]  ;;  %v127_v50 = vld [vmem:[%s3338_s1 + $0x188] sm:$0xff]  ;;  %v2169_v52 = vcombine.low %v118_v39, %v122_v40  ;;  %v2171_v54 = vcombine.low %v119_v41, %v123_v42 }
   0xe   :  { %1694 = vmatpush1.bf16.msra.mxu0 %v2145_v26  ;;  %1776 = vmatpush1.bf16.msra.mxu1 %v2147_v27  ;;  %v130_v49 = vld [vmem:[%s3338_s1 + $0x1a0] sm:$0xff]  ;;  %v131_v51 = vld [vmem:[%s3338_s1 + $0x1a8] sm:$0xff]  ;;  %v2615_v42 = vsub.s32 0, %v2521_v44 }
   0xf   :  { %1695 = vmatprep.subr.bf16.mxu0 %v2154_v28  ;;  %1777 = vmatprep.subr.bf16.mxu1 %v2156_v29  ;;  %v2178_v55 = vcombine.high %v126_v48, %v130_v49  ;;  %v2388_v56 = vld [vmem:[%s3339_s0] sm:$0xff]   ;;  %v2180_v57 = vcombine.high %v127_v50, %v131_v51  ;;  %v135_v62 = vld [vmem:[%s3338_s1 + $0x1c8] sm:$0xff]  ;;  %v2177_v0 = vcombine.low %v126_v48, %v130_v49  ;;  %v2624_v49 = vsub.s32 4, %v2521_v44 }
  0x10   :  { %v134_v58 = vld [vmem:[%s3338_s1 + $0x1c0] sm:$0xff]  ;;  %v2547_v60 = vunpack.c.l.bf16 %v2388_v56  ;;  %v2549_v61 = vunpack.c.h.bf16 %v2388_v56  ;;  %v139_v63 = vld [vmem:[%s3338_s1 + $0x1e8] sm:$0xff]  ;;  %v2179_v3 = vcombine.low %v127_v50, %v131_v51 }
  0x11   :  { %v138_v59 = vld [vmem:[%s3338_s1 + $0x1e0] sm:$0xff]  ;;  %v2188_v5 = vcombine.high %v135_v62, %v139_v63  ;;  %v143_v10 = vld [vmem:[%s3338_s1 + $0x208] sm:$0xff]  ;;  %v2187_v15 = vcombine.low %v135_v62, %v139_v63 }
  0x12   :  { %1696 = vmatpush1.bf16.msra.mxu0 %v2153_v34  ;;  %1778 = vmatpush1.bf16.msra.mxu1 %v2155_v36  ;;  %v37_v1 = vrot.slane %v2547_v60, %v2536_v53  ;;  %v53_v2 = vrot.slane %v2549_v61, %v2536_v53  ;;  %v2186_v4 = vcombine.high %v134_v58, %v138_v59  ;;  %v142_v6 = vld [vmem:[%s3338_s1 + $0x200] sm:$0xff]  ;;  %v147_v11 = vld [vmem:[%s3338_s1 + $0x228] sm:$0xff] }
  0x13   :  { %1697 = vmatprep.subr.bf16.mxu0 %v2162_v37  ;;  %1779 = vmatprep.subr.bf16.mxu1 %v2164_v38  ;;  %v146_v7 = vld [vmem:[%s3338_s1 + $0x220] sm:$0xff]  ;;  %v2185_v12 = vcombine.low %v134_v58, %v138_v59  ;;  %v2196_v17 = vcombine.high %v143_v10, %v147_v11  ;;  %v151_v21 = vld [vmem:[%s3338_s1 + $0x248] sm:$0xff]  ;;  %v2195_v25 = vcombine.low %v143_v10, %v147_v11 }
  0x14   :  { %v71_v8 = vpack.c.bf16 %v37_v1, %v37_v1  ;;  %v75_v9 = vpack.c.bf16 %v53_v2, %v53_v2  ;;  %v2194_v16 = vcombine.high %v142_v6, %v146_v7  ;;  %v150_v18 = vld [vmem:[%s3338_s1 + $0x240] sm:$0xff]  ;;  %v155_v22 = vld [vmem:[%s3338_s1 + $0x268] sm:$0xff]  ;;  %v2193_v23 = vcombine.low %v142_v6, %v146_v7 }
  0x15   :  { %v154_v19 = vld [vmem:[%s3338_s1 + $0x260] sm:$0xff]  ;;  %v2204_v28 = vcombine.high %v151_v21, %v155_v22  ;;  %v159_v31 = vld [vmem:[%s3338_s1 + $0x288] sm:$0xff]  ;;  %v2203_v34 = vcombine.low %v151_v21, %v155_v22  ;;  %v41_v58 = vrot.slane %v2547_v60, %v2624_v49  ;;  %v33_v6 = vrot.slane %v2547_v60, %v2615_v42 }
  0x16   :  { %1698 = vmatpush1.bf16.msra.mxu0 %v2161_v43  ;;  %1780 = vmatpush1.bf16.msra.mxu1 %v2163_v45  ;;  %v385_v13 = vunpack.c.l.b16 %v71_v8  ;;  %v389_v14 = vunpack.c.l.b16 %v75_v9  ;;  %v2202_v26 = vcombine.high %v150_v18, %v154_v19  ;;  %v158_v29 = vld [vmem:[%s3338_s1 + $0x280] sm:$0xff]  ;;  %v163_v32 = vld [vmem:[%s3338_s1 + $0x2a8] sm:$0xff]  ;;  %v2201_v33 = vcombine.low %v150_v18, %v154_v19 }
  0x17   :  { %1699 = vmatprep.subr.bf16.mxu0 %v2170_v46  ;;  %1781 = vmatprep.subr.bf16.mxu1 %v2172_v47  ;;  %v162_v30 = vld [vmem:[%s3338_s1 + $0x2a0] sm:$0xff]  ;;  %v2212_v36 = vcombine.high %v159_v31, %v163_v32  ;;  %v167_v39 = vld [vmem:[%s3338_s1 + $0x2c8] sm:$0xff]  ;;  %v2211_v43 = vcombine.low %v159_v31, %v163_v32 }
  0x18   :  { %v395_v20 = vrot.slane %v389_v14, 7  ;;  %v2210_v35 = vcombine.high %v158_v29, %v162_v30  ;;  %v166_v37 = vld [vmem:[%s3338_s1 + $0x2c0] sm:$0xff]  ;;  %v171_v40 = vld [vmem:[%s3338_s1 + $0x2e8] sm:$0xff]  ;;  %v2209_v41 = vcombine.low %v158_v29, %v162_v30 }
  0x19   :  { %v170_v38 = vld [vmem:[%s3338_s1 + $0x2e0] sm:$0xff]  ;;  %v2220_v46 = vcombine.high %v167_v39, %v171_v40  ;;  %v175_v50 = vld [vmem:[%s3338_s1 + $0x308] sm:$0xff]  ;;  %v2219_v56 = vcombine.low %v167_v39, %v171_v40 }
  0x1a   :  { %1700 = vmatpush1.bf16.msra.mxu0 %v2169_v52  ;;  %1782 = vmatpush1.bf16.msra.mxu1 %v2171_v54  ;;  %v396_v24 = vsel %vm393_vm0, %v395_v20, %v385_v13  ;;  %v2218_v45 = vcombine.high %v166_v37, %v170_v38  ;;  %v174_v47 = vld [vmem:[%s3338_s1 + $0x300] sm:$0xff]  ;;  %v179_v51 = vld [vmem:[%s3338_s1 + $0x328] sm:$0xff]  ;;  %v2633_v52 = vsub.s32 6, %v2521_v44  ;;  %v2217_v54 = vcombine.low %v166_v37, %v170_v38 }
  0x1b   :  { %1701 = vmatprep.subr.bf16.mxu0 %v2178_v55  ;;  %1783 = vmatprep.subr.bf16.mxu1 %v2180_v57  ;;  %v2586_v27 = vpack.c.b16 %v396_v24, %v396_v24  ;;  %v178_v48 = vld [vmem:[%s3338_s1 + $0x320] sm:$0xff]  ;;  %v49_v55 = vrot.slane %v2549_v61, %v2615_v42  ;;  %v2228_v59 = vcombine.high %v175_v50, %v179_v51  ;;  %v183_v1 = vld [vmem:[%s3338_s1 + $0x348] sm:$0xff] }
  0x1c   :  { %v2226_v57 = vcombine.high %v174_v47, %v178_v48  ;;  %v182_v62 = vld [vmem:[%s3338_s1 + $0x340] sm:$0xff]  ;;  %v187_v2 = vld [vmem:[%s3338_s1 + $0x368] sm:$0xff]  ;;  %v2227_v9 = vcombine.low %v175_v50, %v179_v51  ;;  %v70_v20 = vpack.c.bf16 %v33_v6, %v33_v6 }
  0x1d   :  { %1721 = vmatprep.mubr.bf16.mxu0 %v2586_v27  ;;  %1803 = vmatprep.mubr.bf16.mxu1 %v2586_v27  ;;  %v186_v63 = vld [vmem:[%s3338_s1 + $0x360] sm:$0xff]  ;;  %v74_v7 = vpack.c.bf16 %v49_v55, %v49_v55  ;;  %v2236_v11 = vcombine.high %v183_v1, %v187_v2  ;;  %v199_v29 = vld [vmem:[%s3338_s1 + $0x3c8] sm:$0xff] }
  0x1e   :  { %1702 = vmatpush1.bf16.msra.mxu0 %v2177_v0  ;;  %1784 = vmatpush1.bf16.msra.mxu1 %v2179_v3  ;;  %v57_v0 = vrot.slane %v2549_v61, %v2624_v49  ;;  %v61_v3 = vrot.slane %v2549_v61, %v2633_v52  ;;  %v2234_v10 = vcombine.high %v182_v62, %v186_v63  ;;  %v194_v61 = vld [vmem:[%s3338_s1 + $0x3a0] sm:$0xff]  ;;  %v203_v30 = vld [vmem:[%s3338_s1 + $0x3e8] sm:$0xff] }
  0x1f   :  { %1703 = vmatprep.subr.bf16.mxu0 %v2186_v4  ;;  %1785 = vmatprep.subr.bf16.mxu1 %v2188_v5  ;;  %v72_v4 = vpack.c.bf16 %v41_v58, %v41_v58  ;;  %v2225_v5 = vcombine.low %v174_v47, %v178_v48  ;;  %v2233_v19 = vcombine.low %v182_v62, %v186_v63  ;;  %v388_v21 = vunpack.c.l.b16 %v74_v7  ;;  %v206_v39 = vld [vmem:[%s3338_s1 + $0x400] sm:$0xff]  ;;  %v215_v58 = vld [vmem:[%s3338_s1 + $0x448] sm:$0xff] }
  0x20   :  { %v76_v8 = vpack.c.bf16 %v57_v0, %v57_v0  ;;  %v77_v18 = vpack.c.bf16 %v61_v3, %v61_v3  ;;  %v2252_v38 = vcombine.high %v199_v29, %v203_v30  ;;  %v210_v40 = vld [vmem:[%s3338_s1 + $0x420] sm:$0xff]  ;;  %v2251_v50 = vcombine.low %v199_v29, %v203_v30  ;;  %v223_v6 = vld [vmem:[%s3338_s1 + $0x488] sm:$0xff] }
  0x21   :  { %v386_v13 = vunpack.c.l.b16 %v72_v4  ;;  %v2258_v51 = vcombine.high %v206_v39, %v210_v40  ;;  %v214_v55 = vld [vmem:[%s3338_s1 + $0x440] sm:$0xff]  ;;  %v2257_v63 = vcombine.low %v206_v39, %v210_v40  ;;  %v227_v7 = vld [vmem:[%s3338_s1 + $0x4a8] sm:$0xff] }
  0x22   :  { %1704 = vmatpush1.bf16.msra.mxu0 %v2185_v12  ;;  %1786 = vmatpush1.bf16.msra.mxu1 %v2187_v15  ;;  %v190_v12 = vld [vmem:[%s3338_s1 + $0x380] sm:$0xff]  ;;  %v390_v14 = vunpack.c.l.b16 %v76_v8  ;;  %v191_v15 = vld [vmem:[%s3338_s1 + $0x388] sm:$0xff]  ;;  %v391_v32 = vunpack.c.l.b16 %v77_v18 }
  0x23   :  { %1705 = vmatprep.subr.bf16.mxu0 %v2194_v16  ;;  %1787 = vmatprep.subr.bf16.mxu1 %v2196_v17  ;;  %v195_v16 = vld [vmem:[%s3338_s1 + $0x3a8] sm:$0xff]  ;;  %v45_v17 = vrot.slane %v2547_v60, %v2633_v52  ;;  %v2242_v24 = vcombine.high %v190_v12, %v194_v61  ;;  %v202_v60 = vld [vmem:[%s3338_s1 + $0x3e0] sm:$0xff] }
  0x24   :  { %v397_v22 = vrot.slane %v390_v14, 7  ;;  %v222_v3 = vld [vmem:[%s3338_s1 + $0x480] sm:$0xff]  ;;  %v235_v14 = vld [vmem:[%s3338_s1 + $0x4e8] sm:$0xff] }
  0x25   :  { %v73_v31 = vpack.c.bf16 %v45_v17, %v45_v17  ;;  %v226_v4 = vld [vmem:[%s3338_s1 + $0x4a0] sm:$0xff]  ;;  %v247_v30 = vld [vmem:[%s3338_s1 + $0x548] sm:$0xff] }
  0x26   :  { %1706 = vmatpush1.bf16.msra.mxu0 %v2193_v23  ;;  %1788 = vmatpush1.bf16.msra.mxu1 %v2195_v25  ;;  %v2235_v23 = vcombine.low %v183_v1, %v187_v2  ;;  %v2244_v25 = vcombine.high %v191_v15, %v195_v16  ;;  %v250_v29 = vld [vmem:[%s3338_s1 + $0x560] sm:$0xff]  ;;  %v259_v39 = vld [vmem:[%s3338_s1 + $0x5a8] sm:$0xff] }
  0x27   :  { %1707 = vmatprep.subr.bf16.mxu0 %v2202_v26  ;;  %1789 = vmatprep.subr.bf16.mxu1 %v2204_v28  ;;  %v198_v26 = vld [vmem:[%s3338_s1 + $0x3c0] sm:$0xff]  ;;  %v2678_v28 = vsel %vm393_vm0, %v397_v22, %v386_v13  ;;  %v231_v13 = vld [vmem:[%s3338_s1 + $0x4c8] sm:$0xff] }
  0x28   :  { %v2250_v37 = vcombine.high %v198_v26, %v202_v60  ;;  %v2249_v47 = vcombine.low %v198_v26, %v202_v60  ;;  %v2284_v18 = vcombine.high %v231_v13, %v235_v14  ;;  %v243_v22 = vld [vmem:[%s3338_s1 + $0x528] sm:$0xff]  ;;  %v246_v60 = vld [vmem:[%s3338_s1 + $0x540] sm:$0xff] }
  0x29   :  { %v2297_v40 = vcombine.low %v246_v60, %v250_v29 }
  0x2a   :  { %1708 = vmatpush1.bf16.msra.mxu0 %v2201_v33  ;;  %1790 = vmatpush1.bf16.msra.mxu1 %v2203_v34  ;;  %v2241_v33 = vcombine.low %v190_v12, %v194_v61  ;;  %v384_v34 = vunpack.c.l.b16 %v70_v20  ;;  %v230_v12 = vld [vmem:[%s3338_s1 + $0x4c0] sm:$0xff] }
  0x2b   :  { %1709 = vmatprep.subr.bf16.mxu0 %v2210_v35  ;;  %1791 = vmatprep.subr.bf16.mxu1 %v2212_v36  ;;  %v392_v35 = vrot.slane %v388_v21, 7  ;;  %v2243_v36 = vcombine.low %v191_v15, %v195_v16  ;;  %v234_v61 = vld [vmem:[%s3338_s1 + $0x4e0] sm:$0xff]  ;;  %v2273_v15 = vcombine.low %v222_v3, %v226_v4  ;;  %v2275_v16 = vcombine.low %v223_v6, %v227_v7  ;;  %v239_v21 = vld [vmem:[%s3338_s1 + $0x508] sm:$0xff] }
  0x2c   :  { %v2282_v17 = vcombine.high %v230_v12, %v234_v61  ;;  %v242_v20 = vld [vmem:[%s3338_s1 + $0x520] sm:$0xff]  ;;  %v2292_v26 = vcombine.high %v239_v21, %v243_v22 }
  0x2d   :  { %v394_v48 = vsel %vm393_vm0, %v392_v35, %v384_v34  ;;  %v2298_v34 = vcombine.high %v246_v60, %v250_v29  ;;  %v302_v29 = vld [vmem:[%s3338_s1 + $0x700] sm:$0xff] }
  0x2e   :  { %1710 = vmatpush1.bf16.msra.mxu0 %v2209_v41  ;;  %1792 = vmatpush1.bf16.msra.mxu1 %v2211_v43  ;;  %v207_v41 = vld [vmem:[%s3338_s1 + $0x408] sm:$0xff] }
  0x2f   :  { %1711 = vmatprep.subr.bf16.mxu0 %v2218_v45  ;;  %1793 = vmatprep.subr.bf16.mxu1 %v2220_v46  ;;  %v211_v43 = vld [vmem:[%s3338_s1 + $0x428] sm:$0xff]  ;;  %v387_v45 = vunpack.c.l.b16 %v73_v31  ;;  %v399_v46 = vrot.slane %v391_v32, 7 }
  0x30   :  { %v2259_v0 = vcombine.low %v207_v41, %v211_v43  ;;  %v251_v31 = vld [vmem:[%s3338_s1 + $0x568] sm:$0xff] }
  0x31   :  { %v400_v62 = vsel %vm393_vm0, %v399_v46, %v387_v45  ;;  %v2300_v35 = vcombine.high %v247_v30, %v251_v31  ;;  %v262_v46 = vld [vmem:[%s3338_s1 + $0x5c0] sm:$0xff] }
  0x32   :  { %1712 = vmatpush1.bf16.msra.mxu0 %v2217_v54  ;;  %1794 = vmatpush1.bf16.msra.mxu1 %v2219_v56  ;;  %v2260_v54 = vcombine.high %v207_v41, %v211_v43  ;;  %v218_v56 = vld [vmem:[%s3338_s1 + $0x460] sm:$0xff]  ;;  %v2299_v41 = vcombine.low %v247_v30, %v251_v31  ;;  %v303_v31 = vld [vmem:[%s3338_s1 + $0x708] sm:$0xff] }
  0x33   :  { %1713 = vmatprep.subr.bf16.mxu0 %v2226_v57  ;;  %1795 = vmatprep.subr.bf16.mxu1 %v2228_v59  ;;  %v2705_v57 = vpack.c.b16 %v394_v48, %v394_v48  ;;  %v219_v59 = vld [vmem:[%s3338_s1 + $0x468] sm:$0xff]  ;;  %v2266_v1 = vcombine.high %v214_v55, %v218_v56  ;;  %v2265_v8 = vcombine.low %v214_v55, %v218_v56  ;;  %v306_v30 = vld [vmem:[%s3338_s1 + $0x720] sm:$0xff] }
  0x34   :  { %v2268_v2 = vcombine.high %v215_v58, %v219_v59  ;;  %v263_v48 = vld [vmem:[%s3338_s1 + $0x5c8] sm:$0xff] }
  0x36   :  { %1714 = vmatpush1.bf16.msra.mxu0 %v2225_v5  ;;  %1796 = vmatpush1.bf16.msra.mxu1 %v2227_v9  ;;  %v2720_v5 = vpack.c.b16 %v400_v62, %v400_v62  ;;  %v2267_v9 = vcombine.low %v215_v58, %v219_v59  ;;  %v270_v58 = vld [vmem:[%s3338_s1 + $0x600] sm:$0xff]  ;;  %v271_v62 = vld [vmem:[%s3338_s1 + $0x608] sm:$0xff] }
  0x37   :  { %1715 = vmatprep.subr.bf16.mxu0 %v2234_v10  ;;  %1797 = vmatprep.subr.bf16.mxu1 %v2236_v11  ;;  %v2274_v10 = vcombine.high %v222_v3, %v226_v4  ;;  %v2276_v11 = vcombine.high %v223_v6, %v227_v7  ;;  %v274_v59 = vld [vmem:[%s3338_s1 + $0x620] sm:$0xff]  ;;  %v279_v7 = vld [vmem:[%s3338_s1 + $0x648] sm:$0xff] }
  0x38   :  { %v278_v4 = vld [vmem:[%s3338_s1 + $0x640] sm:$0xff] }
  0x39   :  { %v282_v6 = vld [vmem:[%s3338_s1 + $0x660] sm:$0xff] }
  0x3a   :  { %1716 = vmatpush1.bf16.msra.mxu0 %v2233_v19  ;;  %1798 = vmatpush1.bf16.msra.mxu1 %v2235_v23  ;;  %v238_v19 = vld [vmem:[%s3338_s1 + $0x500] sm:$0xff]  ;;  %v2281_v23 = vcombine.low %v230_v12, %v234_v61 }
  0x3b   :  { %1717 = vmatprep.subr.bf16.mxu0 %v2242_v24  ;;  %1799 = vmatprep.subr.bf16.mxu1 %v2244_v25  ;;  %v2283_v24 = vcombine.low %v231_v13, %v235_v14  ;;  %v2290_v25 = vcombine.high %v238_v19, %v242_v20  ;;  %v2289_v32 = vcombine.low %v238_v19, %v242_v20  ;;  %v286_v61 = vld [vmem:[%s3338_s1 + $0x680] sm:$0xff]  ;;  %v287_v14 = vld [vmem:[%s3338_s1 + $0x688] sm:$0xff] }
  0x3c   :  { %v290_v13 = vld [vmem:[%s3338_s1 + $0x6a0] sm:$0xff] }
  0x3d   :  { %v294_v20 = vld [vmem:[%s3338_s1 + $0x6c0] sm:$0xff] }
  0x3e   :  { %1718 = vmatpush1.bf16.msra.mxu0 %v2241_v33  ;;  %1800 = vmatpush1.bf16.msra.mxu1 %v2243_v36  ;;  %v2291_v33 = vcombine.low %v239_v21, %v243_v22  ;;  %v254_v36 = vld [vmem:[%s3338_s1 + $0x580] sm:$0xff]  ;;  %v295_v22 = vld [vmem:[%s3338_s1 + $0x6c8] sm:$0xff] }
  0x3f   :  { %1719 = vmatprep.subr.bf16.mxu0 %v2250_v37  ;;  %1801 = vmatprep.subr.bf16.mxu1 %v2252_v38  ;;  %v258_v37 = vld [vmem:[%s3338_s1 + $0x5a0] sm:$0xff]  ;;  %v255_v38 = vld [vmem:[%s3338_s1 + $0x588] sm:$0xff] }
  0x40   :  { %v2306_v43 = vcombine.high %v254_v36, %v258_v37  ;;  %v2308_v45 = vcombine.high %v255_v38, %v259_v39  ;;  %v298_v21 = vld [vmem:[%s3338_s1 + $0x6e0] sm:$0xff] }
  0x42   :  { %1720 = vmatpush1.bf16.msra.mxu0 %v2249_v47  ;;  %1802 = vmatpush1.bf16.msra.mxu1 %v2251_v50  ;;  %v266_v47 = vld [vmem:[%s3338_s1 + $0x5e0] sm:$0xff]  ;;  %v267_v50 = vld [vmem:[%s3338_s1 + $0x5e8] sm:$0xff] }
  0x43   :  { %1730 = vmatprep.subr.bf16.mxu0 %v2258_v51  ;;  %1812 = vmatprep.subr.bf16.mxu1 %v2260_v54  ;;  %v2305_v51 = vcombine.low %v254_v36, %v258_v37  ;;  %v2307_v54 = vcombine.low %v255_v38, %v259_v39  ;;  %v2314_v55 = vcombine.high %v262_v46, %v266_v47  ;;  %v310_v37 = vld [vmem:[%s3338_s1 + $0x740] sm:$0xff]  ;;  %v311_v39 = vld [vmem:[%s3338_s1 + $0x748] sm:$0xff] }
  0x44   :  { %v2316_v56 = vcombine.high %v263_v48, %v267_v50  ;;  %v314_v38 = vld [vmem:[%s3338_s1 + $0x760] sm:$0xff] }
  0x45   :  { %1722 = vmatmul.mubr.bf16.vlgmr.msra.gmra.mrb[0].mxu0 %v2705_v57  ;;  %1804 = vmatmul.mubr.bf16.vlgmr.msra.gmra.mrb[0].mxu1 %v2705_v57 }
  0x46   :  { %1731 = vmatpush1.bf16.msra.mxu0 %v2257_v63  ;;  %1813 = vmatpush1.bf16.msra.mxu1 %v2259_v0  ;;  %v275_v63 = vld [vmem:[%s3338_s1 + $0x628] sm:$0xff]  ;;  %v2313_v0 = vcombine.low %v262_v46, %v266_v47  ;;  %v318_v47 = vld [vmem:[%s3338_s1 + $0x780] sm:$0xff] }
  0x47   :  { %1732 = vmatprep.subr.bf16.mxu0 %v2266_v1  ;;  %1814 = vmatprep.subr.bf16.mxu1 %v2268_v2  ;;  %v2315_v1 = vcombine.low %v263_v48, %v267_v50  ;;  %v2322_v2 = vcombine.high %v270_v58, %v274_v59  ;;  %v2324_v3 = vcombine.high %v271_v62, %v275_v63  ;;  %v322_v48 = vld [vmem:[%s3338_s1 + $0x7a0] sm:$0xff]  ;;  %v319_v50 = vld [vmem:[%s3338_s1 + $0x788] sm:$0xff] }
  0x48   :  { %1762 = vmatprep.mubr.bf16.mxu0 %v2720_v5  ;;  %1844 = vmatprep.mubr.bf16.mxu1 %v2720_v5 }
  0x4a   :  { %1733 = vmatpush1.bf16.msra.mxu0 %v2265_v8  ;;  %1815 = vmatpush1.bf16.msra.mxu1 %v2267_v9  ;;  %v283_v8 = vld [vmem:[%s3338_s1 + $0x668] sm:$0xff]  ;;  %v2321_v9 = vcombine.low %v270_v58, %v274_v59  ;;  %v326_v59 = vld [vmem:[%s3338_s1 + $0x7c0] sm:$0xff] }
  0x4b   :  { %1734 = vmatprep.subr.bf16.mxu0 %v2274_v10  ;;  %1816 = vmatprep.subr.bf16.mxu1 %v2276_v11  ;;  %v2323_v10 = vcombine.low %v271_v62, %v275_v63  ;;  %v2330_v11 = vcombine.high %v278_v4, %v282_v6  ;;  %v2332_v12 = vcombine.high %v279_v7, %v283_v8  ;;  %v330_v62 = vld [vmem:[%s3338_s1 + $0x7e0] sm:$0xff]  ;;  %v327_v63 = vld [vmem:[%s3338_s1 + $0x7c8] sm:$0xff] }
  0x4e   :  { %1735 = vmatpush1.bf16.msra.mxu0 %v2273_v15  ;;  %1817 = vmatpush1.bf16.msra.mxu1 %v2275_v16  ;;  %v291_v15 = vld [vmem:[%s3338_s1 + $0x6a8] sm:$0xff]  ;;  %v2329_v16 = vcombine.low %v278_v4, %v282_v6  ;;  %v80_v6 = vld [vmem:[%s3338_s1 + $0x10] sm:$0xff] }
  0x4f   :  { %1736 = vmatprep.subr.bf16.mxu0 %v2282_v17  ;;  %1818 = vmatprep.subr.bf16.mxu1 %v2284_v18  ;;  %v2331_v17 = vcombine.low %v279_v7, %v283_v8  ;;  %v2338_v18 = vcombine.high %v286_v61, %v290_v13  ;;  %v2340_v19 = vcombine.high %v287_v14, %v291_v15  ;;  %v84_v7 = vld [vmem:[%s3338_s1 + $0x30] sm:$0xff]  ;;  %v81_v8 = vld [vmem:[%s3338_s1 + $0x18] sm:$0xff] }
  0x52   :  { %1737 = vmatpush1.bf16.msra.mxu0 %v2281_v23  ;;  %1819 = vmatpush1.bf16.msra.mxu1 %v2283_v24  ;;  %v299_v23 = vld [vmem:[%s3338_s1 + $0x6e8] sm:$0xff]  ;;  %v2337_v24 = vcombine.low %v286_v61, %v290_v13  ;;  %v88_v13 = vld [vmem:[%s3338_s1 + $0x50] sm:$0xff] }
  0x53   :  { %1738 = vmatprep.subr.bf16.mxu0 %v2290_v25  ;;  %1820 = vmatprep.subr.bf16.mxu1 %v2292_v26  ;;  %v2339_v25 = vcombine.low %v287_v14, %v291_v15  ;;  %v2346_v26 = vcombine.high %v294_v20, %v298_v21  ;;  %v2348_v60 = vcombine.high %v295_v22, %v299_v23  ;;  %v92_v14 = vld [vmem:[%s3338_s1 + $0x70] sm:$0xff] }
  0x54   :  { %v2908_v15 = vpack.c.b16 %v2678_v28, %v2678_v28  ;;  %v96_v28 = vld [vmem:[%s3338_s1 + $0x90] sm:$0xff] }
  0x56   :  { %1739 = vmatpush1.bf16.msra.mxu0 %v2289_v32  ;;  %1821 = vmatpush1.bf16.msra.mxu1 %v2291_v33  ;;  %v307_v32 = vld [vmem:[%s3338_s1 + $0x728] sm:$0xff]  ;;  %v2345_v33 = vcombine.low %v294_v20, %v298_v21  ;;  %v2142_v20 = vcombine.high %v88_v13, %v92_v14 }
  0x57   :  { %1740 = vmatprep.subr.bf16.mxu0 %v2298_v34  ;;  %1822 = vmatprep.subr.bf16.mxu1 %v2300_v35  ;;  %v2347_v34 = vcombine.low %v295_v22, %v299_v23  ;;  %v2354_v35 = vcombine.high %v302_v29, %v306_v30  ;;  %v2356_v36 = vcombine.high %v303_v31, %v307_v32  ;;  %v100_v22 = vld [vmem:[%s3338_s1 + $0xb0] sm:$0xff]  ;;  %v97_v23 = vld [vmem:[%s3338_s1 + $0x98] sm:$0xff] }
  0x5a   :  { %1741 = vmatpush1.bf16.msra.mxu0 %v2297_v40  ;;  %1823 = vmatpush1.bf16.msra.mxu1 %v2299_v41  ;;  %v315_v40 = vld [vmem:[%s3338_s1 + $0x768] sm:$0xff]  ;;  %v2353_v41 = vcombine.low %v302_v29, %v306_v30  ;;  %v104_v30 = vld [vmem:[%s3338_s1 + $0xd0] sm:$0xff] }
  0x5b   :  { %1742 = vmatprep.subr.bf16.mxu0 %v2306_v43  ;;  %1824 = vmatprep.subr.bf16.mxu1 %v2308_v45  ;;  %v2355_v43 = vcombine.low %v303_v31, %v307_v32  ;;  %v2362_v45 = vcombine.high %v310_v37, %v314_v38  ;;  %v2364_v46 = vcombine.high %v311_v39, %v315_v40  ;;  %v108_v31 = vld [vmem:[%s3338_s1 + $0xf0] sm:$0xff]  ;;  %v105_v32 = vld [vmem:[%s3338_s1 + $0xd8] sm:$0xff] }
  0x5e   :  { %1743 = vmatpush1.bf16.msra.mxu0 %v2305_v51  ;;  %1825 = vmatpush1.bf16.msra.mxu1 %v2307_v54  ;;  %v323_v51 = vld [vmem:[%s3338_s1 + $0x7a8] sm:$0xff]  ;;  %v2361_v54 = vcombine.low %v310_v37, %v314_v38  ;;  %v112_v38 = vld [vmem:[%s3338_s1 + $0x110] sm:$0xff] }
  0x5f   :  { %1744 = vmatprep.subr.bf16.mxu0 %v2314_v55  ;;  %1826 = vmatprep.subr.bf16.mxu1 %v2316_v56  ;;  %v2363_v55 = vcombine.low %v311_v39, %v315_v40  ;;  %v2370_v56 = vcombine.high %v318_v47, %v322_v48  ;;  %v2372_v58 = vcombine.high %v319_v50, %v323_v51  ;;  %v116_v39 = vld [vmem:[%s3338_s1 + $0x130] sm:$0xff]  ;;  %v117_v40 = vld [vmem:[%s3338_s1 + $0x138] sm:$0xff] }
  0x62   :  { %1745 = vmatpush1.bf16.msra.mxu0 %v2313_v0  ;;  %1827 = vmatpush1.bf16.msra.mxu1 %v2315_v1  ;;  %v331_v0 = vld [vmem:[%s3338_s1 + $0x7e8] sm:$0xff]  ;;  %v2369_v1 = vcombine.low %v318_v47, %v322_v48  ;;  %v120_v47 = vld [vmem:[%s3338_s1 + $0x150] sm:$0xff] }
  0x63   :  { %1746 = vmatprep.subr.bf16.mxu0 %v2322_v2  ;;  %1828 = vmatprep.subr.bf16.mxu1 %v2324_v3  ;;  %v2371_v2 = vcombine.low %v319_v50, %v323_v51  ;;  %v2378_v3 = vcombine.high %v326_v59, %v330_v62  ;;  %v2380_v4 = vcombine.high %v327_v63, %v331_v0  ;;  %v124_v48 = vld [vmem:[%s3338_s1 + $0x170] sm:$0xff]  ;;  %v121_v50 = vld [vmem:[%s3338_s1 + $0x158] sm:$0xff] }
  0x64   :  { %v125_v51 = vld [vmem:[%s3338_s1 + $0x178] sm:$0xff] }
  0x66   :  { %1747 = vmatpush1.bf16.msra.mxu0 %v2321_v9  ;;  %1829 = vmatpush1.bf16.msra.mxu1 %v2323_v10  ;;  %v85_v9 = vld [vmem:[%s3338_s1 + $0x38] sm:$0xff]  ;;  %v2377_v10 = vcombine.low %v326_v59, %v330_v62  ;;  %v128_v59 = vld [vmem:[%s3338_s1 + $0x190] sm:$0xff] }
  0x67   :  { %1748 = vmatprep.subr.bf16.mxu0 %v2330_v11  ;;  %1830 = vmatprep.subr.bf16.mxu1 %v2332_v12  ;;  %v2379_v11 = vcombine.low %v327_v63, %v331_v0  ;;  %v2134_v12 = vcombine.high %v80_v6, %v84_v7  ;;  %v2136_v61 = vcombine.high %v81_v8, %v85_v9  ;;  %v132_v62 = vld [vmem:[%s3338_s1 + $0x1b0] sm:$0xff]  ;;  %v129_v63 = vld [vmem:[%s3338_s1 + $0x198] sm:$0xff] }
  0x68   :  { %v133_v0 = vld [vmem:[%s3338_s1 + $0x1b8] sm:$0xff] }
  0x6a   :  { %1749 = vmatpush1.bf16.msra.mxu0 %v2329_v16  ;;  %1831 = vmatpush1.bf16.msra.mxu1 %v2331_v17  ;;  %v89_v16 = vld [vmem:[%s3338_s1 + $0x58] sm:$0xff] }
  0x6b   :  { %1750 = vmatprep.subr.bf16.mxu0 %v2338_v18  ;;  %1832 = vmatprep.subr.bf16.mxu1 %v2340_v19  ;;  %v93_v17 = vld [vmem:[%s3338_s1 + $0x78] sm:$0xff]  ;;  %v2133_v18 = vcombine.low %v80_v6, %v84_v7  ;;  %v2135_v19 = vcombine.low %v81_v8, %v85_v9  ;;  %v136_v6 = vld [vmem:[%s3338_s1 + $0x1d0] sm:$0xff] }
  0x6c   :  { %v2144_v21 = vcombine.high %v89_v16, %v93_v17  ;;  %v140_v7 = vld [vmem:[%s3338_s1 + $0x1f0] sm:$0xff]  ;;  %v137_v8 = vld [vmem:[%s3338_s1 + $0x1d8] sm:$0xff] }
  0x6d   :  { %v141_v9 = vld [vmem:[%s3338_s1 + $0x1f8] sm:$0xff] }
  0x6e   :  { %1751 = vmatpush1.bf16.msra.mxu0 %v2337_v24  ;;  %1833 = vmatpush1.bf16.msra.mxu1 %v2339_v25  ;;  %v101_v24 = vld [vmem:[%s3338_s1 + $0xb8] sm:$0xff]  ;;  %v2141_v25 = vcombine.low %v88_v13, %v92_v14  ;;  %v144_v13 = vld [vmem:[%s3338_s1 + $0x210] sm:$0xff] }
  0x6f   :  { %1752 = vmatprep.subr.bf16.mxu0 %v2346_v26  ;;  %1834 = vmatprep.subr.bf16.mxu1 %v2348_v60  ;;  %v2143_v26 = vcombine.low %v89_v16, %v93_v17  ;;  %v2150_v60 = vcombine.high %v96_v28, %v100_v22  ;;  %v2152_v29 = vcombine.high %v97_v23, %v101_v24  ;;  %v148_v14 = vld [vmem:[%s3338_s1 + $0x230] sm:$0xff]  ;;  %v145_v16 = vld [vmem:[%s3338_s1 + $0x218] sm:$0xff] }
  0x70   :  { %v149_v17 = vld [vmem:[%s3338_s1 + $0x238] sm:$0xff] }
  0x72   :  { %1753 = vmatpush1.bf16.msra.mxu0 %v2345_v33  ;;  %1835 = vmatpush1.bf16.msra.mxu1 %v2347_v34  ;;  %v109_v33 = vld [vmem:[%s3338_s1 + $0xf8] sm:$0xff]  ;;  %v2149_v34 = vcombine.low %v96_v28, %v100_v22  ;;  %v152_v28 = vld [vmem:[%s3338_s1 + $0x250] sm:$0xff] }
  0x73   :  { %1754 = vmatprep.subr.bf16.mxu0 %v2354_v35  ;;  %1836 = vmatprep.subr.bf16.mxu1 %v2356_v36  ;;  %v2151_v35 = vcombine.low %v97_v23, %v101_v24  ;;  %v2158_v36 = vcombine.high %v104_v30, %v108_v31  ;;  %v2160_v37 = vcombine.high %v105_v32, %v109_v33  ;;  %v156_v22 = vld [vmem:[%s3338_s1 + $0x270] sm:$0xff]  ;;  %v153_v23 = vld [vmem:[%s3338_s1 + $0x258] sm:$0xff] }
  0x74   :  { %v157_v24 = vld [vmem:[%s3338_s1 + $0x278] sm:$0xff] }
  0x76   :  { %1755 = vmatpush1.bf16.msra.mxu0 %v2353_v41  ;;  %1837 = vmatpush1.bf16.msra.mxu1 %v2355_v43  ;;  %v2157_v41 = vcombine.low %v104_v30, %v108_v31  ;;  %v2159_v43 = vcombine.low %v105_v32, %v109_v33  ;;  %v160_v30 = vld [vmem:[%s3338_s1 + $0x290] sm:$0xff]  ;;  %v161_v32 = vld [vmem:[%s3338_s1 + $0x298] sm:$0xff] }
  0x77   :  { %1756 = vmatprep.subr.bf16.mxu0 %v2362_v45  ;;  %1838 = vmatprep.subr.bf16.mxu1 %v2364_v46  ;;  %v2166_v45 = vcombine.high %v112_v38, %v116_v39  ;;  %v164_v31 = vld [vmem:[%s3338_s1 + $0x2b0] sm:$0xff]  ;;  %v165_v33 = vld [vmem:[%s3338_s1 + $0x2b8] sm:$0xff] }
  0x7a   :  { %1757 = vmatpush1.bf16.msra.mxu0 %v2361_v54  ;;  %1839 = vmatpush1.bf16.msra.mxu1 %v2363_v55  ;;  %v2165_v54 = vcombine.low %v112_v38, %v116_v39  ;;  %v168_v38 = vld [vmem:[%s3338_s1 + $0x2d0] sm:$0xff] }
  0x7b   :  { %1758 = vmatprep.subr.bf16.mxu0 %v2370_v56  ;;  %1840 = vmatprep.subr.bf16.mxu1 %v2372_v58  ;;  %v2174_v56 = vcombine.high %v120_v47, %v124_v48  ;;  %v2176_v58 = vcombine.high %v121_v50, %v125_v51  ;;  %v172_v39 = vld [vmem:[%s3338_s1 + $0x2f0] sm:$0xff] }
  0x7e   :  { %1759 = vmatpush1.bf16.msra.mxu0 %v2369_v1  ;;  %1841 = vmatpush1.bf16.msra.mxu1 %v2371_v2  ;;  %v2173_v1 = vcombine.low %v120_v47, %v124_v48  ;;  %v2175_v2 = vcombine.low %v121_v50, %v125_v51  ;;  %v176_v47 = vld [vmem:[%s3338_s1 + $0x310] sm:$0xff]  ;;  %v177_v50 = vld [vmem:[%s3338_s1 + $0x318] sm:$0xff] }
  0x7f   :  { %1760 = vmatprep.subr.bf16.mxu0 %v2378_v3  ;;  %1842 = vmatprep.subr.bf16.mxu1 %v2380_v4  ;;  %v2182_v3 = vcombine.high %v128_v59, %v132_v62  ;;  %v2184_v4 = vcombine.high %v129_v63, %v133_v0  ;;  %v180_v48 = vld [vmem:[%s3338_s1 + $0x330] sm:$0xff]  ;;  %v181_v51 = vld [vmem:[%s3338_s1 + $0x338] sm:$0xff] }
  0x82   :  { %1761 = vmatpush1.bf16.msra.mxu0 %v2377_v10  ;;  %1843 = vmatpush1.bf16.msra.mxu1 %v2379_v11  ;;  %v2181_v10 = vcombine.low %v128_v59, %v132_v62  ;;  %v2183_v11 = vcombine.low %v129_v63, %v133_v0  ;;  %v184_v59 = vld [vmem:[%s3338_s1 + $0x350] sm:$0xff]  ;;  %v185_v63 = vld [vmem:[%s3338_s1 + $0x358] sm:$0xff] }
  0x83   :  { %1853 = vmatprep.subr.bf16.mxu0 %v2134_v12  ;;  %1935 = vmatprep.subr.bf16.mxu1 %v2136_v61  ;;  %v2190_v12 = vcombine.high %v136_v6, %v140_v7  ;;  %v2192_v61 = vcombine.high %v137_v8, %v141_v9  ;;  %v188_v62 = vld [vmem:[%s3338_s1 + $0x370] sm:$0xff]  ;;  %v189_v0 = vld [vmem:[%s3338_s1 + $0x378] sm:$0xff] }
  0x85   :  { %1763 = vmatmul.mubr.bf16.vlgmr.msra.gmra.mrb[0].mxu0 %v2908_v15  ;;  %1845 = vmatmul.mubr.bf16.vlgmr.msra.gmra.mrb[0].mxu1 %v2908_v15 }
  0x86   :  { %1854 = vmatpush1.bf16.msra.mxu0 %v2133_v18  ;;  %1936 = vmatpush1.bf16.msra.mxu1 %v2135_v19  ;;  %v2189_v18 = vcombine.low %v136_v6, %v140_v7  ;;  %v2191_v19 = vcombine.low %v137_v8, %v141_v9  ;;  %v192_v6 = vld [vmem:[%s3338_s1 + $0x390] sm:$0xff]  ;;  %v193_v8 = vld [vmem:[%s3338_s1 + $0x398] sm:$0xff] }
  0x87   :  { %1855 = vmatprep.subr.bf16.mxu0 %v2142_v20  ;;  %1937 = vmatprep.subr.bf16.mxu1 %v2144_v21  ;;  %v2198_v20 = vcombine.high %v144_v13, %v148_v14  ;;  %v2200_v21 = vcombine.high %v145_v16, %v149_v17  ;;  %v196_v7 = vld [vmem:[%s3338_s1 + $0x3b0] sm:$0xff]  ;;  %v197_v9 = vld [vmem:[%s3338_s1 + $0x3b8] sm:$0xff] }
  0x88   :  { %1885 = vmatprep.mubr.bf16.mxu0 %v2586_v27  ;;  %1967 = vmatprep.mubr.bf16.mxu1 %v2586_v27  ;;  %v113_v27 = vld [vmem:[%s3338_s1 + $0x118] sm:$0xff] }
  0x89   :  { %v2168_v46 = vcombine.high %v113_v27, %v117_v40  ;;  %v2167_v55 = vcombine.low %v113_v27, %v117_v40  ;;  %v169_v27 = vld [vmem:[%s3338_s1 + $0x2d8] sm:$0xff] }
  0x8a   :  { %1856 = vmatpush1.bf16.msra.mxu0 %v2141_v25  ;;  %1938 = vmatpush1.bf16.msra.mxu1 %v2143_v26  ;;  %v2197_v25 = vcombine.low %v144_v13, %v148_v14  ;;  %v2199_v26 = vcombine.low %v145_v16, %v149_v17  ;;  %v173_v40 = vld [vmem:[%s3338_s1 + $0x2f8] sm:$0xff]  ;;  %v200_v13 = vld [vmem:[%s3338_s1 + $0x3d0] sm:$0xff] }
  0x8b   :  { %1857 = vmatprep.subr.bf16.mxu0 %v2150_v60  ;;  %1939 = vmatprep.subr.bf16.mxu1 %v2152_v29  ;;  %v2206_v60 = vcombine.high %v152_v28, %v156_v22  ;;  %v2208_v29 = vcombine.high %v153_v23, %v157_v24  ;;  %v204_v14 = vld [vmem:[%s3338_s1 + $0x3f0] sm:$0xff]  ;;  %v201_v16 = vld [vmem:[%s3338_s1 + $0x3d8] sm:$0xff] }
  0x8c   :  { %v205_v17 = vld [vmem:[%s3338_s1 + $0x3f8] sm:$0xff] }
  0x8e   :  { %1858 = vmatpush1.bf16.msra.mxu0 %v2149_v34  ;;  %1940 = vmatpush1.bf16.msra.mxu1 %v2151_v35  ;;  %v2205_v34 = vcombine.low %v152_v28, %v156_v22  ;;  %v2207_v35 = vcombine.low %v153_v23, %v157_v24  ;;  %v208_v28 = vld [vmem:[%s3338_s1 + $0x410] sm:$0xff]  ;;  %v209_v23 = vld [vmem:[%s3338_s1 + $0x418] sm:$0xff] }
  0x8f   :  { %1859 = vmatprep.subr.bf16.mxu0 %v2158_v36  ;;  %1941 = vmatprep.subr.bf16.mxu1 %v2160_v37  ;;  %v2214_v36 = vcombine.high %v160_v30, %v164_v31  ;;  %v2216_v37 = vcombine.high %v161_v32, %v165_v33  ;;  %v212_v22 = vld [vmem:[%s3338_s1 + $0x430] sm:$0xff]  ;;  %v213_v24 = vld [vmem:[%s3338_s1 + $0x438] sm:$0xff] }
  0x92   :  { %1860 = vmatpush1.bf16.msra.mxu0 %v2157_v41  ;;  %1942 = vmatpush1.bf16.msra.mxu1 %v2159_v43  ;;  %v2213_v41 = vcombine.low %v160_v30, %v164_v31  ;;  %v2215_v43 = vcombine.low %v161_v32, %v165_v33  ;;  %v216_v30 = vld [vmem:[%s3338_s1 + $0x450] sm:$0xff]  ;;  %v217_v32 = vld [vmem:[%s3338_s1 + $0x458] sm:$0xff] }
  0x93   :  { %1861 = vmatprep.subr.bf16.mxu0 %v2166_v45  ;;  %1943 = vmatprep.subr.bf16.mxu1 %v2168_v46  ;;  %v2222_v45 = vcombine.high %v168_v38, %v172_v39  ;;  %v2224_v46 = vcombine.high %v169_v27, %v173_v40  ;;  %v220_v31 = vld [vmem:[%s3338_s1 + $0x470] sm:$0xff]  ;;  %v221_v33 = vld [vmem:[%s3338_s1 + $0x478] sm:$0xff] }
  0x96   :  { %1862 = vmatpush1.bf16.msra.mxu0 %v2165_v54  ;;  %1944 = vmatpush1.bf16.msra.mxu1 %v2167_v55  ;;  %v2221_v54 = vcombine.low %v168_v38, %v172_v39  ;;  %v2223_v55 = vcombine.low %v169_v27, %v173_v40  ;;  %v224_v38 = vld [vmem:[%s3338_s1 + $0x490] sm:$0xff]  ;;  %v225_v27 = vld [vmem:[%s3338_s1 + $0x498] sm:$0xff] }
  0x97   :  { %1863 = vmatprep.subr.bf16.mxu0 %v2174_v56  ;;  %1945 = vmatprep.subr.bf16.mxu1 %v2176_v58  ;;  %v2230_v56 = vcombine.high %v176_v47, %v180_v48  ;;  %v2232_v58 = vcombine.high %v177_v50, %v181_v51  ;;  %v228_v39 = vld [vmem:[%s3338_s1 + $0x4b0] sm:$0xff]  ;;  %v229_v40 = vld [vmem:[%s3338_s1 + $0x4b8] sm:$0xff] }
  0x9a   :  { %1864 = vmatpush1.bf16.msra.mxu0 %v2173_v1  ;;  %1946 = vmatpush1.bf16.msra.mxu1 %v2175_v2  ;;  %v2229_v1 = vcombine.low %v176_v47, %v180_v48  ;;  %v2231_v2 = vcombine.low %v177_v50, %v181_v51  ;;  %v232_v47 = vld [vmem:[%s3338_s1 + $0x4d0] sm:$0xff]  ;;  %v237_v50 = vld [vmem:[%s3338_s1 + $0x4f8] sm:$0xff]  ;;  %v2277_v51 = vcombine.low %v224_v38, %v228_v39 }
  0x9b   :  { %1865 = vmatprep.subr.bf16.mxu0 %v2182_v3  ;;  %1947 = vmatprep.subr.bf16.mxu1 %v2184_v4  ;;  %v2238_v3 = vcombine.high %v184_v59, %v188_v62  ;;  %v2240_v4 = vcombine.high %v185_v63, %v189_v0  ;;  %v236_v48 = vld [vmem:[%s3338_s1 + $0x4f0] sm:$0xff] }
  0x9e   :  { %1866 = vmatpush1.bf16.msra.mxu0 %v2181_v10  ;;  %1948 = vmatpush1.bf16.msra.mxu1 %v2183_v11  ;;  %v2237_v10 = vcombine.low %v184_v59, %v188_v62  ;;  %v2239_v11 = vcombine.low %v185_v63, %v189_v0  ;;  %v244_v59 = vld [vmem:[%s3338_s1 + $0x530] sm:$0xff]  ;;  %v245_v62 = vld [vmem:[%s3338_s1 + $0x538] sm:$0xff]  ;;  %v2285_v63 = vcombine.low %v232_v47, %v236_v48 }
  0x9f   :  { %1867 = vmatprep.subr.bf16.mxu0 %v2190_v12  ;;  %1949 = vmatprep.subr.bf16.mxu1 %v2192_v61  ;;  %v2246_v12 = vcombine.high %v192_v6, %v196_v7  ;;  %v2248_v61 = vcombine.high %v193_v8, %v197_v9 }
  0xa2   :  { %1868 = vmatpush1.bf16.msra.mxu0 %v2189_v18  ;;  %1950 = vmatpush1.bf16.msra.mxu1 %v2191_v19  ;;  %v2245_v18 = vcombine.low %v192_v6, %v196_v7  ;;  %v2247_v19 = vcombine.low %v193_v8, %v197_v9  ;;  %v249_v6 = vld [vmem:[%s3338_s1 + $0x558] sm:$0xff] }
  0xa3   :  { %1869 = vmatprep.subr.bf16.mxu0 %v2198_v20  ;;  %1951 = vmatprep.subr.bf16.mxu1 %v2200_v21  ;;  %v2254_v20 = vcombine.high %v200_v13, %v204_v14  ;;  %v2256_v21 = vcombine.high %v201_v16, %v205_v17  ;;  %v253_v7 = vld [vmem:[%s3338_s1 + $0x578] sm:$0xff] }
  0xa6   :  { %1870 = vmatpush1.bf16.msra.mxu0 %v2197_v25  ;;  %1952 = vmatpush1.bf16.msra.mxu1 %v2199_v26  ;;  %v2253_v25 = vcombine.low %v200_v13, %v204_v14  ;;  %v2255_v26 = vcombine.low %v201_v16, %v205_v17  ;;  %v257_v13 = vld [vmem:[%s3338_s1 + $0x598] sm:$0xff]  ;;  %v2303_v17 = vcombine.low %v249_v6, %v253_v7 }
  0xa7   :  { %1871 = vmatprep.subr.bf16.mxu0 %v2206_v60  ;;  %1953 = vmatprep.subr.bf16.mxu1 %v2208_v29  ;;  %v2262_v60 = vcombine.high %v208_v28, %v212_v22  ;;  %v2264_v29 = vcombine.high %v209_v23, %v213_v24  ;;  %v261_v14 = vld [vmem:[%s3338_s1 + $0x5b8] sm:$0xff] }
  0xaa   :  { %1872 = vmatpush1.bf16.msra.mxu0 %v2205_v34  ;;  %1954 = vmatpush1.bf16.msra.mxu1 %v2207_v35  ;;  %v2261_v34 = vcombine.low %v208_v28, %v212_v22  ;;  %v2263_v35 = vcombine.low %v209_v23, %v213_v24  ;;  %v265_v28 = vld [vmem:[%s3338_s1 + $0x5d8] sm:$0xff]  ;;  %v2311_v24 = vcombine.low %v257_v13, %v261_v14 }
  0xab   :  { %1873 = vmatprep.subr.bf16.mxu0 %v2214_v36  ;;  %1955 = vmatprep.subr.bf16.mxu1 %v2216_v37  ;;  %v2270_v36 = vcombine.high %v216_v30, %v220_v31  ;;  %v2272_v37 = vcombine.high %v217_v32, %v221_v33  ;;  %v269_v22 = vld [vmem:[%s3338_s1 + $0x5f8] sm:$0xff] }
  0xae   :  { %1874 = vmatpush1.bf16.msra.mxu0 %v2213_v41  ;;  %1956 = vmatpush1.bf16.msra.mxu1 %v2215_v43  ;;  %v2269_v41 = vcombine.low %v216_v30, %v220_v31  ;;  %v2271_v43 = vcombine.low %v217_v32, %v221_v33  ;;  %v273_v30 = vld [vmem:[%s3338_s1 + $0x618] sm:$0xff]  ;;  %v2319_v33 = vcombine.low %v265_v28, %v269_v22 }
  0xaf   :  { %1875 = vmatprep.subr.bf16.mxu0 %v2222_v45  ;;  %1957 = vmatprep.subr.bf16.mxu1 %v2224_v46  ;;  %v2278_v45 = vcombine.high %v224_v38, %v228_v39  ;;  %v2280_v46 = vcombine.high %v225_v27, %v229_v40  ;;  %v277_v31 = vld [vmem:[%s3338_s1 + $0x638] sm:$0xff] }
  0xb0   :  { %v281_v38 = vld [vmem:[%s3338_s1 + $0x658] sm:$0xff] }
  0xb1   :  { %v285_v39 = vld [vmem:[%s3338_s1 + $0x678] sm:$0xff] }
  0xb2   :  { %1876 = vmatpush1.bf16.msra.mxu0 %v2221_v54  ;;  %1958 = vmatpush1.bf16.msra.mxu1 %v2223_v55  ;;  %v2279_v54 = vcombine.low %v225_v27, %v229_v40  ;;  %v2286_v55 = vcombine.high %v232_v47, %v236_v48  ;;  %v2327_v40 = vcombine.low %v273_v30, %v277_v31  ;;  %v289_v47 = vld [vmem:[%s3338_s1 + $0x698] sm:$0xff] }
  0xb3   :  { %1877 = vmatprep.subr.bf16.mxu0 %v2230_v56  ;;  %1959 = vmatprep.subr.bf16.mxu1 %v2232_v58  ;;  %v240_v58 = vld [vmem:[%s3338_s1 + $0x510] sm:$0xff]  ;;  %v293_v48 = vld [vmem:[%s3338_s1 + $0x6b8] sm:$0xff] }
  0xb4   :  { %v2293_v8 = vcombine.low %v240_v58, %v244_v59 }
  0xb6   :  { %1878 = vmatpush1.bf16.msra.mxu0 %v2229_v1  ;;  %1960 = vmatpush1.bf16.msra.mxu1 %v2231_v2  ;;  %v2294_v1 = vcombine.high %v240_v58, %v244_v59  ;;  %v297_v58 = vld [vmem:[%s3338_s1 + $0x6d8] sm:$0xff] }
  0xb7   :  { %1879 = vmatprep.subr.bf16.mxu0 %v2238_v3  ;;  %1961 = vmatprep.subr.bf16.mxu1 %v2240_v4  ;;  %v248_v3 = vld [vmem:[%s3338_s1 + $0x550] sm:$0xff]  ;;  %v301_v59 = vld [vmem:[%s3338_s1 + $0x6f8] sm:$0xff] }
  0xb8   :  { %v252_v4 = vld [vmem:[%s3338_s1 + $0x570] sm:$0xff] }
  0xb9   :  { %v2301_v16 = vcombine.low %v248_v3, %v252_v4 }
  0xba   :  { %1880 = vmatpush1.bf16.msra.mxu0 %v2237_v10  ;;  %1962 = vmatpush1.bf16.msra.mxu1 %v2239_v11  ;;  %v2302_v10 = vcombine.high %v248_v3, %v252_v4  ;;  %v2304_v11 = vcombine.high %v249_v6, %v253_v7  ;;  %v305_v3 = vld [vmem:[%s3338_s1 + $0x718] sm:$0xff]  ;;  %v2351_v7 = vcombine.low %v297_v58, %v301_v59 }
  0xbb   :  { %1881 = vmatprep.subr.bf16.mxu0 %v2246_v12  ;;  %1963 = vmatprep.subr.bf16.mxu1 %v2248_v61  ;;  %v256_v12 = vld [vmem:[%s3338_s1 + $0x590] sm:$0xff]  ;;  %v309_v4 = vld [vmem:[%s3338_s1 + $0x738] sm:$0xff] }
  0xbc   :  { %v260_v61 = vld [vmem:[%s3338_s1 + $0x5b0] sm:$0xff] }
  0xbd   :  { %v2309_v23 = vcombine.low %v256_v12, %v260_v61 }
  0xbe   :  { %1882 = vmatpush1.bf16.msra.mxu0 %v2245_v18  ;;  %1964 = vmatpush1.bf16.msra.mxu1 %v2247_v19  ;;  %v2310_v18 = vcombine.high %v256_v12, %v260_v61  ;;  %v2312_v19 = vcombine.high %v257_v13, %v261_v14  ;;  %v313_v12 = vld [vmem:[%s3338_s1 + $0x758] sm:$0xff]  ;;  %v2359_v14 = vcombine.low %v305_v3, %v309_v4 }
  0xbf   :  { %1883 = vmatprep.subr.bf16.mxu0 %v2254_v20  ;;  %1965 = vmatprep.subr.bf16.mxu1 %v2256_v21  ;;  %v264_v20 = vld [vmem:[%s3338_s1 + $0x5d0] sm:$0xff]  ;;  %v317_v61 = vld [vmem:[%s3338_s1 + $0x778] sm:$0xff] }
  0xc0   :  { %v268_v21 = vld [vmem:[%s3338_s1 + $0x5f0] sm:$0xff] }
  0xc1   :  { %v2317_v32 = vcombine.low %v264_v20, %v268_v21 }
  0xc2   :  { %1884 = vmatpush1.bf16.msra.mxu0 %v2253_v25  ;;  %1966 = vmatpush1.bf16.msra.mxu1 %v2255_v26  ;;  %v2318_v25 = vcombine.high %v264_v20, %v268_v21  ;;  %v2320_v26 = vcombine.high %v265_v28, %v269_v22  ;;  %v321_v20 = vld [vmem:[%s3338_s1 + $0x798] sm:$0xff]  ;;  %v2367_v22 = vcombine.low %v313_v12, %v317_v61 }
  0xc3   :  { %1894 = vmatprep.subr.bf16.mxu0 %v2262_v60  ;;  %1976 = vmatprep.subr.bf16.mxu1 %v2264_v29  ;;  %v272_v60 = vld [vmem:[%s3338_s1 + $0x610] sm:$0xff]  ;;  %v325_v21 = vld [vmem:[%s3338_s1 + $0x7b8] sm:$0xff] }
  0xc4   :  { %v276_v29 = vld [vmem:[%s3338_s1 + $0x630] sm:$0xff] }
  0xc5   :  { %1886 = vmatmul.mubr.bf16.vlgmr.msra.gmra.mrb[4].mxu0 %v2705_v57  ;;  %1968 = vmatmul.mubr.bf16.vlgmr.msra.gmra.mrb[4].mxu1 %v2705_v57  ;;  %v233_v57 = vld [vmem:[%s3338_s1 + $0x4d8] sm:$0xff]  ;;  %v2325_v27 = vcombine.low %v272_v60, %v276_v29 }
  0xc6   :  { %1895 = vmatpush1.bf16.msra.mxu0 %v2261_v34  ;;  %1977 = vmatpush1.bf16.msra.mxu1 %v2263_v35  ;;  %v2288_v56 = vcombine.high %v233_v57, %v237_v50  ;;  %v2287_v0 = vcombine.low %v233_v57, %v237_v50  ;;  %v2326_v34 = vcombine.high %v272_v60, %v276_v29  ;;  %v329_v60 = vld [vmem:[%s3338_s1 + $0x7d8] sm:$0xff] }
  0xc7   :  { %1896 = vmatprep.subr.bf16.mxu0 %v2270_v36  ;;  %1978 = vmatprep.subr.bf16.mxu1 %v2272_v37  ;;  %v2328_v35 = vcombine.high %v273_v30, %v277_v31  ;;  %v280_v36 = vld [vmem:[%s3338_s1 + $0x650] sm:$0xff]  ;;  %v2335_v50 = vcombine.low %v281_v38, %v285_v39  ;;  %v333_v29 = vld [vmem:[%s3338_s1 + $0x7f8] sm:$0xff]  ;;  %v2375_v31 = vcombine.low %v321_v20, %v325_v21 }
  0xc8   :  { %1926 = vmatprep.mubr.bf16.mxu0 %v2720_v5  ;;  %2008 = vmatprep.mubr.bf16.mxu1 %v2720_v5  ;;  %v241_v5 = vld [vmem:[%s3338_s1 + $0x518] sm:$0xff]  ;;  %v284_v37 = vld [vmem:[%s3338_s1 + $0x670] sm:$0xff] }
  0xc9   :  { %v2296_v2 = vcombine.high %v241_v5, %v245_v62  ;;  %v2295_v9 = vcombine.low %v241_v5, %v245_v62  ;;  %v2333_v57 = vcombine.low %v280_v36, %v284_v37  ;;  %v2343_v62 = vcombine.low %v289_v47, %v293_v48 }
  0xca   :  { %1897 = vmatpush1.bf16.msra.mxu0 %v2269_v41  ;;  %1979 = vmatpush1.bf16.msra.mxu1 %v2271_v43  ;;  %v2334_v41 = vcombine.high %v280_v36, %v284_v37  ;;  %v2336_v43 = vcombine.high %v281_v38, %v285_v39  ;;  %v3289_v36 = vld [vmem:[%s3340_s2] sm:$0xff]  ;;  %v342_v37 = vsub.s32 1, %v2521_v44  ;;  %v350_v38 = vsub.s32 3, %v2521_v44 }
  0xcb   :  { %1898 = vmatprep.subr.bf16.mxu0 %v2278_v45  ;;  %1980 = vmatprep.subr.bf16.mxu1 %v2280_v46  ;;  %v288_v45 = vld [vmem:[%s3338_s1 + $0x690] sm:$0xff]  ;;  %v339_v39 = vrot.slane %v3289_v36, %v2615_v42 }
  0xcc   :  { %v292_v46 = vld [vmem:[%s3338_s1 + $0x6b0] sm:$0xff] }
  0xcd   :  { %v2341_v5 = vcombine.low %v288_v45, %v292_v46 }
  0xce   :  { %1899 = vmatpush1.bf16.msra.mxu0 %v2277_v51  ;;  %1981 = vmatpush1.bf16.msra.mxu1 %v2279_v54  ;;  %v2342_v51 = vcombine.high %v288_v45, %v292_v46  ;;  %v2344_v54 = vcombine.high %v289_v47, %v293_v48 }
  0xcf   :  { %1900 = vmatprep.subr.bf16.mxu0 %v2286_v55  ;;  %1982 = vmatprep.subr.bf16.mxu1 %v2288_v56  ;;  %v296_v55 = vld [vmem:[%s3338_s1 + $0x6d0] sm:$0xff] }
  0xd0   :  { %v300_v56 = vld [vmem:[%s3338_s1 + $0x6f0] sm:$0xff] }
  0xd1   :  { %v2349_v6 = vcombine.low %v296_v55, %v300_v56 }
  0xd2   :  { %1901 = vmatpush1.bf16.msra.mxu0 %v2285_v63  ;;  %1983 = vmatpush1.bf16.msra.mxu1 %v2287_v0  ;;  %v2350_v63 = vcombine.high %v296_v55, %v300_v56  ;;  %v2352_v0 = vcombine.high %v297_v58, %v301_v59 }
  0xd3   :  { %1902 = vmatprep.subr.bf16.mxu0 %v2294_v1  ;;  %1984 = vmatprep.subr.bf16.mxu1 %v2296_v2  ;;  %v304_v1 = vld [vmem:[%s3338_s1 + $0x710] sm:$0xff] }
  0xd4   :  { %v308_v2 = vld [vmem:[%s3338_s1 + $0x730] sm:$0xff] }
  0xd5   :  { %v2357_v13 = vcombine.low %v304_v1, %v308_v2 }
  0xd6   :  { %1903 = vmatpush1.bf16.msra.mxu0 %v2293_v8  ;;  %1985 = vmatpush1.bf16.msra.mxu1 %v2295_v9  ;;  %v2358_v8 = vcombine.high %v304_v1, %v308_v2  ;;  %v2360_v9 = vcombine.high %v305_v3, %v309_v4 }
  0xd7   :  { %1904 = vmatprep.subr.bf16.mxu0 %v2302_v10  ;;  %1986 = vmatprep.subr.bf16.mxu1 %v2304_v11  ;;  %v312_v10 = vld [vmem:[%s3338_s1 + $0x750] sm:$0xff] }
  0xd8   :  { %v316_v11 = vld [vmem:[%s3338_s1 + $0x770] sm:$0xff] }
  0xd9   :  { %v2365_v28 = vcombine.low %v312_v10, %v316_v11 }
  0xda   :  { %1905 = vmatpush1.bf16.msra.mxu0 %v2301_v16  ;;  %1987 = vmatpush1.bf16.msra.mxu1 %v2303_v17  ;;  %v2366_v16 = vcombine.high %v312_v10, %v316_v11  ;;  %v2368_v17 = vcombine.high %v313_v12, %v317_v61 }
  0xdb   :  { %1906 = vmatprep.subr.bf16.mxu0 %v2310_v18  ;;  %1988 = vmatprep.subr.bf16.mxu1 %v2312_v19  ;;  %v320_v18 = vld [vmem:[%s3338_s1 + $0x790] sm:$0xff] }
  0xdc   :  { %v324_v19 = vld [vmem:[%s3338_s1 + $0x7b0] sm:$0xff] }
  0xdd   :  { %v2373_v30 = vcombine.low %v320_v18, %v324_v19 }
  0xde   :  { %1907 = vmatpush1.bf16.msra.mxu0 %v2309_v23  ;;  %1989 = vmatpush1.bf16.msra.mxu1 %v2311_v24  ;;  %v2374_v23 = vcombine.high %v320_v18, %v324_v19  ;;  %v2376_v24 = vcombine.high %v321_v20, %v325_v21  ;;  %v10_v18 = vstv %s3342_s4  ;;  %v358_v19 = vsub.s32 5, %v2521_v44 }
  0xdf   :  { %1908 = vmatprep.subr.bf16.mxu0 %v2318_v25  ;;  %1990 = vmatprep.subr.bf16.mxu1 %v2320_v26  ;;  %v328_v25 = vld [vmem:[%s3338_s1 + $0x7d0] sm:$0xff]  ;;  %11 = vst [vmem:[#allocation2] sm:$0x1] %v10_v18  ;;  %v366_v20 = vsub.s32 7, %v2521_v44  ;;  %v355_v21 = vrot.slane %v3289_v36, %v2624_v49 }
  0xe0   :  { %v332_v26 = vld [vmem:[%s3338_s1 + $0x7f0] sm:$0xff] }
  0xe2   :  { %1909 = vmatpush1.bf16.msra.mxu0 %v2317_v32  ;;  %1991 = vmatpush1.bf16.msra.mxu1 %v2319_v33  ;;  %v2382_v32 = vcombine.high %v328_v25, %v332_v26  ;;  %v2384_v33 = vcombine.high %v329_v60, %v333_v29 }
  0xe3   :  { %1910 = vmatprep.subr.bf16.mxu0 %v2326_v34  ;;  %1992 = vmatprep.subr.bf16.mxu1 %v2328_v35  ;;  %v2381_v34 = vcombine.low %v328_v25, %v332_v26  ;;  %v2383_v35 = vcombine.low %v329_v60, %v333_v29 }
  0xe6   :  { %1911 = vmatpush1.bf16.msra.mxu0 %v2325_v27  ;;  %1993 = vmatpush1.bf16.msra.mxu1 %v2327_v40  ;;  %v3298_v27 = vld [vmem:[%s3341_s3] sm:$0xff]  ;;  %v343_v40 = vrot.slane %v3289_v36, %v342_v37 }
  0xe7   :  { %1912 = vmatprep.subr.bf16.mxu0 %v2334_v41  ;;  %1994 = vmatprep.subr.bf16.mxu1 %v2336_v43  ;;  %v351_v41 = vrot.slane %v3289_v36, %v350_v38  ;;  %v2046_v46 = vrot.slane %v3298_v27, %v2615_v42  ;;  %v2050_v58 = vrot.slane %v3298_v27, %v342_v37 }
  0xe8   :  { %v2058_v2 = vrot.slane %v3298_v27, %v350_v38  ;;  %v2062_v29 = vrot.slane %v3298_v27, %v2624_v49  ;;  %v2066_v44 = vrot.slane %v3298_v27, %v358_v19 }
  0xea   :  { %1913 = vmatpush1.bf16.msra.mxu0 %v2333_v57  ;;  %1995 = vmatpush1.bf16.msra.mxu1 %v2335_v50  ;;  %v2054_v50 = vrot.slane %v3298_v27, %v2536_v53 }
  0xeb   :  { %1914 = vmatprep.subr.bf16.mxu0 %v2342_v51  ;;  %1996 = vmatprep.subr.bf16.mxu1 %v2344_v54 }
  0xee   :  { %1915 = vmatpush1.bf16.msra.mxu0 %v2341_v5  ;;  %1997 = vmatpush1.bf16.msra.mxu1 %v2343_v62 }
  0xef   :  { %1916 = vmatprep.subr.bf16.mxu0 %v2350_v63  ;;  %1998 = vmatprep.subr.bf16.mxu1 %v2352_v0 }
  0xf2   :  { %1917 = vmatpush1.bf16.msra.mxu0 %v2349_v6  ;;  %1999 = vmatpush1.bf16.msra.mxu1 %v2351_v7 }
  0xf3   :  { %1918 = vmatprep.subr.bf16.mxu0 %v2358_v8  ;;  %2000 = vmatprep.subr.bf16.mxu1 %v2360_v9 }
  0xf6   :  { %1919 = vmatpush1.bf16.msra.mxu0 %v2357_v13  ;;  %2001 = vmatpush1.bf16.msra.mxu1 %v2359_v14 }
  0xf7   :  { %1920 = vmatprep.subr.bf16.mxu0 %v2366_v16  ;;  %2002 = vmatprep.subr.bf16.mxu1 %v2368_v17 }
  0xfa   :  { %1921 = vmatpush1.bf16.msra.mxu0 %v2365_v28  ;;  %2003 = vmatpush1.bf16.msra.mxu1 %v2367_v22  ;;  %v363_v28 = vrot.slane %v3289_v36, %v2633_v52  ;;  %v359_v22 = vrot.slane %v3289_v36, %v358_v19 }
  0xfb   :  { %1922 = vmatprep.subr.bf16.mxu0 %v2374_v23  ;;  %2004 = vmatprep.subr.bf16.mxu1 %v2376_v24  ;;  %v367_v23 = vrot.slane %v3289_v36, %v366_v20 }
  0xfe   :  { %1923 = vmatpush1.bf16.msra.mxu0 %v2373_v30  ;;  %2005 = vmatpush1.bf16.msra.mxu1 %v2375_v31 }
  0xff   :  { %1924 = vmatprep.subr.bf16.mxu0 %v2382_v32  ;;  %2006 = vmatprep.subr.bf16.mxu1 %v2384_v33 }
 0x102   :  { %1925 = vmatpush1.bf16.msra.mxu0 %v2381_v34  ;;  %2007 = vmatpush1.bf16.msra.mxu1 %v2383_v35 }
 0x105   :  { %1927 = vmatmul.mubr.bf16.vlgmr.msra.gmra.mrb[4].mxu0 %v2908_v15  ;;  %2009 = vmatmul.mubr.bf16.vlgmr.msra.gmra.mrb[4].mxu1 %v2908_v15  ;;  %v347_v15 = vrot.slane %v3289_v36, %v2536_v53  ;;  %v2070_v36 = vrot.slane %v3298_v27, %v2633_v52 }
 0x158   :  { %v1764_v43 = vpop.f32.mrb[0].mxu0  ;;  %v1846_v47 = vpop.f32.mrb[0].mxu1 }
 0x159   :  { %v2391_v45 = vadd.f32 %v1764_v43, %v339_v39  ;;  %v1766_v48 = vpop.f32.mrb[1].mxu0  ;;  %v2393_v57 = vadd.f32 %v1846_v47, %v347_v15  ;;  %v1848_v54 = vpop.f32.mrb[1].mxu1  ;;  %v2074_v47 = vrot.slane %v3298_v27, %v366_v20 }
 0x15a   :  { %v2392_v51 = vadd.f32 %v1766_v48, %v343_v40  ;;  %v1768_v55 = vpop.f32.mrb[2].mxu0  ;;  %v2394_v59 = vadd.f32 %v1848_v54, %v351_v41  ;;  %v1850_v5 = vpop.f32.mrb[2].mxu1 }
 0x15b   :  { %vm2017_vm2 = vcmp.ge.f32.partialorder %v2391_v45, 0.0  ;;  %v2025_v56 = vmul.f32 0.2, %v2391_v45  ;;  %v1769_v62 = vpop.f32.mrb[3].mxu0  ;;  %vm2019_vm3 = vcmp.ge.f32.partialorder %v2393_v57, 0.0  ;;  %v1851_v53 = vpop.f32.mrb[3].mxu1 }
 0x15c   :  { %v2027_v63 = vmul.f32 0.2, %v2393_v57  ;;  %vm2018_vm4 = vcmp.ge.f32.partialorder %v2392_v51, 0.0  ;;  %v2026_v42 = vmul.f32 0.2, %v2392_v51  ;;  %vm2020_vm5 = vcmp.ge.f32.partialorder %v2394_v59, 0.0 }
 0x15d   :  { %v2033_v0 = vsel %vm2017_vm2, %v2391_v45, %v2025_v56  ;;  %v2028_v1 = vmul.f32 0.2, %v2394_v59 }
 0x15e   :  { %v2083_v3 = vmul.f32 %v2046_v46, %v2033_v0  ;;  %v2035_v4 = vsel %vm2019_vm3, %v2393_v57, %v2027_v63  ;;  %v2034_v6 = vsel %vm2018_vm4, %v2392_v51, %v2026_v42  ;;  %v2385_v63 = vld [vmem:[#allocation2] ss:$0 sm:$0xff] }
 0x15f   :  { %v2085_v7 = vmul.f32 %v2054_v50, %v2035_v4  ;;  %v2084_v8 = vmul.f32 %v2050_v58, %v2034_v6  ;;  %v2036_v9 = vsel %vm2020_vm5, %v2394_v59, %v2028_v1 }
 0x160   :  { %v2092_v10 = vsel %vm2091_vm1, %v2083_v3, 0.0  ;;  %v2086_v12 = vmul.f32 %v2058_v2, %v2036_v9 }
 0x161   :  { %v2093_v11 = vsel %vm2091_vm1, %v2084_v8, 0.0  ;;  %v2095_v13 = vsel %vm2091_vm1, %v2085_v7, 0.0 }
 0x162   :  { %v2094_v61 = vadd.f32 %v2093_v11, %v2092_v10  ;;  %v2097_v16 = vsel %vm2091_vm1, %v2086_v12, 0.0 }
 0x164   :  { %v2096_v14 = vadd.f32 %v2095_v13, %v2094_v61 }
 0x166   :  { %v2098_v17 = vadd.f32 %v2097_v16, %v2096_v14 }
 0x1d8   :  { %v1928_v24 = vpop.f32.mrb[4].mxu0  ;;  %v2010_v26 = vpop.f32.mrb[4].mxu1 }
 0x1d9   :  { %v2395_v25 = vadd.f32 %v1928_v24, %v355_v21  ;;  %v1930_v60 = vpop.f32.mrb[5].mxu0  ;;  %v2397_v30 = vadd.f32 %v2010_v26, %v363_v28  ;;  %v2012_v32 = vpop.f32.mrb[5].mxu1 }
 0x1da   :  { %v2396_v31 = vadd.f32 %v1930_v60, %v359_v22  ;;  %v1932_v33 = vpop.f32.mrb[6].mxu0  ;;  %v2398_v35 = vadd.f32 %v2012_v32, %v367_v23  ;;  %v2014_v37 = vpop.f32.mrb[6].mxu1 }
 0x1db   :  { %vm2021_vm6 = vcmp.ge.f32.partialorder %v2395_v25, 0.0  ;;  %v2029_v34 = vmul.f32 0.2, %v2395_v25  ;;  %v1933_v38 = vpop.f32.mrb[7].mxu0  ;;  %vm2023_vm7 = vcmp.ge.f32.partialorder %v2397_v30, 0.0  ;;  %v2015_v41 = vpop.f32.mrb[7].mxu1 }
 0x1dc   :  { %v2031_v39 = vmul.f32 0.2, %v2397_v30  ;;  %vm2022_vm8 = vcmp.ge.f32.partialorder %v2396_v31, 0.0  ;;  %v2030_v15 = vmul.f32 0.2, %v2396_v31  ;;  %vm2024_vm9 = vcmp.ge.f32.partialorder %v2398_v35, 0.0 }
 0x1dd   :  { %v2037_v40 = vsel %vm2021_vm6, %v2395_v25, %v2029_v34  ;;  %v2032_v49 = vmul.f32 0.2, %v2398_v35 }
 0x1de   :  { %v2087_v43 = vmul.f32 %v2062_v29, %v2037_v40  ;;  %v2039_v45 = vsel %vm2023_vm7, %v2397_v30, %v2031_v39  ;;  %v2038_v46 = vsel %vm2022_vm8, %v2396_v31, %v2030_v15 }
 0x1df   :  { %v2088_v48 = vmul.f32 %v2066_v44, %v2038_v46  ;;  %v2040_v57 = vsel %vm2024_vm9, %v2398_v35, %v2032_v49  ;;  %v2089_v50 = vmul.f32 %v2070_v36, %v2039_v45 }
 0x1e0   :  { %v2099_v51 = vsel %vm2091_vm1, %v2087_v43, 0.0  ;;  %v2090_v55 = vmul.f32 %v2074_v47, %v2040_v57 }
 0x1e1   :  { %v2100_v54 = vadd.f32 %v2099_v51, %v2098_v17  ;;  %v2101_v52 = vsel %vm2091_vm1, %v2088_v48, 0.0  ;;  %v2103_v58 = vsel %vm2091_vm1, %v2089_v50, 0.0 }
 0x1e2   :  { %v2105_v5 = vsel %vm2091_vm1, %v2090_v55, 0.0 }
 0x1e3   :  { %v2102_v56 = vadd.f32 %v2101_v52, %v2100_v54 }
 0x1e5   :  { %v2104_v59 = vadd.f32 %v2103_v58, %v2102_v56 }
 0x1e7   :  { %v2106_v62 = vadd.f32 %v2105_v5, %v2104_v59 }
 0x1e9   :  { %2107 = vadd.xlane.f32.xlu0 %v2106_v62 }
 0x276   :  { %v2108_v42 = vpop.xlane.xlu0 %2107 }
 0x277   :  { %v2116_v27 = vadd.f32 %v2385_v63, %v2108_v42 }
 0x279   :  { %v2386_v0 = vmul.f32 -1.442695, %v2116_v27 }
 0x27b   :  { %2415 = vpow2.f32 %v2386_v0 }
 0x285   :  { %v2416_v1 = vpop.eup %2415 }
 0x286   :  { %v2120_v2 = vadd.f32 1.0, %v2416_v1 }
 0x288   :  { %2417 = vrcp.f32 %v2120_v2 }
 0x292   :  { %v2418_v53 = vpop.eup %2417 }
 0x293   :  { %2124 = vst.msk [vmem:[%s3343_s5] sm:$0x3] %vm2123_vm10, %v2418_v53 }

</bundles_post_ra>
